<compile_context>
chip_gen: v7x
topology: tpu7x:2x2x1
jax: 0.10.0
libtpu: 0.0.40
codegen_flags: <defaults>
</compile_context>

<pallas_src>
import functools

import jax
import jax.numpy as jnp
from jax.experimental import pallas as pl
from jax.experimental.pallas import tpu as pltpu

EPS = 1e-5


def _round_up(x, m):
    return (x + m - 1) // m * m


def _plan_dim(d, target, align):
    """(tile, padded_extent) for one GEMM dimension.

    A dim that already fits one tile uses a full-extent block (legal even when
    not 8/128-aligned) -> no padding.  Otherwise pick the largest
    `align`-multiple tile <= target that divides the align-padded extent.
    """
    if d <= target:
        return d, d
    dp = _round_up(d, align)
    tile = align
    t = align
    while t <= target:
        if dp % t == 0:
            tile = t
        t += align
    return tile, dp


# ---------------------------------------------------------------------------
# Fused full-K GEMM kernel:
#   out = act( (x @ w) * scale + bias
#              [+ (x2 @ w2) * scale2 + bias2]      # fused 1x1 downsample conv
#              [+ residual] )
# ---------------------------------------------------------------------------
def _gemm_fused_kernel(*refs, relu, has_res, has_down):
    it = iter(refs)
    x_ref = next(it)
    w_ref = next(it)
    s_ref = next(it)
    b_ref = next(it)
    r_ref = next(it) if has_res else None
    if has_down:
        x2_ref = next(it)
        w2_ref = next(it)
        s2_ref = next(it)
        b2_ref = next(it)
    o_ref = next(it)

    # Full-K: single MXU dot, no accumulator scratch, no pl.when phases.
    y = jnp.dot(x_ref[...], w_ref[...], preferred_element_type=jnp.float32)
    y = y * s_ref[...] + b_ref[...]
    if has_down:
        y2 = jnp.dot(x2_ref[...], w2_ref[...],
                     preferred_element_type=jnp.float32)
        y = y + (y2 * s2_ref[...] + b2_ref[...])
    if has_res:
        y = y + r_ref[...].astype(jnp.float32)
    if relu:
        y = jnp.maximum(y, 0.0)
    o_ref[...] = y.astype(o_ref.dtype)


def gemm_fused(x, w, scale, bias, *, relu, residual=None, down=None,
               out_dtype=jnp.bfloat16):
    """Tiled fused (M,K)@(K,N)*scale+bias (+down GEMM) (+residual) (+ReLU)."""
    M, K = x.shape
    Kw, N = w.shape
    assert K == Kw

    tm, Mp = _plan_dim(M, target=256, align=8)
    m_tiles = Mp // tm
    if N <= 128:
        tn, Np = N, N
    elif m_tiles == 1:
        # Single M tile: split N so >=2 parallel tiles exist (engages both
        # v7x TensorCores / their DMA paths for these weight-DMA-bound GEMMs).
        tn, Np = 128, _round_up(N, 128)
    else:
        tn, Np = _plan_dim(N, target=256, align=128)
    n_tiles = Np // tn

    x = x.astype(jnp.bfloat16)
    w = w.astype(jnp.bfloat16)
    # Padding never triggers for this network at these sizes (K is never
    # padded at all with full-K blocks); kept for generality.
    if Mp != M:
        x = jnp.pad(x, ((0, Mp - M), (0, 0)))
    if Np != N:
        w = jnp.pad(w, ((0, 0), (0, Np - N)))
        scale = jnp.pad(scale, ((0, 0), (0, Np - N)))
        bias = jnp.pad(bias, ((0, 0), (0, Np - N)))

    in_specs = [
        pl.BlockSpec((tm, K), lambda i, j: (i, 0)),
        pl.BlockSpec((K, tn), lambda i, j: (0, j)),
        pl.BlockSpec((1, tn), lambda i, j: (0, j)),
        pl.BlockSpec((1, tn), lambda i, j: (0, j)),
    ]
    args = [x, w, scale, bias]

    has_res = residual is not None
    if has_res:
        r = residual.astype(jnp.bfloat16)
        if (Mp, Np) != (M, N):
            r = jnp.pad(r, ((0, Mp - M), (0, Np - N)))
        in_specs.append(pl.BlockSpec((tm, tn), lambda i, j: (i, j)))
        args.append(r)

    has_down = down is not None
    if has_down:
        x2, dpk = down
        Kd = x2.shape[1]
        w2 = dpk["w"].astype(jnp.bfloat16)
        s2, b2 = dpk["scale"], dpk["bias"]
        x2 = x2.astype(jnp.bfloat16)
        if Mp != M:
            x2 = jnp.pad(x2, ((0, Mp - M), (0, 0)))
        if Np != N:
            w2 = jnp.pad(w2, ((0, 0), (0, Np - N)))
            s2 = jnp.pad(s2, ((0, 0), (0, Np - N)))
            b2 = jnp.pad(b2, ((0, 0), (0, Np - N)))
        in_specs += [
            pl.BlockSpec((tm, Kd), lambda i, j: (i, 0)),
            pl.BlockSpec((Kd, tn), lambda i, j: (0, j)),
            pl.BlockSpec((1, tn), lambda i, j: (0, j)),
            pl.BlockSpec((1, tn), lambda i, j: (0, j)),
        ]
        args += [x2, w2, s2, b2]

    out = pl.pallas_call(
        functools.partial(_gemm_fused_kernel, relu=relu, has_res=has_res,
                          has_down=has_down),
        out_shape=jax.ShapeDtypeStruct((Mp, Np), out_dtype),
        grid=(m_tiles, n_tiles),
        in_specs=in_specs,
        out_specs=pl.BlockSpec((tm, tn), lambda i, j: (i, j)),
        compiler_params=pltpu.CompilerParams(
            dimension_semantics=("parallel", "parallel"),
            vmem_limit_bytes=32 * 1024 * 1024,
        ),
    )(*args)
    if (Mp, Np) != (M, N):
        out = out[:M, :N]
    return out


# ---------------------------------------------------------------------------
# Conv as im2col + fused Pallas GEMM
# ---------------------------------------------------------------------------
def im2col(x, kh, kw, stride, pad):
    B, H, W, C = x.shape
    xp = jnp.pad(x, ((0, 0), (pad, pad), (pad, pad), (0, 0)))
    Ho = (H + 2 * pad - kh) // stride + 1
    Wo = (W + 2 * pad - kw) // stride + 1
    cols = []
    for i in range(kh):
        for j in range(kw):
            cols.append(xp[:, i:i + stride * Ho:stride,
                           j:j + stride * Wo:stride, :])
    patches = jnp.stack(cols, axis=3)  # (B, Ho, Wo, kh*kw, C)
    return patches.reshape(B * Ho * Wo, kh * kw * C), (B, Ho, Wo)


def fold_bn(bn):
    scale = bn["gamma"] / jnp.sqrt(bn["var"] + EPS)
    bias = bn["beta"] - bn["mean"] * scale
    return scale, bias


def conv_bn(x, pk, kh, kw, stride, pad, relu, residual=None, down=None):
    cols, (B, Ho, Wo) = im2col(x, kh, kw, stride, pad)
    cout = pk["w"].shape[1]
    M = B * Ho * Wo
    res2 = None if residual is None else residual.reshape(M, cout)
    down2 = None
    if down is not None:
        x_s, dpk = down
        down2 = (x_s.reshape(M, x_s.shape[-1]), dpk)
    out = gemm_fused(cols, pk["w"], pk["scale"], pk["bias"],
                     relu=relu, residual=res2, down=down2)
    return out.reshape(B, Ho, Wo, cout)


def max_pool_3x3_s2_p1(x):
    return jax.lax.reduce_window(
        x, jnp.array(-jnp.inf, x.dtype), jax.lax.max,
        window_dimensions=(1, 3, 3, 1),
        window_strides=(1, 2, 2, 1),
        padding=((0, 0), (1, 1), (1, 1), (0, 0)),
    )


# ---------------------------------------------------------------------------
# Parameters (deterministic init mirroring torchvision ResNet.__init__)
# ---------------------------------------------------------------------------
def init_bn(c):
    return dict(
        gamma=jnp.ones((c,), jnp.float32),
        beta=jnp.zeros((c,), jnp.float32),
        mean=jnp.zeros((c,), jnp.float32),
        var=jnp.ones((c,), jnp.float32),
    )


def kaiming_conv(key, cout, cin, kh, kw):
    fan_out = cout * kh * kw
    std = (2.0 / fan_out) ** 0.5
    return std * jax.random.normal(key, (cout, cin, kh, kw), jnp.float32)


def init_params(key, layers=(1, 1, 1, 1), num_classes=10):
    keys = iter(jax.random.split(key, 64))
    p = {}
    p["conv1_w"] = kaiming_conv(next(keys), 64, 3, 7, 7)
    p["bn1"] = init_bn(64)
    inplanes = 64
    planes_list = [64, 128, 256, 512]
    strides = [1, 2, 2, 2]
    for li, (planes, nblocks, stride) in enumerate(zip(planes_list, layers, strides)):
        blocks = []
        for bi in range(nblocks):
            s = stride if bi == 0 else 1
            blk = {}
            blk["conv1_w"] = kaiming_conv(next(keys), planes, inplanes, 3, 3)
            blk["bn1"] = init_bn(planes)
            blk["conv2_w"] = kaiming_conv(next(keys), planes, planes, 3, 3)
            blk["bn2"] = init_bn(planes)
            if s != 1 or inplanes != planes:
                blk["down_w"] = kaiming_conv(next(keys), planes, inplanes, 1, 1)
                blk["down_bn"] = init_bn(planes)
            blocks.append(blk)
            inplanes = planes
        p[f"layer{li + 1}"] = blocks
    fan_in = 512
    bound = 1.0 / (fan_in ** 0.5)
    p["fc_w"] = jax.random.uniform(next(keys), (num_classes, 512), jnp.float32,
                                   -bound, bound)
    p["fc_b"] = jax.random.uniform(next(keys), (num_classes,), jnp.float32,
                                   -bound, bound)
    return p


def _pack_conv(w_torch, bn):
    """PyTorch conv weight + BN -> GEMM-ready bf16 matrix + f32 scale/bias."""
    cout, cin, kh, kw = w_torch.shape
    wm = jnp.transpose(w_torch, (2, 3, 1, 0)).reshape(kh * kw * cin, cout)
    scale, bias = fold_bn(bn)
    return dict(
        w=wm.astype(jnp.bfloat16),
        scale=scale.reshape(1, cout).astype(jnp.float32),
        bias=bias.reshape(1, cout).astype(jnp.float32),
    )


def prepare_params(p):
    """Fold BN, reshape to GEMM layout and cast to bf16 once (outside jit)."""
    fp = {"stem": _pack_conv(p["conv1_w"], p["bn1"])}
    for li in range(1, 5):
        blocks = []
        for blk in p[f"layer{li}"]:
            b = dict(c1=_pack_conv(blk["conv1_w"], blk["bn1"]),
                     c2=_pack_conv(blk["conv2_w"], blk["bn2"]))
            if "down_w" in blk:
                b["down"] = _pack_conv(blk["down_w"], blk["down_bn"])
            blocks.append(b)
        fp[f"layer{li}"] = blocks
    # FC stays f32 and runs in plain XLA (work << pallas_call overhead).
    fp["fc"] = dict(w=p["fc_w"].T.astype(jnp.float32),
                    b=p["fc_b"].astype(jnp.float32))
    return fp


# ---------------------------------------------------------------------------
# Forward (BasicBlock ResNet)
# ---------------------------------------------------------------------------
LAYER_STRIDES = (1, 2, 2, 2)


def basic_block(x, bp, stride):
    out = conv_bn(x, bp["c1"], kh=3, kw=3, stride=stride, pad=1, relu=True)
    if "down" in bp:
        # 1x1 stride-s downsample conv + BN fused into the conv2 kernel as a
        # second dot; its GEMM input is just the stride-subsampled activation.
        x_s = x[:, ::stride, ::stride, :]
        return conv_bn(out, bp["c2"], kh=3, kw=3, stride=1, pad=1, relu=True,
                       down=(x_s, bp["down"]))
    # conv2 + bn2 + identity-add + ReLU fused into one kernel epilogue.
    return conv_bn(out, bp["c2"], kh=3, kw=3, stride=1, pad=1, relu=True,
                   residual=x)


def resnet_forward(fp, x_nchw):
    x = jnp.transpose(x_nchw, (0, 2, 3, 1)).astype(jnp.bfloat16)  # NCHW->NHWC
    x = conv_bn(x, fp["stem"], kh=7, kw=7, stride=2, pad=3, relu=True)
    x = max_pool_3x3_s2_p1(x)
    for li in range(1, 5):
        for bi, bp in enumerate(fp[f"layer{li}"]):
            s = LAYER_STRIDES[li - 1] if bi == 0 else 1
            x = basic_block(x, bp, s)
    x = jnp.mean(x.astype(jnp.float32), axis=(1, 2))  # avgpool(1,1) + flatten
    return x @ fp["fc"]["w"] + fp["fc"]["b"]           # FC in plain XLA


if __name__ == "__main__":
    key = jax.random.PRNGKey(0)
    pkey, xkey = jax.random.split(key)
    params = init_params(pkey, layers=(1, 1, 1, 1), num_classes=10)
    fast_params = prepare_params(params)
    # NCHW input like PyTorch; conv1 requires 3 input channels.
    x = jax.random.normal(xkey, (2, 3, 32, 32), jnp.float32)
    fwd = jax.jit(resnet_forward)
    out = jax.block_until_ready(fwd(fast_params, x))
    assert out.shape == (2, 10) and out.dtype == jnp.float32
    print("KERNEL_OK")
</pallas_src>

<mosaic_0001>
module attributes {stable_mosaic.version = 11 : i64} {
  func.func @_gemm_fused_kernel(%arg0: i32, %arg1: i32, %arg2: memref<256x147xbf16, #tpu.memory_space<vmem>>, %arg3: memref<147x64xbf16, #tpu.memory_space<vmem>>, %arg4: memref<1x64xf32, #tpu.memory_space<vmem>>, %arg5: memref<1x64xf32, #tpu.memory_space<vmem>>, %arg6: memref<256x64xbf16, #tpu.memory_space<vmem>>) attributes {dimension_semantics = [#tpu.dimension_semantics<parallel>, #tpu.dimension_semantics<parallel>], iteration_bounds = array<i64: 2, 1>, scalar_prefetch = 0 : i64, scratch_operands = 0 : i64, tpu.core_type = #tpu.core_type<tc>, window_params = [{transform_indices = @transform_0, window_bounds = array<i64: 256, 147>}, {transform_indices = @transform_1, window_bounds = array<i64: 147, 64>}, {transform_indices = @transform_2, window_bounds = array<i64: 1, 64>}, {transform_indices = @transform_3, window_bounds = array<i64: 1, 64>}, {transform_indices = @transform_4, window_bounds = array<i64: 256, 64>}]} {
    %c0 = arith.constant 0 : index
    %c0_0 = arith.constant 0 : index
    %0 = vector.load %arg2[%c0, %c0_0] : memref<256x147xbf16, #tpu.memory_space<vmem>>, vector<256x147xbf16>
    %c0_1 = arith.constant 0 : index
    %c0_2 = arith.constant 0 : index
    %1 = vector.load %arg3[%c0_1, %c0_2] : memref<147x64xbf16, #tpu.memory_space<vmem>>, vector<147x64xbf16>
    %cst = arith.constant dense<0.000000e+00> : vector<256x64xf32>
    %2 = tpu.matmul %0, %1, %cst {dimension_numbers = #tpu.dot_dimension_numbers<[1], [0], [0], [1], [0, 0, 1, 1], [], []>} : vector<256x147xbf16>, vector<147x64xbf16>, vector<256x64xf32> -> vector<256x64xf32>
    %c0_3 = arith.constant 0 : index
    %c0_4 = arith.constant 0 : index
    %3 = vector.load %arg4[%c0_3, %c0_4] : memref<1x64xf32, #tpu.memory_space<vmem>>, vector<1x64xf32>
    %4 = vector.broadcast %3 : vector<1x64xf32> to vector<256x64xf32>
    %5 = arith.mulf %2, %4 : vector<256x64xf32>
    %c0_5 = arith.constant 0 : index
    %c0_6 = arith.constant 0 : index
    %6 = vector.load %arg5[%c0_5, %c0_6] : memref<1x64xf32, #tpu.memory_space<vmem>>, vector<1x64xf32>
    %7 = vector.broadcast %6 : vector<1x64xf32> to vector<256x64xf32>
    %8 = arith.addf %5, %7 : vector<256x64xf32>
    %cst_7 = arith.constant 0.000000e+00 : f32
    %9 = vector.broadcast %cst_7 : f32 to vector<256x64xf32>
    %10 = arith.maximumf %8, %9 : vector<256x64xf32>
    %11 = arith.truncf %10 : vector<256x64xf32> to vector<256x64xbf16>
    %c0_8 = arith.constant 0 : index
    %c0_9 = arith.constant 0 : index
    %12 = vector.load %arg6[%c0_8, %c0_9] : memref<256x64xbf16, #tpu.memory_space<vmem>>, vector<256x64xbf16>
    tpu.vector_store %arg6[%c0_8, %c0_9], %11 {strides = array<i32>} : memref<256x64xbf16, #tpu.memory_space<vmem>>, vector<256x64xbf16>,
    return
  }
  func.func @transform_0(%arg0: i32, %arg1: i32) -> (i32, i32) {
    %c0_i32 = arith.constant 0 : i32
    %c0_i32_0 = arith.constant 0 : i32
    return %arg0, %c0_i32 : i32, i32
  }
  func.func @transform_1(%arg0: i32, %arg1: i32) -> (i32, i32) {
    %c0_i32 = arith.constant 0 : i32
    %c0_i32_0 = arith.constant 0 : i32
    return %c0_i32, %arg1 : i32, i32
  }
  func.func @transform_2(%arg0: i32, %arg1: i32) -> (i32, i32) {
    %c0_i32 = arith.constant 0 : i32
    %c0_i32_0 = arith.constant 0 : i32
    return %c0_i32, %arg1 : i32, i32
  }
  func.func @transform_3(%arg0: i32, %arg1: i32) -> (i32, i32) {
    %c0_i32 = arith.constant 0 : i32
    %c0_i32_0 = arith.constant 0 : i32
    return %c0_i32, %arg1 : i32, i32
  }
  func.func @transform_4(%arg0: i32, %arg1: i32) -> (i32, i32) {
    %c0_i32 = arith.constant 0 : i32
    return %arg0, %arg1 : i32, i32
  }
}

module attributes {stable_mosaic.version = 11 : i64} {
  func.func @_gemm_fused_kernel(%arg0: i32, %arg1: i32, %arg2: memref<128x576xbf16, #tpu.memory_space<vmem>>, %arg3: memref<576x64xbf16, #tpu.memory_space<vmem>>, %arg4: memref<1x64xf32, #tpu.memory_space<vmem>>, %arg5: memref<1x64xf32, #tpu.memory_space<vmem>>, %arg6: memref<128x64xbf16, #tpu.memory_space<vmem>>) attributes {dimension_semantics = [#tpu.dimension_semantics<parallel>, #tpu.dimension_semantics<parallel>], iteration_bounds = array<i64: 1, 1>, scalar_prefetch = 0 : i64, scratch_operands = 0 : i64, tpu.core_type = #tpu.core_type<tc>, window_params = [{transform_indices = @transform_0, window_bounds = array<i64: 128, 576>}, {transform_indices = @transform_1, window_bounds = array<i64: 576, 64>}, {transform_indices = @transform_2, window_bounds = array<i64: 1, 64>}, {transform_indices = @transform_3, window_bounds = array<i64: 1, 64>}, {transform_indices = @transform_4, window_bounds = array<i64: 128, 64>}]} {
    %c0 = arith.constant 0 : index
    %c0_0 = arith.constant 0 : index
    %0 = vector.load %arg2[%c0, %c0_0] : memref<128x576xbf16, #tpu.memory_space<vmem>>, vector<128x576xbf16>
    %c0_1 = arith.constant 0 : index
    %c0_2 = arith.constant 0 : index
    %1 = vector.load %arg3[%c0_1, %c0_2] : memref<576x64xbf16, #tpu.memory_space<vmem>>, vector<576x64xbf16>
    %cst = arith.constant dense<0.000000e+00> : vector<128x64xf32>
    %2 = tpu.matmul %0, %1, %cst {dimension_numbers = #tpu.dot_dimension_numbers<[1], [0], [0], [1], [0, 0, 1, 1], [], []>} : vector<128x576xbf16>, vector<576x64xbf16>, vector<128x64xf32> -> vector<128x64xf32>
    %c0_3 = arith.constant 0 : index
    %c0_4 = arith.constant 0 : index
    %3 = vector.load %arg4[%c0_3, %c0_4] : memref<1x64xf32, #tpu.memory_space<vmem>>, vector<1x64xf32>
    %4 = vector.broadcast %3 : vector<1x64xf32> to vector<128x64xf32>
    %5 = arith.mulf %2, %4 : vector<128x64xf32>
    %c0_5 = arith.constant 0 : index
    %c0_6 = arith.constant 0 : index
    %6 = vector.load %arg5[%c0_5, %c0_6] : memref<1x64xf32, #tpu.memory_space<vmem>>, vector<1x64xf32>
    %7 = vector.broadcast %6 : vector<1x64xf32> to vector<128x64xf32>
    %8 = arith.addf %5, %7 : vector<128x64xf32>
    %cst_7 = arith.constant 0.000000e+00 : f32
    %9 = vector.broadcast %cst_7 : f32 to vector<128x64xf32>
    %10 = arith.maximumf %8, %9 : vector<128x64xf32>
    %11 = arith.truncf %10 : vector<128x64xf32> to vector<128x64xbf16>
    %c0_8 = arith.constant 0 : index
    %c0_9 = arith.constant 0 : index
    %12 = vector.load %arg6[%c0_8, %c0_9] : memref<128x64xbf16, #tpu.memory_space<vmem>>, vector<128x64xbf16>
    tpu.vector_store %arg6[%c0_8, %c0_9], %11 {strides = array<i32>} : memref<128x64xbf16, #tpu.memory_space<vmem>>, vector<128x64xbf16>,
    return
  }
  func.func @transform_0(%arg0: i32, %arg1: i32) -> (i32, i32) {
    %c0_i32 = arith.constant 0 : i32
    %c0_i32_0 = arith.constant 0 : i32
    return %arg0, %c0_i32 : i32, i32
  }
  func.func @transform_1(%arg0: i32, %arg1: i32) -> (i32, i32) {
    %c0_i32 = arith.constant 0 : i32
    %c0_i32_0 = arith.constant 0 : i32
    return %c0_i32, %arg1 : i32, i32
  }
  func.func @transform_2(%arg0: i32, %arg1: i32) -> (i32, i32) {
    %c0_i32 = arith.constant 0 : i32
    %c0_i32_0 = arith.constant 0 : i32
    return %c0_i32, %arg1 : i32, i32
  }
  func.func @transform_3(%arg0: i32, %arg1: i32) -> (i32, i32) {
    %c0_i32 = arith.constant 0 : i32
    %c0_i32_0 = arith.constant 0 : i32
    return %c0_i32, %arg1 : i32, i32
  }
  func.func @transform_4(%arg0: i32, %arg1: i32) -> (i32, i32) {
    %c0_i32 = arith.constant 0 : i32
    return %arg0, %arg1 : i32, i32
  }
}

module attributes {stable_mosaic.version = 11 : i64} {
  func.func @_gemm_fused_kernel(%arg0: i32, %arg1: i32, %arg2: memref<128x576xbf16, #tpu.memory_space<vmem>>, %arg3: memref<576x64xbf16, #tpu.memory_space<vmem>>, %arg4: memref<1x64xf32, #tpu.memory_space<vmem>>, %arg5: memref<1x64xf32, #tpu.memory_space<vmem>>, %arg6: memref<128x64xbf16, #tpu.memory_space<vmem>>, %arg7: memref<128x64xbf16, #tpu.memory_space<vmem>>) attributes {dimension_semantics = [#tpu.dimension_semantics<parallel>, #tpu.dimension_semantics<parallel>], iteration_bounds = array<i64: 1, 1>, scalar_prefetch = 0 : i64, scratch_operands = 0 : i64, tpu.core_type = #tpu.core_type<tc>, window_params = [{transform_indices = @transform_0, window_bounds = array<i64: 128, 576>}, {transform_indices = @transform_1, window_bounds = array<i64: 576, 64>}, {transform_indices = @transform_2, window_bounds = array<i64: 1, 64>}, {transform_indices = @transform_3, window_bounds = array<i64: 1, 64>}, {transform_indices = @transform_4, window_bounds = array<i64: 128, 64>}, {transform_indices = @transform_5, window_bounds = array<i64: 128, 64>}]} {
    %c0 = arith.constant 0 : index
    %c0_0 = arith.constant 0 : index
    %0 = vector.load %arg2[%c0, %c0_0] : memref<128x576xbf16, #tpu.memory_space<vmem>>, vector<128x576xbf16>
    %c0_1 = arith.constant 0 : index
    %c0_2 = arith.constant 0 : index
    %1 = vector.load %arg3[%c0_1, %c0_2] : memref<576x64xbf16, #tpu.memory_space<vmem>>, vector<576x64xbf16>
    %cst = arith.constant dense<0.000000e+00> : vector<128x64xf32>
    %2 = tpu.matmul %0, %1, %cst {dimension_numbers = #tpu.dot_dimension_numbers<[1], [0], [0], [1], [0, 0, 1, 1], [], []>} : vector<128x576xbf16>, vector<576x64xbf16>, vector<128x64xf32> -> vector<128x64xf32>
    %c0_3 = arith.constant 0 : index
    %c0_4 = arith.constant 0 : index
    %3 = vector.load %arg4[%c0_3, %c0_4] : memref<1x64xf32, #tpu.memory_space<vmem>>, vector<1x64xf32>
    %4 = vector.broadcast %3 : vector<1x64xf32> to vector<128x64xf32>
    %5 = arith.mulf %2, %4 : vector<128x64xf32>
    %c0_5 = arith.constant 0 : index
    %c0_6 = arith.constant 0 : index
    %6 = vector.load %arg5[%c0_5, %c0_6] : memref<1x64xf32, #tpu.memory_space<vmem>>, vector<1x64xf32>
    %7 = vector.broadcast %6 : vector<1x64xf32> to vector<128x64xf32>
    %8 = arith.addf %5, %7 : vector<128x64xf32>
    %c0_7 = arith.constant 0 : index
    %c0_8 = arith.constant 0 : index
    %9 = vector.load %arg6[%c0_7, %c0_8] : memref<128x64xbf16, #tpu.memory_space<vmem>>, vector<128x64xbf16>
    %10 = arith.extf %9 : vector<128x64xbf16> to vector<128x64xf32>
    %11 = arith.addf %8, %10 : vector<128x64xf32>
    %cst_9 = arith.constant 0.000000e+00 : f32
    %12 = vector.broadcast %cst_9 : f32 to vector<128x64xf32>
    %13 = arith.maximumf %11, %12 : vector<128x64xf32>
    %14 = arith.truncf %13 : vector<128x64xf32> to vector<128x64xbf16>
    %c0_10 = arith.constant 0 : index
    %c0_11 = arith.constant 0 : index
    %15 = vector.load %arg7[%c0_10, %c0_11] : memref<128x64xbf16, #tpu.memory_space<vmem>>, vector<128x64xbf16>
    tpu.vector_store %arg7[%c0_10, %c0_11], %14 {strides = array<i32>} : memref<128x64xbf16, #tpu.memory_space<vmem>>, vector<128x64xbf16>,
    return
  }
  func.func @transform_0(%arg0: i32, %arg1: i32) -> (i32, i32) {
    %c0_i32 = arith.constant 0 : i32
    %c0_i32_0 = arith.constant 0 : i32
    return %arg0, %c0_i32 : i32, i32
  }
  func.func @transform_1(%arg0: i32, %arg1: i32) -> (i32, i32) {
    %c0_i32 = arith.constant 0 : i32
    %c0_i32_0 = arith.constant 0 : i32
    return %c0_i32, %arg1 : i32, i32
  }
  func.func @transform_2(%arg0: i32, %arg1: i32) -> (i32, i32) {
    %c0_i32 = arith.constant 0 : i32
    %c0_i32_0 = arith.constant 0 : i32
    return %c0_i32, %arg1 : i32, i32
  }
  func.func @transform_3(%arg0: i32, %arg1: i32) -> (i32, i32) {
    %c0_i32 = arith.constant 0 : i32
    %c0_i32_0 = arith.constant 0 : i32
    return %c0_i32, %arg1 : i32, i32
  }
  func.func @transform_4(%arg0: i32, %arg1: i32) -> (i32, i32) {
    %c0_i32 = arith.constant 0 : i32
    return %arg0, %arg1 : i32, i32
  }
  func.func @transform_5(%arg0: i32, %arg1: i32) -> (i32, i32) {
    %c0_i32 = arith.constant 0 : i32
    return %arg0, %arg1 : i32, i32
  }
}

module attributes {stable_mosaic.version = 11 : i64} {
  func.func @_gemm_fused_kernel(%arg0: i32, %arg1: i32, %arg2: memref<32x576xbf16, #tpu.memory_space<vmem>>, %arg3: memref<576x128xbf16, #tpu.memory_space<vmem>>, %arg4: memref<1x128xf32, #tpu.memory_space<vmem>>, %arg5: memref<1x128xf32, #tpu.memory_space<vmem>>, %arg6: memref<32x128xbf16, #tpu.memory_space<vmem>>) attributes {dimension_semantics = [#tpu.dimension_semantics<parallel>, #tpu.dimension_semantics<parallel>], iteration_bounds = array<i64: 1, 1>, scalar_prefetch = 0 : i64, scratch_operands = 0 : i64, tpu.core_type = #tpu.core_type<tc>, window_params = [{transform_indices = @transform_0, window_bounds = array<i64: 32, 576>}, {transform_indices = @transform_1, window_bounds = array<i64: 576, 128>}, {transform_indices = @transform_2, window_bounds = array<i64: 1, 128>}, {transform_indices = @transform_3, window_bounds = array<i64: 1, 128>}, {transform_indices = @transform_4, window_bounds = array<i64: 32, 128>}]} {
    %c0 = arith.constant 0 : index
    %c0_0 = arith.constant 0 : index
    %0 = vector.load %arg2[%c0, %c0_0] : memref<32x576xbf16, #tpu.memory_space<vmem>>, vector<32x576xbf16>
    %c0_1 = arith.constant 0 : index
    %c0_2 = arith.constant 0 : index
    %1 = vector.load %arg3[%c0_1, %c0_2] : memref<576x128xbf16, #tpu.memory_space<vmem>>, vector<576x128xbf16>
    %cst = arith.constant dense<0.000000e+00> : vector<32x128xf32>
    %2 = tpu.matmul %0, %1, %cst {dimension_numbers = #tpu.dot_dimension_numbers<[1], [0], [0], [1], [0, 0, 1, 1], [], []>} : vector<32x576xbf16>, vector<576x128xbf16>, vector<32x128xf32> -> vector<32x128xf32>
    %c0_3 = arith.constant 0 : index
    %c0_4 = arith.constant 0 : index
    %3 = vector.load %arg4[%c0_3, %c0_4] : memref<1x128xf32, #tpu.memory_space<vmem>>, vector<1x128xf32>
    %4 = vector.broadcast %3 : vector<1x128xf32> to vector<32x128xf32>
    %5 = arith.mulf %2, %4 : vector<32x128xf32>
    %c0_5 = arith.constant 0 : index
    %c0_6 = arith.constant 0 : index
    %6 = vector.load %arg5[%c0_5, %c0_6] : memref<1x128xf32, #tpu.memory_space<vmem>>, vector<1x128xf32>
    %7 = vector.broadcast %6 : vector<1x128xf32> to vector<32x128xf32>
    %8 = arith.addf %5, %7 : vector<32x128xf32>
    %cst_7 = arith.constant 0.000000e+00 : f32
    %9 = vector.broadcast %cst_7 : f32 to vector<32x128xf32>
    %10 = arith.maximumf %8, %9 : vector<32x128xf32>
    %11 = arith.truncf %10 : vector<32x128xf32> to vector<32x128xbf16>
    %c0_8 = arith.constant 0 : index
    %c0_9 = arith.constant 0 : index
    %12 = vector.load %arg6[%c0_8, %c0_9] : memref<32x128xbf16, #tpu.memory_space<vmem>>, vector<32x128xbf16>
    tpu.vector_store %arg6[%c0_8, %c0_9], %11 {strides = array<i32>} : memref<32x128xbf16, #tpu.memory_space<vmem>>, vector<32x128xbf16>,
    return
  }
  func.func @transform_0(%arg0: i32, %arg1: i32) -> (i32, i32) {
    %c0_i32 = arith.constant 0 : i32
    %c0_i32_0 = arith.constant 0 : i32
    return %arg0, %c0_i32 : i32, i32
  }
  func.func @transform_1(%arg0: i32, %arg1: i32) -> (i32, i32) {
    %c0_i32 = arith.constant 0 : i32
    %c0_i32_0 = arith.constant 0 : i32
    return %c0_i32, %arg1 : i32, i32
  }
  func.func @transform_2(%arg0: i32, %arg1: i32) -> (i32, i32) {
    %c0_i32 = arith.constant 0 : i32
    %c0_i32_0 = arith.constant 0 : i32
    return %c0_i32, %arg1 : i32, i32
  }
  func.func @transform_3(%arg0: i32, %arg1: i32) -> (i32, i32) {
    %c0_i32 = arith.constant 0 : i32
    %c0_i32_0 = arith.constant 0 : i32
    return %c0_i32, %arg1 : i32, i32
  }
  func.func @transform_4(%arg0: i32, %arg1: i32) -> (i32, i32) {
    %c0_i32 = arith.constant 0 : i32
    return %arg0, %arg1 : i32, i32
  }
}

module attributes {stable_mosaic.version = 11 : i64} {
  func.func @_gemm_fused_kernel(%arg0: i32, %arg1: i32, %arg2: memref<32x1152xbf16, #tpu.memory_space<vmem>>, %arg3: memref<1152x128xbf16, #tpu.memory_space<vmem>>, %arg4: memref<1x128xf32, #tpu.memory_space<vmem>>, %arg5: memref<1x128xf32, #tpu.memory_space<vmem>>, %arg6: memref<32x64xbf16, #tpu.memory_space<vmem>>, %arg7: memref<64x128xbf16, #tpu.memory_space<vmem>>, %arg8: memref<1x128xf32, #tpu.memory_space<vmem>>, %arg9: memref<1x128xf32, #tpu.memory_space<vmem>>, %arg10: memref<32x128xbf16, #tpu.memory_space<vmem>>) attributes {dimension_semantics = [#tpu.dimension_semantics<parallel>, #tpu.dimension_semantics<parallel>], iteration_bounds = array<i64: 1, 1>, scalar_prefetch = 0 : i64, scratch_operands = 0 : i64, tpu.core_type = #tpu.core_type<tc>, window_params = [{transform_indices = @transform_0, window_bounds = array<i64: 32, 1152>}, {transform_indices = @transform_1, window_bounds = array<i64: 1152, 128>}, {transform_indices = @transform_2, window_bounds = array<i64: 1, 128>}, {transform_indices = @transform_3, window_bounds = array<i64: 1, 128>}, {transform_indices = @transform_4, window_bounds = array<i64: 32, 64>}, {transform_indices = @transform_5, window_bounds = array<i64: 64, 128>}, {transform_indices = @transform_6, window_bounds = array<i64: 1, 128>}, {transform_indices = @transform_7, window_bounds = array<i64: 1, 128>}, {transform_indices = @transform_8, window_bounds = array<i64: 32, 128>}]} {
    %c0 = arith.constant 0 : index
    %c0_0 = arith.constant 0 : index
    %0 = vector.load %arg2[%c0, %c0_0] : memref<32x1152xbf16, #tpu.memory_space<vmem>>, vector<32x1152xbf16>
    %c0_1 = arith.constant 0 : index
    %c0_2 = arith.constant 0 : index
    %1 = vector.load %arg3[%c0_1, %c0_2] : memref<1152x128xbf16, #tpu.memory_space<vmem>>, vector<1152x128xbf16>
    %cst = arith.constant dense<0.000000e+00> : vector<32x128xf32>
    %2 = tpu.matmul %0, %1, %cst {dimension_numbers = #tpu.dot_dimension_numbers<[1], [0], [0], [1], [0, 0, 1, 1], [], []>} : vector<32x1152xbf16>, vector<1152x128xbf16>, vector<32x128xf32> -> vector<32x128xf32>
    %c0_3 = arith.constant 0 : index
    %c0_4 = arith.constant 0 : index
    %3 = vector.load %arg4[%c0_3, %c0_4] : memref<1x128xf32, #tpu.memory_space<vmem>>, vector<1x128xf32>
    %4 = vector.broadcast %3 : vector<1x128xf32> to vector<32x128xf32>
    %5 = arith.mulf %2, %4 : vector<32x128xf32>
    %c0_5 = arith.constant 0 : index
    %c0_6 = arith.constant 0 : index
    %6 = vector.load %arg5[%c0_5, %c0_6] : memref<1x128xf32, #tpu.memory_space<vmem>>, vector<1x128xf32>
    %7 = vector.broadcast %6 : vector<1x128xf32> to vector<32x128xf32>
    %8 = arith.addf %5, %7 : vector<32x128xf32>
    %c0_7 = arith.constant 0 : index
    %c0_8 = arith.constant 0 : index
    %9 = vector.load %arg6[%c0_7, %c0_8] : memref<32x64xbf16, #tpu.memory_space<vmem>>, vector<32x64xbf16>
    %c0_9 = arith.constant 0 : index
    %c0_10 = arith.constant 0 : index
    %10 = vector.load %arg7[%c0_9, %c0_10] : memref<64x128xbf16, #tpu.memory_space<vmem>>, vector<64x128xbf16>
    %cst_11 = arith.constant dense<0.000000e+00> : vector<32x128xf32>
    %11 = tpu.matmul %9, %10, %cst_11 {dimension_numbers = #tpu.dot_dimension_numbers<[1], [0], [0], [1], [0, 0, 1, 1], [], []>} : vector<32x64xbf16>, vector<64x128xbf16>, vector<32x128xf32> -> vector<32x128xf32>
    %c0_12 = arith.constant 0 : index
    %c0_13 = arith.constant 0 : index
    %12 = vector.load %arg8[%c0_12, %c0_13] : memref<1x128xf32, #tpu.memory_space<vmem>>, vector<1x128xf32>
    %13 = vector.broadcast %12 : vector<1x128xf32> to vector<32x128xf32>
    %14 = arith.mulf %11, %13 : vector<32x128xf32>
    %c0_14 = arith.constant 0 : index
    %c0_15 = arith.constant 0 : index
    %15 = vector.load %arg9[%c0_14, %c0_15] : memref<1x128xf32, #tpu.memory_space<vmem>>, vector<1x128xf32>
    %16 = vector.broadcast %15 : vector<1x128xf32> to vector<32x128xf32>
    %17 = arith.addf %14, %16 : vector<32x128xf32>
    %18 = arith.addf %8, %17 : vector<32x128xf32>
    %cst_16 = arith.constant 0.000000e+00 : f32
    %19 = vector.broadcast %cst_16 : f32 to vector<32x128xf32>
    %20 = arith.maximumf %18, %19 : vector<32x128xf32>
    %21 = arith.truncf %20 : vector<32x128xf32> to vector<32x128xbf16>
    %c0_17 = arith.constant 0 : index
    %c0_18 = arith.constant 0 : index
    %22 = vector.load %arg10[%c0_17, %c0_18] : memref<32x128xbf16, #tpu.memory_space<vmem>>, vector<32x128xbf16>
    tpu.vector_store %arg10[%c0_17, %c0_18], %21 {strides = array<i32>} : memref<32x128xbf16, #tpu.memory_space<vmem>>, vector<32x128xbf16>,
    return
  }
  func.func @transform_0(%arg0: i32, %arg1: i32) -> (i32, i32) {
    %c0_i32 = arith.constant 0 : i32
    %c0_i32_0 = arith.constant 0 : i32
    return %arg0, %c0_i32 : i32, i32
  }
  func.func @transform_1(%arg0: i32, %arg1: i32) -> (i32, i32) {
    %c0_i32 = arith.constant 0 : i32
    %c0_i32_0 = arith.constant 0 : i32
    return %c0_i32, %arg1 : i32, i32
  }
  func.func @transform_2(%arg0: i32, %arg1: i32) -> (i32, i32) {
    %c0_i32 = arith.constant 0 : i32
    %c0_i32_0 = arith.constant 0 : i32
    return %c0_i32, %arg1 : i32, i32
  }
  func.func @transform_3(%arg0: i32, %arg1: i32) -> (i32, i32) {
    %c0_i32 = arith.constant 0 : i32
    %c0_i32_0 = arith.constant 0 : i32
    return %c0_i32, %arg1 : i32, i32
  }
  func.func @transform_4(%arg0: i32, %arg1: i32) -> (i32, i32) {
    %c0_i32 = arith.constant 0 : i32
    %c0_i32_0 = arith.constant 0 : i32
    return %arg0, %c0_i32 : i32, i32
  }
  func.func @transform_5(%arg0: i32, %arg1: i32) -> (i32, i32) {
    %c0_i32 = arith.constant 0 : i32
    %c0_i32_0 = arith.constant 0 : i32
    return %c0_i32, %arg1 : i32, i32
  }
  func.func @transform_6(%arg0: i32, %arg1: i32) -> (i32, i32) {
    %c0_i32 = arith.constant 0 : i32
    %c0_i32_0 = arith.constant 0 : i32
    return %c0_i32, %arg1 : i32, i32
  }
  func.func @transform_7(%arg0: i32, %arg1: i32) -> (i32, i32) {
    %c0_i32 = arith.constant 0 : i32
    %c0_i32_0 = arith.constant 0 : i32
    return %c0_i32, %arg1 : i32, i32
  }
  func.func @transform_8(%arg0: i32, %arg1: i32) -> (i32, i32) {
    %c0_i32 = arith.constant 0 : i32
    return %arg0, %arg1 : i32, i32
  }
}

module attributes {stable_mosaic.version = 11 : i64} {
  func.func @_gemm_fused_kernel(%arg0: i32, %arg1: i32, %arg2: memref<8x1152xbf16, #tpu.memory_space<vmem>>, %arg3: memref<1152x128xbf16, #tpu.memory_space<vmem>>, %arg4: memref<1x128xf32, #tpu.memory_space<vmem>>, %arg5: memref<1x128xf32, #tpu.memory_space<vmem>>, %arg6: memref<8x128xbf16, #tpu.memory_space<vmem>>) attributes {dimension_semantics = [#tpu.dimension_semantics<parallel>, #tpu.dimension_semantics<parallel>], iteration_bounds = array<i64: 1, 2>, scalar_prefetch = 0 : i64, scratch_operands = 0 : i64, tpu.core_type = #tpu.core_type<tc>, window_params = [{transform_indices = @transform_0, window_bounds = array<i64: 8, 1152>}, {transform_indices = @transform_1, window_bounds = array<i64: 1152, 128>}, {transform_indices = @transform_2, window_bounds = array<i64: 1, 128>}, {transform_indices = @transform_3, window_bounds = array<i64: 1, 128>}, {transform_indices = @transform_4, window_bounds = array<i64: 8, 128>}]} {
    %c0 = arith.constant 0 : index
    %c0_0 = arith.constant 0 : index
    %0 = vector.load %arg2[%c0, %c0_0] : memref<8x1152xbf16, #tpu.memory_space<vmem>>, vector<8x1152xbf16>
    %c0_1 = arith.constant 0 : index
    %c0_2 = arith.constant 0 : index
    %1 = vector.load %arg3[%c0_1, %c0_2] : memref<1152x128xbf16, #tpu.memory_space<vmem>>, vector<1152x128xbf16>
    %cst = arith.constant dense<0.000000e+00> : vector<8x128xf32>
    %2 = tpu.matmul %0, %1, %cst {dimension_numbers = #tpu.dot_dimension_numbers<[1], [0], [0], [1], [0, 0, 1, 1], [], []>} : vector<8x1152xbf16>, vector<1152x128xbf16>, vector<8x128xf32> -> vector<8x128xf32>
    %c0_3 = arith.constant 0 : index
    %c0_4 = arith.constant 0 : index
    %3 = vector.load %arg4[%c0_3, %c0_4] : memref<1x128xf32, #tpu.memory_space<vmem>>, vector<1x128xf32>
    %4 = vector.broadcast %3 : vector<1x128xf32> to vector<8x128xf32>
    %5 = arith.mulf %2, %4 : vector<8x128xf32>
    %c0_5 = arith.constant 0 : index
    %c0_6 = arith.constant 0 : index
    %6 = vector.load %arg5[%c0_5, %c0_6] : memref<1x128xf32, #tpu.memory_space<vmem>>, vector<1x128xf32>
    %7 = vector.broadcast %6 : vector<1x128xf32> to vector<8x128xf32>
    %8 = arith.addf %5, %7 : vector<8x128xf32>
    %cst_7 = arith.constant 0.000000e+00 : f32
    %9 = vector.broadcast %cst_7 : f32 to vector<8x128xf32>
    %10 = arith.maximumf %8, %9 : vector<8x128xf32>
    %11 = arith.truncf %10 : vector<8x128xf32> to vector<8x128xbf16>
    %c0_8 = arith.constant 0 : index
    %c0_9 = arith.constant 0 : index
    %12 = vector.load %arg6[%c0_8, %c0_9] : memref<8x128xbf16, #tpu.memory_space<vmem>>, vector<8x128xbf16>
    tpu.vector_store %arg6[%c0_8, %c0_9], %11 {strides = array<i32>} : memref<8x128xbf16, #tpu.memory_space<vmem>>, vector<8x128xbf16>,
    return
  }
  func.func @transform_0(%arg0: i32, %arg1: i32) -> (i32, i32) {
    %c0_i32 = arith.constant 0 : i32
    %c0_i32_0 = arith.constant 0 : i32
    return %arg0, %c0_i32 : i32, i32
  }
  func.func @transform_1(%arg0: i32, %arg1: i32) -> (i32, i32) {
    %c0_i32 = arith.constant 0 : i32
    %c0_i32_0 = arith.constant 0 : i32
    return %c0_i32, %arg1 : i32, i32
  }
  func.func @transform_2(%arg0: i32, %arg1: i32) -> (i32, i32) {
    %c0_i32 = arith.constant 0 : i32
    %c0_i32_0 = arith.constant 0 : i32
    return %c0_i32, %arg1 : i32, i32
  }
  func.func @transform_3(%arg0: i32, %arg1: i32) -> (i32, i32) {
    %c0_i32 = arith.constant 0 : i32
    %c0_i32_0 = arith.constant 0 : i32
    return %c0_i32, %arg1 : i32, i32
  }
  func.func @transform_4(%arg0: i32, %arg1: i32) -> (i32, i32) {
    %c0_i32 = arith.constant 0 : i32
    return %arg0, %arg1 : i32, i32
  }
}

module attributes {stable_mosaic.version = 11 : i64} {
  func.func @_gemm_fused_kernel(%arg0: i32, %arg1: i32, %arg2: memref<8x2304xbf16, #tpu.memory_space<vmem>>, %arg3: memref<2304x128xbf16, #tpu.memory_space<vmem>>, %arg4: memref<1x128xf32, #tpu.memory_space<vmem>>, %arg5: memref<1x128xf32, #tpu.memory_space<vmem>>, %arg6: memref<8x128xbf16, #tpu.memory_space<vmem>>, %arg7: memref<128x128xbf16, #tpu.memory_space<vmem>>, %arg8: memref<1x128xf32, #tpu.memory_space<vmem>>, %arg9: memref<1x128xf32, #tpu.memory_space<vmem>>, %arg10: memref<8x128xbf16, #tpu.memory_space<vmem>>) attributes {dimension_semantics = [#tpu.dimension_semantics<parallel>, #tpu.dimension_semantics<parallel>], iteration_bounds = array<i64: 1, 2>, scalar_prefetch = 0 : i64, scratch_operands = 0 : i64, tpu.core_type = #tpu.core_type<tc>, window_params = [{transform_indices = @transform_0, window_bounds = array<i64: 8, 2304>}, {transform_indices = @transform_1, window_bounds = array<i64: 2304, 128>}, {transform_indices = @transform_2, window_bounds = array<i64: 1, 128>}, {transform_indices = @transform_3, window_bounds = array<i64: 1, 128>}, {transform_indices = @transform_4, window_bounds = array<i64: 8, 128>}, {transform_indices = @transform_5, window_bounds = array<i64: 128, 128>}, {transform_indices = @transform_6, window_bounds = array<i64: 1, 128>}, {transform_indices = @transform_7, window_bounds = array<i64: 1, 128>}, {transform_indices = @transform_8, window_bounds = array<i64: 8, 128>}]} {
    %c0 = arith.constant 0 : index
    %c0_0 = arith.constant 0 : index
    %0 = vector.load %arg2[%c0, %c0_0] : memref<8x2304xbf16, #tpu.memory_space<vmem>>, vector<8x2304xbf16>
    %c0_1 = arith.constant 0 : index
    %c0_2 = arith.constant 0 : index
    %1 = vector.load %arg3[%c0_1, %c0_2] : memref<2304x128xbf16, #tpu.memory_space<vmem>>, vector<2304x128xbf16>
    %cst = arith.constant dense<0.000000e+00> : vector<8x128xf32>
    %2 = tpu.matmul %0, %1, %cst {dimension_numbers = #tpu.dot_dimension_numbers<[1], [0], [0], [1], [0, 0, 1, 1], [], []>} : vector<8x2304xbf16>, vector<2304x128xbf16>, vector<8x128xf32> -> vector<8x128xf32>
    %c0_3 = arith.constant 0 : index
    %c0_4 = arith.constant 0 : index
    %3 = vector.load %arg4[%c0_3, %c0_4] : memref<1x128xf32, #tpu.memory_space<vmem>>, vector<1x128xf32>
    %4 = vector.broadcast %3 : vector<1x128xf32> to vector<8x128xf32>
    %5 = arith.mulf %2, %4 : vector<8x128xf32>
    %c0_5 = arith.constant 0 : index
    %c0_6 = arith.constant 0 : index
    %6 = vector.load %arg5[%c0_5, %c0_6] : memref<1x128xf32, #tpu.memory_space<vmem>>, vector<1x128xf32>
    %7 = vector.broadcast %6 : vector<1x128xf32> to vector<8x128xf32>
    %8 = arith.addf %5, %7 : vector<8x128xf32>
    %c0_7 = arith.constant 0 : index
    %c0_8 = arith.constant 0 : index
    %9 = vector.load %arg6[%c0_7, %c0_8] : memref<8x128xbf16, #tpu.memory_space<vmem>>, vector<8x128xbf16>
    %c0_9 = arith.constant 0 : index
    %c0_10 = arith.constant 0 : index
    %10 = vector.load %arg7[%c0_9, %c0_10] : memref<128x128xbf16, #tpu.memory_space<vmem>>, vector<128x128xbf16>
    %cst_11 = arith.constant dense<0.000000e+00> : vector<8x128xf32>
    %11 = tpu.matmul %9, %10, %cst_11 {dimension_numbers = #tpu.dot_dimension_numbers<[1], [0], [0], [1], [0, 0, 1, 1], [], []>} : vector<8x128xbf16>, vector<128x128xbf16>, vector<8x128xf32> -> vector<8x128xf32>
    %c0_12 = arith.constant 0 : index
    %c0_13 = arith.constant 0 : index
    %12 = vector.load %arg8[%c0_12, %c0_13] : memref<1x128xf32, #tpu.memory_space<vmem>>, vector<1x128xf32>
    %13 = vector.broadcast %12 : vector<1x128xf32> to vector<8x128xf32>
    %14 = arith.mulf %11, %13 : vector<8x128xf32>
    %c0_14 = arith.constant 0 : index
    %c0_15 = arith.constant 0 : index
    %15 = vector.load %arg9[%c0_14, %c0_15] : memref<1x128xf32, #tpu.memory_space<vmem>>, vector<1x128xf32>
    %16 = vector.broadcast %15 : vector<1x128xf32> to vector<8x128xf32>
    %17 = arith.addf %14, %16 : vector<8x128xf32>
    %18 = arith.addf %8, %17 : vector<8x128xf32>
    %cst_16 = arith.constant 0.000000e+00 : f32
    %19 = vector.broadcast %cst_16 : f32 to vector<8x128xf32>
    %20 = arith.maximumf %18, %19 : vector<8x128xf32>
    %21 = arith.truncf %20 : vector<8x128xf32> to vector<8x128xbf16>
    %c0_17 = arith.constant 0 : index
    %c0_18 = arith.constant 0 : index
    %22 = vector.load %arg10[%c0_17, %c0_18] : memref<8x128xbf16, #tpu.memory_space<vmem>>, vector<8x128xbf16>
    tpu.vector_store %arg10[%c0_17, %c0_18], %21 {strides = array<i32>} : memref<8x128xbf16, #tpu.memory_space<vmem>>, vector<8x128xbf16>,
    return
  }
  func.func @transform_0(%arg0: i32, %arg1: i32) -> (i32, i32) {
    %c0_i32 = arith.constant 0 : i32
    %c0_i32_0 = arith.constant 0 : i32
    return %arg0, %c0_i32 : i32, i32
  }
  func.func @transform_1(%arg0: i32, %arg1: i32) -> (i32, i32) {
    %c0_i32 = arith.constant 0 : i32
    %c0_i32_0 = arith.constant 0 : i32
    return %c0_i32, %arg1 : i32, i32
  }
  func.func @transform_2(%arg0: i32, %arg1: i32) -> (i32, i32) {
    %c0_i32 = arith.constant 0 : i32
    %c0_i32_0 = arith.constant 0 : i32
    return %c0_i32, %arg1 : i32, i32
  }
  func.func @transform_3(%arg0: i32, %arg1: i32) -> (i32, i32) {
    %c0_i32 = arith.constant 0 : i32
    %c0_i32_0 = arith.constant 0 : i32
    return %c0_i32, %arg1 : i32, i32
  }
  func.func @transform_4(%arg0: i32, %arg1: i32) -> (i32, i32) {
    %c0_i32 = arith.constant 0 : i32
    %c0_i32_0 = arith.constant 0 : i32
    return %arg0, %c0_i32 : i32, i32
  }
  func.func @transform_5(%arg0: i32, %arg1: i32) -> (i32, i32) {
    %c0_i32 = arith.constant 0 : i32
    %c0_i32_0 = arith.constant 0 : i32
    return %c0_i32, %arg1 : i32, i32
  }
  func.func @transform_6(%arg0: i32, %arg1: i32) -> (i32, i32) {
    %c0_i32 = arith.constant 0 : i32
    %c0_i32_0 = arith.constant 0 : i32
    return %c0_i32, %arg1 : i32, i32
  }
  func.func @transform_7(%arg0: i32, %arg1: i32) -> (i32, i32) {
    %c0_i32 = arith.constant 0 : i32
    %c0_i32_0 = arith.constant 0 : i32
    return %c0_i32, %arg1 : i32, i32
  }
  func.func @transform_8(%arg0: i32, %arg1: i32) -> (i32, i32) {
    %c0_i32 = arith.constant 0 : i32
    return %arg0, %arg1 : i32, i32
  }
}

module attributes {stable_mosaic.version = 11 : i64} {
  func.func @_gemm_fused_kernel(%arg0: i32, %arg1: i32, %arg2: memref<2x2304xbf16, #tpu.memory_space<vmem>>, %arg3: memref<2304x128xbf16, #tpu.memory_space<vmem>>, %arg4: memref<1x128xf32, #tpu.memory_space<vmem>>, %arg5: memref<1x128xf32, #tpu.memory_space<vmem>>, %arg6: memref<2x128xbf16, #tpu.memory_space<vmem>>) attributes {dimension_semantics = [#tpu.dimension_semantics<parallel>, #tpu.dimension_semantics<parallel>], iteration_bounds = array<i64: 1, 4>, scalar_prefetch = 0 : i64, scratch_operands = 0 : i64, tpu.core_type = #tpu.core_type<tc>, window_params = [{transform_indices = @transform_0, window_bounds = array<i64: 2, 2304>}, {transform_indices = @transform_1, window_bounds = array<i64: 2304, 128>}, {transform_indices = @transform_2, window_bounds = array<i64: 1, 128>}, {transform_indices = @transform_3, window_bounds = array<i64: 1, 128>}, {transform_indices = @transform_4, window_bounds = array<i64: 2, 128>}]} {
    %c0 = arith.constant 0 : index
    %c0_0 = arith.constant 0 : index
    %0 = vector.load %arg2[%c0, %c0_0] : memref<2x2304xbf16, #tpu.memory_space<vmem>>, vector<2x2304xbf16>
    %c0_1 = arith.constant 0 : index
    %c0_2 = arith.constant 0 : index
    %1 = vector.load %arg3[%c0_1, %c0_2] : memref<2304x128xbf16, #tpu.memory_space<vmem>>, vector<2304x128xbf16>
    %cst = arith.constant dense<0.000000e+00> : vector<2x128xf32>
    %2 = tpu.matmul %0, %1, %cst {dimension_numbers = #tpu.dot_dimension_numbers<[1], [0], [0], [1], [0, 0, 1, 1], [], []>} : vector<2x2304xbf16>, vector<2304x128xbf16>, vector<2x128xf32> -> vector<2x128xf32>
    %c0_3 = arith.constant 0 : index
    %c0_4 = arith.constant 0 : index
    %3 = vector.load %arg4[%c0_3, %c0_4] : memref<1x128xf32, #tpu.memory_space<vmem>>, vector<1x128xf32>
    %4 = vector.broadcast %3 : vector<1x128xf32> to vector<2x128xf32>
    %5 = arith.mulf %2, %4 : vector<2x128xf32>
    %c0_5 = arith.constant 0 : index
    %c0_6 = arith.constant 0 : index
    %6 = vector.load %arg5[%c0_5, %c0_6] : memref<1x128xf32, #tpu.memory_space<vmem>>, vector<1x128xf32>
    %7 = vector.broadcast %6 : vector<1x128xf32> to vector<2x128xf32>
    %8 = arith.addf %5, %7 : vector<2x128xf32>
    %cst_7 = arith.constant 0.000000e+00 : f32
    %9 = vector.broadcast %cst_7 : f32 to vector<2x128xf32>
    %10 = arith.maximumf %8, %9 : vector<2x128xf32>
    %11 = arith.truncf %10 : vector<2x128xf32> to vector<2x128xbf16>
    %c0_8 = arith.constant 0 : index
    %c0_9 = arith.constant 0 : index
    %12 = vector.load %arg6[%c0_8, %c0_9] : memref<2x128xbf16, #tpu.memory_space<vmem>>, vector<2x128xbf16>
    tpu.vector_store %arg6[%c0_8, %c0_9], %11 {strides = array<i32>} : memref<2x128xbf16, #tpu.memory_space<vmem>>, vector<2x128xbf16>,
    return
  }
  func.func @transform_0(%arg0: i32, %arg1: i32) -> (i32, i32) {
    %c0_i32 = arith.constant 0 : i32
    %c0_i32_0 = arith.constant 0 : i32
    return %arg0, %c0_i32 : i32, i32
  }
  func.func @transform_1(%arg0: i32, %arg1: i32) -> (i32, i32) {
    %c0_i32 = arith.constant 0 : i32
    %c0_i32_0 = arith.constant 0 : i32
    return %c0_i32, %arg1 : i32, i32
  }
  func.func @transform_2(%arg0: i32, %arg1: i32) -> (i32, i32) {
    %c0_i32 = arith.constant 0 : i32
    %c0_i32_0 = arith.constant 0 : i32
    return %c0_i32, %arg1 : i32, i32
  }
  func.func @transform_3(%arg0: i32, %arg1: i32) -> (i32, i32) {
    %c0_i32 = arith.constant 0 : i32
    %c0_i32_0 = arith.constant 0 : i32
    return %c0_i32, %arg1 : i32, i32
  }
  func.func @transform_4(%arg0: i32, %arg1: i32) -> (i32, i32) {
    %c0_i32 = arith.constant 0 : i32
    return %arg0, %arg1 : i32, i32
  }
}

module attributes {stable_mosaic.version = 11 : i64} {
  func.func @_gemm_fused_kernel(%arg0: i32, %arg1: i32, %arg2: memref<2x4608xbf16, #tpu.memory_space<vmem>>, %arg3: memref<4608x128xbf16, #tpu.memory_space<vmem>>, %arg4: memref<1x128xf32, #tpu.memory_space<vmem>>, %arg5: memref<1x128xf32, #tpu.memory_space<vmem>>, %arg6: memref<2x256xbf16, #tpu.memory_space<vmem>>, %arg7: memref<256x128xbf16, #tpu.memory_space<vmem>>, %arg8: memref<1x128xf32, #tpu.memory_space<vmem>>, %arg9: memref<1x128xf32, #tpu.memory_space<vmem>>, %arg10: memref<2x128xbf16, #tpu.memory_space<vmem>>) attributes {dimension_semantics = [#tpu.dimension_semantics<parallel>, #tpu.dimension_semantics<parallel>], iteration_bounds = array<i64: 1, 4>, scalar_prefetch = 0 : i64, scratch_operands = 0 : i64, tpu.core_type = #tpu.core_type<tc>, window_params = [{transform_indices = @transform_0, window_bounds = array<i64: 2, 4608>}, {transform_indices = @transform_1, window_bounds = array<i64: 4608, 128>}, {transform_indices = @transform_2, window_bounds = array<i64: 1, 128>}, {transform_indices = @transform_3, window_bounds = array<i64: 1, 128>}, {transform_indices = @transform_4, window_bounds = array<i64: 2, 256>}, {transform_indices = @transform_5, window_bounds = array<i64: 256, 128>}, {transform_indices = @transform_6, window_bounds = array<i64: 1, 128>}, {transform_indices = @transform_7, window_bounds = array<i64: 1, 128>}, {transform_indices = @transform_8, window_bounds = array<i64: 2, 128>}]} {
    %c0 = arith.constant 0 : index
    %c0_0 = arith.constant 0 : index
    %0 = vector.load %arg2[%c0, %c0_0] : memref<2x4608xbf16, #tpu.memory_space<vmem>>, vector<2x4608xbf16>
    %c0_1 = arith.constant 0 : index
    %c0_2 = arith.constant 0 : index
    %1 = vector.load %arg3[%c0_1, %c0_2] : memref<4608x128xbf16, #tpu.memory_space<vmem>>, vector<4608x128xbf16>
    %cst = arith.constant dense<0.000000e+00> : vector<2x128xf32>
    %2 = tpu.matmul %0, %1, %cst {dimension_numbers = #tpu.dot_dimension_numbers<[1], [0], [0], [1], [0, 0, 1, 1], [], []>} : vector<2x4608xbf16>, vector<4608x128xbf16>, vector<2x128xf32> -> vector<2x128xf32>
    %c0_3 = arith.constant 0 : index
    %c0_4 = arith.constant 0 : index
    %3 = vector.load %arg4[%c0_3, %c0_4] : memref<1x128xf32, #tpu.memory_space<vmem>>, vector<1x128xf32>
    %4 = vector.broadcast %3 : vector<1x128xf32> to vector<2x128xf32>
    %5 = arith.mulf %2, %4 : vector<2x128xf32>
    %c0_5 = arith.constant 0 : index
    %c0_6 = arith.constant 0 : index
    %6 = vector.load %arg5[%c0_5, %c0_6] : memref<1x128xf32, #tpu.memory_space<vmem>>, vector<1x128xf32>
    %7 = vector.broadcast %6 : vector<1x128xf32> to vector<2x128xf32>
    %8 = arith.addf %5, %7 : vector<2x128xf32>
    %c0_7 = arith.constant 0 : index
    %c0_8 = arith.constant 0 : index
    %9 = vector.load %arg6[%c0_7, %c0_8] : memref<2x256xbf16, #tpu.memory_space<vmem>>, vector<2x256xbf16>
    %c0_9 = arith.constant 0 : index
    %c0_10 = arith.constant 0 : index
    %10 = vector.load %arg7[%c0_9, %c0_10] : memref<256x128xbf16, #tpu.memory_space<vmem>>, vector<256x128xbf16>
    %cst_11 = arith.constant dense<0.000000e+00> : vector<2x128xf32>
    %11 = tpu.matmul %9, %10, %cst_11 {dimension_numbers = #tpu.dot_dimension_numbers<[1], [0], [0], [1], [0, 0, 1, 1], [], []>} : vector<2x256xbf16>, vector<256x128xbf16>, vector<2x128xf32> -> vector<2x128xf32>
    %c0_12 = arith.constant 0 : index
    %c0_13 = arith.constant 0 : index
    %12 = vector.load %arg8[%c0_12, %c0_13] : memref<1x128xf32, #tpu.memory_space<vmem>>, vector<1x128xf32>
    %13 = vector.broadcast %12 : vector<1x128xf32> to vector<2x128xf32>
    %14 = arith.mulf %11, %13 : vector<2x128xf32>
    %c0_14 = arith.constant 0 : index
    %c0_15 = arith.constant 0 : index
    %15 = vector.load %arg9[%c0_14, %c0_15] : memref<1x128xf32, #tpu.memory_space<vmem>>, vector<1x128xf32>
    %16 = vector.broadcast %15 : vector<1x128xf32> to vector<2x128xf32>
    %17 = arith.addf %14, %16 : vector<2x128xf32>
    %18 = arith.addf %8, %17 : vector<2x128xf32>
    %cst_16 = arith.constant 0.000000e+00 : f32
    %19 = vector.broadcast %cst_16 : f32 to vector<2x128xf32>
    %20 = arith.maximumf %18, %19 : vector<2x128xf32>
    %21 = arith.truncf %20 : vector<2x128xf32> to vector<2x128xbf16>
    %c0_17 = arith.constant 0 : index
    %c0_18 = arith.constant 0 : index
    %22 = vector.load %arg10[%c0_17, %c0_18] : memref<2x128xbf16, #tpu.memory_space<vmem>>, vector<2x128xbf16>
    tpu.vector_store %arg10[%c0_17, %c0_18], %21 {strides = array<i32>} : memref<2x128xbf16, #tpu.memory_space<vmem>>, vector<2x128xbf16>,
    return
  }
  func.func @transform_0(%arg0: i32, %arg1: i32) -> (i32, i32) {
    %c0_i32 = arith.constant 0 : i32
    %c0_i32_0 = arith.constant 0 : i32
    return %arg0, %c0_i32 : i32, i32
  }
  func.func @transform_1(%arg0: i32, %arg1: i32) -> (i32, i32) {
    %c0_i32 = arith.constant 0 : i32
    %c0_i32_0 = arith.constant 0 : i32
    return %c0_i32, %arg1 : i32, i32
  }
  func.func @transform_2(%arg0: i32, %arg1: i32) -> (i32, i32) {
    %c0_i32 = arith.constant 0 : i32
    %c0_i32_0 = arith.constant 0 : i32
    return %c0_i32, %arg1 : i32, i32
  }
  func.func @transform_3(%arg0: i32, %arg1: i32) -> (i32, i32) {
    %c0_i32 = arith.constant 0 : i32
    %c0_i32_0 = arith.constant 0 : i32
    return %c0_i32, %arg1 : i32, i32
  }
  func.func @transform_4(%arg0: i32, %arg1: i32) -> (i32, i32) {
    %c0_i32 = arith.constant 0 : i32
    %c0_i32_0 = arith.constant 0 : i32
    return %arg0, %c0_i32 : i32, i32
  }
  func.func @transform_5(%arg0: i32, %arg1: i32) -> (i32, i32) {
    %c0_i32 = arith.constant 0 : i32
    %c0_i32_0 = arith.constant 0 : i32
    return %c0_i32, %arg1 : i32, i32
  }
  func.func @transform_6(%arg0: i32, %arg1: i32) -> (i32, i32) {
    %c0_i32 = arith.constant 0 : i32
    %c0_i32_0 = arith.constant 0 : i32
    return %c0_i32, %arg1 : i32, i32
  }
  func.func @transform_7(%arg0: i32, %arg1: i32) -> (i32, i32) {
    %c0_i32 = arith.constant 0 : i32
    %c0_i32_0 = arith.constant 0 : i32
    return %c0_i32, %arg1 : i32, i32
  }
  func.func @transform_8(%arg0: i32, %arg1: i32) -> (i32, i32) {
    %c0_i32 = arith.constant 0 : i32
    return %arg0, %arg1 : i32, i32
  }
}

</mosaic_0001>

<bundles_post_ra>
// kernel: resnet_forward.10
= control target key start
LH: loop header
LB: loop body
LE: loop exit
PB: predicated region body
PF: predicated region fallthrough
CT: control target
= control target key end

     0   :  { %s1419_s15 = smov 0   ;;  %s1421_s16 = smov 0   ;;  %s1676_s0 = inlined_call_operand.vmem [shape: bf16[512,147], index: 0, kind: input, shape index: {}]   ;;  %s1677_s1 = inlined_call_operand.vmem [shape: bf16[147,64], index: 1, kind: input, shape index: {}]   ;;  %s1678_s2 = inlined_call_operand.vmem [shape: f32[1,64], index: 2, kind: input, shape index: {}]   ;;  %s1679_s3 = inlined_call_operand.vmem [shape: f32[1,64], index: 3, kind: input, shape index: {}]   ;;  %s1680_s4 = inlined_call_operand.vmem [shape: bf16[512,64], index: 4, kind: output, shape index: {}]  }
   0x1   :  { %s1423_s17 = smov 0  }
   0x2 LB: > { %s26_s18 = sadd.s32 1, %s1386_s16  ;;  %p1131_p0 = scmp.ge.s32.totalorder %s1390_s17, 1  ;;  %s1390_s17 = sphi %s1423_s17, %s14_s17   ;;  %s1386_s16 = sphi %s1421_s16, %s1682_s16   ;;  %s1382_s15 = sphi %s1419_s15, %s1681_s15  }
   0x3   : > { %p28_p1 = scmp.ge.s32.totalorder %s26_s18, 2  ;;  %p203_p2 = scmp.lt.s32.totalorder %s1390_s17, 3 }
   0x5   : > { %s1684_s18 = smov (%p28_p1, %s26_s18), 0  ;;  %p204_p3 = pnand %p1131_p0, %p203_p2 }
   0x6   : > { %v1310_v0 = vld [vmem:[%s1677_s1] sm:$0xff] (!%p204_p3)   ;;  %v1392_v1 = vmov (!%p204_p3), 0   ;;  %v1311_v2 = vld [vmem:[%s1677_s1 + $0x8] sm:$0xff] (!%p204_p3)   ;;  %v1312_v3 = vld [vmem:[%s1677_s1 + $0x10] sm:$0xff] (!%p204_p3)   ;;  %s1132_s25 = sshll.u32 (!%p204_p3), %s1382_s15, 5  ;;  %vm522_vm0 = vcmask (!%p204_p3), 154624  }
   0x7   : > { %207 = sbr.rel (%p204_p3) target bundleno = 326 (0x146), region = 36  ;;  %578 = vmatprep.subr.bf16.mxu0 (!%p204_p3), %v1392_v1  ;;  %1264 = vmatprep.subr.bf16.mxu1 (!%p204_p3), %v1392_v1  ;;  %p244_p4 = scmp.lt.s32.totalorder (!%p204_p3), %s1132_s25, 63  ;;  %v1313_v4 = vld [vmem:[%s1677_s1 + $0x18] sm:$0xff] (!%p204_p3)   ;;  %v1314_v5 = vld [vmem:[%s1677_s1 + $0x20] sm:$0xff] (!%p204_p3)   ;;  %v1315_v8 = vld [vmem:[%s1677_s1 + $0x28] sm:$0xff] (!%p204_p3)   ;;  %vm571_vm1 = vcmask (!%p204_p3), 1040384  }
   0x8   : > { %579 = vmatpush1.bf16.msra.mxu0 (!%p204_p3), %v1310_v0  ;;  %1274 = vmatpush1.bf16.msra.mxu1 (!%p204_p3), %v1310_v0  ;;  %v1316_v9 = vld [vmem:[%s1677_s1 + $0x30] sm:$0xff] (!%p204_p3)   ;;  %v1317_v10 = vld [vmem:[%s1677_s1 + $0x38] sm:$0xff] (!%p204_p3)   ;;  %vm572_vm2 = vcmask (!%p204_p3), 1041408   ;;  %v1393_v11 = vmov (!%p204_p3), 65535   ;;  %v1318_v13 = vld [vmem:[%s1677_s1 + $0x40] sm:$0xff] (!%p204_p3)   ;;  %vm977_vm3 = vcmask (!%p204_p3), 519168  }
   0x9   : > { %580 = vmatprep.subr.bf16.mxu0 (!%p204_p3), %v1392_v1  ;;  %1265 = vmatprep.subr.bf16.mxu1 (!%p204_p3), %v1392_v1  ;;  %v573_v12 = vsel (!%p204_p3), %vm571_vm1, 4294967295, %v1393_v11  ;;  %v1319_v14 = vld [vmem:[%s1677_s1 + $0x48] ss:$0 sps:$4 sm:$0x33] (!%p204_p3)   ;;  %v1526_v47 = vld [vmem:[%s1678_s2] ss:$0 sm:$0xff] (!%p204_p3) }
   0xa   : > { %v574_v15 = vsel (!%p204_p3), %vm572_vm2, %v573_v12, 0  ;;  %v1531_v49 = vld [vmem:[%s1679_s3] ss:$0 sm:$0xff] (!%p204_p3) }
   0xb   : > { %v576_v16 = vand.u32 (!%p204_p3), %v1319_v14, %v574_v15 }
   0xc   : > { %581 = vmatpush1.bf16.msra.mxu0 (!%p204_p3), %v1311_v2  ;;  %1275 = vmatpush1.bf16.msra.mxu1 (!%p204_p3), %v1311_v2 }
   0xd   : > { %582 = vmatprep.subr.bf16.mxu0 (!%p204_p3), %v1392_v1  ;;  %1266 = vmatprep.subr.bf16.mxu1 (!%p204_p3), %v1392_v1 }
   0xe   : > { %s1686_s25 = smov (!%p244_p4, %s1132_s25), 63 }
   0xf   : > { %s1231_s28 = sshll.u32 %s1686_s25, 3  ;;  %s1136_s26 = sshll.u32 %s1686_s25, 2 }
  0x10   : > { %583 = vmatpush1.bf16.msra.mxu0 %v1312_v3  ;;  %1276 = vmatpush1.bf16.msra.mxu1 %v1312_v3  ;;  %s1455_s5 = scalar_lea.vmem %s1676_s0, %s1231_s28  ;;  %s1545_s25 = scalar_lea.vmem %s1680_s4, %s1136_s26 }
  0x11   : > { %584 = vmatprep.subr.bf16.mxu0 %v1392_v1  ;;  %1267 = vmatprep.subr.bf16.mxu1 %v1392_v1  ;;  %v1322_v6 = vld [vmem:[%s1455_s5 + $0x4] ss:$8 sps:$4 sm:$0xff]   ;;  %v1320_v17 = vld [vmem:[%s1455_s5] ss:$8 sps:$4 sm:$0xff]   ;;  %v1326_v19 = vld [vmem:[%s1455_s5 + $0x14] ss:$8 sps:$4 sm:$0xff]  }
  0x12   : > { %v1325_v7 = vld [vmem:[%s1455_s5 + $0x84] ss:$8 sps:$4 sm:$0xff]   ;;  %1179 = vmatprep.mubr.msk.bf16.mxu0 %vm522_vm0, %v1322_v6  ;;  %v1323_v18 = vld [vmem:[%s1455_s5 + $0x80] ss:$8 sps:$4 sm:$0xff]   ;;  %v1328_v20 = vld [vmem:[%s1455_s5 + $0x94] ss:$8 sps:$4 sm:$0xff]  }
  0x13   : > { %1187 = vmatprep.mubr.msk.bf16.mxu1 %vm522_vm0, %v1325_v7  ;;  %v1330_v21 = vld [vmem:[%s1455_s5 + $0x10] ss:$8 sps:$4 sm:$0xff]   ;;  %v1332_v23 = vld [vmem:[%s1455_s5 + $0x24] ss:$8 sps:$4 sm:$0xff]   ;;  %v1336_v25 = vld [vmem:[%s1455_s5 + $0x20] ss:$8 sps:$4 sm:$0xff]  }
  0x14   : > { %585 = vmatpush1.bf16.msra.mxu0 %v1313_v4  ;;  %1277 = vmatpush1.bf16.msra.mxu1 %v1313_v4  ;;  %v1331_v22 = vld [vmem:[%s1455_s5 + $0x90] ss:$8 sps:$4 sm:$0xff]   ;;  %v1334_v24 = vld [vmem:[%s1455_s5 + $0xa4] ss:$8 sps:$4 sm:$0xff]   ;;  %v1337_v26 = vld [vmem:[%s1455_s5 + $0xa0] ss:$8 sps:$4 sm:$0xff]  }
  0x15   : > { %586 = vmatprep.subr.bf16.mxu0 %v1392_v1  ;;  %1268 = vmatprep.subr.bf16.mxu1 %v1392_v1  ;;  %v1338_v27 = vld [vmem:[%s1455_s5 + $0x34] ss:$8 sps:$4 sm:$0xff]   ;;  %v1342_v29 = vld [vmem:[%s1455_s5 + $0x30] ss:$8 sps:$4 sm:$0xff]   ;;  %v1344_v31 = vld [vmem:[%s1455_s5 + $0x44] ss:$8 sps:$4 sm:$0xff]  }
  0x16   : > { %v1340_v28 = vld [vmem:[%s1455_s5 + $0xb4] ss:$8 sps:$4 sm:$0xff]   ;;  %v1343_v30 = vld [vmem:[%s1455_s5 + $0xb0] ss:$8 sps:$4 sm:$0xff]   ;;  %v1346_v32 = vld [vmem:[%s1455_s5 + $0xc4] ss:$8 sps:$4 sm:$0xff]  }
  0x17   : > { %v1348_v33 = vld [vmem:[%s1455_s5 + $0x40] ss:$8 sps:$4 sm:$0xff]   ;;  %v1350_v35 = vld [vmem:[%s1455_s5 + $0x54] ss:$8 sps:$4 sm:$0xff]   ;;  %v1354_v37 = vld [vmem:[%s1455_s5 + $0x50] ss:$8 sps:$4 sm:$0xff]  }
  0x18   : > { %587 = vmatpush1.bf16.msra.mxu0 %v1314_v5  ;;  %1278 = vmatpush1.bf16.msra.mxu1 %v1314_v5  ;;  %v1349_v34 = vld [vmem:[%s1455_s5 + $0xc0] ss:$8 sps:$4 sm:$0xff]   ;;  %v1352_v36 = vld [vmem:[%s1455_s5 + $0xd4] ss:$8 sps:$4 sm:$0xff]   ;;  %v1355_v38 = vld [vmem:[%s1455_s5 + $0xd0] ss:$8 sps:$4 sm:$0xff]  }
  0x19   : > { %588 = vmatprep.subr.bf16.mxu0 %v1392_v1  ;;  %1269 = vmatprep.subr.bf16.mxu1 %v1392_v1  ;;  %v1356_v39 = vld [vmem:[%s1455_s5 + $0x64] ss:$8 sps:$4 sm:$0xff]   ;;  %v1360_v41 = vld [vmem:[%s1455_s5 + $0x60] ss:$8 sps:$4 sm:$0xff]   ;;  %v1362_v43 = vld [vmem:[%s1455_s5 + $0x74] ss:$8 sps:$4 sm:$0xff]  }
  0x1a   : > { %v1358_v40 = vld [vmem:[%s1455_s5 + $0xe4] ss:$8 sps:$4 sm:$0xff]   ;;  %v1361_v42 = vld [vmem:[%s1455_s5 + $0xe0] ss:$8 sps:$4 sm:$0xff]   ;;  %v1364_v44 = vld [vmem:[%s1455_s5 + $0xf4] ss:$8 sps:$4 sm:$0xff]  }
  0x1b   : > { %v1366_v45 = vld [vmem:[%s1455_s5 + $0x70] ss:$8 sps:$4 sm:$0xff]  }
  0x1c   : > { %589 = vmatpush1.bf16.msra.mxu0 %v1315_v8  ;;  %1279 = vmatpush1.bf16.msra.mxu1 %v1315_v8  ;;  %v1367_v46 = vld [vmem:[%s1455_s5 + $0xf0] ss:$8 sps:$4 sm:$0xff]  }
  0x1d   : > { %590 = vmatprep.subr.bf16.mxu0 %v1392_v1  ;;  %1270 = vmatprep.subr.bf16.mxu1 %v1392_v1 }
  0x20   : > { %591 = vmatpush1.bf16.msra.mxu0 %v1316_v9  ;;  %1280 = vmatpush1.bf16.msra.mxu1 %v1316_v9 }
  0x21   : > { %592 = vmatprep.subr.bf16.mxu0 %v1392_v1  ;;  %1271 = vmatprep.subr.bf16.mxu1 %v1392_v1 }
  0x24   : > { %593 = vmatpush1.bf16.msra.mxu0 %v1317_v10  ;;  %1281 = vmatpush1.bf16.msra.mxu1 %v1317_v10 }
  0x25   : > { %594 = vmatprep.subr.bf16.mxu0 %v1392_v1  ;;  %1272 = vmatprep.subr.bf16.mxu1 %v1392_v1 }
  0x28   : > { %595 = vmatpush1.bf16.msra.mxu0 %v1318_v13  ;;  %1282 = vmatpush1.bf16.msra.mxu1 %v1318_v13 }
  0x29   : > { %596 = vmatprep.subr.bf16.mxu0 %v1392_v1  ;;  %1273 = vmatprep.subr.bf16.mxu1 %v1392_v1 }
  0x2c   : > { %597 = vmatpush1.bf16.msra.mxu0 %v576_v16  ;;  %1283 = vmatpush1.bf16.msra.mxu1 %v576_v16 }
  0x2f   : > { %611 = vmatmul.mubr.bf16.vlgmr.msra.gmra.mrb[0].mxu0 %v1320_v17  ;;  %675 = vmatmul.mubr.bf16.vlgmr.msra.gmra.mrb[0].mxu1 %v1323_v18 }
  0x30   : > { %1180 = vmatprep.mubr.msk.bf16.mxu0 %vm522_vm0, %v1326_v19  ;;  %1188 = vmatprep.mubr.msk.bf16.mxu1 %vm522_vm0, %v1328_v20 }
  0x37   : > { %619 = vmatmul.mubr.bf16.gmra.mrb[4].mxu0 %v1330_v21  ;;  %683 = vmatmul.mubr.bf16.gmra.mrb[4].mxu1 %v1331_v22 }
  0x38   : > { %1181 = vmatprep.mubr.msk.bf16.mxu0 %vm522_vm0, %v1332_v23  ;;  %1189 = vmatprep.mubr.msk.bf16.mxu1 %vm522_vm0, %v1334_v24 }
  0x3f   : > { %627 = vmatmul.mubr.bf16.gmra.mrb[8].mxu0 %v1336_v25  ;;  %691 = vmatmul.mubr.bf16.gmra.mrb[8].mxu1 %v1337_v26 }
  0x40   : > { %1182 = vmatprep.mubr.msk.bf16.mxu0 %vm522_vm0, %v1338_v27  ;;  %1190 = vmatprep.mubr.msk.bf16.mxu1 %vm522_vm0, %v1340_v28 }
  0x47   : > { %635 = vmatmul.mubr.bf16.gmra.mrb[12].mxu0 %v1342_v29  ;;  %699 = vmatmul.mubr.bf16.gmra.mrb[12].mxu1 %v1343_v30 }
  0x48   : > { %1183 = vmatprep.mubr.msk.bf16.mxu0 %vm522_vm0, %v1344_v31  ;;  %1191 = vmatprep.mubr.msk.bf16.mxu1 %vm522_vm0, %v1346_v32 }
  0x4f   : > { %643 = vmatmul.mubr.bf16.gmra.mrb[16].mxu0 %v1348_v33  ;;  %707 = vmatmul.mubr.bf16.gmra.mrb[16].mxu1 %v1349_v34 }
  0x50   : > { %1184 = vmatprep.mubr.msk.bf16.mxu0 %vm522_vm0, %v1350_v35  ;;  %1192 = vmatprep.mubr.msk.bf16.mxu1 %vm522_vm0, %v1352_v36 }
  0x57   : > { %651 = vmatmul.mubr.bf16.gmra.mrb[20].mxu0 %v1354_v37  ;;  %715 = vmatmul.mubr.bf16.gmra.mrb[20].mxu1 %v1355_v38 }
  0x58   : > { %1185 = vmatprep.mubr.msk.bf16.mxu0 %vm522_vm0, %v1356_v39  ;;  %1193 = vmatprep.mubr.msk.bf16.mxu1 %vm522_vm0, %v1358_v40 }
  0x5f   : > { %659 = vmatmul.mubr.bf16.gmra.mrb[24].mxu0 %v1360_v41  ;;  %723 = vmatmul.mubr.bf16.gmra.mrb[24].mxu1 %v1361_v42 }
  0x60   : > { %1186 = vmatprep.mubr.msk.bf16.mxu0 %vm522_vm0, %v1362_v43  ;;  %1194 = vmatprep.mubr.msk.bf16.mxu1 %vm522_vm0, %v1364_v44 }
  0x67   : > { %667 = vmatmul.mubr.bf16.gmra.mrb[28].mxu0 %v1366_v45  ;;  %731 = vmatmul.mubr.bf16.gmra.mrb[28].mxu1 %v1367_v46 }
 0x102   : > { %v612_v48 = vpop.f32.mrb[0].mxu0  ;;  %v676_v50 = vpop.f32.mrb[0].mxu1 }
 0x103   : > { %v746_v51 = vmul.f32 %v1526_v47, %v612_v48  ;;  %v762_v52 = vmul.f32 %v1526_v47, %v676_v50  ;;  %v614_v53 = vpop.f32.mrb[1].mxu0  ;;  %v678_v54 = vpop.f32.mrb[1].mxu1 }
 0x104   : > { %v615_v55 = vpop.f32.mrb[2].mxu0  ;;  %v679_v56 = vpop.f32.mrb[2].mxu1 }
 0x105   : > { %v785_v57 = vadd.f32 %v1531_v49, %v746_v51  ;;  %v801_v58 = vadd.f32 %v1531_v49, %v762_v52  ;;  %v747_v59 = vmul.f32 %v1526_v47, %v615_v55  ;;  %v763_v60 = vmul.f32 %v1526_v47, %v679_v56  ;;  %v617_v61 = vpop.f32.mrb[3].mxu0  ;;  %v681_v62 = vpop.f32.mrb[3].mxu1 }
 0x107   : > { %v817_v63 = vmax.f32 %v785_v57, 0.0  ;;  %v833_v0 = vmax.f32 %v801_v58, 0.0  ;;  %v786_v1 = vadd.f32 %v1531_v49, %v747_v59  ;;  %v802_v2 = vadd.f32 %v1531_v49, %v763_v60 }
 0x109   : > { %v1232_v3 = vpack.c.bf16 %v817_v63, %v817_v63  ;;  %v1248_v4 = vpack.c.bf16 %v833_v0, %v833_v0  ;;  %v818_v5 = vmax.f32 %v786_v1, 0.0  ;;  %v834_v6 = vmax.f32 %v802_v2, 0.0 }
 0x10a   : > { %v620_v7 = vpop.f32.mrb[4].mxu0  ;;  %v684_v8 = vpop.f32.mrb[4].mxu1 }
 0x10b   : > { %978 = vst.msk [vmem:[%s1545_s25] sm:$0xf] %vm977_vm3, %v1232_v3  ;;  %994 = vst.msk [vmem:[%s1545_s25 + $0x40] sm:$0xf] %vm977_vm3, %v1248_v4  ;;  %v1233_v9 = vpack.c.bf16 %v818_v5, %v818_v5  ;;  %v1249_v10 = vpack.c.bf16 %v834_v6, %v834_v6  ;;  %v748_v11 = vmul.f32 %v1526_v47, %v620_v7  ;;  %v622_v13 = vpop.f32.mrb[5].mxu0  ;;  %v686_v14 = vpop.f32.mrb[5].mxu1 }
 0x10c   : > { %v764_v12 = vmul.f32 %v1526_v47, %v684_v8  ;;  %v623_v15 = vpop.f32.mrb[6].mxu0  ;;  %v687_v16 = vpop.f32.mrb[6].mxu1 }
 0x10d   : > { %979 = vst.msk [vmem:[%s1545_s25 + $0x4] sm:$0xf] %vm977_vm3, %v1233_v9  ;;  %995 = vst.msk [vmem:[%s1545_s25 + $0x44] sm:$0xf] %vm977_vm3, %v1249_v10  ;;  %v787_v17 = vadd.f32 %v1531_v49, %v748_v11  ;;  %v749_v19 = vmul.f32 %v1526_v47, %v623_v15  ;;  %v765_v20 = vmul.f32 %v1526_v47, %v687_v16  ;;  %v625_v21 = vpop.f32.mrb[7].mxu0  ;;  %v689_v22 = vpop.f32.mrb[7].mxu1 }
 0x10e   : > { %v803_v18 = vadd.f32 %v1531_v49, %v764_v12 }
 0x10f   : > { %v819_v23 = vmax.f32 %v787_v17, 0.0  ;;  %v788_v25 = vadd.f32 %v1531_v49, %v749_v19  ;;  %v804_v26 = vadd.f32 %v1531_v49, %v765_v20 }
 0x110   : > { %v835_v24 = vmax.f32 %v803_v18, 0.0 }
 0x111   : > { %v1234_v27 = vpack.c.bf16 %v819_v23, %v819_v23  ;;  %v820_v29 = vmax.f32 %v788_v25, 0.0  ;;  %v836_v30 = vmax.f32 %v804_v26, 0.0 }
 0x112   : > { %v1250_v28 = vpack.c.bf16 %v835_v24, %v835_v24  ;;  %v628_v31 = vpop.f32.mrb[8].mxu0  ;;  %v692_v32 = vpop.f32.mrb[8].mxu1 }
 0x113   : > { %980 = vst.msk [vmem:[%s1545_s25 + $0x8] sm:$0xf] %vm977_vm3, %v1234_v27  ;;  %v1235_v33 = vpack.c.bf16 %v820_v29, %v820_v29  ;;  %v1251_v34 = vpack.c.bf16 %v836_v30, %v836_v30  ;;  %v750_v35 = vmul.f32 %v1526_v47, %v628_v31  ;;  %v766_v36 = vmul.f32 %v1526_v47, %v692_v32  ;;  %v630_v37 = vpop.f32.mrb[9].mxu0  ;;  %v694_v38 = vpop.f32.mrb[9].mxu1 }
 0x114   : > { %996 = vst.msk [vmem:[%s1545_s25 + $0x48] sm:$0xf] %vm977_vm3, %v1250_v28  ;;  %v631_v39 = vpop.f32.mrb[10].mxu0  ;;  %v695_v40 = vpop.f32.mrb[10].mxu1 }
 0x115   : > { %981 = vst.msk [vmem:[%s1545_s25 + $0xc] sm:$0xf] %vm977_vm3, %v1235_v33  ;;  %997 = vst.msk [vmem:[%s1545_s25 + $0x4c] sm:$0xf] %vm977_vm3, %v1251_v34  ;;  %v789_v41 = vadd.f32 %v1531_v49, %v750_v35  ;;  %v805_v42 = vadd.f32 %v1531_v49, %v766_v36  ;;  %v751_v43 = vmul.f32 %v1526_v47, %v631_v39  ;;  %v633_v45 = vpop.f32.mrb[11].mxu0  ;;  %v697_v46 = vpop.f32.mrb[11].mxu1 }
 0x116   : > { %v767_v44 = vmul.f32 %v1526_v47, %v695_v40 }
 0x117   : > { %v821_v48 = vmax.f32 %v789_v41, 0.0  ;;  %v837_v50 = vmax.f32 %v805_v42, 0.0  ;;  %v790_v51 = vadd.f32 %v1531_v49, %v751_v43 }
 0x118   : > { %v806_v52 = vadd.f32 %v1531_v49, %v767_v44 }
 0x119   : > { %v1236_v53 = vpack.c.bf16 %v821_v48, %v821_v48  ;;  %v1252_v54 = vpack.c.bf16 %v837_v50, %v837_v50  ;;  %v822_v55 = vmax.f32 %v790_v51, 0.0 }
 0x11a   : > { %v838_v56 = vmax.f32 %v806_v52, 0.0  ;;  %v636_v57 = vpop.f32.mrb[12].mxu0  ;;  %v700_v58 = vpop.f32.mrb[12].mxu1 }
 0x11b   : > { %982 = vst.msk [vmem:[%s1545_s25 + $0x10] sm:$0xf] %vm977_vm3, %v1236_v53  ;;  %998 = vst.msk [vmem:[%s1545_s25 + $0x50] sm:$0xf] %vm977_vm3, %v1252_v54  ;;  %v1237_v59 = vpack.c.bf16 %v822_v55, %v822_v55  ;;  %v752_v61 = vmul.f32 %v1526_v47, %v636_v57  ;;  %v768_v62 = vmul.f32 %v1526_v47, %v700_v58  ;;  %v638_v63 = vpop.f32.mrb[13].mxu0  ;;  %v702_v0 = vpop.f32.mrb[13].mxu1 }
 0x11c   : > { %v1253_v60 = vpack.c.bf16 %v838_v56, %v838_v56  ;;  %v639_v1 = vpop.f32.mrb[14].mxu0  ;;  %v703_v2 = vpop.f32.mrb[14].mxu1 }
 0x11d   : > { %983 = vst.msk [vmem:[%s1545_s25 + $0x14] sm:$0xf] %vm977_vm3, %v1237_v59  ;;  %v791_v3 = vadd.f32 %v1531_v49, %v752_v61  ;;  %v807_v4 = vadd.f32 %v1531_v49, %v768_v62  ;;  %v753_v5 = vmul.f32 %v1526_v47, %v639_v1  ;;  %v769_v6 = vmul.f32 %v1526_v47, %v703_v2  ;;  %v641_v7 = vpop.f32.mrb[15].mxu0  ;;  %v705_v8 = vpop.f32.mrb[15].mxu1 }
 0x11e   : > { %999 = vst.msk [vmem:[%s1545_s25 + $0x54] sm:$0xf] %vm977_vm3, %v1253_v60 }
 0x11f   : > { %v823_v9 = vmax.f32 %v791_v3, 0.0  ;;  %v839_v10 = vmax.f32 %v807_v4, 0.0  ;;  %v792_v11 = vadd.f32 %v1531_v49, %v753_v5  ;;  %v808_v12 = vadd.f32 %v1531_v49, %v769_v6 }
 0x121   : > { %v1238_v13 = vpack.c.bf16 %v823_v9, %v823_v9  ;;  %v1254_v14 = vpack.c.bf16 %v839_v10, %v839_v10  ;;  %v824_v15 = vmax.f32 %v792_v11, 0.0  ;;  %v840_v16 = vmax.f32 %v808_v12, 0.0 }
 0x122   : > { %v644_v17 = vpop.f32.mrb[16].mxu0  ;;  %v708_v18 = vpop.f32.mrb[16].mxu1 }
 0x123   : > { %984 = vst.msk [vmem:[%s1545_s25 + $0x18] sm:$0xf] %vm977_vm3, %v1238_v13  ;;  %1000 = vst.msk [vmem:[%s1545_s25 + $0x58] sm:$0xf] %vm977_vm3, %v1254_v14  ;;  %v1239_v19 = vpack.c.bf16 %v824_v15, %v824_v15  ;;  %v1255_v20 = vpack.c.bf16 %v840_v16, %v840_v16  ;;  %v754_v21 = vmul.f32 %v1526_v47, %v644_v17  ;;  %v646_v23 = vpop.f32.mrb[17].mxu0  ;;  %v710_v24 = vpop.f32.mrb[17].mxu1 }
 0x124   : > { %v770_v22 = vmul.f32 %v1526_v47, %v708_v18  ;;  %v647_v25 = vpop.f32.mrb[18].mxu0  ;;  %v711_v26 = vpop.f32.mrb[18].mxu1 }
 0x125   : > { %985 = vst.msk [vmem:[%s1545_s25 + $0x1c] sm:$0xf] %vm977_vm3, %v1239_v19  ;;  %1001 = vst.msk [vmem:[%s1545_s25 + $0x5c] sm:$0xf] %vm977_vm3, %v1255_v20  ;;  %v793_v27 = vadd.f32 %v1531_v49, %v754_v21  ;;  %v755_v29 = vmul.f32 %v1526_v47, %v647_v25  ;;  %v771_v30 = vmul.f32 %v1526_v47, %v711_v26  ;;  %v649_v31 = vpop.f32.mrb[19].mxu0  ;;  %v713_v32 = vpop.f32.mrb[19].mxu1 }
 0x126   : > { %v809_v28 = vadd.f32 %v1531_v49, %v770_v22 }
 0x127   : > { %v825_v33 = vmax.f32 %v793_v27, 0.0  ;;  %v794_v35 = vadd.f32 %v1531_v49, %v755_v29  ;;  %v810_v36 = vadd.f32 %v1531_v49, %v771_v30 }
 0x128   : > { %v841_v34 = vmax.f32 %v809_v28, 0.0 }
 0x129   : > { %v1240_v37 = vpack.c.bf16 %v825_v33, %v825_v33  ;;  %v826_v39 = vmax.f32 %v794_v35, 0.0  ;;  %v842_v40 = vmax.f32 %v810_v36, 0.0 }
 0x12a   : > { %v1256_v38 = vpack.c.bf16 %v841_v34, %v841_v34  ;;  %v652_v41 = vpop.f32.mrb[20].mxu0  ;;  %v716_v42 = vpop.f32.mrb[20].mxu1 }
 0x12b   : > { %986 = vst.msk [vmem:[%s1545_s25 + $0x20] sm:$0xf] %vm977_vm3, %v1240_v37  ;;  %v1241_v43 = vpack.c.bf16 %v826_v39, %v826_v39  ;;  %v1257_v44 = vpack.c.bf16 %v842_v40, %v842_v40  ;;  %v756_v45 = vmul.f32 %v1526_v47, %v652_v41  ;;  %v772_v46 = vmul.f32 %v1526_v47, %v716_v42  ;;  %v654_v48 = vpop.f32.mrb[21].mxu0  ;;  %v718_v50 = vpop.f32.mrb[21].mxu1 }
 0x12c   : > { %1002 = vst.msk [vmem:[%s1545_s25 + $0x60] sm:$0xf] %vm977_vm3, %v1256_v38  ;;  %v655_v51 = vpop.f32.mrb[22].mxu0  ;;  %v719_v52 = vpop.f32.mrb[22].mxu1 }
 0x12d   : > { %987 = vst.msk [vmem:[%s1545_s25 + $0x24] sm:$0xf] %vm977_vm3, %v1241_v43  ;;  %1003 = vst.msk [vmem:[%s1545_s25 + $0x64] sm:$0xf] %vm977_vm3, %v1257_v44  ;;  %v795_v53 = vadd.f32 %v1531_v49, %v756_v45  ;;  %v811_v54 = vadd.f32 %v1531_v49, %v772_v46  ;;  %v757_v55 = vmul.f32 %v1526_v47, %v655_v51  ;;  %v657_v57 = vpop.f32.mrb[23].mxu0  ;;  %v721_v58 = vpop.f32.mrb[23].mxu1 }
 0x12e   : > { %v773_v56 = vmul.f32 %v1526_v47, %v719_v52 }
 0x12f   : > { %v827_v59 = vmax.f32 %v795_v53, 0.0  ;;  %v843_v60 = vmax.f32 %v811_v54, 0.0  ;;  %v796_v61 = vadd.f32 %v1531_v49, %v757_v55 }
 0x130   : > { %v812_v62 = vadd.f32 %v1531_v49, %v773_v56 }
 0x131   : > { %v1242_v63 = vpack.c.bf16 %v827_v59, %v827_v59  ;;  %v1258_v0 = vpack.c.bf16 %v843_v60, %v843_v60  ;;  %v828_v1 = vmax.f32 %v796_v61, 0.0 }
 0x132   : > { %v844_v2 = vmax.f32 %v812_v62, 0.0  ;;  %v660_v3 = vpop.f32.mrb[24].mxu0  ;;  %v724_v4 = vpop.f32.mrb[24].mxu1 }
 0x133   : > { %988 = vst.msk [vmem:[%s1545_s25 + $0x28] sm:$0xf] %vm977_vm3, %v1242_v63  ;;  %1004 = vst.msk [vmem:[%s1545_s25 + $0x68] sm:$0xf] %vm977_vm3, %v1258_v0  ;;  %v1243_v5 = vpack.c.bf16 %v828_v1, %v828_v1  ;;  %v758_v7 = vmul.f32 %v1526_v47, %v660_v3  ;;  %v774_v8 = vmul.f32 %v1526_v47, %v724_v4  ;;  %v662_v9 = vpop.f32.mrb[25].mxu0  ;;  %v726_v10 = vpop.f32.mrb[25].mxu1 }
 0x134   : > { %v1259_v6 = vpack.c.bf16 %v844_v2, %v844_v2  ;;  %v663_v11 = vpop.f32.mrb[26].mxu0  ;;  %v727_v12 = vpop.f32.mrb[26].mxu1 }
 0x135   : > { %989 = vst.msk [vmem:[%s1545_s25 + $0x2c] sm:$0xf] %vm977_vm3, %v1243_v5  ;;  %v797_v13 = vadd.f32 %v1531_v49, %v758_v7  ;;  %v813_v14 = vadd.f32 %v1531_v49, %v774_v8  ;;  %v759_v15 = vmul.f32 %v1526_v47, %v663_v11  ;;  %v775_v16 = vmul.f32 %v1526_v47, %v727_v12  ;;  %v665_v17 = vpop.f32.mrb[27].mxu0  ;;  %v729_v18 = vpop.f32.mrb[27].mxu1 }
 0x136   : > { %1005 = vst.msk [vmem:[%s1545_s25 + $0x6c] sm:$0xf] %vm977_vm3, %v1259_v6 }
 0x137   : > { %v829_v19 = vmax.f32 %v797_v13, 0.0  ;;  %v845_v20 = vmax.f32 %v813_v14, 0.0  ;;  %v798_v21 = vadd.f32 %v1531_v49, %v759_v15  ;;  %v814_v22 = vadd.f32 %v1531_v49, %v775_v16 }
 0x139   : > { %v1244_v23 = vpack.c.bf16 %v829_v19, %v829_v19  ;;  %v1260_v24 = vpack.c.bf16 %v845_v20, %v845_v20  ;;  %v830_v25 = vmax.f32 %v798_v21, 0.0  ;;  %v846_v26 = vmax.f32 %v814_v22, 0.0 }
 0x13a   : > { %v668_v27 = vpop.f32.mrb[28].mxu0  ;;  %v732_v28 = vpop.f32.mrb[28].mxu1 }
 0x13b   : > { %990 = vst.msk [vmem:[%s1545_s25 + $0x30] sm:$0xf] %vm977_vm3, %v1244_v23  ;;  %1006 = vst.msk [vmem:[%s1545_s25 + $0x70] sm:$0xf] %vm977_vm3, %v1260_v24  ;;  %v1245_v29 = vpack.c.bf16 %v830_v25, %v830_v25  ;;  %v1261_v30 = vpack.c.bf16 %v846_v26, %v846_v26  ;;  %v760_v31 = vmul.f32 %v1526_v47, %v668_v27  ;;  %v670_v33 = vpop.f32.mrb[29].mxu0  ;;  %v734_v34 = vpop.f32.mrb[29].mxu1 }
 0x13c   : > { %v776_v32 = vmul.f32 %v1526_v47, %v732_v28  ;;  %v671_v35 = vpop.f32.mrb[30].mxu0  ;;  %v735_v36 = vpop.f32.mrb[30].mxu1 }
 0x13d   : > { %991 = vst.msk [vmem:[%s1545_s25 + $0x34] sm:$0xf] %vm977_vm3, %v1245_v29  ;;  %1007 = vst.msk [vmem:[%s1545_s25 + $0x74] sm:$0xf] %vm977_vm3, %v1261_v30  ;;  %v799_v37 = vadd.f32 %v1531_v49, %v760_v31  ;;  %v761_v39 = vmul.f32 %v1526_v47, %v671_v35  ;;  %v777_v40 = vmul.f32 %v1526_v47, %v735_v36  ;;  %v673_v41 = vpop.f32.mrb[31].mxu0  ;;  %v737_v42 = vpop.f32.mrb[31].mxu1 }
 0x13e   : > { %v815_v38 = vadd.f32 %v1531_v49, %v776_v32 }
 0x13f   : > { %v831_v43 = vmax.f32 %v799_v37, 0.0  ;;  %v800_v45 = vadd.f32 %v1531_v49, %v761_v39  ;;  %v816_v46 = vadd.f32 %v1531_v49, %v777_v40 }
 0x140   : > { %v847_v44 = vmax.f32 %v815_v38, 0.0 }
 0x141   : > { %v1246_v48 = vpack.c.bf16 %v831_v43, %v831_v43  ;;  %v832_v51 = vmax.f32 %v800_v45, 0.0  ;;  %v848_v52 = vmax.f32 %v816_v46, 0.0 }
 0x142   : > { %v1262_v50 = vpack.c.bf16 %v847_v44, %v847_v44 }
 0x143   : > { %992 = vst.msk [vmem:[%s1545_s25 + $0x38] sm:$0xf] %vm977_vm3, %v1246_v48  ;;  %v1247_v53 = vpack.c.bf16 %v832_v51, %v832_v51  ;;  %v1263_v54 = vpack.c.bf16 %v848_v52, %v848_v52 }
 0x144   : > { %1008 = vst.msk [vmem:[%s1545_s25 + $0x78] sm:$0xf] %vm977_vm3, %v1262_v50 }
 0x145   : > { %993 = vst.msk [vmem:[%s1545_s25 + $0x3c] sm:$0xf] %vm977_vm3, %v1247_v53  ;;  %1009 = vst.msk [vmem:[%s1545_s25 + $0x7c] sm:$0xf] %vm977_vm3, %v1263_v54 }
 0x146 PF: > { %s14_s17 = sadd.s32 1, %s1390_s17   ;;  %s1681_s15 = smov %s1386_s16 }
 0x147   : > { %p11_p5 = scmp.ge.s32.totalorder %s14_s17, 4   ;;  %s1682_s16 = smov %s1684_s18 }
 0x149   :  { %13 = sbr.rel (!%p11_p5) target bundleno = 2 (0x2), region = 75 }

// kernel: resnet_forward.11
= control target key start
LH: loop header
LB: loop body
LE: loop exit
PB: predicated region body
PF: predicated region fallthrough
CT: control target
= control target key end

     0   :  { %vm554_vm0 = vcmask 523264   ;;  %vm996_vm1 = vcmask 519168   ;;  %s1805_s1 = inlined_call_operand.vmem [shape: bf16[576,64], index: 1, kind: input, shape index: {}]   ;;  %s1806_s0 = inlined_call_operand.vmem [shape: bf16[128,576], index: 0, kind: input, shape index: {}]   ;;  %s1807_s2 = inlined_call_operand.vmem [shape: f32[1,64], index: 2, kind: input, shape index: {}]   ;;  %s1808_s3 = inlined_call_operand.vmem [shape: f32[1,64], index: 3, kind: input, shape index: {}]   ;;  %s1809_s4 = inlined_call_operand.vmem [shape: bf16[128,64], index: 4, kind: output, shape index: {}]  }
   0x1   :  { %v1307_v0 = vld [vmem:[%s1805_s1 + $0x40] sm:$0xff]   ;;  %v1311_v4 = vld [vmem:[%s1805_s1 + $0x48] sm:$0xff]   ;;  %v1315_v8 = vld [vmem:[%s1805_s1 + $0x50] sm:$0xff]  }
   0x2   :  { %v1308_v1 = vld [vmem:[%s1805_s1 + $0xc0] sm:$0xff]   ;;  %1135 = vmatprep.subr.bf16.mxu0 %v1307_v0  ;;  %v1312_v5 = vld [vmem:[%s1805_s1 + $0xc8] sm:$0xff]   ;;  %v1316_v9 = vld [vmem:[%s1805_s1 + $0xd0] sm:$0xff]  }
   0x3   :  { %v1309_v2 = vld [vmem:[%s1805_s1] sm:$0xff]   ;;  %1199 = vmatprep.subr.bf16.mxu1 %v1308_v1  ;;  %v1313_v6 = vld [vmem:[%s1805_s1 + $0x8] sm:$0xff]   ;;  %v1317_v10 = vld [vmem:[%s1805_s1 + $0x10] sm:$0xff]  }
   0x4   :  { %v1310_v3 = vld [vmem:[%s1805_s1 + $0x80] sm:$0xff]   ;;  %1136 = vmatpush3.bf16.msra.mxu0 %v1309_v2  ;;  %v1314_v7 = vld [vmem:[%s1805_s1 + $0x88] sm:$0xff]   ;;  %v1318_v11 = vld [vmem:[%s1805_s1 + $0x90] sm:$0xff]  }
   0x5   :  { %1200 = vmatpush3.bf16.msra.mxu1 %v1310_v3  ;;  %1137 = vmatprep.subr.bf16.mxu0 %v1311_v4  ;;  %v1319_v12 = vld [vmem:[%s1805_s1 + $0x58] sm:$0xff]   ;;  %v1323_v16 = vld [vmem:[%s1805_s1 + $0x60] sm:$0xff]   ;;  %v1327_v20 = vld [vmem:[%s1805_s1 + $0x68] sm:$0xff]  }
   0x6   :  { %1201 = vmatprep.subr.bf16.mxu1 %v1312_v5  ;;  %v1320_v13 = vld [vmem:[%s1805_s1 + $0xd8] sm:$0xff]   ;;  %v1324_v17 = vld [vmem:[%s1805_s1 + $0xe0] sm:$0xff]   ;;  %v1328_v21 = vld [vmem:[%s1805_s1 + $0xe8] sm:$0xff]  }
   0x7   :  { %v1321_v14 = vld [vmem:[%s1805_s1 + $0x18] sm:$0xff]   ;;  %v1325_v18 = vld [vmem:[%s1805_s1 + $0x20] sm:$0xff]   ;;  %v1329_v22 = vld [vmem:[%s1805_s1 + $0x28] sm:$0xff]  }
   0x8   :  { %1138 = vmatpush3.bf16.msra.mxu0 %v1313_v6  ;;  %v1322_v15 = vld [vmem:[%s1805_s1 + $0x98] sm:$0xff]   ;;  %v1326_v19 = vld [vmem:[%s1805_s1 + $0xa0] sm:$0xff]   ;;  %v1330_v23 = vld [vmem:[%s1805_s1 + $0xa8] sm:$0xff]  }
   0x9   :  { %1202 = vmatpush3.bf16.msra.mxu1 %v1314_v7  ;;  %1139 = vmatprep.subr.bf16.mxu0 %v1315_v8  ;;  %v1331_v24 = vld [vmem:[%s1805_s1 + $0x70] sm:$0xff]   ;;  %v1335_v28 = vld [vmem:[%s1805_s1 + $0x78] sm:$0xff]   ;;  %v1344_v35 = vld [vmem:[%s1806_s0 + $0xc] ss:$20 sps:$4 sm:$0xff]  }
   0xa   :  { %1203 = vmatprep.subr.bf16.mxu1 %v1316_v9  ;;  %v1332_v25 = vld [vmem:[%s1805_s1 + $0xf0] sm:$0xff]   ;;  %v1336_v29 = vld [vmem:[%s1805_s1 + $0xf8] sm:$0xff]   ;;  %v1345_v36 = vld [vmem:[%s1805_s1 + $0x100] sm:$0xff]   ;;  %708 = vmatprep.mubr.bf16.mxu1 %v1344_v35 }
   0xb   :  { %v1333_v26 = vld [vmem:[%s1805_s1 + $0x30] sm:$0xff]   ;;  %v1337_v30 = vld [vmem:[%s1805_s1 + $0x38] sm:$0xff]   ;;  %v1346_v37 = vld [vmem:[%s1806_s0 + $0x2c] ss:$20 sps:$4 sm:$0xff]  }
   0xc   :  { %1140 = vmatpush3.bf16.msra.mxu0 %v1317_v10  ;;  %v1334_v27 = vld [vmem:[%s1805_s1 + $0xb0] sm:$0xff]   ;;  %v1338_v31 = vld [vmem:[%s1805_s1 + $0xb8] sm:$0xff]   ;;  %v1358_v42 = vld [vmem:[%s1805_s1 + $0x108] sm:$0xff]  }
   0xd   :  { %1204 = vmatpush3.bf16.msra.mxu1 %v1318_v11  ;;  %1141 = vmatprep.subr.bf16.mxu0 %v1319_v12  ;;  %v1339_v32 = vld [vmem:[%s1806_s0] ss:$20 sps:$4 sm:$0xff]   ;;  %v1341_v33 = vld [vmem:[%s1806_s0 + $0x4] ss:$20 sps:$4 sm:$0xff]   ;;  %v1342_v34 = vld [vmem:[%s1806_s0 + $0x8] ss:$20 sps:$4 sm:$0xff]  }
   0xe   :  { %1205 = vmatprep.subr.bf16.mxu1 %v1320_v13  ;;  %611 = vmatprep.mubr.bf16.mxu0 %v1341_v33  ;;  %v1348_v38 = vld [vmem:[%s1806_s0 + $0x34] ss:$20 sps:$4 sm:$0xff]   ;;  %v1351_v40 = vld [vmem:[%s1806_s0 + $0x30] ss:$20 sps:$4 sm:$0xff]   ;;  %v1357_v45 = vld [vmem:[%s1806_s0 + $0x58] ss:$20 sps:$4 sm:$0xff]  }
   0xf   :  { %v1350_v39 = vld [vmem:[%s1806_s0 + $0x28] ss:$20 sps:$4 sm:$0xff]   ;;  %v1356_v44 = vld [vmem:[%s1806_s0 + $0x50] ss:$20 sps:$4 sm:$0xff]   ;;  %v1363_v50 = vld [vmem:[%s1806_s0 + $0x78] ss:$20 sps:$4 sm:$0xff]  }
  0x10   :  { %1142 = vmatpush3.bf16.msra.mxu0 %v1321_v14  ;;  %v1352_v41 = vld [vmem:[%s1806_s0 + $0x54] ss:$20 sps:$4 sm:$0xff]   ;;  %v1354_v43 = vld [vmem:[%s1806_s0 + $0x5c] ss:$20 sps:$4 sm:$0xff]   ;;  %v1361_v48 = vld [vmem:[%s1806_s0 + $0x84] ss:$20 sps:$4 sm:$0xff]  }
  0x11   :  { %1206 = vmatpush3.bf16.msra.mxu1 %v1322_v15  ;;  %1143 = vmatprep.subr.bf16.mxu0 %v1323_v16  ;;  %v1371_v46 = vld [vmem:[%s1805_s1 + $0x110] sm:$0xff]   ;;  %v1384_v49 = vld [vmem:[%s1805_s1 + $0x118] sm:$0xff]   ;;  %v1367_v53 = vld [vmem:[%s1806_s0 + $0xac] ss:$20 sps:$4 sm:$0xff]  }
  0x12   :  { %1207 = vmatprep.subr.bf16.mxu1 %v1324_v17  ;;  %v1359_v47 = vld [vmem:[%s1806_s0 + $0x7c] ss:$20 sps:$4 sm:$0xff]   ;;  %v1364_v51 = vld [vmem:[%s1806_s0 + $0x80] ss:$20 sps:$4 sm:$0xff]   ;;  %v1365_v52 = vld [vmem:[%s1806_s0 + $0xa4] ss:$20 sps:$4 sm:$0xff]  }
  0x13   :  { %v1369_v54 = vld [vmem:[%s1806_s0 + $0xa0] ss:$20 sps:$4 sm:$0xff]   ;;  %v1370_v55 = vld [vmem:[%s1806_s0 + $0xa8] ss:$20 sps:$4 sm:$0xff]   ;;  %v1377_v59 = vld [vmem:[%s1806_s0 + $0xd0] ss:$20 sps:$4 sm:$0xff]  }
  0x14   :  { %1144 = vmatpush3.bf16.msra.mxu0 %v1325_v18  ;;  %v1372_v56 = vld [vmem:[%s1806_s0 + $0xcc] ss:$20 sps:$4 sm:$0xff]   ;;  %v1374_v57 = vld [vmem:[%s1806_s0 + $0xd4] ss:$20 sps:$4 sm:$0xff]   ;;  %v1380_v61 = vld [vmem:[%s1806_s0 + $0xfc] ss:$20 sps:$4 sm:$0xff]  }
  0x15   :  { %1208 = vmatpush3.bf16.msra.mxu1 %v1326_v19  ;;  %1145 = vmatprep.subr.bf16.mxu0 %v1327_v20  ;;  %v1376_v58 = vld [vmem:[%s1806_s0 + $0xc8] ss:$20 sps:$4 sm:$0xff]   ;;  %v1382_v62 = vld [vmem:[%s1806_s0 + $0xf0] ss:$20 sps:$4 sm:$0xff]   ;;  %v1383_v63 = vld [vmem:[%s1806_s0 + $0xf8] ss:$20 sps:$4 sm:$0xff]  }
  0x16   :  { %1209 = vmatprep.subr.bf16.mxu1 %v1328_v21  ;;  %v1378_v60 = vld [vmem:[%s1806_s0 + $0xf4] ss:$20 sps:$4 sm:$0xff]   ;;  %v1385_v0 = vld [vmem:[%s1806_s0 + $0x11c] ss:$20 sps:$4 sm:$0xff]   ;;  %v1387_v1 = vld [vmem:[%s1806_s0 + $0x124] ss:$20 sps:$4 sm:$0xff]  }
  0x17   :  { %v1389_v2 = vld [vmem:[%s1806_s0 + $0x118] ss:$20 sps:$4 sm:$0xff]   ;;  %v1390_v3 = vld [vmem:[%s1806_s0 + $0x120] ss:$20 sps:$4 sm:$0xff]   ;;  %v1391_v4 = vld [vmem:[%s1806_s0 + $0x10] ss:$20 sps:$4 sm:$0xff]  }
  0x18   :  { %1146 = vmatpush3.bf16.msra.mxu0 %v1329_v22  ;;  %v1392_v5 = vld [vmem:[%s1806_s0 + $0xb0] ss:$20 sps:$4 sm:$0xff]   ;;  %v1393_v6 = vld [vmem:[%s1806_s0 + $0x38] ss:$20 sps:$4 sm:$0xff]   ;;  %v1395_v8 = vld [vmem:[%s1806_s0 + $0x60] ss:$20 sps:$4 sm:$0xff]  }
  0x19   :  { %1210 = vmatpush3.bf16.msra.mxu1 %v1330_v23  ;;  %1147 = vmatprep.subr.bf16.mxu0 %v1331_v24  ;;  %v1394_v7 = vld [vmem:[%s1806_s0 + $0xd8] ss:$20 sps:$4 sm:$0xff]   ;;  %v1396_v9 = vld [vmem:[%s1806_s0 + $0x100] ss:$20 sps:$4 sm:$0xff]   ;;  %v1397_v10 = vld [vmem:[%s1806_s0 + $0x88] ss:$20 sps:$4 sm:$0xff]  }
  0x1a   :  { %1211 = vmatprep.subr.bf16.mxu1 %v1332_v25  ;;  %v1398_v11 = vld [vmem:[%s1806_s0 + $0x128] ss:$20 sps:$4 sm:$0xff]  }
  0x1c   :  { %1148 = vmatpush3.bf16.msra.mxu0 %v1333_v26 }
  0x1d   :  { %1212 = vmatpush3.bf16.msra.mxu1 %v1334_v27  ;;  %1149 = vmatprep.subr.bf16.mxu0 %v1335_v28 }
  0x1e   :  { %1213 = vmatprep.subr.bf16.mxu1 %v1336_v29 }
  0x20   :  { %1150 = vmatpush3.bf16.msra.mxu0 %v1337_v30 }
  0x21   :  { %1214 = vmatpush3.bf16.msra.mxu1 %v1338_v31  ;;  %1275 = vmatprep.subr.bf16.mxu0 %v1345_v36 }
  0x22   :  { %1299 = vmatprep.subr.bf16.mxu1 %v1345_v36 }
  0x23   :  { %612 = vmatmul.mubr.bf16.vlgmr.msra.gmra.mrb[0].mxu0 %v1339_v32 }
  0x24   :  { %709 = vmatmul.mubr.bf16.vlgmr.msra.gmra.mrb[0].mxu1 %v1342_v34  ;;  %1276 = vmatpush3.bf16.msra.mxu0 %v1345_v36 }
  0x25   :  { %1303 = vmatpush3.bf16.msra.mxu1 %v1345_v36  ;;  %619 = vmatprep.mubr.bf16.mxu0 %v1346_v37 }
  0x26   :  { %716 = vmatprep.mubr.bf16.mxu1 %v1348_v38  ;;  %1277 = vmatprep.subr.bf16.mxu0 %v1358_v42 }
  0x27   :  { %1300 = vmatprep.subr.bf16.mxu1 %v1358_v42 }
  0x28   :  { %1278 = vmatpush3.bf16.msra.mxu0 %v1358_v42 }
  0x29   :  { %1304 = vmatpush3.bf16.msra.mxu1 %v1358_v42  ;;  %1279 = vmatprep.subr.bf16.mxu0 %v1371_v46 }
  0x2a   :  { %1301 = vmatprep.subr.bf16.mxu1 %v1371_v46 }
  0x2b   :  { %620 = vmatmul.mubr.bf16.gmra.mrb[4].mxu0 %v1350_v39 }
  0x2c   :  { %717 = vmatmul.mubr.bf16.gmra.mrb[4].mxu1 %v1351_v40  ;;  %627 = vmatprep.mubr.bf16.mxu0 %v1352_v41 }
  0x2d   :  { %724 = vmatprep.mubr.bf16.mxu1 %v1354_v43  ;;  %1280 = vmatpush3.bf16.msra.mxu0 %v1371_v46 }
  0x2e   :  { %1305 = vmatpush3.bf16.msra.mxu1 %v1371_v46  ;;  %1281 = vmatprep.subr.bf16.mxu0 %v1384_v49 }
  0x2f   :  { %1302 = vmatprep.subr.bf16.mxu1 %v1384_v49 }
  0x31   :  { %1282 = vmatpush3.bf16.msra.mxu0 %v1384_v49 }
  0x32   :  { %1306 = vmatpush3.bf16.msra.mxu1 %v1384_v49 }
  0x33   :  { %628 = vmatmul.mubr.bf16.gmra.mrb[8].mxu0 %v1356_v44 }
  0x34   :  { %725 = vmatmul.mubr.bf16.gmra.mrb[8].mxu1 %v1357_v45  ;;  %635 = vmatprep.mubr.bf16.mxu0 %v1359_v47 }
  0x35   :  { %732 = vmatprep.mubr.bf16.mxu1 %v1361_v48 }
  0x3b   :  { %636 = vmatmul.mubr.bf16.gmra.mrb[12].mxu0 %v1363_v50 }
  0x3c   :  { %733 = vmatmul.mubr.bf16.gmra.mrb[12].mxu1 %v1364_v51  ;;  %643 = vmatprep.mubr.bf16.mxu0 %v1365_v52 }
  0x3d   :  { %740 = vmatprep.mubr.bf16.mxu1 %v1367_v53 }
  0x43   :  { %644 = vmatmul.mubr.bf16.gmra.mrb[16].mxu0 %v1369_v54 }
  0x44   :  { %741 = vmatmul.mubr.bf16.gmra.mrb[16].mxu1 %v1370_v55  ;;  %651 = vmatprep.mubr.bf16.mxu0 %v1372_v56 }
  0x45   :  { %748 = vmatprep.mubr.bf16.mxu1 %v1374_v57 }
  0x4b   :  { %652 = vmatmul.mubr.bf16.gmra.mrb[20].mxu0 %v1376_v58 }
  0x4c   :  { %749 = vmatmul.mubr.bf16.gmra.mrb[20].mxu1 %v1377_v59  ;;  %659 = vmatprep.mubr.bf16.mxu0 %v1378_v60 }
  0x4d   :  { %756 = vmatprep.mubr.bf16.mxu1 %v1380_v61 }
  0x53   :  { %660 = vmatmul.mubr.bf16.gmra.mrb[24].mxu0 %v1382_v62 }
  0x54   :  { %757 = vmatmul.mubr.bf16.gmra.mrb[24].mxu1 %v1383_v63  ;;  %667 = vmatprep.mubr.bf16.mxu0 %v1385_v0 }
  0x55   :  { %764 = vmatprep.mubr.bf16.mxu1 %v1387_v1 }
  0x5b   :  { %668 = vmatmul.mubr.bf16.gmra.mrb[28].mxu0 %v1389_v2 }
  0x5c   :  { %765 = vmatmul.mubr.bf16.gmra.mrb[28].mxu1 %v1390_v3  ;;  %1283 = vmatprep.mubr.msk.bf16.mxu0 %vm554_vm0, %v1391_v4 }
  0x5d   :  { %1291 = vmatprep.mubr.msk.bf16.mxu1 %vm554_vm0, %v1392_v5 }
  0x63   :  { %1284 = vmatmul.mubr.msk.bf16.vlgmr.msra.gmra.mrb[32].mxu0 %vm554_vm0, %v1393_v6 }
  0x64   :  { %1292 = vmatmul.mubr.msk.bf16.vlgmr.msra.gmra.mrb[32].mxu1 %vm554_vm0, %v1394_v7  ;;  %1287 = vmatprep.mubr.msk.bf16.mxu0 %vm554_vm0, %v1395_v8 }
  0x65   :  { %1295 = vmatprep.mubr.msk.bf16.mxu1 %vm554_vm0, %v1396_v9 }
  0x6b   :  { %1288 = vmatmul.mubr.msk.bf16.gmra.mrb[36].mxu0 %vm554_vm0, %v1397_v10 }
  0x6c   :  { %1296 = vmatmul.mubr.msk.bf16.gmra.mrb[36].mxu1 %vm554_vm0, %v1398_v11 }
  0xf6   :  { %v1151_v12 = vpop.f32.mrb[0].mxu0 }
  0xf7   :  { %v1215_v13 = vpop.f32.mrb[0].mxu1  ;;  %v1152_v14 = vpop.f32.mrb[1].mxu0 }
  0xf8   :  { %v1153_v15 = vadd.f32 %v1152_v14, %v1151_v12  ;;  %v1216_v16 = vpop.f32.mrb[1].mxu1  ;;  %v1154_v17 = vpop.f32.mrb[2].mxu0 }
  0xf9   :  { %v1217_v18 = vadd.f32 %v1216_v16, %v1215_v13  ;;  %v1218_v19 = vpop.f32.mrb[2].mxu1  ;;  %v1155_v20 = vpop.f32.mrb[3].mxu0 }
  0xfa   :  { %v1156_v21 = vadd.f32 %v1155_v20, %v1154_v17  ;;  %v1219_v22 = vpop.f32.mrb[3].mxu1 }
  0xfb   :  { %v1220_v23 = vadd.f32 %v1219_v22, %v1218_v19  ;;  %v1660_v24 = vadd.f32 %v1217_v18, %v1153_v15 }
  0xfd   :  { %v1662_v25 = vadd.f32 %v1220_v23, %v1156_v21 }
  0xfe   :  { %v1157_v26 = vpop.f32.mrb[4].mxu0 }
  0xff   :  { %v1221_v27 = vpop.f32.mrb[4].mxu1  ;;  %v1158_v28 = vpop.f32.mrb[5].mxu0 }
 0x100   :  { %v1159_v29 = vadd.f32 %v1158_v28, %v1157_v26  ;;  %v1222_v30 = vpop.f32.mrb[5].mxu1  ;;  %v1160_v31 = vpop.f32.mrb[6].mxu0 }
 0x101   :  { %v1223_v32 = vadd.f32 %v1222_v30, %v1221_v27  ;;  %v1224_v33 = vpop.f32.mrb[6].mxu1  ;;  %v1161_v34 = vpop.f32.mrb[7].mxu0 }
 0x102   :  { %v1162_v35 = vadd.f32 %v1161_v34, %v1160_v31  ;;  %v1225_v36 = vpop.f32.mrb[7].mxu1 }
 0x103   :  { %v1226_v37 = vadd.f32 %v1225_v36, %v1224_v33  ;;  %v1664_v38 = vadd.f32 %v1223_v32, %v1159_v29 }
 0x105   :  { %v1666_v39 = vadd.f32 %v1226_v37, %v1162_v35 }
 0x106   :  { %v1163_v40 = vpop.f32.mrb[8].mxu0 }
 0x107   :  { %v1227_v41 = vpop.f32.mrb[8].mxu1  ;;  %v1164_v42 = vpop.f32.mrb[9].mxu0 }
 0x108   :  { %v1165_v43 = vadd.f32 %v1164_v42, %v1163_v40  ;;  %v1228_v44 = vpop.f32.mrb[9].mxu1  ;;  %v1166_v45 = vpop.f32.mrb[10].mxu0 }
 0x109   :  { %v1229_v46 = vadd.f32 %v1228_v44, %v1227_v41  ;;  %v1230_v47 = vpop.f32.mrb[10].mxu1  ;;  %v1167_v48 = vpop.f32.mrb[11].mxu0 }
 0x10a   :  { %v1168_v49 = vadd.f32 %v1167_v48, %v1166_v45  ;;  %v1231_v50 = vpop.f32.mrb[11].mxu1 }
 0x10b   :  { %v1232_v51 = vadd.f32 %v1231_v50, %v1230_v47  ;;  %v1668_v52 = vadd.f32 %v1229_v46, %v1165_v43 }
 0x10d   :  { %v1670_v53 = vadd.f32 %v1232_v51, %v1168_v49 }
 0x10e   :  { %v1169_v54 = vpop.f32.mrb[12].mxu0 }
 0x10f   :  { %v1233_v55 = vpop.f32.mrb[12].mxu1  ;;  %v1170_v56 = vpop.f32.mrb[13].mxu0 }
 0x110   :  { %v1171_v57 = vadd.f32 %v1170_v56, %v1169_v54  ;;  %v1234_v58 = vpop.f32.mrb[13].mxu1  ;;  %v1172_v59 = vpop.f32.mrb[14].mxu0 }
 0x111   :  { %v1235_v60 = vadd.f32 %v1234_v58, %v1233_v55  ;;  %v1236_v61 = vpop.f32.mrb[14].mxu1  ;;  %v1173_v62 = vpop.f32.mrb[15].mxu0 }
 0x112   :  { %v1174_v63 = vadd.f32 %v1173_v62, %v1172_v59  ;;  %v1237_v0 = vpop.f32.mrb[15].mxu1 }
 0x113   :  { %v1238_v1 = vadd.f32 %v1237_v0, %v1236_v61  ;;  %v1672_v2 = vadd.f32 %v1235_v60, %v1171_v57 }
 0x115   :  { %v1674_v3 = vadd.f32 %v1238_v1, %v1174_v63 }
 0x116   :  { %v1175_v4 = vpop.f32.mrb[16].mxu0 }
 0x117   :  { %v1239_v5 = vpop.f32.mrb[16].mxu1  ;;  %v1176_v6 = vpop.f32.mrb[17].mxu0 }
 0x118   :  { %v1177_v7 = vadd.f32 %v1176_v6, %v1175_v4  ;;  %v1240_v8 = vpop.f32.mrb[17].mxu1  ;;  %v1178_v9 = vpop.f32.mrb[18].mxu0 }
 0x119   :  { %v1241_v10 = vadd.f32 %v1240_v8, %v1239_v5  ;;  %v1242_v11 = vpop.f32.mrb[18].mxu1  ;;  %v1179_v12 = vpop.f32.mrb[19].mxu0  ;;  %v1689_v5 = vld [vmem:[%s1807_s2] ss:$0 sm:$0xff] }
 0x11a   :  { %v1180_v13 = vadd.f32 %v1179_v12, %v1178_v9  ;;  %v1243_v14 = vpop.f32.mrb[19].mxu1  ;;  %v1695_v9 = vld [vmem:[%s1808_s3] ss:$0 sm:$0xff] }
 0x11b   :  { %v1244_v15 = vadd.f32 %v1243_v14, %v1242_v11  ;;  %v743_v16 = vadd.f32 %v1241_v10, %v1177_v7 }
 0x11d   :  { %v1676_v17 = vadd.f32 %v1244_v15, %v1180_v13 }
 0x11e   :  { %v1181_v18 = vpop.f32.mrb[20].mxu0 }
 0x11f   :  { %v1245_v19 = vpop.f32.mrb[20].mxu1  ;;  %v1182_v20 = vpop.f32.mrb[21].mxu0 }
 0x120   :  { %v1183_v21 = vadd.f32 %v1182_v20, %v1181_v18  ;;  %v1246_v22 = vpop.f32.mrb[21].mxu1  ;;  %v1184_v23 = vpop.f32.mrb[22].mxu0 }
 0x121   :  { %v1247_v26 = vadd.f32 %v1246_v22, %v1245_v19  ;;  %v1248_v27 = vpop.f32.mrb[22].mxu1  ;;  %v1185_v28 = vpop.f32.mrb[23].mxu0 }
 0x122   :  { %v1186_v29 = vadd.f32 %v1185_v28, %v1184_v23  ;;  %v1249_v30 = vpop.f32.mrb[23].mxu1 }
 0x123   :  { %v1250_v31 = vadd.f32 %v1249_v30, %v1248_v27  ;;  %v751_v32 = vadd.f32 %v1247_v26, %v1183_v21 }
 0x125   :  { %v754_v33 = vadd.f32 %v1250_v31, %v1186_v29 }
 0x126   :  { %v1187_v34 = vpop.f32.mrb[24].mxu0 }
 0x127   :  { %v1251_v35 = vpop.f32.mrb[24].mxu1  ;;  %v1188_v36 = vpop.f32.mrb[25].mxu0 }
 0x128   :  { %v1189_v37 = vadd.f32 %v1188_v36, %v1187_v34  ;;  %v1252_v40 = vpop.f32.mrb[25].mxu1  ;;  %v1190_v41 = vpop.f32.mrb[26].mxu0 }
 0x129   :  { %v1253_v42 = vadd.f32 %v1252_v40, %v1251_v35  ;;  %v1254_v43 = vpop.f32.mrb[26].mxu1  ;;  %v1191_v44 = vpop.f32.mrb[27].mxu0 }
 0x12a   :  { %v1192_v45 = vadd.f32 %v1191_v44, %v1190_v41  ;;  %v1255_v46 = vpop.f32.mrb[27].mxu1 }
 0x12b   :  { %v1256_v47 = vadd.f32 %v1255_v46, %v1254_v43  ;;  %v1678_v48 = vadd.f32 %v1253_v42, %v1189_v37 }
 0x12d   :  { %v1680_v49 = vadd.f32 %v1256_v47, %v1192_v45 }
 0x12e   :  { %v1193_v50 = vpop.f32.mrb[28].mxu0 }
 0x12f   :  { %v1257_v51 = vpop.f32.mrb[28].mxu1  ;;  %v1194_v54 = vpop.f32.mrb[29].mxu0 }
 0x130   :  { %v1195_v55 = vadd.f32 %v1194_v54, %v1193_v50  ;;  %v1258_v56 = vpop.f32.mrb[29].mxu1  ;;  %v1196_v57 = vpop.f32.mrb[30].mxu0 }
 0x131   :  { %v1259_v58 = vadd.f32 %v1258_v56, %v1257_v51  ;;  %v1260_v59 = vpop.f32.mrb[30].mxu1  ;;  %v1197_v60 = vpop.f32.mrb[31].mxu0 }
 0x132   :  { %v1198_v61 = vadd.f32 %v1197_v60, %v1196_v57  ;;  %v1261_v62 = vpop.f32.mrb[31].mxu1 }
 0x133   :  { %v1262_v63 = vadd.f32 %v1261_v62, %v1260_v59  ;;  %v1682_v0 = vadd.f32 %v1259_v58, %v1195_v55 }
 0x135   :  { %v1684_v1 = vadd.f32 %v1262_v63, %v1198_v61 }
 0x136   :  { %v1285_v4 = vpop.f32.mrb[32].mxu0 }
 0x137   :  { %v816_v6 = vadd.f32 %v1285_v4, %v1664_v38  ;;  %v1293_v7 = vpop.f32.mrb[32].mxu1  ;;  %v807_v8 = vpop.f32.mrb[33].mxu0 }
 0x138   :  { %v848_v10 = vadd.f32 %v1293_v7, %v751_v32  ;;  %v808_v11 = vadd.f32 %v807_v8, %v1660_v24  ;;  %v839_v12 = vpop.f32.mrb[33].mxu1  ;;  %v1286_v13 = vpop.f32.mrb[34].mxu0 }
 0x139   :  { %v879_v14 = vmul.f32 %v1689_v5, %v816_v6  ;;  %v840_v15 = vadd.f32 %v839_v12, %v743_v16  ;;  %v819_v18 = vadd.f32 %v1286_v13, %v1666_v39  ;;  %v1294_v19 = vpop.f32.mrb[34].mxu1  ;;  %v810_v38 = vpop.f32.mrb[35].mxu0 }
 0x13a   :  { %v887_v20 = vmul.f32 %v1689_v5, %v848_v10  ;;  %v877_v21 = vmul.f32 %v1689_v5, %v808_v11  ;;  %v851_v22 = vadd.f32 %v1294_v19, %v754_v33  ;;  %v811_v23 = vadd.f32 %v810_v38, %v1662_v25  ;;  %v842_v26 = vpop.f32.mrb[35].mxu1 }
 0x13b   :  { %v902_v24 = vadd.f32 %v1695_v9, %v879_v14  ;;  %v885_v27 = vmul.f32 %v1689_v5, %v840_v15  ;;  %v880_v28 = vmul.f32 %v1689_v5, %v819_v18  ;;  %v843_v16 = vadd.f32 %v842_v26, %v1676_v17 }
 0x13c   :  { %v910_v39 = vadd.f32 %v1695_v9, %v887_v20  ;;  %v900_v29 = vadd.f32 %v1695_v9, %v877_v21  ;;  %v888_v30 = vmul.f32 %v1689_v5, %v851_v22  ;;  %v878_v31 = vmul.f32 %v1689_v5, %v811_v23 }
 0x13d   :  { %v918_v32 = vmax.f32 %v902_v24, 0.0  ;;  %v908_v25 = vadd.f32 %v1695_v9, %v885_v27  ;;  %v903_v33 = vadd.f32 %v1695_v9, %v880_v28  ;;  %v886_v34 = vmul.f32 %v1689_v5, %v843_v16 }
 0x13e   :  { %v926_v35 = vmax.f32 %v910_v39, 0.0  ;;  %v916_v36 = vmax.f32 %v900_v29, 0.0  ;;  %v911_v37 = vadd.f32 %v1695_v9, %v888_v30  ;;  %v901_v17 = vadd.f32 %v1695_v9, %v878_v31  ;;  %v1289_v40 = vpop.f32.mrb[36].mxu0 }
 0x13f   :  { %v1121_v41 = vpack.c.bf16 %v918_v32, %v918_v32  ;;  %v924_v42 = vmax.f32 %v908_v25, 0.0  ;;  %v919_v43 = vmax.f32 %v903_v33, 0.0  ;;  %v909_v44 = vadd.f32 %v1695_v9, %v886_v34  ;;  %v1297_v45 = vpop.f32.mrb[36].mxu1  ;;  %v823_v46 = vpop.f32.mrb[37].mxu0 }
 0x140   :  { %v1129_v47 = vpack.c.bf16 %v926_v35, %v926_v35  ;;  %v1119_v50 = vpack.c.bf16 %v916_v36, %v916_v36  ;;  %v927_v51 = vmax.f32 %v911_v37, 0.0  ;;  %v917_v54 = vmax.f32 %v901_v17, 0.0  ;;  %v855_v55 = vpop.f32.mrb[37].mxu1  ;;  %v1290_v56 = vpop.f32.mrb[38].mxu0 }
 0x141   :  { %999 = vst.msk [vmem:[%s1809_s4 + $0x8] sm:$0xf] %vm996_vm1, %v1121_v41  ;;  %v1127_v57 = vpack.c.bf16 %v924_v42, %v924_v42  ;;  %v1122_v58 = vpack.c.bf16 %v919_v43, %v919_v43  ;;  %v925_v59 = vmax.f32 %v909_v44, 0.0  ;;  %v832_v60 = vadd.f32 %v1289_v40, %v1672_v2  ;;  %v1298_v61 = vpop.f32.mrb[38].mxu1  ;;  %v826_v62 = vpop.f32.mrb[39].mxu0 }
 0x142   :  { %1007 = vst.msk [vmem:[%s1809_s4 + $0x28] sm:$0xf] %vm996_vm1, %v1129_v47  ;;  %997 = vst.msk [vmem:[%s1809_s4] sm:$0xf] %vm996_vm1, %v1119_v50  ;;  %v1130_v63 = vpack.c.bf16 %v927_v51, %v927_v51  ;;  %v1120_v4 = vpack.c.bf16 %v917_v54, %v917_v54  ;;  %v864_v6 = vadd.f32 %v1297_v45, %v1682_v0  ;;  %v858_v8 = vpop.f32.mrb[39].mxu1 }
 0x143   :  { %v824_v7 = vadd.f32 %v823_v46, %v1668_v52  ;;  %1005 = vst.msk [vmem:[%s1809_s4 + $0x20] sm:$0xf] %vm996_vm1, %v1127_v57  ;;  %1000 = vst.msk [vmem:[%s1809_s4 + $0xc] sm:$0xf] %vm996_vm1, %v1122_v58  ;;  %v1128_v2 = vpack.c.bf16 %v925_v59, %v925_v59  ;;  %v883_v10 = vmul.f32 %v1689_v5, %v832_v60 }
 0x144   :  { %v856_v11 = vadd.f32 %v855_v55, %v1678_v48  ;;  %v835_v0 = vadd.f32 %v1290_v56, %v1674_v3  ;;  %1008 = vst.msk [vmem:[%s1809_s4 + $0x2c] sm:$0xf] %vm996_vm1, %v1130_v63  ;;  %998 = vst.msk [vmem:[%s1809_s4 + $0x4] sm:$0xf] %vm996_vm1, %v1120_v4  ;;  %v891_v52 = vmul.f32 %v1689_v5, %v864_v6 }
 0x145   :  { %v881_v12 = vmul.f32 %v1689_v5, %v824_v7  ;;  %v867_v13 = vadd.f32 %v1298_v61, %v1684_v1  ;;  %v827_v48 = vadd.f32 %v826_v62, %v1670_v53  ;;  %1006 = vst.msk [vmem:[%s1809_s4 + $0x24] sm:$0xf] %vm996_vm1, %v1128_v2  ;;  %v906_v3 = vadd.f32 %v1695_v9, %v883_v10 }
 0x146   :  { %v889_v14 = vmul.f32 %v1689_v5, %v856_v11  ;;  %v884_v15 = vmul.f32 %v1689_v5, %v835_v0  ;;  %v859_v18 = vadd.f32 %v858_v8, %v1680_v49  ;;  %v914_v19 = vadd.f32 %v1695_v9, %v891_v52 }
 0x147   :  { %v904_v38 = vadd.f32 %v1695_v9, %v881_v12  ;;  %v892_v1 = vmul.f32 %v1689_v5, %v867_v13  ;;  %v882_v53 = vmul.f32 %v1689_v5, %v827_v48  ;;  %v922_v20 = vmax.f32 %v906_v3, 0.0 }
 0x148   :  { %v912_v21 = vadd.f32 %v1695_v9, %v889_v14  ;;  %v907_v22 = vadd.f32 %v1695_v9, %v884_v15  ;;  %v890_v23 = vmul.f32 %v1689_v5, %v859_v18  ;;  %v930_v26 = vmax.f32 %v914_v19, 0.0 }
 0x149   :  { %v920_v24 = vmax.f32 %v904_v38, 0.0  ;;  %v915_v27 = vadd.f32 %v1695_v9, %v892_v1  ;;  %v905_v49 = vadd.f32 %v1695_v9, %v882_v53  ;;  %v1125_v28 = vpack.c.bf16 %v922_v20, %v922_v20 }
 0x14a   :  { %v928_v16 = vmax.f32 %v912_v21, 0.0  ;;  %v923_v39 = vmax.f32 %v907_v22, 0.0  ;;  %v913_v29 = vadd.f32 %v1695_v9, %v890_v23  ;;  %v1133_v30 = vpack.c.bf16 %v930_v26, %v930_v26 }
 0x14b   :  { %v1123_v31 = vpack.c.bf16 %v920_v24, %v920_v24  ;;  %v931_v32 = vmax.f32 %v915_v27, 0.0  ;;  %v921_v25 = vmax.f32 %v905_v49, 0.0  ;;  %1003 = vst.msk [vmem:[%s1809_s4 + $0x18] sm:$0xf] %vm996_vm1, %v1125_v28 }
 0x14c   :  { %v1131_v5 = vpack.c.bf16 %v928_v16, %v928_v16  ;;  %v1126_v33 = vpack.c.bf16 %v923_v39, %v923_v39  ;;  %v929_v34 = vmax.f32 %v913_v29, 0.0  ;;  %1011 = vst.msk [vmem:[%s1809_s4 + $0x38] sm:$0xf] %vm996_vm1, %v1133_v30 }
 0x14d   :  { %1001 = vst.msk [vmem:[%s1809_s4 + $0x10] sm:$0xf] %vm996_vm1, %v1123_v31  ;;  %v1134_v9 = vpack.c.bf16 %v931_v32, %v931_v32  ;;  %v1124_v35 = vpack.c.bf16 %v921_v25, %v921_v25 }
 0x14e   :  { %1009 = vst.msk [vmem:[%s1809_s4 + $0x30] sm:$0xf] %vm996_vm1, %v1131_v5  ;;  %1004 = vst.msk [vmem:[%s1809_s4 + $0x1c] sm:$0xf] %vm996_vm1, %v1126_v33  ;;  %v1132_v36 = vpack.c.bf16 %v929_v34, %v929_v34 }
 0x14f   :  { %1012 = vst.msk [vmem:[%s1809_s4 + $0x3c] sm:$0xf] %vm996_vm1, %v1134_v9  ;;  %1002 = vst.msk [vmem:[%s1809_s4 + $0x14] sm:$0xf] %vm996_vm1, %v1124_v35 }
 0x150   :  { %1010 = vst.msk [vmem:[%s1809_s4 + $0x34] sm:$0xf] %vm996_vm1, %v1132_v36 }

// kernel: resnet_forward.12
= control target key start
LH: loop header
LB: loop body
LE: loop exit
PB: predicated region body
PF: predicated region fallthrough
CT: control target
= control target key end

     0   :  { %vm557_vm0 = vcmask 523264   ;;  %vm1047_vm1 = vcmask 519168   ;;  %s1978_s1 = inlined_call_operand.vmem [shape: bf16[576,64], index: 1, kind: input, shape index: {}]   ;;  %s1979_s0 = inlined_call_operand.vmem [shape: bf16[128,576], index: 0, kind: input, shape index: {}]   ;;  %s1980_s4 = inlined_call_operand.vmem [shape: bf16[128,64], index: 4, kind: input, shape index: {}]   ;;  %s1981_s2 = inlined_call_operand.vmem [shape: f32[1,64], index: 2, kind: input, shape index: {}]   ;;  %s1982_s3 = inlined_call_operand.vmem [shape: f32[1,64], index: 3, kind: input, shape index: {}]   ;;  %s1983_s5 = inlined_call_operand.vmem [shape: bf16[128,64], index: 5, kind: output, shape index: {}]  }
   0x1   :  { %v1397_v0 = vld [vmem:[%s1978_s1 + $0x40] sm:$0xff]   ;;  %v1401_v4 = vld [vmem:[%s1978_s1 + $0x48] sm:$0xff]   ;;  %v1405_v8 = vld [vmem:[%s1978_s1 + $0x50] sm:$0xff]  }
   0x2   :  { %v1398_v1 = vld [vmem:[%s1978_s1 + $0xc0] sm:$0xff]   ;;  %1225 = vmatprep.subr.bf16.mxu0 %v1397_v0  ;;  %v1402_v5 = vld [vmem:[%s1978_s1 + $0xc8] sm:$0xff]   ;;  %v1406_v9 = vld [vmem:[%s1978_s1 + $0xd0] sm:$0xff]  }
   0x3   :  { %v1399_v2 = vld [vmem:[%s1978_s1] sm:$0xff]   ;;  %1289 = vmatprep.subr.bf16.mxu1 %v1398_v1  ;;  %v1403_v6 = vld [vmem:[%s1978_s1 + $0x8] sm:$0xff]   ;;  %v1407_v10 = vld [vmem:[%s1978_s1 + $0x10] sm:$0xff]  }
   0x4   :  { %v1400_v3 = vld [vmem:[%s1978_s1 + $0x80] sm:$0xff]   ;;  %1226 = vmatpush3.bf16.msra.mxu0 %v1399_v2  ;;  %v1404_v7 = vld [vmem:[%s1978_s1 + $0x88] sm:$0xff]   ;;  %v1408_v11 = vld [vmem:[%s1978_s1 + $0x90] sm:$0xff]  }
   0x5   :  { %1290 = vmatpush3.bf16.msra.mxu1 %v1400_v3  ;;  %1227 = vmatprep.subr.bf16.mxu0 %v1401_v4  ;;  %v1409_v12 = vld [vmem:[%s1978_s1 + $0x58] sm:$0xff]   ;;  %v1413_v16 = vld [vmem:[%s1978_s1 + $0x60] sm:$0xff]   ;;  %v1417_v20 = vld [vmem:[%s1978_s1 + $0x68] sm:$0xff]  }
   0x6   :  { %1291 = vmatprep.subr.bf16.mxu1 %v1402_v5  ;;  %v1410_v13 = vld [vmem:[%s1978_s1 + $0xd8] sm:$0xff]   ;;  %v1414_v17 = vld [vmem:[%s1978_s1 + $0xe0] sm:$0xff]   ;;  %v1418_v21 = vld [vmem:[%s1978_s1 + $0xe8] sm:$0xff]  }
   0x7   :  { %v1411_v14 = vld [vmem:[%s1978_s1 + $0x18] sm:$0xff]   ;;  %v1415_v18 = vld [vmem:[%s1978_s1 + $0x20] sm:$0xff]   ;;  %v1419_v22 = vld [vmem:[%s1978_s1 + $0x28] sm:$0xff]  }
   0x8   :  { %1228 = vmatpush3.bf16.msra.mxu0 %v1403_v6  ;;  %v1412_v15 = vld [vmem:[%s1978_s1 + $0x98] sm:$0xff]   ;;  %v1416_v19 = vld [vmem:[%s1978_s1 + $0xa0] sm:$0xff]   ;;  %v1420_v23 = vld [vmem:[%s1978_s1 + $0xa8] sm:$0xff]  }
   0x9   :  { %1292 = vmatpush3.bf16.msra.mxu1 %v1404_v7  ;;  %1229 = vmatprep.subr.bf16.mxu0 %v1405_v8  ;;  %v1421_v24 = vld [vmem:[%s1978_s1 + $0x70] sm:$0xff]   ;;  %v1425_v28 = vld [vmem:[%s1978_s1 + $0x78] sm:$0xff]   ;;  %v1434_v35 = vld [vmem:[%s1979_s0 + $0xc] ss:$20 sps:$4 sm:$0xff]  }
   0xa   :  { %1293 = vmatprep.subr.bf16.mxu1 %v1406_v9  ;;  %v1422_v25 = vld [vmem:[%s1978_s1 + $0xf0] sm:$0xff]   ;;  %v1426_v29 = vld [vmem:[%s1978_s1 + $0xf8] sm:$0xff]   ;;  %v1435_v36 = vld [vmem:[%s1978_s1 + $0x100] sm:$0xff]   ;;  %711 = vmatprep.mubr.bf16.mxu1 %v1434_v35 }
   0xb   :  { %v1423_v26 = vld [vmem:[%s1978_s1 + $0x30] sm:$0xff]   ;;  %v1427_v30 = vld [vmem:[%s1978_s1 + $0x38] sm:$0xff]   ;;  %v1436_v37 = vld [vmem:[%s1979_s0 + $0x2c] ss:$20 sps:$4 sm:$0xff]  }
   0xc   :  { %1230 = vmatpush3.bf16.msra.mxu0 %v1407_v10  ;;  %v1424_v27 = vld [vmem:[%s1978_s1 + $0xb0] sm:$0xff]   ;;  %v1428_v31 = vld [vmem:[%s1978_s1 + $0xb8] sm:$0xff]   ;;  %v1448_v42 = vld [vmem:[%s1978_s1 + $0x108] sm:$0xff]  }
   0xd   :  { %1294 = vmatpush3.bf16.msra.mxu1 %v1408_v11  ;;  %1231 = vmatprep.subr.bf16.mxu0 %v1409_v12  ;;  %v1429_v32 = vld [vmem:[%s1979_s0] ss:$20 sps:$4 sm:$0xff]   ;;  %v1431_v33 = vld [vmem:[%s1979_s0 + $0x4] ss:$20 sps:$4 sm:$0xff]   ;;  %v1432_v34 = vld [vmem:[%s1979_s0 + $0x8] ss:$20 sps:$4 sm:$0xff]  }
   0xe   :  { %1295 = vmatprep.subr.bf16.mxu1 %v1410_v13  ;;  %614 = vmatprep.mubr.bf16.mxu0 %v1431_v33  ;;  %v1438_v38 = vld [vmem:[%s1979_s0 + $0x34] ss:$20 sps:$4 sm:$0xff]   ;;  %v1441_v40 = vld [vmem:[%s1979_s0 + $0x30] ss:$20 sps:$4 sm:$0xff]   ;;  %v1447_v45 = vld [vmem:[%s1979_s0 + $0x58] ss:$20 sps:$4 sm:$0xff]  }
   0xf   :  { %v1440_v39 = vld [vmem:[%s1979_s0 + $0x28] ss:$20 sps:$4 sm:$0xff]   ;;  %v1446_v44 = vld [vmem:[%s1979_s0 + $0x50] ss:$20 sps:$4 sm:$0xff]   ;;  %v1453_v50 = vld [vmem:[%s1979_s0 + $0x78] ss:$20 sps:$4 sm:$0xff]  }
  0x10   :  { %1232 = vmatpush3.bf16.msra.mxu0 %v1411_v14  ;;  %v1442_v41 = vld [vmem:[%s1979_s0 + $0x54] ss:$20 sps:$4 sm:$0xff]   ;;  %v1444_v43 = vld [vmem:[%s1979_s0 + $0x5c] ss:$20 sps:$4 sm:$0xff]   ;;  %v1451_v48 = vld [vmem:[%s1979_s0 + $0x84] ss:$20 sps:$4 sm:$0xff]  }
  0x11   :  { %1296 = vmatpush3.bf16.msra.mxu1 %v1412_v15  ;;  %1233 = vmatprep.subr.bf16.mxu0 %v1413_v16  ;;  %v1461_v46 = vld [vmem:[%s1978_s1 + $0x110] sm:$0xff]   ;;  %v1474_v49 = vld [vmem:[%s1978_s1 + $0x118] sm:$0xff]   ;;  %v1457_v53 = vld [vmem:[%s1979_s0 + $0xac] ss:$20 sps:$4 sm:$0xff]  }
  0x12   :  { %1297 = vmatprep.subr.bf16.mxu1 %v1414_v17  ;;  %v1449_v47 = vld [vmem:[%s1979_s0 + $0x7c] ss:$20 sps:$4 sm:$0xff]   ;;  %v1454_v51 = vld [vmem:[%s1979_s0 + $0x80] ss:$20 sps:$4 sm:$0xff]   ;;  %v1455_v52 = vld [vmem:[%s1979_s0 + $0xa4] ss:$20 sps:$4 sm:$0xff]  }
  0x13   :  { %v1459_v54 = vld [vmem:[%s1979_s0 + $0xa0] ss:$20 sps:$4 sm:$0xff]   ;;  %v1460_v55 = vld [vmem:[%s1979_s0 + $0xa8] ss:$20 sps:$4 sm:$0xff]   ;;  %v1467_v59 = vld [vmem:[%s1979_s0 + $0xd0] ss:$20 sps:$4 sm:$0xff]  }
  0x14   :  { %1234 = vmatpush3.bf16.msra.mxu0 %v1415_v18  ;;  %v1462_v56 = vld [vmem:[%s1979_s0 + $0xcc] ss:$20 sps:$4 sm:$0xff]   ;;  %v1464_v57 = vld [vmem:[%s1979_s0 + $0xd4] ss:$20 sps:$4 sm:$0xff]   ;;  %v1470_v61 = vld [vmem:[%s1979_s0 + $0xfc] ss:$20 sps:$4 sm:$0xff]  }
  0x15   :  { %1298 = vmatpush3.bf16.msra.mxu1 %v1416_v19  ;;  %1235 = vmatprep.subr.bf16.mxu0 %v1417_v20  ;;  %v1466_v58 = vld [vmem:[%s1979_s0 + $0xc8] ss:$20 sps:$4 sm:$0xff]   ;;  %v1472_v62 = vld [vmem:[%s1979_s0 + $0xf0] ss:$20 sps:$4 sm:$0xff]   ;;  %v1473_v63 = vld [vmem:[%s1979_s0 + $0xf8] ss:$20 sps:$4 sm:$0xff]  }
  0x16   :  { %1299 = vmatprep.subr.bf16.mxu1 %v1418_v21  ;;  %v1468_v60 = vld [vmem:[%s1979_s0 + $0xf4] ss:$20 sps:$4 sm:$0xff]   ;;  %v1475_v0 = vld [vmem:[%s1979_s0 + $0x11c] ss:$20 sps:$4 sm:$0xff]   ;;  %v1477_v1 = vld [vmem:[%s1979_s0 + $0x124] ss:$20 sps:$4 sm:$0xff]  }
  0x17   :  { %v1479_v2 = vld [vmem:[%s1979_s0 + $0x118] ss:$20 sps:$4 sm:$0xff]   ;;  %v1480_v3 = vld [vmem:[%s1979_s0 + $0x120] ss:$20 sps:$4 sm:$0xff]   ;;  %v1481_v4 = vld [vmem:[%s1979_s0 + $0x10] ss:$20 sps:$4 sm:$0xff]  }
  0x18   :  { %1236 = vmatpush3.bf16.msra.mxu0 %v1419_v22  ;;  %v1482_v5 = vld [vmem:[%s1979_s0 + $0xb0] ss:$20 sps:$4 sm:$0xff]   ;;  %v1483_v6 = vld [vmem:[%s1979_s0 + $0x38] ss:$20 sps:$4 sm:$0xff]   ;;  %v1485_v8 = vld [vmem:[%s1979_s0 + $0x60] ss:$20 sps:$4 sm:$0xff]  }
  0x19   :  { %1300 = vmatpush3.bf16.msra.mxu1 %v1420_v23  ;;  %1237 = vmatprep.subr.bf16.mxu0 %v1421_v24  ;;  %v1484_v7 = vld [vmem:[%s1979_s0 + $0xd8] ss:$20 sps:$4 sm:$0xff]   ;;  %v1486_v9 = vld [vmem:[%s1979_s0 + $0x100] ss:$20 sps:$4 sm:$0xff]   ;;  %v1487_v10 = vld [vmem:[%s1979_s0 + $0x88] ss:$20 sps:$4 sm:$0xff]  }
  0x1a   :  { %1301 = vmatprep.subr.bf16.mxu1 %v1422_v25  ;;  %v1488_v11 = vld [vmem:[%s1979_s0 + $0x128] ss:$20 sps:$4 sm:$0xff]  }
  0x1c   :  { %1238 = vmatpush3.bf16.msra.mxu0 %v1423_v26 }
  0x1d   :  { %1302 = vmatpush3.bf16.msra.mxu1 %v1424_v27  ;;  %1239 = vmatprep.subr.bf16.mxu0 %v1425_v28 }
  0x1e   :  { %1303 = vmatprep.subr.bf16.mxu1 %v1426_v29 }
  0x20   :  { %1240 = vmatpush3.bf16.msra.mxu0 %v1427_v30 }
  0x21   :  { %1304 = vmatpush3.bf16.msra.mxu1 %v1428_v31  ;;  %1365 = vmatprep.subr.bf16.mxu0 %v1435_v36 }
  0x22   :  { %1389 = vmatprep.subr.bf16.mxu1 %v1435_v36 }
  0x23   :  { %615 = vmatmul.mubr.bf16.vlgmr.msra.gmra.mrb[0].mxu0 %v1429_v32 }
  0x24   :  { %712 = vmatmul.mubr.bf16.vlgmr.msra.gmra.mrb[0].mxu1 %v1432_v34  ;;  %1366 = vmatpush3.bf16.msra.mxu0 %v1435_v36 }
  0x25   :  { %1393 = vmatpush3.bf16.msra.mxu1 %v1435_v36  ;;  %622 = vmatprep.mubr.bf16.mxu0 %v1436_v37 }
  0x26   :  { %719 = vmatprep.mubr.bf16.mxu1 %v1438_v38  ;;  %1367 = vmatprep.subr.bf16.mxu0 %v1448_v42 }
  0x27   :  { %1390 = vmatprep.subr.bf16.mxu1 %v1448_v42 }
  0x28   :  { %1368 = vmatpush3.bf16.msra.mxu0 %v1448_v42 }
  0x29   :  { %1394 = vmatpush3.bf16.msra.mxu1 %v1448_v42  ;;  %1369 = vmatprep.subr.bf16.mxu0 %v1461_v46 }
  0x2a   :  { %1391 = vmatprep.subr.bf16.mxu1 %v1461_v46 }
  0x2b   :  { %623 = vmatmul.mubr.bf16.gmra.mrb[4].mxu0 %v1440_v39 }
  0x2c   :  { %720 = vmatmul.mubr.bf16.gmra.mrb[4].mxu1 %v1441_v40  ;;  %630 = vmatprep.mubr.bf16.mxu0 %v1442_v41 }
  0x2d   :  { %727 = vmatprep.mubr.bf16.mxu1 %v1444_v43  ;;  %1370 = vmatpush3.bf16.msra.mxu0 %v1461_v46 }
  0x2e   :  { %1395 = vmatpush3.bf16.msra.mxu1 %v1461_v46  ;;  %1371 = vmatprep.subr.bf16.mxu0 %v1474_v49 }
  0x2f   :  { %1392 = vmatprep.subr.bf16.mxu1 %v1474_v49 }
  0x31   :  { %1372 = vmatpush3.bf16.msra.mxu0 %v1474_v49 }
  0x32   :  { %1396 = vmatpush3.bf16.msra.mxu1 %v1474_v49 }
  0x33   :  { %631 = vmatmul.mubr.bf16.gmra.mrb[8].mxu0 %v1446_v44 }
  0x34   :  { %728 = vmatmul.mubr.bf16.gmra.mrb[8].mxu1 %v1447_v45  ;;  %638 = vmatprep.mubr.bf16.mxu0 %v1449_v47 }
  0x35   :  { %735 = vmatprep.mubr.bf16.mxu1 %v1451_v48 }
  0x3b   :  { %639 = vmatmul.mubr.bf16.gmra.mrb[12].mxu0 %v1453_v50 }
  0x3c   :  { %736 = vmatmul.mubr.bf16.gmra.mrb[12].mxu1 %v1454_v51  ;;  %646 = vmatprep.mubr.bf16.mxu0 %v1455_v52 }
  0x3d   :  { %743 = vmatprep.mubr.bf16.mxu1 %v1457_v53 }
  0x43   :  { %647 = vmatmul.mubr.bf16.gmra.mrb[16].mxu0 %v1459_v54 }
  0x44   :  { %744 = vmatmul.mubr.bf16.gmra.mrb[16].mxu1 %v1460_v55  ;;  %654 = vmatprep.mubr.bf16.mxu0 %v1462_v56 }
  0x45   :  { %751 = vmatprep.mubr.bf16.mxu1 %v1464_v57 }
  0x4b   :  { %655 = vmatmul.mubr.bf16.gmra.mrb[20].mxu0 %v1466_v58 }
  0x4c   :  { %752 = vmatmul.mubr.bf16.gmra.mrb[20].mxu1 %v1467_v59  ;;  %662 = vmatprep.mubr.bf16.mxu0 %v1468_v60 }
  0x4d   :  { %759 = vmatprep.mubr.bf16.mxu1 %v1470_v61 }
  0x53   :  { %663 = vmatmul.mubr.bf16.gmra.mrb[24].mxu0 %v1472_v62 }
  0x54   :  { %760 = vmatmul.mubr.bf16.gmra.mrb[24].mxu1 %v1473_v63  ;;  %670 = vmatprep.mubr.bf16.mxu0 %v1475_v0 }
  0x55   :  { %767 = vmatprep.mubr.bf16.mxu1 %v1477_v1 }
  0x5b   :  { %671 = vmatmul.mubr.bf16.gmra.mrb[28].mxu0 %v1479_v2 }
  0x5c   :  { %768 = vmatmul.mubr.bf16.gmra.mrb[28].mxu1 %v1480_v3  ;;  %1373 = vmatprep.mubr.msk.bf16.mxu0 %vm557_vm0, %v1481_v4 }
  0x5d   :  { %1381 = vmatprep.mubr.msk.bf16.mxu1 %vm557_vm0, %v1482_v5 }
  0x63   :  { %1374 = vmatmul.mubr.msk.bf16.vlgmr.msra.gmra.mrb[32].mxu0 %vm557_vm0, %v1483_v6 }
  0x64   :  { %1382 = vmatmul.mubr.msk.bf16.vlgmr.msra.gmra.mrb[32].mxu1 %vm557_vm0, %v1484_v7  ;;  %1377 = vmatprep.mubr.msk.bf16.mxu0 %vm557_vm0, %v1485_v8 }
  0x65   :  { %1385 = vmatprep.mubr.msk.bf16.mxu1 %vm557_vm0, %v1486_v9 }
  0x6b   :  { %1378 = vmatmul.mubr.msk.bf16.gmra.mrb[36].mxu0 %vm557_vm0, %v1487_v10 }
  0x6c   :  { %1386 = vmatmul.mubr.msk.bf16.gmra.mrb[36].mxu1 %vm557_vm0, %v1488_v11 }
  0xf6   :  { %v1241_v12 = vpop.f32.mrb[0].mxu0 }
  0xf7   :  { %v1305_v13 = vpop.f32.mrb[0].mxu1  ;;  %v1242_v14 = vpop.f32.mrb[1].mxu0 }
  0xf8   :  { %v1243_v15 = vadd.f32 %v1242_v14, %v1241_v12  ;;  %v1306_v16 = vpop.f32.mrb[1].mxu1  ;;  %v1244_v17 = vpop.f32.mrb[2].mxu0 }
  0xf9   :  { %v1307_v18 = vadd.f32 %v1306_v16, %v1305_v13  ;;  %v1308_v19 = vpop.f32.mrb[2].mxu1  ;;  %v1245_v20 = vpop.f32.mrb[3].mxu0 }
  0xfa   :  { %v1246_v21 = vadd.f32 %v1245_v20, %v1244_v17  ;;  %v1309_v22 = vpop.f32.mrb[3].mxu1 }
  0xfb   :  { %v1310_v23 = vadd.f32 %v1309_v22, %v1308_v19  ;;  %v1755_v24 = vadd.f32 %v1307_v18, %v1243_v15 }
  0xfd   :  { %v1757_v25 = vadd.f32 %v1310_v23, %v1246_v21 }
  0xfe   :  { %v1247_v26 = vpop.f32.mrb[4].mxu0 }
  0xff   :  { %v1311_v27 = vpop.f32.mrb[4].mxu1  ;;  %v1248_v28 = vpop.f32.mrb[5].mxu0 }
 0x100   :  { %v1249_v29 = vadd.f32 %v1248_v28, %v1247_v26  ;;  %v1312_v30 = vpop.f32.mrb[5].mxu1  ;;  %v1250_v31 = vpop.f32.mrb[6].mxu0 }
 0x101   :  { %v1313_v32 = vadd.f32 %v1312_v30, %v1311_v27  ;;  %v1314_v33 = vpop.f32.mrb[6].mxu1  ;;  %v1251_v34 = vpop.f32.mrb[7].mxu0 }
 0x102   :  { %v1252_v35 = vadd.f32 %v1251_v34, %v1250_v31  ;;  %v1315_v36 = vpop.f32.mrb[7].mxu1 }
 0x103   :  { %v1316_v37 = vadd.f32 %v1315_v36, %v1314_v33  ;;  %v1759_v38 = vadd.f32 %v1313_v32, %v1249_v29 }
 0x105   :  { %v1761_v39 = vadd.f32 %v1316_v37, %v1252_v35 }
 0x106   :  { %v1253_v40 = vpop.f32.mrb[8].mxu0 }
 0x107   :  { %v1317_v41 = vpop.f32.mrb[8].mxu1  ;;  %v1254_v42 = vpop.f32.mrb[9].mxu0 }
 0x108   :  { %v1255_v43 = vadd.f32 %v1254_v42, %v1253_v40  ;;  %v1318_v44 = vpop.f32.mrb[9].mxu1  ;;  %v1256_v45 = vpop.f32.mrb[10].mxu0 }
 0x109   :  { %v1319_v46 = vadd.f32 %v1318_v44, %v1317_v41  ;;  %v1320_v47 = vpop.f32.mrb[10].mxu1  ;;  %v1257_v48 = vpop.f32.mrb[11].mxu0 }
 0x10a   :  { %v1258_v49 = vadd.f32 %v1257_v48, %v1256_v45  ;;  %v1321_v50 = vpop.f32.mrb[11].mxu1 }
 0x10b   :  { %v1322_v51 = vadd.f32 %v1321_v50, %v1320_v47  ;;  %v1763_v52 = vadd.f32 %v1319_v46, %v1255_v43 }
 0x10d   :  { %v1765_v53 = vadd.f32 %v1322_v51, %v1258_v49 }
 0x10e   :  { %v1259_v54 = vpop.f32.mrb[12].mxu0 }
 0x10f   :  { %v1323_v55 = vpop.f32.mrb[12].mxu1  ;;  %v1260_v56 = vpop.f32.mrb[13].mxu0 }
 0x110   :  { %v1261_v57 = vadd.f32 %v1260_v56, %v1259_v54  ;;  %v1324_v58 = vpop.f32.mrb[13].mxu1  ;;  %v1262_v59 = vpop.f32.mrb[14].mxu0 }
 0x111   :  { %v1325_v60 = vadd.f32 %v1324_v58, %v1323_v55  ;;  %v1326_v61 = vpop.f32.mrb[14].mxu1  ;;  %v1263_v62 = vpop.f32.mrb[15].mxu0 }
 0x112   :  { %v1264_v63 = vadd.f32 %v1263_v62, %v1262_v59  ;;  %v1327_v0 = vpop.f32.mrb[15].mxu1  ;;  %v1789_v62 = vld [vmem:[%s1980_s4 + $0x28] sm:$0xff]  }
 0x113   :  { %v1328_v1 = vadd.f32 %v1327_v0, %v1326_v61  ;;  %v1767_v2 = vadd.f32 %v1325_v60, %v1261_v57  ;;  %v1784_v61 = vld [vmem:[%s1980_s4 + $0x8] sm:$0xff]  }
 0x115   :  { %v1769_v3 = vadd.f32 %v1328_v1, %v1264_v63  ;;  %v1794_v63 = vld [vmem:[%s1980_s4] sm:$0xff]  }
 0x116   :  { %v1265_v4 = vpop.f32.mrb[16].mxu0 }
 0x117   :  { %v1329_v5 = vpop.f32.mrb[16].mxu1  ;;  %v1266_v6 = vpop.f32.mrb[17].mxu0 }
 0x118   :  { %v1267_v7 = vadd.f32 %v1266_v6, %v1265_v4  ;;  %v1330_v8 = vpop.f32.mrb[17].mxu1  ;;  %v1268_v9 = vpop.f32.mrb[18].mxu0  ;;  %v1799_v4 = vld [vmem:[%s1980_s4 + $0x20] sm:$0xff]   ;;  %v1804_v6 = vld [vmem:[%s1980_s4 + $0x18] sm:$0xff]  }
 0x119   :  { %v1331_v10 = vadd.f32 %v1330_v8, %v1329_v5  ;;  %v1332_v11 = vpop.f32.mrb[18].mxu1  ;;  %v1269_v12 = vpop.f32.mrb[19].mxu0  ;;  %v1811_v8 = vld [vmem:[%s1980_s4 + $0x38] sm:$0xff]  }
 0x11a   :  { %v1270_v13 = vadd.f32 %v1269_v12, %v1268_v9  ;;  %v1333_v14 = vpop.f32.mrb[19].mxu1  ;;  %v1192_v9 = vunpack.c.l.bf16 %v1784_v61  ;;  %v1819_v12 = vld [vmem:[%s1980_s4 + $0x10] sm:$0xff]  }
 0x11b   :  { %v1334_v15 = vadd.f32 %v1333_v14, %v1332_v11  ;;  %v1771_v16 = vadd.f32 %v1331_v10, %v1267_v7  ;;  %v1208_v10 = vunpack.c.l.bf16 %v1789_v62  ;;  %v1188_v11 = vunpack.c.l.bf16 %v1794_v63 }
 0x11c   :  { %v1204_v14 = vunpack.c.l.bf16 %v1799_v4 }
 0x11d   :  { %v1773_v17 = vadd.f32 %v1334_v15, %v1270_v13  ;;  %v1824_v13 = vld [vmem:[%s1980_s4 + $0x30] sm:$0xff]   ;;  %v1193_v15 = vunpack.c.h.bf16 %v1784_v61 }
 0x11e   :  { %v1271_v18 = vpop.f32.mrb[20].mxu0 }
 0x11f   :  { %v1335_v19 = vpop.f32.mrb[20].mxu1  ;;  %v1272_v20 = vpop.f32.mrb[21].mxu0 }
 0x120   :  { %v1273_v21 = vadd.f32 %v1272_v20, %v1271_v18  ;;  %v1336_v22 = vpop.f32.mrb[21].mxu1  ;;  %v1274_v23 = vpop.f32.mrb[22].mxu0  ;;  %v1209_v18 = vunpack.c.h.bf16 %v1789_v62 }
 0x121   :  { %v1337_v26 = vadd.f32 %v1336_v22, %v1335_v19  ;;  %v1338_v27 = vpop.f32.mrb[22].mxu1  ;;  %v1275_v28 = vpop.f32.mrb[23].mxu0  ;;  %v1189_v22 = vunpack.c.h.bf16 %v1794_v63 }
 0x122   :  { %v1276_v29 = vadd.f32 %v1275_v28, %v1274_v23  ;;  %v1339_v30 = vpop.f32.mrb[23].mxu1  ;;  %v1205_v23 = vunpack.c.h.bf16 %v1799_v4 }
 0x123   :  { %v1340_v31 = vadd.f32 %v1339_v30, %v1338_v27  ;;  %v754_v32 = vadd.f32 %v1337_v26, %v1273_v21  ;;  %v1834_v21 = vld [vmem:[%s1981_s2] ss:$0 sm:$0xff]  ;;  %v1200_v26 = vunpack.c.l.bf16 %v1804_v6  ;;  %v1216_v27 = vunpack.c.l.bf16 %v1811_v8 }
 0x125   :  { %v1775_v33 = vadd.f32 %v1340_v31, %v1276_v29  ;;  %v1196_v31 = vunpack.c.l.bf16 %v1819_v12 }
 0x126   :  { %v1277_v34 = vpop.f32.mrb[24].mxu0 }
 0x127   :  { %v1341_v35 = vpop.f32.mrb[24].mxu1  ;;  %v1278_v36 = vpop.f32.mrb[25].mxu0 }
 0x128   :  { %v1279_v37 = vadd.f32 %v1278_v36, %v1277_v34  ;;  %v1342_v40 = vpop.f32.mrb[25].mxu1  ;;  %v1280_v41 = vpop.f32.mrb[26].mxu0  ;;  %v1212_v34 = vunpack.c.l.bf16 %v1824_v13  ;;  %v1847_v36 = vld [vmem:[%s1982_s3] ss:$0 sm:$0xff] }
 0x129   :  { %v1343_v42 = vadd.f32 %v1342_v40, %v1341_v35  ;;  %v1344_v43 = vpop.f32.mrb[26].mxu1  ;;  %v1281_v44 = vpop.f32.mrb[27].mxu0  ;;  %v1201_v35 = vunpack.c.h.bf16 %v1804_v6 }
 0x12a   :  { %v1282_v45 = vadd.f32 %v1281_v44, %v1280_v41  ;;  %v1345_v46 = vpop.f32.mrb[27].mxu1 }
 0x12b   :  { %v1346_v47 = vadd.f32 %v1345_v46, %v1344_v43  ;;  %v1777_v48 = vadd.f32 %v1343_v42, %v1279_v37  ;;  %v1197_v43 = vunpack.c.h.bf16 %v1819_v12 }
 0x12d   :  { %v1779_v49 = vadd.f32 %v1346_v47, %v1282_v45 }
 0x12e   :  { %v1283_v50 = vpop.f32.mrb[28].mxu0 }
 0x12f   :  { %v1347_v51 = vpop.f32.mrb[28].mxu1  ;;  %v1284_v54 = vpop.f32.mrb[29].mxu0 }
 0x130   :  { %v1285_v55 = vadd.f32 %v1284_v54, %v1283_v50  ;;  %v1348_v56 = vpop.f32.mrb[29].mxu1  ;;  %v1286_v57 = vpop.f32.mrb[30].mxu0 }
 0x131   :  { %v1349_v58 = vadd.f32 %v1348_v56, %v1347_v51  ;;  %v1350_v59 = vpop.f32.mrb[30].mxu1  ;;  %v1287_v60 = vpop.f32.mrb[31].mxu0  ;;  %v1213_v51 = vunpack.c.h.bf16 %v1824_v13 }
 0x132   :  { %v1288_v0 = vadd.f32 %v1287_v60, %v1286_v57  ;;  %v1351_v1 = vpop.f32.mrb[31].mxu1 }
 0x133   :  { %v1352_v5 = vadd.f32 %v1351_v1, %v1350_v59  ;;  %v1806_v7 = vadd.f32 %v1349_v58, %v1285_v55 }
 0x135   :  { %v1829_v19 = vadd.f32 %v1352_v5, %v1288_v0 }
 0x136   :  { %v1375_v20 = vpop.f32.mrb[32].mxu0 }
 0x137   :  { %v819_v28 = vadd.f32 %v1375_v20, %v1759_v38  ;;  %v1383_v29 = vpop.f32.mrb[32].mxu1  ;;  %v810_v30 = vpop.f32.mrb[33].mxu0  ;;  %v1217_v38 = vunpack.c.h.bf16 %v1811_v8 }
 0x138   :  { %v851_v37 = vadd.f32 %v1383_v29, %v754_v32  ;;  %v811_v40 = vadd.f32 %v810_v30, %v1755_v24  ;;  %v842_v41 = vpop.f32.mrb[33].mxu1  ;;  %v1376_v42 = vpop.f32.mrb[34].mxu0 }
 0x139   :  { %v882_v44 = vmul.f32 %v1834_v21, %v819_v28  ;;  %v843_v45 = vadd.f32 %v842_v41, %v1771_v16  ;;  %v822_v46 = vadd.f32 %v1376_v42, %v1761_v39  ;;  %v1384_v47 = vpop.f32.mrb[34].mxu1  ;;  %v813_v50 = vpop.f32.mrb[35].mxu0 }
 0x13a   :  { %v890_v32 = vmul.f32 %v1834_v21, %v851_v37  ;;  %v880_v24 = vmul.f32 %v1834_v21, %v811_v40  ;;  %v854_v54 = vadd.f32 %v1384_v47, %v1775_v33  ;;  %v814_v55 = vadd.f32 %v813_v50, %v1757_v25  ;;  %v845_v56 = vpop.f32.mrb[35].mxu1 }
 0x13b   :  { %v905_v57 = vadd.f32 %v1847_v36, %v882_v44  ;;  %v888_v58 = vmul.f32 %v1834_v21, %v843_v45  ;;  %v883_v16 = vmul.f32 %v1834_v21, %v822_v46  ;;  %v846_v39 = vadd.f32 %v845_v56, %v1773_v17 }
 0x13c   :  { %v913_v59 = vadd.f32 %v1847_v36, %v890_v32  ;;  %v903_v60 = vadd.f32 %v1847_v36, %v880_v24  ;;  %v891_v61 = vmul.f32 %v1834_v21, %v854_v54  ;;  %v881_v62 = vmul.f32 %v1834_v21, %v814_v55 }
 0x13d   :  { %v953_v33 = vadd.f32 %v1192_v9, %v905_v57  ;;  %v911_v25 = vadd.f32 %v1847_v36, %v888_v58  ;;  %v906_v63 = vadd.f32 %v1847_v36, %v883_v16  ;;  %v889_v0 = vmul.f32 %v1834_v21, %v846_v39 }
 0x13e   :  { %v961_v1 = vadd.f32 %v1208_v10, %v913_v59  ;;  %v951_v4 = vadd.f32 %v1188_v11, %v903_v60  ;;  %v914_v5 = vadd.f32 %v1847_v36, %v891_v61  ;;  %v904_v17 = vadd.f32 %v1847_v36, %v881_v62  ;;  %v1379_v20 = vpop.f32.mrb[36].mxu0 }
 0x13f   :  { %v969_v28 = vmax.f32 %v953_v33, 0.0  ;;  %v959_v29 = vadd.f32 %v1204_v14, %v911_v25  ;;  %v954_v30 = vadd.f32 %v1193_v15, %v906_v63  ;;  %v912_v37 = vadd.f32 %v1847_v36, %v889_v0  ;;  %v1387_v40 = vpop.f32.mrb[36].mxu1  ;;  %v826_v9 = vpop.f32.mrb[37].mxu0 }
 0x140   :  { %v977_v41 = vmax.f32 %v961_v1, 0.0  ;;  %v967_v42 = vmax.f32 %v951_v4, 0.0  ;;  %v962_v44 = vadd.f32 %v1209_v18, %v914_v5  ;;  %v952_v45 = vadd.f32 %v1189_v22, %v904_v17  ;;  %v858_v46 = vpop.f32.mrb[37].mxu1  ;;  %v1380_v47 = vpop.f32.mrb[38].mxu0 }
 0x141   :  { %v1172_v10 = vpack.c.bf16 %v969_v28, %v969_v28  ;;  %v975_v11 = vmax.f32 %v959_v29, 0.0  ;;  %v970_v50 = vmax.f32 %v954_v30, 0.0  ;;  %v960_v32 = vadd.f32 %v1205_v23, %v912_v37  ;;  %v1388_v24 = vpop.f32.mrb[38].mxu1  ;;  %v829_v54 = vpop.f32.mrb[39].mxu0 }
 0x142   :  { %v1180_v55 = vpack.c.bf16 %v977_v41, %v977_v41  ;;  %v1170_v56 = vpack.c.bf16 %v967_v42, %v967_v42  ;;  %v978_v14 = vmax.f32 %v962_v44, 0.0  ;;  %v968_v15 = vmax.f32 %v952_v45, 0.0  ;;  %v861_v57 = vpop.f32.mrb[39].mxu1 }
 0x143   :  { %1050 = vst.msk [vmem:[%s1983_s5 + $0x8] sm:$0xf] %vm1047_vm1, %v1172_v10  ;;  %v1178_v18 = vpack.c.bf16 %v975_v11, %v975_v11  ;;  %v1173_v22 = vpack.c.bf16 %v970_v50, %v970_v50  ;;  %v976_v58 = vmax.f32 %v960_v32, 0.0  ;;  %v835_v16 = vadd.f32 %v1379_v20, %v1767_v2 }
 0x144   :  { %1058 = vst.msk [vmem:[%s1983_s5 + $0x28] sm:$0xf] %vm1047_vm1, %v1180_v55  ;;  %1048 = vst.msk [vmem:[%s1983_s5] sm:$0xf] %vm1047_vm1, %v1170_v56  ;;  %v1181_v23 = vpack.c.bf16 %v978_v14, %v978_v14  ;;  %v1171_v39 = vpack.c.bf16 %v968_v15, %v968_v15  ;;  %v867_v59 = vadd.f32 %v1387_v40, %v1806_v7 }
 0x145   :  { %v827_v60 = vadd.f32 %v826_v9, %v1763_v52  ;;  %1056 = vst.msk [vmem:[%s1983_s5 + $0x20] sm:$0xf] %vm1047_vm1, %v1178_v18  ;;  %1051 = vst.msk [vmem:[%s1983_s5 + $0xc] sm:$0xf] %vm1047_vm1, %v1173_v22  ;;  %v1179_v2 = vpack.c.bf16 %v976_v58, %v976_v58  ;;  %v886_v61 = vmul.f32 %v1834_v21, %v835_v16 }
 0x146   :  { %v859_v62 = vadd.f32 %v858_v46, %v1777_v48  ;;  %v838_v33 = vadd.f32 %v1380_v47, %v1769_v3  ;;  %1059 = vst.msk [vmem:[%s1983_s5 + $0x2c] sm:$0xf] %vm1047_vm1, %v1181_v23  ;;  %1049 = vst.msk [vmem:[%s1983_s5 + $0x4] sm:$0xf] %vm1047_vm1, %v1171_v39  ;;  %v894_v52 = vmul.f32 %v1834_v21, %v867_v59 }
 0x147   :  { %v884_v7 = vmul.f32 %v1834_v21, %v827_v60  ;;  %v870_v25 = vadd.f32 %v1388_v24, %v1829_v19  ;;  %v830_v48 = vadd.f32 %v829_v54, %v1765_v53  ;;  %1057 = vst.msk [vmem:[%s1983_s5 + $0x24] sm:$0xf] %vm1047_vm1, %v1179_v2  ;;  %v909_v3 = vadd.f32 %v1847_v36, %v886_v61 }
 0x148   :  { %v892_v63 = vmul.f32 %v1834_v21, %v859_v62  ;;  %v887_v0 = vmul.f32 %v1834_v21, %v838_v33  ;;  %v862_v1 = vadd.f32 %v861_v57, %v1779_v49  ;;  %v917_v4 = vadd.f32 %v1847_v36, %v894_v52 }
 0x149   :  { %v907_v5 = vadd.f32 %v1847_v36, %v884_v7  ;;  %v895_v19 = vmul.f32 %v1834_v21, %v870_v25  ;;  %v885_v53 = vmul.f32 %v1834_v21, %v830_v48  ;;  %v957_v17 = vadd.f32 %v1200_v26, %v909_v3 }
 0x14a   :  { %v915_v20 = vadd.f32 %v1847_v36, %v892_v63  ;;  %v910_v28 = vadd.f32 %v1847_v36, %v887_v0  ;;  %v893_v29 = vmul.f32 %v1834_v21, %v862_v1  ;;  %v965_v49 = vadd.f32 %v1216_v27, %v917_v4 }
 0x14b   :  { %v955_v30 = vadd.f32 %v1196_v31, %v907_v5  ;;  %v918_v37 = vadd.f32 %v1847_v36, %v895_v19  ;;  %v908_v40 = vadd.f32 %v1847_v36, %v885_v53  ;;  %v973_v9 = vmax.f32 %v957_v17, 0.0 }
 0x14c   :  { %v963_v26 = vadd.f32 %v1212_v34, %v915_v20  ;;  %v958_v41 = vadd.f32 %v1201_v35, %v910_v28  ;;  %v916_v42 = vadd.f32 %v1847_v36, %v893_v29  ;;  %v981_v21 = vmax.f32 %v965_v49, 0.0 }
 0x14d   :  { %v971_v44 = vmax.f32 %v955_v30, 0.0  ;;  %v966_v27 = vadd.f32 %v1217_v38, %v918_v37  ;;  %v956_v31 = vadd.f32 %v1197_v43, %v908_v40  ;;  %v1176_v45 = vpack.c.bf16 %v973_v9, %v973_v9 }
 0x14e   :  { %v979_v46 = vmax.f32 %v963_v26, 0.0  ;;  %v974_v47 = vmax.f32 %v958_v41, 0.0  ;;  %v964_v10 = vadd.f32 %v1213_v51, %v916_v42  ;;  %v1184_v34 = vpack.c.bf16 %v981_v21, %v981_v21 }
 0x14f   :  { %v1174_v11 = vpack.c.bf16 %v971_v44, %v971_v44  ;;  %v982_v6 = vmax.f32 %v966_v27, 0.0  ;;  %v972_v35 = vmax.f32 %v956_v31, 0.0  ;;  %1054 = vst.msk [vmem:[%s1983_s5 + $0x18] sm:$0xf] %vm1047_vm1, %v1176_v45 }
 0x150   :  { %v1182_v8 = vpack.c.bf16 %v979_v46, %v979_v46  ;;  %v1177_v36 = vpack.c.bf16 %v974_v47, %v974_v47  ;;  %v980_v38 = vmax.f32 %v964_v10, 0.0  ;;  %1062 = vst.msk [vmem:[%s1983_s5 + $0x38] sm:$0xf] %vm1047_vm1, %v1184_v34 }
 0x151   :  { %1052 = vst.msk [vmem:[%s1983_s5 + $0x10] sm:$0xf] %vm1047_vm1, %v1174_v11  ;;  %v1185_v12 = vpack.c.bf16 %v982_v6, %v982_v6  ;;  %v1175_v13 = vpack.c.bf16 %v972_v35, %v972_v35 }
 0x152   :  { %1060 = vst.msk [vmem:[%s1983_s5 + $0x30] sm:$0xf] %vm1047_vm1, %v1182_v8  ;;  %1055 = vst.msk [vmem:[%s1983_s5 + $0x1c] sm:$0xf] %vm1047_vm1, %v1177_v36  ;;  %v1183_v43 = vpack.c.bf16 %v980_v38, %v980_v38 }
 0x153   :  { %1063 = vst.msk [vmem:[%s1983_s5 + $0x3c] sm:$0xf] %vm1047_vm1, %v1185_v12  ;;  %1053 = vst.msk [vmem:[%s1983_s5 + $0x14] sm:$0xf] %vm1047_vm1, %v1175_v13 }
 0x154   :  { %1061 = vst.msk [vmem:[%s1983_s5 + $0x34] sm:$0xf] %vm1047_vm1, %v1183_v43 }

// kernel: resnet_forward.13
= control target key start
LH: loop header
LB: loop body
LE: loop exit
PB: predicated region body
PF: predicated region fallthrough
CT: control target
= control target key end

     0   :  { %vm368_vm0 = vcmask 523264   ;;  %s940_s1 = inlined_call_operand.vmem [shape: bf16[576,128], index: 1, kind: input, shape index: {}]   ;;  %s941_s0 = inlined_call_operand.vmem [shape: bf16[32,576], index: 0, kind: input, shape index: {}]   ;;  %s942_s2 = inlined_call_operand.vmem [shape: f32[1,128], index: 2, kind: input, shape index: {}]   ;;  %s943_s3 = inlined_call_operand.vmem [shape: f32[1,128], index: 3, kind: input, shape index: {}]   ;;  %s944_s4 = inlined_call_operand.vmem [shape: bf16[32,128], index: 4, kind: output, shape index: {}]  }
   0x1   :  { %v715_v0 = vld [vmem:[%s940_s1 + $0x40] sm:$0xff]   ;;  %v719_v4 = vld [vmem:[%s940_s1 + $0x48] sm:$0xff]   ;;  %v723_v8 = vld [vmem:[%s940_s1 + $0x50] sm:$0xff]  }
   0x2   :  { %v716_v1 = vld [vmem:[%s940_s1 + $0xc0] sm:$0xff]   ;;  %641 = vmatprep.subr.bf16.mxu0 %v715_v0  ;;  %v720_v5 = vld [vmem:[%s940_s1 + $0xc8] sm:$0xff]   ;;  %v724_v9 = vld [vmem:[%s940_s1 + $0xd0] sm:$0xff]  }
   0x3   :  { %v717_v2 = vld [vmem:[%s940_s1] sm:$0xff]   ;;  %669 = vmatprep.subr.bf16.mxu1 %v716_v1  ;;  %v721_v6 = vld [vmem:[%s940_s1 + $0x8] sm:$0xff]   ;;  %v725_v10 = vld [vmem:[%s940_s1 + $0x10] sm:$0xff]  }
   0x4   :  { %v718_v3 = vld [vmem:[%s940_s1 + $0x80] sm:$0xff]   ;;  %642 = vmatpush3.bf16.msra.mxu0 %v717_v2  ;;  %v722_v7 = vld [vmem:[%s940_s1 + $0x88] sm:$0xff]   ;;  %v726_v11 = vld [vmem:[%s940_s1 + $0x90] sm:$0xff]  }
   0x5   :  { %670 = vmatpush3.bf16.msra.mxu1 %v718_v3  ;;  %643 = vmatprep.subr.bf16.mxu0 %v719_v4  ;;  %v727_v12 = vld [vmem:[%s940_s1 + $0x58] sm:$0xff]   ;;  %v731_v16 = vld [vmem:[%s940_s1 + $0x60] sm:$0xff]   ;;  %v735_v20 = vld [vmem:[%s940_s1 + $0x68] sm:$0xff]  }
   0x6   :  { %671 = vmatprep.subr.bf16.mxu1 %v720_v5  ;;  %v728_v13 = vld [vmem:[%s940_s1 + $0xd8] sm:$0xff]   ;;  %v732_v17 = vld [vmem:[%s940_s1 + $0xe0] sm:$0xff]   ;;  %v736_v21 = vld [vmem:[%s940_s1 + $0xe8] sm:$0xff]  }
   0x7   :  { %v729_v14 = vld [vmem:[%s940_s1 + $0x18] sm:$0xff]   ;;  %v733_v18 = vld [vmem:[%s940_s1 + $0x20] sm:$0xff]   ;;  %v737_v22 = vld [vmem:[%s940_s1 + $0x28] sm:$0xff]  }
   0x8   :  { %644 = vmatpush3.bf16.msra.mxu0 %v721_v6  ;;  %v730_v15 = vld [vmem:[%s940_s1 + $0x98] sm:$0xff]   ;;  %v734_v19 = vld [vmem:[%s940_s1 + $0xa0] sm:$0xff]   ;;  %v738_v23 = vld [vmem:[%s940_s1 + $0xa8] sm:$0xff]  }
   0x9   :  { %672 = vmatpush3.bf16.msra.mxu1 %v722_v7  ;;  %645 = vmatprep.subr.bf16.mxu0 %v723_v8  ;;  %v739_v24 = vld [vmem:[%s940_s1 + $0x70] sm:$0xff]   ;;  %v743_v28 = vld [vmem:[%s940_s1 + $0x78] sm:$0xff]   ;;  %v752_v35 = vld [vmem:[%s941_s0 + $0xc] ss:$20 sps:$4 sm:$0xff]  }
   0xa   :  { %673 = vmatprep.subr.bf16.mxu1 %v724_v9  ;;  %v740_v25 = vld [vmem:[%s940_s1 + $0xf0] sm:$0xff]   ;;  %v744_v29 = vld [vmem:[%s940_s1 + $0xf8] sm:$0xff]   ;;  %v753_v36 = vld [vmem:[%s940_s1 + $0x100] sm:$0xff]   ;;  %456 = vmatprep.mubr.bf16.mxu1 %v752_v35 }
   0xb   :  { %v741_v26 = vld [vmem:[%s940_s1 + $0x30] sm:$0xff]   ;;  %v745_v30 = vld [vmem:[%s940_s1 + $0x38] sm:$0xff]   ;;  %v754_v37 = vld [vmem:[%s940_s1 + $0x108] sm:$0xff]  }
   0xc   :  { %646 = vmatpush3.bf16.msra.mxu0 %v725_v10  ;;  %v742_v27 = vld [vmem:[%s940_s1 + $0xb0] sm:$0xff]   ;;  %v746_v31 = vld [vmem:[%s940_s1 + $0xb8] sm:$0xff]   ;;  %v755_v38 = vld [vmem:[%s941_s0 + $0x2c] ss:$20 sps:$4 sm:$0xff]  }
   0xd   :  { %674 = vmatpush3.bf16.msra.mxu1 %v726_v11  ;;  %647 = vmatprep.subr.bf16.mxu0 %v727_v12  ;;  %v747_v32 = vld [vmem:[%s941_s0] ss:$20 sps:$4 sm:$0xff]   ;;  %v749_v33 = vld [vmem:[%s941_s0 + $0x4] ss:$20 sps:$4 sm:$0xff]   ;;  %v750_v34 = vld [vmem:[%s941_s0 + $0x8] ss:$20 sps:$4 sm:$0xff]  }
   0xe   :  { %675 = vmatprep.subr.bf16.mxu1 %v728_v13  ;;  %407 = vmatprep.mubr.bf16.mxu0 %v749_v33  ;;  %v757_v39 = vld [vmem:[%s941_s0 + $0x34] ss:$20 sps:$4 sm:$0xff]   ;;  %v760_v42 = vld [vmem:[%s941_s0 + $0x30] ss:$20 sps:$4 sm:$0xff]   ;;  %v762_v44 = vld [vmem:[%s940_s1 + $0x118] sm:$0xff]  }
   0xf   :  { %v759_v40 = vld [vmem:[%s941_s0 + $0x28] ss:$20 sps:$4 sm:$0xff]   ;;  %v761_v41 = vld [vmem:[%s940_s1 + $0x110] sm:$0xff]   ;;  %v764_v45 = vld [vmem:[%s941_s0 + $0x38] ss:$20 sps:$4 sm:$0xff]  }
  0x10   :  { %648 = vmatpush3.bf16.msra.mxu0 %v729_v14  ;;  %v763_v43 = vld [vmem:[%s941_s0 + $0x10] ss:$20 sps:$4 sm:$0xff]   ;;  %v620_v11 = vld [vmem:[%s942_s2] ss:$0 sm:$0xff] }
  0x11   :  { %676 = vmatpush3.bf16.msra.mxu1 %v730_v15  ;;  %649 = vmatprep.subr.bf16.mxu0 %v731_v16  ;;  %v621_v14 = vld [vmem:[%s943_s3] ss:$0 sm:$0xff] }
  0x12   :  { %677 = vmatprep.subr.bf16.mxu1 %v732_v17 }
  0x14   :  { %650 = vmatpush3.bf16.msra.mxu0 %v733_v18 }
  0x15   :  { %678 = vmatpush3.bf16.msra.mxu1 %v734_v19  ;;  %651 = vmatprep.subr.bf16.mxu0 %v735_v20 }
  0x16   :  { %679 = vmatprep.subr.bf16.mxu1 %v736_v21 }
  0x18   :  { %652 = vmatpush3.bf16.msra.mxu0 %v737_v22 }
  0x19   :  { %680 = vmatpush3.bf16.msra.mxu1 %v738_v23  ;;  %653 = vmatprep.subr.bf16.mxu0 %v739_v24 }
  0x1a   :  { %681 = vmatprep.subr.bf16.mxu1 %v740_v25 }
  0x1c   :  { %654 = vmatpush3.bf16.msra.mxu0 %v741_v26 }
  0x1d   :  { %682 = vmatpush3.bf16.msra.mxu1 %v742_v27  ;;  %655 = vmatprep.subr.bf16.mxu0 %v743_v28 }
  0x1e   :  { %683 = vmatprep.subr.bf16.mxu1 %v744_v29 }
  0x20   :  { %656 = vmatpush3.bf16.msra.mxu0 %v745_v30 }
  0x21   :  { %684 = vmatpush3.bf16.msra.mxu1 %v746_v31  ;;  %703 = vmatprep.subr.bf16.mxu0 %v753_v36 }
  0x23   :  { %408 = vmatmul.mubr.bf16.vlgmr.msra.gmra.mrb[0].mxu0 %v747_v32 }
  0x24   :  { %457 = vmatmul.mubr.bf16.vlgmr.msra.gmra.mrb[0].mxu1 %v750_v34  ;;  %704 = vmatpush3.bf16.msra.mxu0 %v753_v36 }
  0x25   :  { %705 = vmatprep.subr.bf16.mxu0 %v754_v37  ;;  %415 = vmatprep.mubr.bf16.mxu0 %v755_v38 }
  0x26   :  { %464 = vmatprep.mubr.bf16.mxu1 %v757_v39 }
  0x28   :  { %706 = vmatpush3.bf16.msra.mxu0 %v754_v37 }
  0x29   :  { %707 = vmatprep.subr.bf16.mxu0 %v761_v41 }
  0x2b   :  { %416 = vmatmul.mubr.bf16.gmra.mrb[4].mxu0 %v759_v40 }
  0x2c   :  { %465 = vmatmul.mubr.bf16.gmra.mrb[4].mxu1 %v760_v42  ;;  %711 = vmatprep.mubr.msk.bf16.mxu0 %vm368_vm0, %v763_v43 }
  0x2d   :  { %708 = vmatpush3.bf16.msra.mxu0 %v761_v41 }
  0x2e   :  { %709 = vmatprep.subr.bf16.mxu0 %v762_v44 }
  0x31   :  { %710 = vmatpush3.bf16.msra.mxu0 %v762_v44 }
  0x34   :  { %712 = vmatmul.mubr.msk.bf16.vlgmr.msra.gmra.mrb[8].mxu0 %vm368_vm0, %v764_v45 }
  0xf6   :  { %v657_v46 = vpop.f32.mrb[0].mxu0 }
  0xf7   :  { %v685_v47 = vpop.f32.mrb[0].mxu1  ;;  %v658_v48 = vpop.f32.mrb[1].mxu0 }
  0xf8   :  { %v659_v49 = vadd.f32 %v658_v48, %v657_v46  ;;  %v686_v50 = vpop.f32.mrb[1].mxu1  ;;  %v660_v51 = vpop.f32.mrb[2].mxu0 }
  0xf9   :  { %v687_v52 = vadd.f32 %v686_v50, %v685_v47  ;;  %v688_v53 = vpop.f32.mrb[2].mxu1  ;;  %v661_v54 = vpop.f32.mrb[3].mxu0 }
  0xfa   :  { %v662_v55 = vadd.f32 %v661_v54, %v660_v51  ;;  %v689_v56 = vpop.f32.mrb[3].mxu1 }
  0xfb   :  { %v690_v57 = vadd.f32 %v689_v56, %v688_v53  ;;  %v459_v58 = vadd.f32 %v687_v52, %v659_v49 }
  0xfd   :  { %v462_v59 = vadd.f32 %v690_v57, %v662_v55 }
  0xfe   :  { %v663_v60 = vpop.f32.mrb[4].mxu0 }
  0xff   :  { %v691_v61 = vpop.f32.mrb[4].mxu1  ;;  %v664_v62 = vpop.f32.mrb[5].mxu0 }
 0x100   :  { %v665_v63 = vadd.f32 %v664_v62, %v663_v60  ;;  %v692_v0 = vpop.f32.mrb[5].mxu1  ;;  %v666_v1 = vpop.f32.mrb[6].mxu0 }
 0x101   :  { %v693_v2 = vadd.f32 %v692_v0, %v691_v61  ;;  %v694_v3 = vpop.f32.mrb[6].mxu1  ;;  %v667_v4 = vpop.f32.mrb[7].mxu0 }
 0x102   :  { %v668_v5 = vadd.f32 %v667_v4, %v666_v1  ;;  %v695_v6 = vpop.f32.mrb[7].mxu1 }
 0x103   :  { %v696_v7 = vadd.f32 %v695_v6, %v694_v3  ;;  %v467_v8 = vadd.f32 %v693_v2, %v665_v63 }
 0x105   :  { %v470_v9 = vadd.f32 %v696_v7, %v668_v5 }
 0x107   :  { %v713_v10 = vpop.f32.mrb[8].mxu0 }
 0x108   :  { %v516_v12 = vadd.f32 %v713_v10, %v467_v8  ;;  %v507_v13 = vpop.f32.mrb[9].mxu0 }
 0x109   :  { %v508_v15 = vadd.f32 %v507_v13, %v459_v58  ;;  %v714_v16 = vpop.f32.mrb[10].mxu0 }
 0x10a   :  { %v531_v17 = vmul.f32 %v620_v11, %v516_v12  ;;  %v519_v18 = vadd.f32 %v714_v16, %v470_v9  ;;  %v510_v19 = vpop.f32.mrb[11].mxu0 }
 0x10b   :  { %v529_v20 = vmul.f32 %v620_v11, %v508_v15  ;;  %v511_v21 = vadd.f32 %v510_v19, %v462_v59 }
 0x10c   :  { %v542_v22 = vadd.f32 %v621_v14, %v531_v17  ;;  %v532_v23 = vmul.f32 %v620_v11, %v519_v18 }
 0x10d   :  { %v540_v24 = vadd.f32 %v621_v14, %v529_v20  ;;  %v530_v25 = vmul.f32 %v620_v11, %v511_v21 }
 0x10e   :  { %v543_v26 = vadd.f32 %v621_v14, %v532_v23  ;;  %v546_v28 = vmax.f32 %v542_v22, 0.0 }
 0x10f   :  { %v541_v27 = vadd.f32 %v621_v14, %v530_v25  ;;  %v544_v30 = vmax.f32 %v540_v24, 0.0 }
 0x110   :  { %v547_v29 = vmax.f32 %v543_v26, 0.0 }
 0x111   :  { %v545_v31 = vmax.f32 %v541_v27, 0.0 }
 0x112   :  { %v638_v32 = vpack.c.bf16 %v547_v29, %v546_v28 }
 0x113   :  { %v633_v33 = vpack.c.bf16 %v545_v31, %v544_v30 }
 0x114   :  { %640 = vst [vmem:[%s944_s4 + $0x8] sm:$0xff] %v638_v32  }
 0x115   :  { %634 = vst [vmem:[%s944_s4] sm:$0xff] %v633_v33  }

// kernel: resnet_forward.14
= control target key start
LH: loop header
LB: loop body
LE: loop exit
PB: predicated region body
PF: predicated region fallthrough
CT: control target
= control target key end

     0   :  { %vm1031_vm0 = vcmask 523264   ;;  %s1877_s1 = inlined_call_operand.vmem [shape: bf16[1152,128], index: 1, kind: input, shape index: {}]   ;;  %s1878_s0 = inlined_call_operand.vmem [shape: bf16[32,1152], index: 0, kind: input, shape index: {}]   ;;  %s1879_s5 = inlined_call_operand.vmem [shape: bf16[64,128], index: 5, kind: input, shape index: {}]   ;;  %s1880_s4 = inlined_call_operand.vmem [shape: bf16[32,64], index: 4, kind: input, shape index: {}]   ;;  %s1881_s6 = inlined_call_operand.vmem [shape: f32[1,128], index: 6, kind: input, shape index: {}]   ;;  %s1882_s7 = inlined_call_operand.vmem [shape: f32[1,128], index: 7, kind: input, shape index: {}]   ;;  %s1883_s2 = inlined_call_operand.vmem [shape: f32[1,128], index: 2, kind: input, shape index: {}]   ;;  %s1884_s3 = inlined_call_operand.vmem [shape: f32[1,128], index: 3, kind: input, shape index: {}]   ;;  %s1885_s8 = inlined_call_operand.vmem [shape: bf16[32,128], index: 8, kind: output, shape index: {}]  }
   0x1   :  { %v1422_v0 = vld [vmem:[%s1877_s1 + $0x40] sm:$0xff]   ;;  %v1426_v4 = vld [vmem:[%s1877_s1 + $0x48] sm:$0xff]   ;;  %v1430_v8 = vld [vmem:[%s1877_s1 + $0x50] sm:$0xff]  }
   0x2   :  { %v1423_v1 = vld [vmem:[%s1877_s1 + $0xc0] sm:$0xff]   ;;  %1262 = vmatprep.subr.bf16.mxu0 %v1422_v0  ;;  %v1427_v5 = vld [vmem:[%s1877_s1 + $0xc8] sm:$0xff]   ;;  %v1431_v9 = vld [vmem:[%s1877_s1 + $0xd0] sm:$0xff]  }
   0x3   :  { %v1424_v2 = vld [vmem:[%s1877_s1] sm:$0xff]   ;;  %1290 = vmatprep.subr.bf16.mxu1 %v1423_v1  ;;  %v1428_v6 = vld [vmem:[%s1877_s1 + $0x8] sm:$0xff]   ;;  %v1432_v10 = vld [vmem:[%s1877_s1 + $0x10] sm:$0xff]  }
   0x4   :  { %v1425_v3 = vld [vmem:[%s1877_s1 + $0x80] sm:$0xff]   ;;  %1263 = vmatpush3.bf16.msra.mxu0 %v1424_v2  ;;  %v1429_v7 = vld [vmem:[%s1877_s1 + $0x88] sm:$0xff]   ;;  %v1433_v11 = vld [vmem:[%s1877_s1 + $0x90] sm:$0xff]  }
   0x5   :  { %1291 = vmatpush3.bf16.msra.mxu1 %v1425_v3  ;;  %1264 = vmatprep.subr.bf16.mxu0 %v1426_v4  ;;  %v1434_v12 = vld [vmem:[%s1877_s1 + $0x58] sm:$0xff]   ;;  %v1438_v16 = vld [vmem:[%s1877_s1 + $0x60] sm:$0xff]   ;;  %v1442_v20 = vld [vmem:[%s1877_s1 + $0x68] sm:$0xff]  }
   0x6   :  { %1292 = vmatprep.subr.bf16.mxu1 %v1427_v5  ;;  %v1435_v13 = vld [vmem:[%s1877_s1 + $0xd8] sm:$0xff]   ;;  %v1439_v17 = vld [vmem:[%s1877_s1 + $0xe0] sm:$0xff]   ;;  %v1443_v21 = vld [vmem:[%s1877_s1 + $0xe8] sm:$0xff]  }
   0x7   :  { %v1436_v14 = vld [vmem:[%s1877_s1 + $0x18] sm:$0xff]   ;;  %v1440_v18 = vld [vmem:[%s1877_s1 + $0x20] sm:$0xff]   ;;  %v1444_v22 = vld [vmem:[%s1877_s1 + $0x28] sm:$0xff]  }
   0x8   :  { %1265 = vmatpush3.bf16.msra.mxu0 %v1428_v6  ;;  %v1437_v15 = vld [vmem:[%s1877_s1 + $0x98] sm:$0xff]   ;;  %v1441_v19 = vld [vmem:[%s1877_s1 + $0xa0] sm:$0xff]   ;;  %v1445_v23 = vld [vmem:[%s1877_s1 + $0xa8] sm:$0xff]  }
   0x9   :  { %1293 = vmatpush3.bf16.msra.mxu1 %v1429_v7  ;;  %1266 = vmatprep.subr.bf16.mxu0 %v1430_v8  ;;  %v1446_v24 = vld [vmem:[%s1877_s1 + $0x70] sm:$0xff]   ;;  %v1450_v28 = vld [vmem:[%s1877_s1 + $0x78] sm:$0xff]   ;;  %v1454_v32 = vld [vmem:[%s1878_s0] ss:$36 sps:$4 sm:$0xff]  }
   0xa   :  { %1294 = vmatprep.subr.bf16.mxu1 %v1431_v9  ;;  %v1447_v25 = vld [vmem:[%s1877_s1 + $0xf0] sm:$0xff]   ;;  %v1451_v29 = vld [vmem:[%s1877_s1 + $0xf8] sm:$0xff]   ;;  %v1456_v33 = vld [vmem:[%s1878_s0 + $0x4] ss:$36 sps:$4 sm:$0xff]  }
   0xb   :  { %v1448_v26 = vld [vmem:[%s1877_s1 + $0x30] sm:$0xff]   ;;  %v1452_v30 = vld [vmem:[%s1877_s1 + $0x38] sm:$0xff]   ;;  %v1457_v34 = vld [vmem:[%s1878_s0 + $0x8] ss:$36 sps:$4 sm:$0xff]   ;;  %750 = vmatprep.mubr.bf16.mxu0 %v1456_v33 }
   0xc   :  { %1267 = vmatpush3.bf16.msra.mxu0 %v1432_v10  ;;  %v1449_v27 = vld [vmem:[%s1877_s1 + $0xb0] sm:$0xff]   ;;  %v1453_v31 = vld [vmem:[%s1877_s1 + $0xb8] sm:$0xff]   ;;  %v1460_v36 = vld [vmem:[%s1877_s1 + $0x140] sm:$0xff]  }
   0xd   :  { %1295 = vmatpush3.bf16.msra.mxu1 %v1433_v11  ;;  %1268 = vmatprep.subr.bf16.mxu0 %v1434_v12  ;;  %v1459_v35 = vld [vmem:[%s1878_s0 + $0xc] ss:$36 sps:$4 sm:$0xff]   ;;  %v1461_v37 = vld [vmem:[%s1877_s1 + $0x100] sm:$0xff]   ;;  %v1472_v48 = vld [vmem:[%s1877_s1 + $0x158] sm:$0xff]  }
   0xe   :  { %1296 = vmatprep.subr.bf16.mxu1 %v1435_v13  ;;  %799 = vmatprep.mubr.bf16.mxu1 %v1459_v35  ;;  %v1462_v38 = vld [vmem:[%s1877_s1 + $0x1c0] sm:$0xff]   ;;  %v1464_v40 = vld [vmem:[%s1877_s1 + $0x148] sm:$0xff]   ;;  %v1468_v44 = vld [vmem:[%s1877_s1 + $0x150] sm:$0xff]  }
   0xf   :  { %v1463_v39 = vld [vmem:[%s1877_s1 + $0x180] sm:$0xff]   ;;  %v1465_v41 = vld [vmem:[%s1877_s1 + $0x108] sm:$0xff]   ;;  %v1469_v45 = vld [vmem:[%s1877_s1 + $0x110] sm:$0xff]  }
  0x10   :  { %1269 = vmatpush3.bf16.msra.mxu0 %v1436_v14  ;;  %v1466_v42 = vld [vmem:[%s1877_s1 + $0x1c8] sm:$0xff]   ;;  %v1470_v46 = vld [vmem:[%s1877_s1 + $0x1d0] sm:$0xff]   ;;  %v1473_v49 = vld [vmem:[%s1877_s1 + $0x118] sm:$0xff]  }
  0x11   :  { %1297 = vmatpush3.bf16.msra.mxu1 %v1437_v15  ;;  %1270 = vmatprep.subr.bf16.mxu0 %v1438_v16  ;;  %v1467_v43 = vld [vmem:[%s1877_s1 + $0x188] sm:$0xff]   ;;  %v1471_v47 = vld [vmem:[%s1877_s1 + $0x190] sm:$0xff]   ;;  %v1474_v50 = vld [vmem:[%s1877_s1 + $0x1d8] sm:$0xff]  }
  0x12   :  { %1298 = vmatprep.subr.bf16.mxu1 %v1439_v17  ;;  %v1475_v51 = vld [vmem:[%s1877_s1 + $0x198] sm:$0xff]   ;;  %v1476_v52 = vld [vmem:[%s1877_s1 + $0x160] sm:$0xff]   ;;  %v1480_v56 = vld [vmem:[%s1877_s1 + $0x168] sm:$0xff]  }
  0x13   :  { %v1477_v53 = vld [vmem:[%s1877_s1 + $0x120] sm:$0xff]   ;;  %v1481_v57 = vld [vmem:[%s1878_s0 + $0x4c] ss:$36 sps:$4 sm:$0xff]   ;;  %v1483_v58 = vld [vmem:[%s1878_s0 + $0x54] ss:$36 sps:$4 sm:$0xff]  }
  0x14   :  { %1271 = vmatpush3.bf16.msra.mxu0 %v1440_v18  ;;  %v1478_v54 = vld [vmem:[%s1877_s1 + $0x1e0] sm:$0xff]   ;;  %v1485_v59 = vld [vmem:[%s1877_s1 + $0x128] sm:$0xff]   ;;  %v1487_v61 = vld [vmem:[%s1878_s0 + $0x50] ss:$36 sps:$4 sm:$0xff]  }
  0x15   :  { %1299 = vmatpush3.bf16.msra.mxu1 %v1441_v19  ;;  %1272 = vmatprep.subr.bf16.mxu0 %v1442_v20  ;;  %v1479_v55 = vld [vmem:[%s1877_s1 + $0x1a0] sm:$0xff]   ;;  %v1486_v60 = vld [vmem:[%s1878_s0 + $0x48] ss:$36 sps:$4 sm:$0xff]   ;;  %v1490_v0 = vld [vmem:[%s1877_s1 + $0x170] sm:$0xff]  }
  0x16   :  { %1300 = vmatprep.subr.bf16.mxu1 %v1443_v21  ;;  %v1488_v62 = vld [vmem:[%s1877_s1 + $0x1e8] sm:$0xff]   ;;  %v1491_v1 = vld [vmem:[%s1877_s1 + $0x130] sm:$0xff]   ;;  %v1494_v4 = vld [vmem:[%s1877_s1 + $0x178] sm:$0xff]  }
  0x17   :  { %v1489_v63 = vld [vmem:[%s1877_s1 + $0x1a8] sm:$0xff]   ;;  %v1492_v2 = vld [vmem:[%s1877_s1 + $0x1f0] sm:$0xff]   ;;  %v1495_v5 = vld [vmem:[%s1877_s1 + $0x138] sm:$0xff]  }
  0x18   :  { %1273 = vmatpush3.bf16.msra.mxu0 %v1444_v22  ;;  %v1493_v3 = vld [vmem:[%s1877_s1 + $0x1b0] sm:$0xff]   ;;  %v1496_v6 = vld [vmem:[%s1877_s1 + $0x1f8] sm:$0xff]   ;;  %v1501_v10 = vld [vmem:[%s1877_s1 + $0x200] sm:$0xff]  }
  0x19   :  { %1301 = vmatpush3.bf16.msra.mxu1 %v1445_v23  ;;  %1274 = vmatprep.subr.bf16.mxu0 %v1446_v24  ;;  %v1497_v7 = vld [vmem:[%s1878_s0 + $0x10] ss:$36 sps:$4 sm:$0xff]   ;;  %v1500_v9 = vld [vmem:[%s1877_s1 + $0x1b8] sm:$0xff]   ;;  %v1505_v13 = vld [vmem:[%s1877_s1 + $0x208] sm:$0xff]  }
  0x1a   :  { %1302 = vmatprep.subr.bf16.mxu1 %v1447_v25  ;;  %v1499_v8 = vld [vmem:[%s1878_s0 + $0x14] ss:$36 sps:$4 sm:$0xff]   ;;  %v1504_v12 = vld [vmem:[%s1878_s0 + $0x1c] ss:$36 sps:$4 sm:$0xff]   ;;  %v1510_v17 = vld [vmem:[%s1878_s0 + $0x64] ss:$36 sps:$4 sm:$0xff]  }
  0x1b   :  { %v1502_v11 = vld [vmem:[%s1878_s0 + $0x18] ss:$36 sps:$4 sm:$0xff]   ;;  %v1509_v16 = vld [vmem:[%s1877_s1 + $0x210] sm:$0xff]   ;;  %v1512_v18 = vld [vmem:[%s1878_s0 + $0x60] ss:$36 sps:$4 sm:$0xff]  }
  0x1c   :  { %1275 = vmatpush3.bf16.msra.mxu0 %v1448_v26  ;;  %v1506_v14 = vld [vmem:[%s1878_s0 + $0x5c] ss:$36 sps:$4 sm:$0xff]   ;;  %v1516_v21 = vld [vmem:[%s1879_s5 + $0x8] sm:$0xff]   ;;  %v1518_v23 = vld [vmem:[%s1879_s5 + $0x10] sm:$0xff]  }
  0x1d   :  { %1303 = vmatpush3.bf16.msra.mxu1 %v1449_v27  ;;  %1276 = vmatprep.subr.bf16.mxu0 %v1450_v28  ;;  %v1508_v15 = vld [vmem:[%s1878_s0 + $0x58] ss:$36 sps:$4 sm:$0xff]   ;;  %v1514_v20 = vld [vmem:[%s1879_s5] sm:$0xff]   ;;  %v1517_v24 = vld [vmem:[%s1877_s1 + $0x228] sm:$0xff]  }
  0x1e   :  { %1304 = vmatprep.subr.bf16.mxu1 %v1451_v29  ;;  %v1513_v19 = vld [vmem:[%s1877_s1 + $0x218] sm:$0xff]   ;;  %v1515_v22 = vld [vmem:[%s1877_s1 + $0x220] sm:$0xff]   ;;  %v1519_v28 = vld [vmem:[%s1877_s1 + $0x230] sm:$0xff]  }
  0x1f   :  { %v1520_v25 = vld [vmem:[%s1879_s5 + $0x18] sm:$0xff]   ;;  %v1522_v26 = vld [vmem:[%s1880_s4] sm:$0xff]   ;;  %v1524_v29 = vld [vmem:[%s1880_s4 + $0x8] sm:$0xff]  }
  0x20   :  { %1277 = vmatpush3.bf16.msra.mxu0 %v1452_v30  ;;  %v1523_v27 = vld [vmem:[%s1878_s0 + $0x20] ss:$36 sps:$4 sm:$0xff]   ;;  %v1521_v30 = vld [vmem:[%s1877_s1 + $0x238] sm:$0xff]  }
  0x21   :  { %1305 = vmatpush3.bf16.msra.mxu1 %v1453_v31  ;;  %1318 = vmatprep.subr.bf16.mxu0 %v1460_v36  ;;  %v1525_v31 = vld [vmem:[%s1878_s0 + $0x68] ss:$36 sps:$4 sm:$0xff]  }
  0x22   :  { %1346 = vmatprep.subr.bf16.mxu1 %v1462_v38 }
  0x23   :  { %751 = vmatmul.mubr.bf16.vlgmr.msra.gmra.mrb[0].mxu0 %v1454_v32 }
  0x24   :  { %800 = vmatmul.mubr.bf16.vlgmr.msra.gmra.mrb[0].mxu1 %v1457_v34  ;;  %1319 = vmatpush3.bf16.msra.mxu0 %v1461_v37 }
  0x25   :  { %1347 = vmatpush3.bf16.msra.mxu1 %v1463_v39  ;;  %1320 = vmatprep.subr.bf16.mxu0 %v1464_v40 }
  0x26   :  { %1348 = vmatprep.subr.bf16.mxu1 %v1466_v42  ;;  %758 = vmatprep.mubr.bf16.mxu0 %v1481_v57 }
  0x27   :  { %807 = vmatprep.mubr.bf16.mxu1 %v1483_v58 }
  0x28   :  { %1321 = vmatpush3.bf16.msra.mxu0 %v1465_v41 }
  0x29   :  { %1349 = vmatpush3.bf16.msra.mxu1 %v1467_v43  ;;  %1322 = vmatprep.subr.bf16.mxu0 %v1468_v44 }
  0x2a   :  { %1350 = vmatprep.subr.bf16.mxu1 %v1470_v46 }
  0x2b   :  { %759 = vmatmul.mubr.bf16.gmra.mrb[4].mxu0 %v1486_v60 }
  0x2c   :  { %1323 = vmatpush3.bf16.msra.mxu0 %v1469_v45  ;;  %808 = vmatmul.mubr.bf16.gmra.mrb[4].mxu1 %v1487_v61 }
  0x2d   :  { %1351 = vmatpush3.bf16.msra.mxu1 %v1471_v47  ;;  %1324 = vmatprep.subr.bf16.mxu0 %v1472_v48 }
  0x2e   :  { %1352 = vmatprep.subr.bf16.mxu1 %v1474_v50  ;;  %848 = vmatprep.mubr.bf16.mxu0 %v1499_v8 }
  0x2f   :  { %897 = vmatprep.mubr.bf16.mxu1 %v1504_v12 }
  0x30   :  { %1325 = vmatpush3.bf16.msra.mxu0 %v1473_v49 }
  0x31   :  { %1353 = vmatpush3.bf16.msra.mxu1 %v1475_v51  ;;  %1326 = vmatprep.subr.bf16.mxu0 %v1476_v52 }
  0x32   :  { %1354 = vmatprep.subr.bf16.mxu1 %v1478_v54 }
  0x34   :  { %1327 = vmatpush3.bf16.msra.mxu0 %v1477_v53 }
  0x35   :  { %1355 = vmatpush3.bf16.msra.mxu1 %v1479_v55  ;;  %1328 = vmatprep.subr.bf16.mxu0 %v1480_v56 }
  0x36   :  { %1356 = vmatprep.subr.bf16.mxu1 %v1488_v62 }
  0x38   :  { %1329 = vmatpush3.bf16.msra.mxu0 %v1485_v59 }
  0x39   :  { %1357 = vmatpush3.bf16.msra.mxu1 %v1489_v63  ;;  %1330 = vmatprep.subr.bf16.mxu0 %v1490_v0 }
  0x3a   :  { %1358 = vmatprep.subr.bf16.mxu1 %v1492_v2 }
  0x3c   :  { %1331 = vmatpush3.bf16.msra.mxu0 %v1491_v1 }
  0x3d   :  { %1359 = vmatpush3.bf16.msra.mxu1 %v1493_v3  ;;  %1332 = vmatprep.subr.bf16.mxu0 %v1494_v4 }
  0x3e   :  { %1360 = vmatprep.subr.bf16.mxu1 %v1496_v6 }
  0x40   :  { %1333 = vmatpush3.bf16.msra.mxu0 %v1495_v5 }
  0x41   :  { %1361 = vmatpush3.bf16.msra.mxu1 %v1500_v9  ;;  %1390 = vmatprep.subr.bf16.mxu0 %v1501_v10 }
  0x42   :  { %1410 = vmatprep.subr.bf16.mxu1 %v1514_v20 }
  0x43   :  { %849 = vmatmul.mubr.bf16.vlgmr.msra.gmra.mrb[8].mxu0 %v1497_v7 }
  0x44   :  { %1391 = vmatpush3.bf16.msra.mxu0 %v1501_v10  ;;  %898 = vmatmul.mubr.bf16.vlgmr.msra.gmra.mrb[8].mxu1 %v1502_v11 }
  0x45   :  { %1392 = vmatprep.subr.bf16.mxu0 %v1505_v13  ;;  %856 = vmatprep.mubr.bf16.mxu0 %v1506_v14 }
  0x46   :  { %905 = vmatprep.mubr.bf16.mxu1 %v1510_v17  ;;  %1411 = vmatpush3.bf16.msra.mxu1 %v1514_v20 }
  0x47   :  { %1412 = vmatprep.subr.bf16.mxu1 %v1516_v21 }
  0x48   :  { %1393 = vmatpush3.bf16.msra.mxu0 %v1505_v13 }
  0x49   :  { %1394 = vmatprep.subr.bf16.mxu0 %v1509_v16 }
  0x4a   :  { %1413 = vmatpush3.bf16.msra.mxu1 %v1516_v21 }
  0x4b   :  { %857 = vmatmul.mubr.bf16.gmra.mrb[12].mxu0 %v1508_v15  ;;  %1414 = vmatprep.subr.bf16.mxu1 %v1518_v23 }
  0x4c   :  { %1395 = vmatpush3.bf16.msra.mxu0 %v1509_v16  ;;  %906 = vmatmul.mubr.bf16.gmra.mrb[12].mxu1 %v1512_v18 }
  0x4d   :  { %1396 = vmatprep.subr.bf16.mxu0 %v1513_v19  ;;  %1418 = vmatprep.mubr.msk.bf16.mxu1 %vm1031_vm0, %v1522_v26 }
  0x4e   :  { %1415 = vmatpush3.bf16.msra.mxu1 %v1518_v23  ;;  %1406 = vmatprep.mubr.bf16.mxu0 %v1523_v27 }
  0x4f   :  { %1416 = vmatprep.subr.bf16.mxu1 %v1520_v25 }
  0x50   :  { %1397 = vmatpush3.bf16.msra.mxu0 %v1513_v19 }
  0x51   :  { %1398 = vmatprep.subr.bf16.mxu0 %v1515_v22 }
  0x52   :  { %1417 = vmatpush3.bf16.msra.mxu1 %v1520_v25 }
  0x54   :  { %1399 = vmatpush3.bf16.msra.mxu0 %v1515_v22 }
  0x55   :  { %1400 = vmatprep.subr.bf16.mxu0 %v1517_v24  ;;  %1419 = vmatmul.mubr.msk.bf16.vlgmr.msra.gmra.mrb[16].mxu1 %vm1031_vm0, %v1524_v29 }
  0x58   :  { %1401 = vmatpush3.bf16.msra.mxu0 %v1517_v24 }
  0x59   :  { %1402 = vmatprep.subr.bf16.mxu0 %v1519_v28 }
  0x5c   :  { %1403 = vmatpush3.bf16.msra.mxu0 %v1519_v28 }
  0x5d   :  { %1404 = vmatprep.subr.bf16.mxu0 %v1521_v30 }
  0x60   :  { %1405 = vmatpush3.bf16.msra.mxu0 %v1521_v30 }
  0x63   :  { %1407 = vmatmul.mubr.bf16.vlgmr.msra.gmra.mrb[16].mxu0 %v1525_v31 }
  0xf6   :  { %v1278_v32 = vpop.f32.mrb[0].mxu0 }
  0xf7   :  { %v1306_v33 = vpop.f32.mrb[0].mxu1  ;;  %v1279_v34 = vpop.f32.mrb[1].mxu0 }
  0xf8   :  { %v1280_v35 = vadd.f32 %v1279_v34, %v1278_v32  ;;  %v1307_v36 = vpop.f32.mrb[1].mxu1  ;;  %v1281_v37 = vpop.f32.mrb[2].mxu0  ;;  %v1241_v32 = vld [vmem:[%s1881_s6] ss:$0 sm:$0xff] }
  0xf9   :  { %v1308_v38 = vadd.f32 %v1307_v36, %v1306_v33  ;;  %v1309_v39 = vpop.f32.mrb[2].mxu1  ;;  %v1282_v40 = vpop.f32.mrb[3].mxu0  ;;  %v1242_v34 = vld [vmem:[%s1882_s7] ss:$0 sm:$0xff] }
  0xfa   :  { %v1283_v41 = vadd.f32 %v1282_v40, %v1281_v37  ;;  %v1310_v42 = vpop.f32.mrb[3].mxu1  ;;  %v1231_v36 = vld [vmem:[%s1883_s2] ss:$0 sm:$0xff] }
  0xfb   :  { %v802_v43 = vadd.f32 %v1308_v38, %v1280_v35  ;;  %v1311_v44 = vadd.f32 %v1310_v42, %v1309_v39  ;;  %v1232_v40 = vld [vmem:[%s1884_s3] ss:$0 sm:$0xff] }
  0xfd   :  { %v805_v45 = vadd.f32 %v1311_v44, %v1283_v41 }
  0xfe   :  { %v1284_v46 = vpop.f32.mrb[4].mxu0 }
  0xff   :  { %v1312_v47 = vpop.f32.mrb[4].mxu1  ;;  %v1285_v48 = vpop.f32.mrb[5].mxu0 }
 0x100   :  { %v1313_v49 = vpop.f32.mrb[5].mxu1  ;;  %v1286_v50 = vadd.f32 %v1285_v48, %v1284_v46  ;;  %v1287_v52 = vpop.f32.mrb[6].mxu0 }
 0x101   :  { %v1314_v51 = vadd.f32 %v1313_v49, %v1312_v47  ;;  %v1315_v53 = vpop.f32.mrb[6].mxu1  ;;  %v1288_v54 = vpop.f32.mrb[7].mxu0 }
 0x102   :  { %v1316_v55 = vpop.f32.mrb[7].mxu1  ;;  %v1289_v57 = vadd.f32 %v1288_v54, %v1287_v52 }
 0x103   :  { %v810_v56 = vadd.f32 %v1314_v51, %v1286_v50  ;;  %v1317_v58 = vadd.f32 %v1316_v55, %v1315_v53 }
 0x105   :  { %v813_v59 = vadd.f32 %v1317_v58, %v1289_v57 }
 0x116   :  { %v1334_v60 = vpop.f32.mrb[8].mxu0 }
 0x117   :  { %v1335_v61 = vpop.f32.mrb[9].mxu0  ;;  %v1362_v0 = vpop.f32.mrb[8].mxu1 }
 0x118   :  { %v1336_v62 = vadd.f32 %v1335_v61, %v1334_v60  ;;  %v1337_v63 = vpop.f32.mrb[10].mxu0  ;;  %v1363_v4 = vpop.f32.mrb[9].mxu1 }
 0x119   :  { %v1338_v1 = vpop.f32.mrb[11].mxu0  ;;  %v1364_v5 = vadd.f32 %v1363_v4, %v1362_v0  ;;  %v1365_v6 = vpop.f32.mrb[10].mxu1 }
 0x11a   :  { %v851_v2 = vadd.f32 %v1336_v62, %v802_v43  ;;  %v1339_v3 = vadd.f32 %v1338_v1, %v1337_v63  ;;  %v1366_v8 = vpop.f32.mrb[11].mxu1 }
 0x11b   :  { %v1367_v9 = vadd.f32 %v1366_v8, %v1365_v6 }
 0x11c   :  { %v854_v7 = vadd.f32 %v1339_v3, %v805_v45  ;;  %v900_v10 = vadd.f32 %v1364_v5, %v851_v2 }
 0x11e   :  { %v1340_v11 = vpop.f32.mrb[12].mxu0  ;;  %v903_v13 = vadd.f32 %v1367_v9, %v854_v7 }
 0x11f   :  { %v1341_v12 = vpop.f32.mrb[13].mxu0  ;;  %v1368_v16 = vpop.f32.mrb[12].mxu1 }
 0x120   :  { %v1342_v14 = vadd.f32 %v1341_v12, %v1340_v11  ;;  %v1343_v15 = vpop.f32.mrb[14].mxu0  ;;  %v1369_v20 = vpop.f32.mrb[13].mxu1 }
 0x121   :  { %v1344_v17 = vpop.f32.mrb[15].mxu0  ;;  %v1370_v21 = vadd.f32 %v1369_v20, %v1368_v16  ;;  %v1371_v22 = vpop.f32.mrb[14].mxu1 }
 0x122   :  { %v859_v18 = vadd.f32 %v1342_v14, %v810_v56  ;;  %v1345_v19 = vadd.f32 %v1344_v17, %v1343_v15  ;;  %v1372_v24 = vpop.f32.mrb[15].mxu1 }
 0x123   :  { %v1373_v25 = vadd.f32 %v1372_v24, %v1371_v22 }
 0x124   :  { %v862_v23 = vadd.f32 %v1345_v19, %v813_v59  ;;  %v908_v26 = vadd.f32 %v1370_v21, %v859_v18 }
 0x126   :  { %v911_v27 = vadd.f32 %v1373_v25, %v862_v23 }
 0x128   :  { %v1420_v28 = vpop.f32.mrb[16].mxu1 }
 0x129   :  { %v1072_v29 = vpop.f32.mrb[17].mxu1  ;;  %v1096_v33 = vmul.f32 %v1420_v28, %v1241_v32 }
 0x12a   :  { %v1421_v30 = vpop.f32.mrb[18].mxu1  ;;  %v1094_v37 = vmul.f32 %v1241_v32, %v1072_v29 }
 0x12b   :  { %v1075_v31 = vpop.f32.mrb[19].mxu1  ;;  %v1107_v43 = vadd.f32 %v1242_v34, %v1096_v33  ;;  %v1097_v45 = vmul.f32 %v1421_v30, %v1241_v32 }
 0x12c   :  { %v1105_v48 = vadd.f32 %v1242_v34, %v1094_v37  ;;  %v1095_v50 = vmul.f32 %v1241_v32, %v1075_v31 }
 0x12d   :  { %v1108_v57 = vadd.f32 %v1242_v34, %v1097_v45 }
 0x12e   :  { %v1106_v60 = vadd.f32 %v1242_v34, %v1095_v50 }
 0x136   :  { %v1408_v35 = vpop.f32.mrb[16].mxu0 }
 0x137   :  { %v957_v38 = vadd.f32 %v1408_v35, %v908_v26  ;;  %v948_v39 = vpop.f32.mrb[17].mxu0 }
 0x138   :  { %v949_v41 = vadd.f32 %v948_v39, %v900_v10  ;;  %v1409_v42 = vpop.f32.mrb[18].mxu0 }
 0x139   :  { %v972_v44 = vmul.f32 %v1231_v36, %v957_v38  ;;  %v960_v46 = vadd.f32 %v1409_v42, %v911_v27  ;;  %v951_v47 = vpop.f32.mrb[19].mxu0 }
 0x13a   :  { %v970_v49 = vmul.f32 %v1231_v36, %v949_v41  ;;  %v952_v51 = vadd.f32 %v951_v47, %v903_v13 }
 0x13b   :  { %v983_v52 = vadd.f32 %v1232_v40, %v972_v44  ;;  %v973_v53 = vmul.f32 %v1231_v36, %v960_v46 }
 0x13c   :  { %v981_v54 = vadd.f32 %v1232_v40, %v970_v49  ;;  %v971_v55 = vmul.f32 %v1231_v36, %v952_v51 }
 0x13d   :  { %v1111_v56 = vadd.f32 %v1107_v43, %v983_v52  ;;  %v984_v58 = vadd.f32 %v1232_v40, %v973_v53 }
 0x13e   :  { %v1109_v59 = vadd.f32 %v1105_v48, %v981_v54  ;;  %v982_v61 = vadd.f32 %v1232_v40, %v971_v55 }
 0x13f   :  { %v1112_v62 = vadd.f32 %v1108_v57, %v984_v58  ;;  %v1115_v0 = vmax.f32 %v1111_v56, 0.0 }
 0x140   :  { %v1110_v63 = vadd.f32 %v1106_v60, %v982_v61  ;;  %v1113_v2 = vmax.f32 %v1109_v59, 0.0 }
 0x141   :  { %v1116_v1 = vmax.f32 %v1112_v62, 0.0 }
 0x142   :  { %v1114_v3 = vmax.f32 %v1110_v63, 0.0 }
 0x143   :  { %v1259_v4 = vpack.c.bf16 %v1116_v1, %v1115_v0 }
 0x144   :  { %v1254_v5 = vpack.c.bf16 %v1114_v3, %v1113_v2 }
 0x145   :  { %1261 = vst [vmem:[%s1885_s8 + $0x8] sm:$0xff] %v1259_v4  }
 0x146   :  { %1255 = vst [vmem:[%s1885_s8] sm:$0xff] %v1254_v5  }

// kernel: resnet_forward.15
= control target key start
LH: loop header
LB: loop body
LE: loop exit
PB: predicated region body
PF: predicated region fallthrough
CT: control target
= control target key end

     0   :  { %s2231_s15 = smov 0   ;;  %s2233_s16 = smov 0   ;;  %s2708_s0 = inlined_call_operand.vmem [shape: bf16[8,1152], index: 0, kind: input, shape index: {}]   ;;  %s2709_s1 = inlined_call_operand.vmem [shape: bf16[1152,256], index: 1, kind: input, shape index: {}]   ;;  %s2710_s2 = inlined_call_operand.vmem [shape: f32[1,256], index: 2, kind: input, shape index: {}]   ;;  %s2711_s3 = inlined_call_operand.vmem [shape: f32[1,256], index: 3, kind: input, shape index: {}]   ;;  %s2712_s4 = inlined_call_operand.vmem [shape: bf16[8,256], index: 4, kind: output, shape index: {}]  }
   0x1   :  { %s2235_s17 = smov 0   ;;  %s2237_s18 = smov 0  }
   0x2   :  { %s2239_s19 = smov 0  }
   0x3 LB: > { %s23_s20 = sadd.s32 1, %s2198_s18  ;;  %p66_p1 = scmp.ne.s32.totalorder %s2190_s16, %s2186_s15  ;;  %s2202_s19 = sphi %s2239_s19, %s14_s19   ;;  %s2198_s18 = sphi %s2237_s18, %s2716_s18   ;;  %s2194_s17 = sphi %s2235_s17, %s2715_s17   ;;  %s2190_s16 = sphi %s2233_s16, %s2714_s16   ;;  %s2186_s15 = sphi %s2231_s15, %s2713_s15  }
   0x4   : > { %p24_p0 = scmp.ge.s32.totalorder %s23_s20, 2  ;;  %p67_p2 = scmp.eq.s32.totalorder %s2202_s19, 0 }
   0x5   : > { %s59_s22 = sadd.s32 1, %s2190_s16  ;;  %p1833_p5 = scmp.ge.s32.totalorder %s2202_s19, 2 }
   0x6   : > { %s2718_s20 = smov (%p24_p0, %s23_s20), 0  ;;  %p68_p3 = por %p67_p2, %p66_p1 }
   0x7   : > { %s56_s21 = ssub.s32 %s2198_s18, %s2718_s20  ;;  %180 = sbr.rel (%p1833_p5) target bundleno = 114 (0x72), region = 20 }
   0x8   : > { %p57_p4 = scmp.eq.s32.totalorder %s56_s21, 0 }
   0xa   : > { %s2266_s23 = scalar_select %p57_p4, %s2190_s16, %s59_s22  }
   0xe   : > { %183 = sbr.rel (!%p68_p3) target bundleno = 114 (0x72), region = 24  ;;  %s185_s24 = sand.u32 (%p68_p3), 1, %s2190_s16  }
   0xf   : > { %s1834_s25 = sshll.u32 (%p68_p3), %s2198_s18, 2  ;;  %s2039_s26 = smul.u32 (%p68_p3), 576, %s185_s24 }
  0x10   : > { %s2274_s29 = scalar_lea.vmem (%p68_p3), %s2709_s1, %s1834_s25 }
  0x11   : > { %v205_v0 = vld [vmem:[%s2274_s29] sm:$0xf] (%p68_p3)  ;;  %v207_v1 = vld [vmem:[%s2274_s29 + $0x8] sm:$0xf] (%p68_p3)  ;;  %v209_v2 = vld [vmem:[%s2274_s29 + $0x10] sm:$0xf] (%p68_p3) }
  0x12   : > { %v211_v3 = vld [vmem:[%s2274_s29 + $0x18] sm:$0xf] (%p68_p3)  ;;  %v213_v4 = vld [vmem:[%s2274_s29 + $0x20] sm:$0xf] (%p68_p3)  ;;  %s2281_s30 = scalar_lea.vmem (%p68_p3), [#allocation2], %s2039_s26 }
  0x13   : > { %206 = vst [vmem:[%s2281_s30] sm:$0xf] (%p68_p3), %v205_v0  ;;  %208 = vst [vmem:[%s2281_s30 + $0x4] sm:$0xf] (%p68_p3), %v207_v1  ;;  %v215_v5 = vld [vmem:[%s2274_s29 + $0x28] sm:$0xf] (%p68_p3) }
  0x14   : > { %210 = vst [vmem:[%s2281_s30 + $0x8] sm:$0xf] (%p68_p3), %v209_v2  ;;  %212 = vst [vmem:[%s2281_s30 + $0xc] sm:$0xf] (%p68_p3), %v211_v3  ;;  %v217_v6 = vld [vmem:[%s2274_s29 + $0x30] sm:$0xf] (%p68_p3) }
  0x15   : > { %214 = vst [vmem:[%s2281_s30 + $0x10] sm:$0xf] %v213_v4  ;;  %v219_v7 = vld [vmem:[%s2274_s29 + $0x38] sm:$0xf]  ;;  %216 = vst [vmem:[%s2281_s30 + $0x14] sm:$0xf] %v215_v5 }
  0x16   : > { %218 = vst [vmem:[%s2281_s30 + $0x18] sm:$0xf] %v217_v6  ;;  %220 = vst [vmem:[%s2281_s30 + $0x1c] sm:$0xf] %v219_v7  ;;  %v221_v8 = vld [vmem:[%s2274_s29 + $0x40] sm:$0xf] }
  0x17   : > { %v223_v9 = vld [vmem:[%s2274_s29 + $0x48] sm:$0xf]  ;;  %v225_v10 = vld [vmem:[%s2274_s29 + $0x50] sm:$0xf]  ;;  %222 = vst [vmem:[%s2281_s30 + $0x20] sm:$0xf] %v221_v8 }
  0x18   : > { %224 = vst [vmem:[%s2281_s30 + $0x24] sm:$0xf] %v223_v9  ;;  %226 = vst [vmem:[%s2281_s30 + $0x28] sm:$0xf] %v225_v10  ;;  %v227_v11 = vld [vmem:[%s2274_s29 + $0x58] sm:$0xf] }
  0x19   : > { %v229_v12 = vld [vmem:[%s2274_s29 + $0x60] sm:$0xf]  ;;  %v231_v13 = vld [vmem:[%s2274_s29 + $0x68] sm:$0xf]  ;;  %228 = vst [vmem:[%s2281_s30 + $0x2c] sm:$0xf] %v227_v11 }
  0x1a   : > { %230 = vst [vmem:[%s2281_s30 + $0x30] sm:$0xf] %v229_v12  ;;  %232 = vst [vmem:[%s2281_s30 + $0x34] sm:$0xf] %v231_v13  ;;  %v233_v14 = vld [vmem:[%s2274_s29 + $0x70] sm:$0xf] }
  0x1b   : > { %v235_v15 = vld [vmem:[%s2274_s29 + $0x78] sm:$0xf]  ;;  %v237_v16 = vld [vmem:[%s2274_s29 + $0x80] sm:$0xf]  ;;  %234 = vst [vmem:[%s2281_s30 + $0x38] sm:$0xf] %v233_v14 }
  0x1c   : > { %236 = vst [vmem:[%s2281_s30 + $0x3c] sm:$0xf] %v235_v15  ;;  %238 = vst [vmem:[%s2281_s30 + $0x40] sm:$0xf] %v237_v16  ;;  %v239_v17 = vld [vmem:[%s2274_s29 + $0x88] sm:$0xf] }
  0x1d   : > { %v241_v18 = vld [vmem:[%s2274_s29 + $0x90] sm:$0xf]  ;;  %v243_v19 = vld [vmem:[%s2274_s29 + $0x98] sm:$0xf]  ;;  %240 = vst [vmem:[%s2281_s30 + $0x44] sm:$0xf] %v239_v17 }
  0x1e   : > { %242 = vst [vmem:[%s2281_s30 + $0x48] sm:$0xf] %v241_v18  ;;  %244 = vst [vmem:[%s2281_s30 + $0x4c] sm:$0xf] %v243_v19  ;;  %v245_v20 = vld [vmem:[%s2274_s29 + $0xa0] sm:$0xf] }
  0x1f   : > { %v247_v21 = vld [vmem:[%s2274_s29 + $0xa8] sm:$0xf]  ;;  %v249_v22 = vld [vmem:[%s2274_s29 + $0xb0] sm:$0xf]  ;;  %246 = vst [vmem:[%s2281_s30 + $0x50] sm:$0xf] %v245_v20 }
  0x20   : > { %248 = vst [vmem:[%s2281_s30 + $0x54] sm:$0xf] %v247_v21  ;;  %250 = vst [vmem:[%s2281_s30 + $0x58] sm:$0xf] %v249_v22  ;;  %v251_v23 = vld [vmem:[%s2274_s29 + $0xb8] sm:$0xf] }
  0x21   : > { %v253_v24 = vld [vmem:[%s2274_s29 + $0xc0] sm:$0xf]  ;;  %v255_v25 = vld [vmem:[%s2274_s29 + $0xc8] sm:$0xf]  ;;  %252 = vst [vmem:[%s2281_s30 + $0x5c] sm:$0xf] %v251_v23 }
  0x22   : > { %254 = vst [vmem:[%s2281_s30 + $0x60] sm:$0xf] %v253_v24  ;;  %256 = vst [vmem:[%s2281_s30 + $0x64] sm:$0xf] %v255_v25  ;;  %v257_v26 = vld [vmem:[%s2274_s29 + $0xd0] sm:$0xf] }
  0x23   : > { %v259_v27 = vld [vmem:[%s2274_s29 + $0xd8] sm:$0xf]  ;;  %v261_v28 = vld [vmem:[%s2274_s29 + $0xe0] sm:$0xf]  ;;  %258 = vst [vmem:[%s2281_s30 + $0x68] sm:$0xf] %v257_v26 }
  0x24   : > { %260 = vst [vmem:[%s2281_s30 + $0x6c] sm:$0xf] %v259_v27  ;;  %262 = vst [vmem:[%s2281_s30 + $0x70] sm:$0xf] %v261_v28  ;;  %v263_v29 = vld [vmem:[%s2274_s29 + $0xe8] sm:$0xf] }
  0x25   : > { %v265_v30 = vld [vmem:[%s2274_s29 + $0xf0] sm:$0xf]  ;;  %v267_v31 = vld [vmem:[%s2274_s29 + $0xf8] sm:$0xf]  ;;  %264 = vst [vmem:[%s2281_s30 + $0x74] sm:$0xf] %v263_v29 }
  0x26   : > { %266 = vst [vmem:[%s2281_s30 + $0x78] sm:$0xf] %v265_v30  ;;  %268 = vst [vmem:[%s2281_s30 + $0x7c] sm:$0xf] %v267_v31  ;;  %v269_v32 = vld [vmem:[%s2274_s29 + $0x100] sm:$0xf] }
  0x27   : > { %v271_v33 = vld [vmem:[%s2274_s29 + $0x108] sm:$0xf]  ;;  %v273_v34 = vld [vmem:[%s2274_s29 + $0x110] sm:$0xf]  ;;  %270 = vst [vmem:[%s2281_s30 + $0x80] sm:$0xf] %v269_v32 }
  0x28   : > { %272 = vst [vmem:[%s2281_s30 + $0x84] sm:$0xf] %v271_v33  ;;  %274 = vst [vmem:[%s2281_s30 + $0x88] sm:$0xf] %v273_v34  ;;  %v275_v35 = vld [vmem:[%s2274_s29 + $0x118] sm:$0xf] }
  0x29   : > { %v277_v36 = vld [vmem:[%s2274_s29 + $0x120] sm:$0xf]  ;;  %v279_v37 = vld [vmem:[%s2274_s29 + $0x128] sm:$0xf]  ;;  %276 = vst [vmem:[%s2281_s30 + $0x8c] sm:$0xf] %v275_v35 }
  0x2a   : > { %278 = vst [vmem:[%s2281_s30 + $0x90] sm:$0xf] %v277_v36  ;;  %280 = vst [vmem:[%s2281_s30 + $0x94] sm:$0xf] %v279_v37  ;;  %v281_v38 = vld [vmem:[%s2274_s29 + $0x130] sm:$0xf] }
  0x2b   : > { %v283_v39 = vld [vmem:[%s2274_s29 + $0x138] sm:$0xf]  ;;  %v285_v40 = vld [vmem:[%s2274_s29 + $0x140] sm:$0xf]  ;;  %282 = vst [vmem:[%s2281_s30 + $0x98] sm:$0xf] %v281_v38 }
  0x2c   : > { %284 = vst [vmem:[%s2281_s30 + $0x9c] sm:$0xf] %v283_v39  ;;  %286 = vst [vmem:[%s2281_s30 + $0xa0] sm:$0xf] %v285_v40  ;;  %v287_v41 = vld [vmem:[%s2274_s29 + $0x148] sm:$0xf] }
  0x2d   : > { %v289_v42 = vld [vmem:[%s2274_s29 + $0x150] sm:$0xf]  ;;  %v291_v43 = vld [vmem:[%s2274_s29 + $0x158] sm:$0xf]  ;;  %288 = vst [vmem:[%s2281_s30 + $0xa4] sm:$0xf] %v287_v41 }
  0x2e   : > { %290 = vst [vmem:[%s2281_s30 + $0xa8] sm:$0xf] %v289_v42  ;;  %292 = vst [vmem:[%s2281_s30 + $0xac] sm:$0xf] %v291_v43  ;;  %v293_v44 = vld [vmem:[%s2274_s29 + $0x160] sm:$0xf] }
  0x2f   : > { %v295_v45 = vld [vmem:[%s2274_s29 + $0x168] sm:$0xf]  ;;  %v297_v46 = vld [vmem:[%s2274_s29 + $0x170] sm:$0xf]  ;;  %294 = vst [vmem:[%s2281_s30 + $0xb0] sm:$0xf] %v293_v44 }
  0x30   : > { %296 = vst [vmem:[%s2281_s30 + $0xb4] sm:$0xf] %v295_v45  ;;  %298 = vst [vmem:[%s2281_s30 + $0xb8] sm:$0xf] %v297_v46  ;;  %v299_v47 = vld [vmem:[%s2274_s29 + $0x178] sm:$0xf] }
  0x31   : > { %v301_v48 = vld [vmem:[%s2274_s29 + $0x180] sm:$0xf]  ;;  %v303_v49 = vld [vmem:[%s2274_s29 + $0x188] sm:$0xf]  ;;  %300 = vst [vmem:[%s2281_s30 + $0xbc] sm:$0xf] %v299_v47 }
  0x32   : > { %302 = vst [vmem:[%s2281_s30 + $0xc0] sm:$0xf] %v301_v48  ;;  %304 = vst [vmem:[%s2281_s30 + $0xc4] sm:$0xf] %v303_v49  ;;  %v305_v50 = vld [vmem:[%s2274_s29 + $0x190] sm:$0xf] }
  0x33   : > { %v307_v51 = vld [vmem:[%s2274_s29 + $0x198] sm:$0xf]  ;;  %v309_v52 = vld [vmem:[%s2274_s29 + $0x1a0] sm:$0xf]  ;;  %306 = vst [vmem:[%s2281_s30 + $0xc8] sm:$0xf] %v305_v50 }
  0x34   : > { %308 = vst [vmem:[%s2281_s30 + $0xcc] sm:$0xf] %v307_v51  ;;  %310 = vst [vmem:[%s2281_s30 + $0xd0] sm:$0xf] %v309_v52  ;;  %v311_v53 = vld [vmem:[%s2274_s29 + $0x1a8] sm:$0xf] }
  0x35   : > { %v313_v54 = vld [vmem:[%s2274_s29 + $0x1b0] sm:$0xf]  ;;  %v315_v55 = vld [vmem:[%s2274_s29 + $0x1b8] sm:$0xf]  ;;  %312 = vst [vmem:[%s2281_s30 + $0xd4] sm:$0xf] %v311_v53 }
  0x36   : > { %314 = vst [vmem:[%s2281_s30 + $0xd8] sm:$0xf] %v313_v54  ;;  %316 = vst [vmem:[%s2281_s30 + $0xdc] sm:$0xf] %v315_v55  ;;  %v317_v56 = vld [vmem:[%s2274_s29 + $0x1c0] sm:$0xf] }
  0x37   : > { %v319_v57 = vld [vmem:[%s2274_s29 + $0x1c8] sm:$0xf]  ;;  %v321_v58 = vld [vmem:[%s2274_s29 + $0x1d0] sm:$0xf]  ;;  %318 = vst [vmem:[%s2281_s30 + $0xe0] sm:$0xf] %v317_v56 }
  0x38   : > { %320 = vst [vmem:[%s2281_s30 + $0xe4] sm:$0xf] %v319_v57  ;;  %322 = vst [vmem:[%s2281_s30 + $0xe8] sm:$0xf] %v321_v58  ;;  %v323_v59 = vld [vmem:[%s2274_s29 + $0x1d8] sm:$0xf] }
  0x39   : > { %v325_v60 = vld [vmem:[%s2274_s29 + $0x1e0] sm:$0xf]  ;;  %v327_v61 = vld [vmem:[%s2274_s29 + $0x1e8] sm:$0xf]  ;;  %324 = vst [vmem:[%s2281_s30 + $0xec] sm:$0xf] %v323_v59 }
  0x3a   : > { %326 = vst [vmem:[%s2281_s30 + $0xf0] sm:$0xf] %v325_v60  ;;  %328 = vst [vmem:[%s2281_s30 + $0xf4] sm:$0xf] %v327_v61  ;;  %v329_v62 = vld [vmem:[%s2274_s29 + $0x1f0] sm:$0xf] }
  0x3b   : > { %v331_v63 = vld [vmem:[%s2274_s29 + $0x1f8] sm:$0xf]  ;;  %v333_v0 = vld [vmem:[%s2274_s29 + $0x200] sm:$0xf]  ;;  %330 = vst [vmem:[%s2281_s30 + $0xf8] sm:$0xf] %v329_v62 }
  0x3c   : > { %332 = vst [vmem:[%s2281_s30 + $0xfc] sm:$0xf] %v331_v63  ;;  %334 = vst [vmem:[%s2281_s30 + $0x100] sm:$0xf] %v333_v0  ;;  %v335_v1 = vld [vmem:[%s2274_s29 + $0x208] sm:$0xf] }
  0x3d   : > { %v337_v2 = vld [vmem:[%s2274_s29 + $0x210] sm:$0xf]  ;;  %v339_v3 = vld [vmem:[%s2274_s29 + $0x218] sm:$0xf]  ;;  %336 = vst [vmem:[%s2281_s30 + $0x104] sm:$0xf] %v335_v1 }
  0x3e   : > { %338 = vst [vmem:[%s2281_s30 + $0x108] sm:$0xf] %v337_v2  ;;  %340 = vst [vmem:[%s2281_s30 + $0x10c] sm:$0xf] %v339_v3  ;;  %v341_v4 = vld [vmem:[%s2274_s29 + $0x220] sm:$0xf] }
  0x3f   : > { %v343_v5 = vld [vmem:[%s2274_s29 + $0x228] sm:$0xf]  ;;  %v345_v6 = vld [vmem:[%s2274_s29 + $0x230] sm:$0xf]  ;;  %342 = vst [vmem:[%s2281_s30 + $0x110] sm:$0xf] %v341_v4 }
  0x40   : > { %344 = vst [vmem:[%s2281_s30 + $0x114] sm:$0xf] %v343_v5  ;;  %346 = vst [vmem:[%s2281_s30 + $0x118] sm:$0xf] %v345_v6  ;;  %v347_v7 = vld [vmem:[%s2274_s29 + $0x238] sm:$0xf] }
  0x41   : > { %v349_v8 = vld [vmem:[%s2274_s29 + $0x240] sm:$0xf]  ;;  %v351_v9 = vld [vmem:[%s2274_s29 + $0x248] sm:$0xf]  ;;  %348 = vst [vmem:[%s2281_s30 + $0x11c] sm:$0xf] %v347_v7 }
  0x42   : > { %350 = vst [vmem:[%s2281_s30 + $0x120] sm:$0xf] %v349_v8  ;;  %352 = vst [vmem:[%s2281_s30 + $0x124] sm:$0xf] %v351_v9  ;;  %v353_v10 = vld [vmem:[%s2274_s29 + $0x250] sm:$0xf] }
  0x43   : > { %v355_v11 = vld [vmem:[%s2274_s29 + $0x258] sm:$0xf]  ;;  %v357_v12 = vld [vmem:[%s2274_s29 + $0x260] sm:$0xf]  ;;  %354 = vst [vmem:[%s2281_s30 + $0x128] sm:$0xf] %v353_v10 }
  0x44   : > { %356 = vst [vmem:[%s2281_s30 + $0x12c] sm:$0xf] %v355_v11  ;;  %358 = vst [vmem:[%s2281_s30 + $0x130] sm:$0xf] %v357_v12  ;;  %v359_v13 = vld [vmem:[%s2274_s29 + $0x268] sm:$0xf] }
  0x45   : > { %v361_v14 = vld [vmem:[%s2274_s29 + $0x270] sm:$0xf]  ;;  %v363_v15 = vld [vmem:[%s2274_s29 + $0x278] sm:$0xf]  ;;  %360 = vst [vmem:[%s2281_s30 + $0x134] sm:$0xf] %v359_v13 }
  0x46   : > { %362 = vst [vmem:[%s2281_s30 + $0x138] sm:$0xf] %v361_v14  ;;  %364 = vst [vmem:[%s2281_s30 + $0x13c] sm:$0xf] %v363_v15  ;;  %v365_v16 = vld [vmem:[%s2274_s29 + $0x280] sm:$0xf] }
  0x47   : > { %v367_v17 = vld [vmem:[%s2274_s29 + $0x288] sm:$0xf]  ;;  %v369_v18 = vld [vmem:[%s2274_s29 + $0x290] sm:$0xf]  ;;  %366 = vst [vmem:[%s2281_s30 + $0x140] sm:$0xf] %v365_v16 }
  0x48   : > { %368 = vst [vmem:[%s2281_s30 + $0x144] sm:$0xf] %v367_v17  ;;  %370 = vst [vmem:[%s2281_s30 + $0x148] sm:$0xf] %v369_v18  ;;  %v371_v19 = vld [vmem:[%s2274_s29 + $0x298] sm:$0xf] }
  0x49   : > { %v373_v20 = vld [vmem:[%s2274_s29 + $0x2a0] sm:$0xf]  ;;  %v375_v21 = vld [vmem:[%s2274_s29 + $0x2a8] sm:$0xf]  ;;  %372 = vst [vmem:[%s2281_s30 + $0x14c] sm:$0xf] %v371_v19 }
  0x4a   : > { %374 = vst [vmem:[%s2281_s30 + $0x150] sm:$0xf] %v373_v20  ;;  %376 = vst [vmem:[%s2281_s30 + $0x154] sm:$0xf] %v375_v21  ;;  %v377_v22 = vld [vmem:[%s2274_s29 + $0x2b0] sm:$0xf] }
  0x4b   : > { %v379_v23 = vld [vmem:[%s2274_s29 + $0x2b8] sm:$0xf]  ;;  %v381_v24 = vld [vmem:[%s2274_s29 + $0x2c0] sm:$0xf]  ;;  %378 = vst [vmem:[%s2281_s30 + $0x158] sm:$0xf] %v377_v22 }
  0x4c   : > { %380 = vst [vmem:[%s2281_s30 + $0x15c] sm:$0xf] %v379_v23  ;;  %382 = vst [vmem:[%s2281_s30 + $0x160] sm:$0xf] %v381_v24  ;;  %v383_v25 = vld [vmem:[%s2274_s29 + $0x2c8] sm:$0xf] }
  0x4d   : > { %v385_v26 = vld [vmem:[%s2274_s29 + $0x2d0] sm:$0xf]  ;;  %v387_v27 = vld [vmem:[%s2274_s29 + $0x2d8] sm:$0xf]  ;;  %384 = vst [vmem:[%s2281_s30 + $0x164] sm:$0xf] %v383_v25 }
  0x4e   : > { %386 = vst [vmem:[%s2281_s30 + $0x168] sm:$0xf] %v385_v26  ;;  %388 = vst [vmem:[%s2281_s30 + $0x16c] sm:$0xf] %v387_v27  ;;  %v389_v28 = vld [vmem:[%s2274_s29 + $0x2e0] sm:$0xf] }
  0x4f   : > { %v391_v29 = vld [vmem:[%s2274_s29 + $0x2e8] sm:$0xf]  ;;  %v393_v30 = vld [vmem:[%s2274_s29 + $0x2f0] sm:$0xf]  ;;  %390 = vst [vmem:[%s2281_s30 + $0x170] sm:$0xf] %v389_v28 }
  0x50   : > { %392 = vst [vmem:[%s2281_s30 + $0x174] sm:$0xf] %v391_v29  ;;  %394 = vst [vmem:[%s2281_s30 + $0x178] sm:$0xf] %v393_v30  ;;  %v395_v31 = vld [vmem:[%s2274_s29 + $0x2f8] sm:$0xf] }
  0x51   : > { %v397_v32 = vld [vmem:[%s2274_s29 + $0x300] sm:$0xf]  ;;  %v399_v33 = vld [vmem:[%s2274_s29 + $0x308] sm:$0xf]  ;;  %396 = vst [vmem:[%s2281_s30 + $0x17c] sm:$0xf] %v395_v31 }
  0x52   : > { %398 = vst [vmem:[%s2281_s30 + $0x180] sm:$0xf] %v397_v32  ;;  %400 = vst [vmem:[%s2281_s30 + $0x184] sm:$0xf] %v399_v33  ;;  %v401_v34 = vld [vmem:[%s2274_s29 + $0x310] sm:$0xf] }
  0x53   : > { %v403_v35 = vld [vmem:[%s2274_s29 + $0x318] sm:$0xf]  ;;  %v405_v36 = vld [vmem:[%s2274_s29 + $0x320] sm:$0xf]  ;;  %402 = vst [vmem:[%s2281_s30 + $0x188] sm:$0xf] %v401_v34 }
  0x54   : > { %404 = vst [vmem:[%s2281_s30 + $0x18c] sm:$0xf] %v403_v35  ;;  %406 = vst [vmem:[%s2281_s30 + $0x190] sm:$0xf] %v405_v36  ;;  %v407_v37 = vld [vmem:[%s2274_s29 + $0x328] sm:$0xf] }
  0x55   : > { %v409_v38 = vld [vmem:[%s2274_s29 + $0x330] sm:$0xf]  ;;  %v411_v39 = vld [vmem:[%s2274_s29 + $0x338] sm:$0xf]  ;;  %408 = vst [vmem:[%s2281_s30 + $0x194] sm:$0xf] %v407_v37 }
  0x56   : > { %410 = vst [vmem:[%s2281_s30 + $0x198] sm:$0xf] %v409_v38  ;;  %412 = vst [vmem:[%s2281_s30 + $0x19c] sm:$0xf] %v411_v39  ;;  %v413_v40 = vld [vmem:[%s2274_s29 + $0x340] sm:$0xf] }
  0x57   : > { %v415_v41 = vld [vmem:[%s2274_s29 + $0x348] sm:$0xf]  ;;  %v417_v42 = vld [vmem:[%s2274_s29 + $0x350] sm:$0xf]  ;;  %414 = vst [vmem:[%s2281_s30 + $0x1a0] sm:$0xf] %v413_v40 }
  0x58   : > { %416 = vst [vmem:[%s2281_s30 + $0x1a4] sm:$0xf] %v415_v41  ;;  %418 = vst [vmem:[%s2281_s30 + $0x1a8] sm:$0xf] %v417_v42  ;;  %v419_v43 = vld [vmem:[%s2274_s29 + $0x358] sm:$0xf] }
  0x59   : > { %v421_v44 = vld [vmem:[%s2274_s29 + $0x360] sm:$0xf]  ;;  %v423_v45 = vld [vmem:[%s2274_s29 + $0x368] sm:$0xf]  ;;  %420 = vst [vmem:[%s2281_s30 + $0x1ac] sm:$0xf] %v419_v43 }
  0x5a   : > { %422 = vst [vmem:[%s2281_s30 + $0x1b0] sm:$0xf] %v421_v44  ;;  %424 = vst [vmem:[%s2281_s30 + $0x1b4] sm:$0xf] %v423_v45  ;;  %v425_v46 = vld [vmem:[%s2274_s29 + $0x370] sm:$0xf] }
  0x5b   : > { %v427_v47 = vld [vmem:[%s2274_s29 + $0x378] sm:$0xf]  ;;  %v429_v48 = vld [vmem:[%s2274_s29 + $0x380] sm:$0xf]  ;;  %426 = vst [vmem:[%s2281_s30 + $0x1b8] sm:$0xf] %v425_v46 }
  0x5c   : > { %428 = vst [vmem:[%s2281_s30 + $0x1bc] sm:$0xf] %v427_v47  ;;  %430 = vst [vmem:[%s2281_s30 + $0x1c0] sm:$0xf] %v429_v48  ;;  %v431_v49 = vld [vmem:[%s2274_s29 + $0x388] sm:$0xf] }
  0x5d   : > { %v433_v50 = vld [vmem:[%s2274_s29 + $0x390] sm:$0xf]  ;;  %v435_v51 = vld [vmem:[%s2274_s29 + $0x398] sm:$0xf]  ;;  %432 = vst [vmem:[%s2281_s30 + $0x1c4] sm:$0xf] %v431_v49 }
  0x5e   : > { %434 = vst [vmem:[%s2281_s30 + $0x1c8] sm:$0xf] %v433_v50  ;;  %436 = vst [vmem:[%s2281_s30 + $0x1cc] sm:$0xf] %v435_v51  ;;  %v437_v52 = vld [vmem:[%s2274_s29 + $0x3a0] sm:$0xf] }
  0x5f   : > { %v439_v53 = vld [vmem:[%s2274_s29 + $0x3a8] sm:$0xf]  ;;  %v441_v54 = vld [vmem:[%s2274_s29 + $0x3b0] sm:$0xf]  ;;  %438 = vst [vmem:[%s2281_s30 + $0x1d0] sm:$0xf] %v437_v52 }
  0x60   : > { %440 = vst [vmem:[%s2281_s30 + $0x1d4] sm:$0xf] %v439_v53  ;;  %442 = vst [vmem:[%s2281_s30 + $0x1d8] sm:$0xf] %v441_v54  ;;  %v443_v55 = vld [vmem:[%s2274_s29 + $0x3b8] sm:$0xf] }
  0x61   : > { %v445_v56 = vld [vmem:[%s2274_s29 + $0x3c0] sm:$0xf]  ;;  %v447_v57 = vld [vmem:[%s2274_s29 + $0x3c8] sm:$0xf]  ;;  %444 = vst [vmem:[%s2281_s30 + $0x1dc] sm:$0xf] %v443_v55 }
  0x62   : > { %446 = vst [vmem:[%s2281_s30 + $0x1e0] sm:$0xf] %v445_v56  ;;  %448 = vst [vmem:[%s2281_s30 + $0x1e4] sm:$0xf] %v447_v57  ;;  %v449_v58 = vld [vmem:[%s2274_s29 + $0x3d0] sm:$0xf] }
  0x63   : > { %v451_v59 = vld [vmem:[%s2274_s29 + $0x3d8] sm:$0xf]  ;;  %v453_v60 = vld [vmem:[%s2274_s29 + $0x3e0] sm:$0xf]  ;;  %450 = vst [vmem:[%s2281_s30 + $0x1e8] sm:$0xf] %v449_v58 }
  0x64   : > { %452 = vst [vmem:[%s2281_s30 + $0x1ec] sm:$0xf] %v451_v59  ;;  %454 = vst [vmem:[%s2281_s30 + $0x1f0] sm:$0xf] %v453_v60  ;;  %v455_v61 = vld [vmem:[%s2274_s29 + $0x3e8] sm:$0xf] }
  0x65   : > { %v457_v62 = vld [vmem:[%s2274_s29 + $0x3f0] sm:$0xf]  ;;  %v459_v63 = vld [vmem:[%s2274_s29 + $0x3f8] sm:$0xf]  ;;  %456 = vst [vmem:[%s2281_s30 + $0x1f4] sm:$0xf] %v455_v61 }
  0x66   : > { %458 = vst [vmem:[%s2281_s30 + $0x1f8] sm:$0xf] %v457_v62  ;;  %460 = vst [vmem:[%s2281_s30 + $0x1fc] sm:$0xf] %v459_v63  ;;  %v461_v0 = vld [vmem:[%s2274_s29 + $0x400] sm:$0xf] }
  0x67   : > { %v463_v1 = vld [vmem:[%s2274_s29 + $0x408] sm:$0xf]  ;;  %v465_v2 = vld [vmem:[%s2274_s29 + $0x410] sm:$0xf]  ;;  %462 = vst [vmem:[%s2281_s30 + $0x200] sm:$0xf] %v461_v0 }
  0x68   : > { %464 = vst [vmem:[%s2281_s30 + $0x204] sm:$0xf] %v463_v1  ;;  %466 = vst [vmem:[%s2281_s30 + $0x208] sm:$0xf] %v465_v2  ;;  %v467_v3 = vld [vmem:[%s2274_s29 + $0x418] sm:$0xf] }
  0x69   : > { %v469_v4 = vld [vmem:[%s2274_s29 + $0x420] sm:$0xf]  ;;  %v471_v5 = vld [vmem:[%s2274_s29 + $0x428] sm:$0xf]  ;;  %468 = vst [vmem:[%s2281_s30 + $0x20c] sm:$0xf] %v467_v3 }
  0x6a   : > { %470 = vst [vmem:[%s2281_s30 + $0x210] sm:$0xf] %v469_v4  ;;  %472 = vst [vmem:[%s2281_s30 + $0x214] sm:$0xf] %v471_v5  ;;  %v473_v6 = vld [vmem:[%s2274_s29 + $0x430] sm:$0xf] }
  0x6b   : > { %v475_v7 = vld [vmem:[%s2274_s29 + $0x438] sm:$0xf]  ;;  %v477_v8 = vld [vmem:[%s2274_s29 + $0x440] sm:$0xf]  ;;  %474 = vst [vmem:[%s2281_s30 + $0x218] sm:$0xf] %v473_v6 }
  0x6c   : > { %476 = vst [vmem:[%s2281_s30 + $0x21c] sm:$0xf] %v475_v7  ;;  %478 = vst [vmem:[%s2281_s30 + $0x220] sm:$0xf] %v477_v8  ;;  %v479_v9 = vld [vmem:[%s2274_s29 + $0x448] sm:$0xf] }
  0x6d   : > { %v481_v10 = vld [vmem:[%s2274_s29 + $0x450] sm:$0xf]  ;;  %v483_v11 = vld [vmem:[%s2274_s29 + $0x458] sm:$0xf]  ;;  %480 = vst [vmem:[%s2281_s30 + $0x224] sm:$0xf] %v479_v9 }
  0x6e   : > { %482 = vst [vmem:[%s2281_s30 + $0x228] sm:$0xf] %v481_v10  ;;  %484 = vst [vmem:[%s2281_s30 + $0x22c] sm:$0xf] %v483_v11  ;;  %v485_v12 = vld [vmem:[%s2274_s29 + $0x460] sm:$0xf] }
  0x6f   : > { %v487_v13 = vld [vmem:[%s2274_s29 + $0x468] sm:$0xf]  ;;  %v489_v14 = vld [vmem:[%s2274_s29 + $0x470] sm:$0xf]  ;;  %486 = vst [vmem:[%s2281_s30 + $0x230] sm:$0xf] %v485_v12 }
  0x70   : > { %488 = vst [vmem:[%s2281_s30 + $0x234] sm:$0xf] %v487_v13  ;;  %490 = vst [vmem:[%s2281_s30 + $0x238] sm:$0xf] %v489_v14  ;;  %v491_v15 = vld [vmem:[%s2274_s29 + $0x478] sm:$0xf] }
  0x71   : > { %492 = vst [vmem:[%s2281_s30 + $0x23c] sm:$0xf] %v491_v15 }
  0x72 PF: > { %p1835_p6 = scmp.ge.s32.totalorder %s2202_s19, 1  ;;  %p814_p7 = scmp.lt.s32.totalorder %s2202_s19, 3 }
  0x74   : > { %p815_p8 = pnand %p1835_p6, %p814_p7 }
  0x75   : > { %s821_s5 = sand.u32 (!%p815_p8), 1, %s2186_s15   ;;  %v2572_v16 = vld [vmem:[%s2708_s0] sm:$0xff] (!%p815_p8)  ;;  %v2577_v17 = vld [vmem:[%s2708_s0 + $0x8] sm:$0xff] (!%p815_p8)  ;;  %v2617_v49 = vld [vmem:[%s2708_s0 + $0x10] sm:$0xff] (!%p815_p8)  ;;  %vm2205_vm0 = vmmov (!%p815_p8), 0   ;;  %p865_p9 = scmp.lt.s32.totalorder (!%p815_p8), %s2194_s17, 1 }
  0x76   : > { %818 = sbr.rel (%p815_p8) target bundleno = 443 (0x1bb), region = 73  ;;  %v1838_v18 = vcombine.high (!%p815_p8), %v2572_v16, %v2572_v16  ;;  %v1840_v19 = vcombine.high (!%p815_p8), %v2577_v17, %v2577_v17  ;;  %v2624_v52 = vld [vmem:[%s2708_s0 + $0x18] sm:$0xff] (!%p815_p8)  ;;  %v1837_v54 = vcombine.low (!%p815_p8), %v2572_v16, %v2572_v16  ;;  %v1839_v55 = vcombine.low (!%p815_p8), %v2577_v17, %v2577_v17 }
  0x77   : > { %s2040_s10 = smul.u32 (!%p815_p8), 576, %s821_s5  ;;  %v1842_v58 = vcombine.high (!%p815_p8), %v2617_v49, %v2617_v49  ;;  %v1844_v61 = vcombine.high (!%p815_p8), %v2624_v52, %v2624_v52 }
  0x78   : > { %1525 = vmatprep.mubr.bf16.mxu0 (!%p815_p8), %v1838_v18  ;;  %1565 = vmatprep.mubr.bf16.mxu1 (!%p815_p8), %v1840_v19 }
  0x79   : > { %s2583_s11 = scalar_lea.vmem (!%p815_p8), [#allocation2], %s2040_s10 }
  0x7a   : > { %v2083_v20 = vld [vmem:[%s2583_s11 + $0x40] sm:$0xff] (!%p815_p8)   ;;  %v2087_v24 = vld [vmem:[%s2583_s11 + $0x48] sm:$0xff] (!%p815_p8)   ;;  %v2091_v28 = vld [vmem:[%s2583_s11 + $0x50] sm:$0xff] (!%p815_p8)  }
  0x7b   : > { %v2084_v21 = vld [vmem:[%s2583_s11 + $0xc0] sm:$0xff] (!%p815_p8)   ;;  %1922 = vmatprep.subr.bf16.mxu0 (!%p815_p8), %v2083_v20  ;;  %v2088_v25 = vld [vmem:[%s2583_s11 + $0xc8] sm:$0xff] (!%p815_p8)   ;;  %v2092_v29 = vld [vmem:[%s2583_s11 + $0xd0] sm:$0xff] (!%p815_p8)  }
  0x7c   : > { %v2085_v22 = vld [vmem:[%s2583_s11] sm:$0xff] (!%p815_p8)   ;;  %1944 = vmatprep.subr.bf16.mxu1 (!%p815_p8), %v2084_v21  ;;  %v2089_v26 = vld [vmem:[%s2583_s11 + $0x8] sm:$0xff] (!%p815_p8)   ;;  %v2093_v30 = vld [vmem:[%s2583_s11 + $0x10] sm:$0xff] (!%p815_p8)  }
  0x7d   : > { %v2086_v23 = vld [vmem:[%s2583_s11 + $0x80] sm:$0xff]   ;;  %1923 = vmatpush3.bf16.msra.mxu0 %v2085_v22  ;;  %v2090_v27 = vld [vmem:[%s2583_s11 + $0x88] sm:$0xff]   ;;  %v2094_v31 = vld [vmem:[%s2583_s11 + $0x90] sm:$0xff]   ;;  %s2720_s17 = smov (!%p865_p9, %s2194_s17), 1 }
  0x7e   : > { %1945 = vmatpush3.bf16.msra.mxu1 %v2086_v23  ;;  %1924 = vmatprep.subr.bf16.mxu0 %v2087_v24  ;;  %v2095_v32 = vld [vmem:[%s2583_s11 + $0x58] sm:$0xff]   ;;  %v2099_v36 = vld [vmem:[%s2583_s11 + $0x60] sm:$0xff]   ;;  %v2103_v40 = vld [vmem:[%s2583_s11 + $0x68] sm:$0xff]   ;;  %s867_s26 = scalar_lea.vmem %s2710_s2, %s2720_s17  ;;  %s870_s29 = scalar_lea.vmem %s2711_s3, %s2720_s17 }
  0x7f   : > { %1946 = vmatprep.subr.bf16.mxu1 %v2088_v25  ;;  %v2096_v33 = vld [vmem:[%s2583_s11 + $0xd8] sm:$0xff]   ;;  %v2100_v37 = vld [vmem:[%s2583_s11 + $0xe0] sm:$0xff]   ;;  %v2104_v41 = vld [vmem:[%s2583_s11 + $0xe8] sm:$0xff]   ;;  %v1841_v25 = vcombine.low %v2617_v49, %v2617_v49  ;;  %s1836_s30 = sshll.u32 %s2720_s17, 2 }
  0x80   : > { %v2097_v34 = vld [vmem:[%s2583_s11 + $0x18] sm:$0xff]   ;;  %v2101_v38 = vld [vmem:[%s2583_s11 + $0x20] sm:$0xff]   ;;  %v2105_v42 = vld [vmem:[%s2583_s11 + $0x28] sm:$0xff]   ;;  %s878_s7 = scalar_lea.vmem %s2712_s4, %s1836_s30 }
  0x81   : > { %1925 = vmatpush3.bf16.msra.mxu0 %v2089_v26  ;;  %v2098_v35 = vld [vmem:[%s2583_s11 + $0x98] sm:$0xff]   ;;  %v2102_v39 = vld [vmem:[%s2583_s11 + $0xa0] sm:$0xff]   ;;  %v2106_v43 = vld [vmem:[%s2583_s11 + $0xa8] sm:$0xff]  }
  0x82   : > { %1947 = vmatpush3.bf16.msra.mxu1 %v2090_v27  ;;  %1926 = vmatprep.subr.bf16.mxu0 %v2091_v28  ;;  %v2107_v44 = vld [vmem:[%s2583_s11 + $0x70] sm:$0xff]   ;;  %v2111_v48 = vld [vmem:[%s2583_s11 + $0x78] sm:$0xff]   ;;  %v2119_v56 = vld [vmem:[%s2583_s11 + $0x140] sm:$0xff]   ;;  %v2204_v28 = vmov 0.0  }
  0x83   : > { %1948 = vmatprep.subr.bf16.mxu1 %v2092_v29  ;;  %v2108_v45 = vld [vmem:[%s2583_s11 + $0xf0] sm:$0xff]   ;;  %v2112_v50 = vld [vmem:[%s2583_s11 + $0xf8] sm:$0xff]   ;;  %v2120_v57 = vld [vmem:[%s2583_s11 + $0x100] sm:$0xff]   ;;  %v1843_v29 = vcombine.low %v2624_v52, %v2624_v52 }
  0x84   : > { %v2109_v46 = vld [vmem:[%s2583_s11 + $0x30] sm:$0xff]   ;;  %v2113_v51 = vld [vmem:[%s2583_s11 + $0x38] sm:$0xff]   ;;  %v2121_v59 = vld [vmem:[%s2583_s11 + $0x1c0] sm:$0xff]  }
  0x85   : > { %1927 = vmatpush3.bf16.msra.mxu0 %v2093_v30  ;;  %v2110_v47 = vld [vmem:[%s2583_s11 + $0xb0] sm:$0xff]   ;;  %v2114_v53 = vld [vmem:[%s2583_s11 + $0xb8] sm:$0xff]   ;;  %v2122_v60 = vld [vmem:[%s2583_s11 + $0x180] sm:$0xff]  }
  0x86   : > { %1949 = vmatpush3.bf16.msra.mxu1 %v2094_v31  ;;  %1928 = vmatprep.subr.bf16.mxu0 %v2095_v32  ;;  %v2123_v62 = vld [vmem:[%s2583_s11 + $0x148] sm:$0xff]   ;;  %v2127_v2 = vld [vmem:[%s2583_s11 + $0x150] sm:$0xff]   ;;  %v2131_v6 = vld [vmem:[%s2583_s11 + $0x158] sm:$0xff]  }
  0x87   : > { %1950 = vmatprep.subr.bf16.mxu1 %v2096_v33  ;;  %v2124_v63 = vld [vmem:[%s2583_s11 + $0x108] sm:$0xff]   ;;  %v2128_v3 = vld [vmem:[%s2583_s11 + $0x110] sm:$0xff]   ;;  %v2132_v7 = vld [vmem:[%s2583_s11 + $0x118] sm:$0xff]  }
  0x88   : > { %v2125_v0 = vld [vmem:[%s2583_s11 + $0x1c8] sm:$0xff]   ;;  %v2129_v4 = vld [vmem:[%s2583_s11 + $0x1d0] sm:$0xff]   ;;  %v2133_v8 = vld [vmem:[%s2583_s11 + $0x1d8] sm:$0xff]  }
  0x89   : > { %1929 = vmatpush3.bf16.msra.mxu0 %v2097_v34  ;;  %v2126_v1 = vld [vmem:[%s2583_s11 + $0x188] sm:$0xff]   ;;  %v2130_v5 = vld [vmem:[%s2583_s11 + $0x190] sm:$0xff]   ;;  %v2134_v9 = vld [vmem:[%s2583_s11 + $0x198] sm:$0xff]  }
  0x8a   : > { %1951 = vmatpush3.bf16.msra.mxu1 %v2098_v35  ;;  %1930 = vmatprep.subr.bf16.mxu0 %v2099_v36  ;;  %v2135_v10 = vld [vmem:[%s2583_s11 + $0x160] sm:$0xff]   ;;  %v2139_v14 = vld [vmem:[%s2583_s11 + $0x168] sm:$0xff]   ;;  %v2143_v18 = vld [vmem:[%s2583_s11 + $0x170] sm:$0xff]  }
  0x8b   : > { %1952 = vmatprep.subr.bf16.mxu1 %v2100_v37  ;;  %v2136_v11 = vld [vmem:[%s2583_s11 + $0x120] sm:$0xff]   ;;  %v2140_v15 = vld [vmem:[%s2583_s11 + $0x128] sm:$0xff]   ;;  %v2144_v19 = vld [vmem:[%s2583_s11 + $0x130] sm:$0xff]  }
  0x8c   : > { %v2137_v12 = vld [vmem:[%s2583_s11 + $0x1e0] sm:$0xff]   ;;  %v2141_v16 = vld [vmem:[%s2583_s11 + $0x1e8] sm:$0xff]   ;;  %v2145_v20 = vld [vmem:[%s2583_s11 + $0x1f0] sm:$0xff]  }
  0x8d   : > { %1931 = vmatpush3.bf16.msra.mxu0 %v2101_v38  ;;  %v2138_v13 = vld [vmem:[%s2583_s11 + $0x1a0] sm:$0xff]   ;;  %v2142_v17 = vld [vmem:[%s2583_s11 + $0x1a8] sm:$0xff]   ;;  %v2146_v21 = vld [vmem:[%s2583_s11 + $0x1b0] sm:$0xff]  }
  0x8e   : > { %1953 = vmatpush3.bf16.msra.mxu1 %v2102_v39  ;;  %1932 = vmatprep.subr.bf16.mxu0 %v2103_v40  ;;  %v2147_v22 = vld [vmem:[%s2583_s11 + $0x178] sm:$0xff]   ;;  %v2155_v27 = vld [vmem:[%s2583_s11 + $0x200] sm:$0xff]   ;;  %v2156_v30 = vld [vmem:[%s2583_s11 + $0x208] sm:$0xff]  }
  0x8f   : > { %1954 = vmatprep.subr.bf16.mxu1 %v2104_v41  ;;  %v2148_v23 = vld [vmem:[%s2583_s11 + $0x138] sm:$0xff]   ;;  %v2157_v31 = vld [vmem:[%s2583_s11 + $0x210] sm:$0xff]   ;;  %v2159_v33 = vld [vmem:[%s2583_s11 + $0x220] sm:$0xff]  }
  0x90   : > { %v2149_v24 = vld [vmem:[%s2583_s11 + $0x1f8] sm:$0xff]   ;;  %v2160_v34 = vld [vmem:[%s2583_s11 + $0x228] sm:$0xff]   ;;  %v2161_v35 = vld [vmem:[%s2583_s11 + $0x230] sm:$0xff]  }
  0x91   : > { %1933 = vmatpush3.bf16.msra.mxu0 %v2105_v42  ;;  %v2152_v26 = vld [vmem:[%s2583_s11 + $0x1b8] sm:$0xff]   ;;  %v2163_v37 = vld [vmem:[%s2708_s0 + $0x20] ss:$0 sps:$4 sm:$0xff]  }
  0x92   : > { %1955 = vmatpush3.bf16.msra.mxu1 %v2106_v43  ;;  %1934 = vmatprep.subr.bf16.mxu0 %v2107_v44  ;;  %v2158_v32 = vld [vmem:[%s2583_s11 + $0x218] sm:$0xff]  }
  0x93   : > { %1956 = vmatprep.subr.bf16.mxu1 %v2108_v45  ;;  %v2162_v36 = vld [vmem:[%s2583_s11 + $0x238] sm:$0xff]  }
  0x95   : > { %1935 = vmatpush3.bf16.msra.mxu0 %v2109_v46 }
  0x96   : > { %1957 = vmatpush3.bf16.msra.mxu1 %v2110_v47  ;;  %1936 = vmatprep.subr.bf16.mxu0 %v2111_v48 }
  0x97   : > { %1958 = vmatprep.subr.bf16.mxu1 %v2112_v50 }
  0x99   : > { %1937 = vmatpush3.bf16.msra.mxu0 %v2113_v51 }
  0x9a   : > { %1959 = vmatpush3.bf16.msra.mxu1 %v2114_v53  ;;  %1966 = vmatprep.subr.bf16.mxu0 %v2119_v56 }
  0x9b   : > { %1988 = vmatprep.subr.bf16.mxu1 %v2121_v59 }
  0x9c   : > { %1526 = vmatmul.mubr.bf16.vlgmr.msra.gmra.mrb[0].mxu0 %v1837_v54 }
  0x9d   : > { %1566 = vmatmul.mubr.bf16.vlgmr.msra.gmra.mrb[0].mxu1 %v1839_v55  ;;  %1967 = vmatpush3.bf16.msra.mxu0 %v2120_v57 }
  0x9e   : > { %1605 = vmatprep.mubr.bf16.mxu0 %v1842_v58  ;;  %1989 = vmatpush3.bf16.msra.mxu1 %v2122_v60 }
  0x9f   : > { %1968 = vmatprep.subr.bf16.mxu0 %v2123_v62  ;;  %1645 = vmatprep.mubr.bf16.mxu1 %v1844_v61  ;;  %v1918_v62 = vld [vmem:[%s867_s26] ss:$0 sm:$0xff] }
  0xa0   : > { %1990 = vmatprep.subr.bf16.mxu1 %v2125_v0 }
  0xa1   : > { %1969 = vmatpush3.bf16.msra.mxu0 %v2124_v63 }
  0xa2   : > { %1991 = vmatpush3.bf16.msra.mxu1 %v2126_v1  ;;  %1970 = vmatprep.subr.bf16.mxu0 %v2127_v2  ;;  %v1919_v1 = vld [vmem:[%s870_s29] ss:$0 sm:$0xff] }
  0xa3   : > { %1992 = vmatprep.subr.bf16.mxu1 %v2129_v4 }
  0xa5   : > { %1971 = vmatpush3.bf16.msra.mxu0 %v2128_v3 }
  0xa6   : > { %1993 = vmatpush3.bf16.msra.mxu1 %v2130_v5  ;;  %1972 = vmatprep.subr.bf16.mxu0 %v2131_v6 }
  0xa7   : > { %1994 = vmatprep.subr.bf16.mxu1 %v2133_v8 }
  0xa9   : > { %1973 = vmatpush3.bf16.msra.mxu0 %v2132_v7 }
  0xaa   : > { %1995 = vmatpush3.bf16.msra.mxu1 %v2134_v9  ;;  %1974 = vmatprep.subr.bf16.mxu0 %v2135_v10 }
  0xab   : > { %1996 = vmatprep.subr.bf16.mxu1 %v2137_v12 }
  0xad   : > { %1975 = vmatpush3.bf16.msra.mxu0 %v2136_v11 }
  0xae   : > { %1997 = vmatpush3.bf16.msra.mxu1 %v2138_v13  ;;  %1976 = vmatprep.subr.bf16.mxu0 %v2139_v14 }
  0xaf   : > { %1998 = vmatprep.subr.bf16.mxu1 %v2141_v16 }
  0xb1   : > { %1977 = vmatpush3.bf16.msra.mxu0 %v2140_v15 }
  0xb2   : > { %1999 = vmatpush3.bf16.msra.mxu1 %v2142_v17  ;;  %1978 = vmatprep.subr.bf16.mxu0 %v2143_v18 }
  0xb3   : > { %2000 = vmatprep.subr.bf16.mxu1 %v2145_v20 }
  0xb5   : > { %1979 = vmatpush3.bf16.msra.mxu0 %v2144_v19 }
  0xb6   : > { %2001 = vmatpush3.bf16.msra.mxu1 %v2146_v21  ;;  %1980 = vmatprep.subr.bf16.mxu0 %v2147_v22 }
  0xb7   : > { %2002 = vmatprep.subr.bf16.mxu1 %v2149_v24 }
  0xb9   : > { %1981 = vmatpush3.bf16.msra.mxu0 %v2148_v23 }
  0xba   : > { %2019 = vmatprep.subr.bf16.mxu0 %v2204_v28  ;;  %2003 = vmatpush3.bf16.msra.mxu1 %v2152_v26 }
  0xbc   : > { %1606 = vmatmul.mubr.bf16.vlgmr.msra.gmra.mrb[4].mxu0 %v1841_v25 }
  0xbd   : > { %2020 = vmatpush3.bf16.msra.mxu0 %v2155_v27  ;;  %2035 = vmatprep.mubr.msk.bf16.mxu0 %vm2205_vm0, %v2204_v28 }
  0xbe   : > { %1646 = vmatmul.mubr.bf16.vlgmr.msra.gmra.mrb[4].mxu1 %v1843_v29  ;;  %2021 = vmatprep.subr.bf16.mxu0 %v2204_v28 }
  0xc1   : > { %2022 = vmatpush3.bf16.msra.mxu0 %v2156_v30 }
  0xc2   : > { %2023 = vmatprep.subr.bf16.mxu0 %v2204_v28 }
  0xc5   : > { %2024 = vmatpush3.bf16.msra.mxu0 %v2157_v31 }
  0xc6   : > { %2025 = vmatprep.subr.bf16.mxu0 %v2204_v28 }
  0xc9   : > { %2026 = vmatpush3.bf16.msra.mxu0 %v2158_v32 }
  0xca   : > { %2027 = vmatprep.subr.bf16.mxu0 %v2204_v28 }
  0xcd   : > { %2028 = vmatpush3.bf16.msra.mxu0 %v2159_v33 }
  0xce   : > { %2029 = vmatprep.subr.bf16.mxu0 %v2204_v28 }
  0xd1   : > { %2030 = vmatpush3.bf16.msra.mxu0 %v2160_v34 }
  0xd2   : > { %2031 = vmatprep.subr.bf16.mxu0 %v2204_v28 }
  0xd5   : > { %2032 = vmatpush3.bf16.msra.mxu0 %v2161_v35 }
  0xd6   : > { %2033 = vmatprep.subr.bf16.mxu0 %v2204_v28 }
  0xd9   : > { %2034 = vmatpush3.bf16.msra.mxu0 %v2162_v36 }
  0xdc   : > { %2036 = vmatmul.mubr.bf16.vlgmr.msra.gmra.mrb[8].mxu0 %v2163_v37 }
 0x16f   : > { %v1938_v38 = vpop.f32.mrb[0].mxu0 }
 0x170   : > { %v1960_v39 = vpop.f32.mrb[0].mxu1  ;;  %v1939_v40 = vpop.f32.mrb[1].mxu0 }
 0x171   : > { %v1940_v41 = vadd.f32 %v1939_v40, %v1938_v38  ;;  %v1961_v42 = vpop.f32.mrb[1].mxu1  ;;  %v1941_v43 = vpop.f32.mrb[2].mxu0 }
 0x172   : > { %v1962_v44 = vadd.f32 %v1961_v42, %v1960_v39  ;;  %v1942_v45 = vpop.f32.mrb[3].mxu0  ;;  %v1963_v46 = vpop.f32.mrb[2].mxu1 }
 0x173   : > { %v1964_v47 = vpop.f32.mrb[3].mxu1 }
 0x174   : > { %v1568_v48 = vadd.f32 %v1962_v44, %v1940_v41 }
 0x18f   : > { %v1982_v49 = vpop.f32.mrb[4].mxu0 }
 0x190   : > { %v1983_v50 = vpop.f32.mrb[5].mxu0 }
 0x191   : > { %v1984_v51 = vadd.f32 %v1983_v50, %v1982_v49  ;;  %v1985_v52 = vpop.f32.mrb[6].mxu0  ;;  %v2004_v53 = vpop.f32.mrb[4].mxu1 }
 0x192   : > { %v1986_v54 = vpop.f32.mrb[7].mxu0  ;;  %v2005_v55 = vpop.f32.mrb[5].mxu1 }
 0x193   : > { %v1608_v56 = vadd.f32 %v1984_v51, %v1568_v48  ;;  %v2006_v57 = vadd.f32 %v2005_v55, %v2004_v53  ;;  %v2007_v58 = vpop.f32.mrb[6].mxu1 }
 0x194   : > { %v2008_v59 = vpop.f32.mrb[7].mxu1 }
 0x195   : > { %v1648_v60 = vadd.f32 %v2006_v57, %v1608_v56 }
 0x1af   : > { %v1687_v61 = vpop.f32.mrb[8].mxu0 }
 0x1b0   : > { %v1688_v63 = vadd.f32 %v1687_v61, %v1648_v60  ;;  %v2037_v0 = vpop.f32.mrb[9].mxu0 }
 0x1b1   : > { %v1690_v2 = vpop.f32.mrb[10].mxu0 }
 0x1b2   : > { %v1700_v3 = vmul.f32 %v1918_v62, %v1688_v63  ;;  %v2038_v4 = vpop.f32.mrb[11].mxu0 }
 0x1b4   : > { %v1708_v5 = vadd.f32 %v1919_v1, %v1700_v3 }
 0x1b6   : > { %v1709_v6 = vmax.f32 %v1708_v5, 0.0 }
 0x1b8   : > { %v1710_v7 = vpack.c.bf16 %v1709_v6, %v1709_v6 }
 0x1ba   : > { %1711 = vst [vmem:[%s878_s7] sm:$0xf] %v1710_v7 }
 0x1bb PF: > { %s14_s19 = sadd.s32 1, %s2202_s19   ;;  %s2713_s15 = smov %s2190_s16 }
 0x1bc   : > { %p11_p10 = scmp.ge.s32.totalorder %s14_s19, 4   ;;  %s2714_s16 = smov %s2266_s23 }
 0x1bd   : > { %s2715_s17 = smov %s2198_s18  ;;  %s2716_s18 = smov %s2718_s20 }
 0x1be   :  { %13 = sbr.rel (!%p11_p10) target bundleno = 3 (0x3), region = 121 }

// kernel: resnet_forward.16
= control target key start
LH: loop header
LB: loop body
LE: loop exit
PB: predicated region body
PF: predicated region fallthrough
CT: control target
= control target key end

     0   :  { %s4339_s27 = smov 0   ;;  %s4341_s28 = smov 0   ;;  %s5254_s0 = inlined_call_operand.vmem [shape: bf16[8,2304], index: 0, kind: input, shape index: {}]   ;;  %s5255_s1 = inlined_call_operand.vmem [shape: bf16[2304,256], index: 1, kind: input, shape index: {}]   ;;  %s5256_s2 = inlined_call_operand.vmem [shape: f32[1,256], index: 2, kind: input, shape index: {}]   ;;  %s5257_s3 = inlined_call_operand.vmem [shape: f32[1,256], index: 3, kind: input, shape index: {}]   ;;  %s5258_s4 = inlined_call_operand.vmem [shape: bf16[8,128], index: 4, kind: input, shape index: {}]   ;;  %s5259_s5 = inlined_call_operand.vmem [shape: bf16[128,256], index: 5, kind: input, shape index: {}]   ;;  %s5260_s6 = inlined_call_operand.vmem [shape: f32[1,256], index: 6, kind: input, shape index: {}]   ;;  %s5261_s7 = inlined_call_operand.vmem [shape: f32[1,256], index: 7, kind: input, shape index: {}]   ;;  %s5262_s8 = inlined_call_operand.vmem [shape: bf16[8,256], index: 8, kind: output, shape index: {}]  }
   0x1   :  { %s4343_s29 = smov 0   ;;  %s4345_s30 = smov 0  }
   0x2   :  { %s4347_s9 = smov 0  }
   0x3 LB: > { %s27_s10 = sadd.s32 1, %s4286_s30  ;;  %p70_p1 = scmp.ne.s32.totalorder %s4278_s28, %s4274_s27  ;;  %s4290_s9 = sphi %s4347_s9, %s18_s9   ;;  %s4286_s30 = sphi %s4345_s30, %s5267_s30   ;;  %s4282_s29 = sphi %s4343_s29, %s5266_s29   ;;  %s4278_s28 = sphi %s4341_s28, %s5265_s28   ;;  %s4274_s27 = sphi %s4339_s27, %s5264_s27  }
   0x4   : > { %p28_p0 = scmp.ge.s32.totalorder %s27_s10, 2  ;;  %p71_p2 = scmp.eq.s32.totalorder %s4290_s9, 0 }
   0x5   : > { %s63_s13 = sadd.s32 1, %s4278_s28  ;;  %p3628_p5 = scmp.ge.s32.totalorder %s4290_s9, 2 }
   0x6   : > { %s5269_s10 = smov (%p28_p0, %s27_s10), 0  ;;  %p4370_p3 = por %p71_p2, %p70_p1 }
   0x7   : > { %s60_s12 = ssub.s32 %s4286_s30, %s5269_s10  ;;  %295 = sbr.rel (%p3628_p5) target bundleno = 224 (0xe0), region = 24 }
   0x8   : > { %p61_p4 = scmp.eq.s32.totalorder %s60_s12, 0 }
   0xa   : > { %s4378_s14 = scalar_select %p61_p4, %s4278_s28, %s63_s13  }
   0xe   : > { %298 = sbr.rel (!%p4370_p3) target bundleno = 210 (0xd2), region = 28  ;;  %s300_s15 = sand.u32 (%p4370_p3), 1, %s4278_s28  }
   0xf   : > { %s3629_s16 = sshll.u32 (%p4370_p3), %s4286_s30, 2  ;;  %s4038_s17 = smul.u32 (%p4370_p3), 1152, %s300_s15 }
  0x10   : > { %s4388_s20 = scalar_lea.vmem (%p4370_p3), %s5255_s1, %s3629_s16 }
  0x11   : > { %v320_v0 = vld [vmem:[%s4388_s20] sm:$0xf] (%p4370_p3)  ;;  %v322_v1 = vld [vmem:[%s4388_s20 + $0x8] sm:$0xf] (%p4370_p3)  ;;  %v324_v2 = vld [vmem:[%s4388_s20 + $0x10] sm:$0xf] (%p4370_p3) }
  0x12   : > { %v326_v3 = vld [vmem:[%s4388_s20 + $0x18] sm:$0xf] (%p4370_p3)  ;;  %v328_v4 = vld [vmem:[%s4388_s20 + $0x20] sm:$0xf] (%p4370_p3)  ;;  %s4395_s21 = scalar_lea.vmem (%p4370_p3), [#allocation2], %s4038_s17 }
  0x13   : > { %321 = vst [vmem:[%s4395_s21] sm:$0xf] (%p4370_p3), %v320_v0  ;;  %323 = vst [vmem:[%s4395_s21 + $0x4] sm:$0xf] (%p4370_p3), %v322_v1  ;;  %v330_v5 = vld [vmem:[%s4388_s20 + $0x28] sm:$0xf] (%p4370_p3) }
  0x14   : > { %325 = vst [vmem:[%s4395_s21 + $0x8] sm:$0xf] (%p4370_p3), %v324_v2  ;;  %327 = vst [vmem:[%s4395_s21 + $0xc] sm:$0xf] (%p4370_p3), %v326_v3  ;;  %v332_v6 = vld [vmem:[%s4388_s20 + $0x30] sm:$0xf] (%p4370_p3) }
  0x15   : > { %329 = vst [vmem:[%s4395_s21 + $0x10] sm:$0xf] %v328_v4  ;;  %v334_v7 = vld [vmem:[%s4388_s20 + $0x38] sm:$0xf]  ;;  %331 = vst [vmem:[%s4395_s21 + $0x14] sm:$0xf] %v330_v5 }
  0x16   : > { %333 = vst [vmem:[%s4395_s21 + $0x18] sm:$0xf] %v332_v6  ;;  %335 = vst [vmem:[%s4395_s21 + $0x1c] sm:$0xf] %v334_v7  ;;  %v336_v8 = vld [vmem:[%s4388_s20 + $0x40] sm:$0xf] }
  0x17   : > { %v338_v9 = vld [vmem:[%s4388_s20 + $0x48] sm:$0xf]  ;;  %v340_v10 = vld [vmem:[%s4388_s20 + $0x50] sm:$0xf]  ;;  %337 = vst [vmem:[%s4395_s21 + $0x20] sm:$0xf] %v336_v8 }
  0x18   : > { %339 = vst [vmem:[%s4395_s21 + $0x24] sm:$0xf] %v338_v9  ;;  %341 = vst [vmem:[%s4395_s21 + $0x28] sm:$0xf] %v340_v10  ;;  %v342_v11 = vld [vmem:[%s4388_s20 + $0x58] sm:$0xf] }
  0x19   : > { %v344_v12 = vld [vmem:[%s4388_s20 + $0x60] sm:$0xf]  ;;  %v346_v13 = vld [vmem:[%s4388_s20 + $0x68] sm:$0xf]  ;;  %343 = vst [vmem:[%s4395_s21 + $0x2c] sm:$0xf] %v342_v11 }
  0x1a   : > { %345 = vst [vmem:[%s4395_s21 + $0x30] sm:$0xf] %v344_v12  ;;  %347 = vst [vmem:[%s4395_s21 + $0x34] sm:$0xf] %v346_v13  ;;  %v348_v14 = vld [vmem:[%s4388_s20 + $0x70] sm:$0xf] }
  0x1b   : > { %v350_v15 = vld [vmem:[%s4388_s20 + $0x78] sm:$0xf]  ;;  %v352_v16 = vld [vmem:[%s4388_s20 + $0x80] sm:$0xf]  ;;  %349 = vst [vmem:[%s4395_s21 + $0x38] sm:$0xf] %v348_v14 }
  0x1c   : > { %351 = vst [vmem:[%s4395_s21 + $0x3c] sm:$0xf] %v350_v15  ;;  %353 = vst [vmem:[%s4395_s21 + $0x40] sm:$0xf] %v352_v16  ;;  %v354_v17 = vld [vmem:[%s4388_s20 + $0x88] sm:$0xf] }
  0x1d   : > { %v356_v18 = vld [vmem:[%s4388_s20 + $0x90] sm:$0xf]  ;;  %v358_v19 = vld [vmem:[%s4388_s20 + $0x98] sm:$0xf]  ;;  %355 = vst [vmem:[%s4395_s21 + $0x44] sm:$0xf] %v354_v17 }
  0x1e   : > { %357 = vst [vmem:[%s4395_s21 + $0x48] sm:$0xf] %v356_v18  ;;  %359 = vst [vmem:[%s4395_s21 + $0x4c] sm:$0xf] %v358_v19  ;;  %v360_v20 = vld [vmem:[%s4388_s20 + $0xa0] sm:$0xf] }
  0x1f   : > { %v362_v21 = vld [vmem:[%s4388_s20 + $0xa8] sm:$0xf]  ;;  %v364_v22 = vld [vmem:[%s4388_s20 + $0xb0] sm:$0xf]  ;;  %361 = vst [vmem:[%s4395_s21 + $0x50] sm:$0xf] %v360_v20 }
  0x20   : > { %363 = vst [vmem:[%s4395_s21 + $0x54] sm:$0xf] %v362_v21  ;;  %365 = vst [vmem:[%s4395_s21 + $0x58] sm:$0xf] %v364_v22  ;;  %v366_v23 = vld [vmem:[%s4388_s20 + $0xb8] sm:$0xf] }
  0x21   : > { %v368_v24 = vld [vmem:[%s4388_s20 + $0xc0] sm:$0xf]  ;;  %v370_v25 = vld [vmem:[%s4388_s20 + $0xc8] sm:$0xf]  ;;  %367 = vst [vmem:[%s4395_s21 + $0x5c] sm:$0xf] %v366_v23 }
  0x22   : > { %369 = vst [vmem:[%s4395_s21 + $0x60] sm:$0xf] %v368_v24  ;;  %371 = vst [vmem:[%s4395_s21 + $0x64] sm:$0xf] %v370_v25  ;;  %v372_v26 = vld [vmem:[%s4388_s20 + $0xd0] sm:$0xf] }
  0x23   : > { %v374_v27 = vld [vmem:[%s4388_s20 + $0xd8] sm:$0xf]  ;;  %v376_v28 = vld [vmem:[%s4388_s20 + $0xe0] sm:$0xf]  ;;  %373 = vst [vmem:[%s4395_s21 + $0x68] sm:$0xf] %v372_v26 }
  0x24   : > { %375 = vst [vmem:[%s4395_s21 + $0x6c] sm:$0xf] %v374_v27  ;;  %377 = vst [vmem:[%s4395_s21 + $0x70] sm:$0xf] %v376_v28  ;;  %v378_v29 = vld [vmem:[%s4388_s20 + $0xe8] sm:$0xf] }
  0x25   : > { %v380_v30 = vld [vmem:[%s4388_s20 + $0xf0] sm:$0xf]  ;;  %v382_v31 = vld [vmem:[%s4388_s20 + $0xf8] sm:$0xf]  ;;  %379 = vst [vmem:[%s4395_s21 + $0x74] sm:$0xf] %v378_v29 }
  0x26   : > { %381 = vst [vmem:[%s4395_s21 + $0x78] sm:$0xf] %v380_v30  ;;  %383 = vst [vmem:[%s4395_s21 + $0x7c] sm:$0xf] %v382_v31  ;;  %v384_v32 = vld [vmem:[%s4388_s20 + $0x100] sm:$0xf] }
  0x27   : > { %v386_v33 = vld [vmem:[%s4388_s20 + $0x108] sm:$0xf]  ;;  %v388_v34 = vld [vmem:[%s4388_s20 + $0x110] sm:$0xf]  ;;  %385 = vst [vmem:[%s4395_s21 + $0x80] sm:$0xf] %v384_v32 }
  0x28   : > { %387 = vst [vmem:[%s4395_s21 + $0x84] sm:$0xf] %v386_v33  ;;  %389 = vst [vmem:[%s4395_s21 + $0x88] sm:$0xf] %v388_v34  ;;  %v390_v35 = vld [vmem:[%s4388_s20 + $0x118] sm:$0xf] }
  0x29   : > { %v392_v36 = vld [vmem:[%s4388_s20 + $0x120] sm:$0xf]  ;;  %v394_v37 = vld [vmem:[%s4388_s20 + $0x128] sm:$0xf]  ;;  %391 = vst [vmem:[%s4395_s21 + $0x8c] sm:$0xf] %v390_v35 }
  0x2a   : > { %393 = vst [vmem:[%s4395_s21 + $0x90] sm:$0xf] %v392_v36  ;;  %395 = vst [vmem:[%s4395_s21 + $0x94] sm:$0xf] %v394_v37  ;;  %v396_v38 = vld [vmem:[%s4388_s20 + $0x130] sm:$0xf] }
  0x2b   : > { %v398_v39 = vld [vmem:[%s4388_s20 + $0x138] sm:$0xf]  ;;  %v400_v40 = vld [vmem:[%s4388_s20 + $0x140] sm:$0xf]  ;;  %397 = vst [vmem:[%s4395_s21 + $0x98] sm:$0xf] %v396_v38 }
  0x2c   : > { %399 = vst [vmem:[%s4395_s21 + $0x9c] sm:$0xf] %v398_v39  ;;  %401 = vst [vmem:[%s4395_s21 + $0xa0] sm:$0xf] %v400_v40  ;;  %v402_v41 = vld [vmem:[%s4388_s20 + $0x148] sm:$0xf] }
  0x2d   : > { %v404_v42 = vld [vmem:[%s4388_s20 + $0x150] sm:$0xf]  ;;  %v406_v43 = vld [vmem:[%s4388_s20 + $0x158] sm:$0xf]  ;;  %403 = vst [vmem:[%s4395_s21 + $0xa4] sm:$0xf] %v402_v41 }
  0x2e   : > { %405 = vst [vmem:[%s4395_s21 + $0xa8] sm:$0xf] %v404_v42  ;;  %407 = vst [vmem:[%s4395_s21 + $0xac] sm:$0xf] %v406_v43  ;;  %v408_v44 = vld [vmem:[%s4388_s20 + $0x160] sm:$0xf] }
  0x2f   : > { %v410_v45 = vld [vmem:[%s4388_s20 + $0x168] sm:$0xf]  ;;  %v412_v46 = vld [vmem:[%s4388_s20 + $0x170] sm:$0xf]  ;;  %409 = vst [vmem:[%s4395_s21 + $0xb0] sm:$0xf] %v408_v44 }
  0x30   : > { %411 = vst [vmem:[%s4395_s21 + $0xb4] sm:$0xf] %v410_v45  ;;  %413 = vst [vmem:[%s4395_s21 + $0xb8] sm:$0xf] %v412_v46  ;;  %v414_v47 = vld [vmem:[%s4388_s20 + $0x178] sm:$0xf] }
  0x31   : > { %v416_v48 = vld [vmem:[%s4388_s20 + $0x180] sm:$0xf]  ;;  %v418_v49 = vld [vmem:[%s4388_s20 + $0x188] sm:$0xf]  ;;  %415 = vst [vmem:[%s4395_s21 + $0xbc] sm:$0xf] %v414_v47 }
  0x32   : > { %417 = vst [vmem:[%s4395_s21 + $0xc0] sm:$0xf] %v416_v48  ;;  %419 = vst [vmem:[%s4395_s21 + $0xc4] sm:$0xf] %v418_v49  ;;  %v420_v50 = vld [vmem:[%s4388_s20 + $0x190] sm:$0xf] }
  0x33   : > { %v422_v51 = vld [vmem:[%s4388_s20 + $0x198] sm:$0xf]  ;;  %v424_v52 = vld [vmem:[%s4388_s20 + $0x1a0] sm:$0xf]  ;;  %421 = vst [vmem:[%s4395_s21 + $0xc8] sm:$0xf] %v420_v50 }
  0x34   : > { %423 = vst [vmem:[%s4395_s21 + $0xcc] sm:$0xf] %v422_v51  ;;  %425 = vst [vmem:[%s4395_s21 + $0xd0] sm:$0xf] %v424_v52  ;;  %v426_v53 = vld [vmem:[%s4388_s20 + $0x1a8] sm:$0xf] }
  0x35   : > { %v428_v54 = vld [vmem:[%s4388_s20 + $0x1b0] sm:$0xf]  ;;  %v430_v55 = vld [vmem:[%s4388_s20 + $0x1b8] sm:$0xf]  ;;  %427 = vst [vmem:[%s4395_s21 + $0xd4] sm:$0xf] %v426_v53 }
  0x36   : > { %429 = vst [vmem:[%s4395_s21 + $0xd8] sm:$0xf] %v428_v54  ;;  %431 = vst [vmem:[%s4395_s21 + $0xdc] sm:$0xf] %v430_v55  ;;  %v432_v56 = vld [vmem:[%s4388_s20 + $0x1c0] sm:$0xf] }
  0x37   : > { %v434_v57 = vld [vmem:[%s4388_s20 + $0x1c8] sm:$0xf]  ;;  %v436_v58 = vld [vmem:[%s4388_s20 + $0x1d0] sm:$0xf]  ;;  %433 = vst [vmem:[%s4395_s21 + $0xe0] sm:$0xf] %v432_v56 }
  0x38   : > { %435 = vst [vmem:[%s4395_s21 + $0xe4] sm:$0xf] %v434_v57  ;;  %437 = vst [vmem:[%s4395_s21 + $0xe8] sm:$0xf] %v436_v58  ;;  %v438_v59 = vld [vmem:[%s4388_s20 + $0x1d8] sm:$0xf] }
  0x39   : > { %v440_v60 = vld [vmem:[%s4388_s20 + $0x1e0] sm:$0xf]  ;;  %v442_v61 = vld [vmem:[%s4388_s20 + $0x1e8] sm:$0xf]  ;;  %439 = vst [vmem:[%s4395_s21 + $0xec] sm:$0xf] %v438_v59 }
  0x3a   : > { %441 = vst [vmem:[%s4395_s21 + $0xf0] sm:$0xf] %v440_v60  ;;  %443 = vst [vmem:[%s4395_s21 + $0xf4] sm:$0xf] %v442_v61  ;;  %v444_v62 = vld [vmem:[%s4388_s20 + $0x1f0] sm:$0xf] }
  0x3b   : > { %v446_v63 = vld [vmem:[%s4388_s20 + $0x1f8] sm:$0xf]  ;;  %v448_v0 = vld [vmem:[%s4388_s20 + $0x200] sm:$0xf]  ;;  %445 = vst [vmem:[%s4395_s21 + $0xf8] sm:$0xf] %v444_v62 }
  0x3c   : > { %447 = vst [vmem:[%s4395_s21 + $0xfc] sm:$0xf] %v446_v63  ;;  %449 = vst [vmem:[%s4395_s21 + $0x100] sm:$0xf] %v448_v0  ;;  %v450_v1 = vld [vmem:[%s4388_s20 + $0x208] sm:$0xf] }
  0x3d   : > { %v452_v2 = vld [vmem:[%s4388_s20 + $0x210] sm:$0xf]  ;;  %v454_v3 = vld [vmem:[%s4388_s20 + $0x218] sm:$0xf]  ;;  %451 = vst [vmem:[%s4395_s21 + $0x104] sm:$0xf] %v450_v1 }
  0x3e   : > { %453 = vst [vmem:[%s4395_s21 + $0x108] sm:$0xf] %v452_v2  ;;  %455 = vst [vmem:[%s4395_s21 + $0x10c] sm:$0xf] %v454_v3  ;;  %v456_v4 = vld [vmem:[%s4388_s20 + $0x220] sm:$0xf] }
  0x3f   : > { %v458_v5 = vld [vmem:[%s4388_s20 + $0x228] sm:$0xf]  ;;  %v460_v6 = vld [vmem:[%s4388_s20 + $0x230] sm:$0xf]  ;;  %457 = vst [vmem:[%s4395_s21 + $0x110] sm:$0xf] %v456_v4 }
  0x40   : > { %459 = vst [vmem:[%s4395_s21 + $0x114] sm:$0xf] %v458_v5  ;;  %461 = vst [vmem:[%s4395_s21 + $0x118] sm:$0xf] %v460_v6  ;;  %v462_v7 = vld [vmem:[%s4388_s20 + $0x238] sm:$0xf] }
  0x41   : > { %v464_v8 = vld [vmem:[%s4388_s20 + $0x240] sm:$0xf]  ;;  %v466_v9 = vld [vmem:[%s4388_s20 + $0x248] sm:$0xf]  ;;  %463 = vst [vmem:[%s4395_s21 + $0x11c] sm:$0xf] %v462_v7 }
  0x42   : > { %465 = vst [vmem:[%s4395_s21 + $0x120] sm:$0xf] %v464_v8  ;;  %467 = vst [vmem:[%s4395_s21 + $0x124] sm:$0xf] %v466_v9  ;;  %v468_v10 = vld [vmem:[%s4388_s20 + $0x250] sm:$0xf] }
  0x43   : > { %v470_v11 = vld [vmem:[%s4388_s20 + $0x258] sm:$0xf]  ;;  %v472_v12 = vld [vmem:[%s4388_s20 + $0x260] sm:$0xf]  ;;  %469 = vst [vmem:[%s4395_s21 + $0x128] sm:$0xf] %v468_v10 }
  0x44   : > { %471 = vst [vmem:[%s4395_s21 + $0x12c] sm:$0xf] %v470_v11  ;;  %473 = vst [vmem:[%s4395_s21 + $0x130] sm:$0xf] %v472_v12  ;;  %v474_v13 = vld [vmem:[%s4388_s20 + $0x268] sm:$0xf] }
  0x45   : > { %v476_v14 = vld [vmem:[%s4388_s20 + $0x270] sm:$0xf]  ;;  %v478_v15 = vld [vmem:[%s4388_s20 + $0x278] sm:$0xf]  ;;  %475 = vst [vmem:[%s4395_s21 + $0x134] sm:$0xf] %v474_v13 }
  0x46   : > { %477 = vst [vmem:[%s4395_s21 + $0x138] sm:$0xf] %v476_v14  ;;  %479 = vst [vmem:[%s4395_s21 + $0x13c] sm:$0xf] %v478_v15  ;;  %v480_v16 = vld [vmem:[%s4388_s20 + $0x280] sm:$0xf] }
  0x47   : > { %v482_v17 = vld [vmem:[%s4388_s20 + $0x288] sm:$0xf]  ;;  %v484_v18 = vld [vmem:[%s4388_s20 + $0x290] sm:$0xf]  ;;  %481 = vst [vmem:[%s4395_s21 + $0x140] sm:$0xf] %v480_v16 }
  0x48   : > { %483 = vst [vmem:[%s4395_s21 + $0x144] sm:$0xf] %v482_v17  ;;  %485 = vst [vmem:[%s4395_s21 + $0x148] sm:$0xf] %v484_v18  ;;  %v486_v19 = vld [vmem:[%s4388_s20 + $0x298] sm:$0xf] }
  0x49   : > { %v488_v20 = vld [vmem:[%s4388_s20 + $0x2a0] sm:$0xf]  ;;  %v490_v21 = vld [vmem:[%s4388_s20 + $0x2a8] sm:$0xf]  ;;  %487 = vst [vmem:[%s4395_s21 + $0x14c] sm:$0xf] %v486_v19 }
  0x4a   : > { %489 = vst [vmem:[%s4395_s21 + $0x150] sm:$0xf] %v488_v20  ;;  %491 = vst [vmem:[%s4395_s21 + $0x154] sm:$0xf] %v490_v21  ;;  %v492_v22 = vld [vmem:[%s4388_s20 + $0x2b0] sm:$0xf] }
  0x4b   : > { %v494_v23 = vld [vmem:[%s4388_s20 + $0x2b8] sm:$0xf]  ;;  %v496_v24 = vld [vmem:[%s4388_s20 + $0x2c0] sm:$0xf]  ;;  %493 = vst [vmem:[%s4395_s21 + $0x158] sm:$0xf] %v492_v22 }
  0x4c   : > { %495 = vst [vmem:[%s4395_s21 + $0x15c] sm:$0xf] %v494_v23  ;;  %497 = vst [vmem:[%s4395_s21 + $0x160] sm:$0xf] %v496_v24  ;;  %v498_v25 = vld [vmem:[%s4388_s20 + $0x2c8] sm:$0xf] }
  0x4d   : > { %v500_v26 = vld [vmem:[%s4388_s20 + $0x2d0] sm:$0xf]  ;;  %v502_v27 = vld [vmem:[%s4388_s20 + $0x2d8] sm:$0xf]  ;;  %499 = vst [vmem:[%s4395_s21 + $0x164] sm:$0xf] %v498_v25 }
  0x4e   : > { %501 = vst [vmem:[%s4395_s21 + $0x168] sm:$0xf] %v500_v26  ;;  %503 = vst [vmem:[%s4395_s21 + $0x16c] sm:$0xf] %v502_v27  ;;  %v504_v28 = vld [vmem:[%s4388_s20 + $0x2e0] sm:$0xf] }
  0x4f   : > { %v506_v29 = vld [vmem:[%s4388_s20 + $0x2e8] sm:$0xf]  ;;  %v508_v30 = vld [vmem:[%s4388_s20 + $0x2f0] sm:$0xf]  ;;  %505 = vst [vmem:[%s4395_s21 + $0x170] sm:$0xf] %v504_v28 }
  0x50   : > { %507 = vst [vmem:[%s4395_s21 + $0x174] sm:$0xf] %v506_v29  ;;  %509 = vst [vmem:[%s4395_s21 + $0x178] sm:$0xf] %v508_v30  ;;  %v510_v31 = vld [vmem:[%s4388_s20 + $0x2f8] sm:$0xf] }
  0x51   : > { %v512_v32 = vld [vmem:[%s4388_s20 + $0x300] sm:$0xf]  ;;  %v514_v33 = vld [vmem:[%s4388_s20 + $0x308] sm:$0xf]  ;;  %511 = vst [vmem:[%s4395_s21 + $0x17c] sm:$0xf] %v510_v31 }
  0x52   : > { %513 = vst [vmem:[%s4395_s21 + $0x180] sm:$0xf] %v512_v32  ;;  %515 = vst [vmem:[%s4395_s21 + $0x184] sm:$0xf] %v514_v33  ;;  %v516_v34 = vld [vmem:[%s4388_s20 + $0x310] sm:$0xf] }
  0x53   : > { %v518_v35 = vld [vmem:[%s4388_s20 + $0x318] sm:$0xf]  ;;  %v520_v36 = vld [vmem:[%s4388_s20 + $0x320] sm:$0xf]  ;;  %517 = vst [vmem:[%s4395_s21 + $0x188] sm:$0xf] %v516_v34 }
  0x54   : > { %519 = vst [vmem:[%s4395_s21 + $0x18c] sm:$0xf] %v518_v35  ;;  %521 = vst [vmem:[%s4395_s21 + $0x190] sm:$0xf] %v520_v36  ;;  %v522_v37 = vld [vmem:[%s4388_s20 + $0x328] sm:$0xf] }
  0x55   : > { %v524_v38 = vld [vmem:[%s4388_s20 + $0x330] sm:$0xf]  ;;  %v526_v39 = vld [vmem:[%s4388_s20 + $0x338] sm:$0xf]  ;;  %523 = vst [vmem:[%s4395_s21 + $0x194] sm:$0xf] %v522_v37 }
  0x56   : > { %525 = vst [vmem:[%s4395_s21 + $0x198] sm:$0xf] %v524_v38  ;;  %527 = vst [vmem:[%s4395_s21 + $0x19c] sm:$0xf] %v526_v39  ;;  %v528_v40 = vld [vmem:[%s4388_s20 + $0x340] sm:$0xf] }
  0x57   : > { %v530_v41 = vld [vmem:[%s4388_s20 + $0x348] sm:$0xf]  ;;  %v532_v42 = vld [vmem:[%s4388_s20 + $0x350] sm:$0xf]  ;;  %529 = vst [vmem:[%s4395_s21 + $0x1a0] sm:$0xf] %v528_v40 }
  0x58   : > { %531 = vst [vmem:[%s4395_s21 + $0x1a4] sm:$0xf] %v530_v41  ;;  %533 = vst [vmem:[%s4395_s21 + $0x1a8] sm:$0xf] %v532_v42  ;;  %v534_v43 = vld [vmem:[%s4388_s20 + $0x358] sm:$0xf] }
  0x59   : > { %v536_v44 = vld [vmem:[%s4388_s20 + $0x360] sm:$0xf]  ;;  %v538_v45 = vld [vmem:[%s4388_s20 + $0x368] sm:$0xf]  ;;  %535 = vst [vmem:[%s4395_s21 + $0x1ac] sm:$0xf] %v534_v43 }
  0x5a   : > { %537 = vst [vmem:[%s4395_s21 + $0x1b0] sm:$0xf] %v536_v44  ;;  %539 = vst [vmem:[%s4395_s21 + $0x1b4] sm:$0xf] %v538_v45  ;;  %v540_v46 = vld [vmem:[%s4388_s20 + $0x370] sm:$0xf] }
  0x5b   : > { %v542_v47 = vld [vmem:[%s4388_s20 + $0x378] sm:$0xf]  ;;  %v544_v48 = vld [vmem:[%s4388_s20 + $0x380] sm:$0xf]  ;;  %541 = vst [vmem:[%s4395_s21 + $0x1b8] sm:$0xf] %v540_v46 }
  0x5c   : > { %543 = vst [vmem:[%s4395_s21 + $0x1bc] sm:$0xf] %v542_v47  ;;  %545 = vst [vmem:[%s4395_s21 + $0x1c0] sm:$0xf] %v544_v48  ;;  %v546_v49 = vld [vmem:[%s4388_s20 + $0x388] sm:$0xf] }
  0x5d   : > { %v548_v50 = vld [vmem:[%s4388_s20 + $0x390] sm:$0xf]  ;;  %v550_v51 = vld [vmem:[%s4388_s20 + $0x398] sm:$0xf]  ;;  %547 = vst [vmem:[%s4395_s21 + $0x1c4] sm:$0xf] %v546_v49 }
  0x5e   : > { %549 = vst [vmem:[%s4395_s21 + $0x1c8] sm:$0xf] %v548_v50  ;;  %551 = vst [vmem:[%s4395_s21 + $0x1cc] sm:$0xf] %v550_v51  ;;  %v552_v52 = vld [vmem:[%s4388_s20 + $0x3a0] sm:$0xf] }
  0x5f   : > { %v554_v53 = vld [vmem:[%s4388_s20 + $0x3a8] sm:$0xf]  ;;  %v556_v54 = vld [vmem:[%s4388_s20 + $0x3b0] sm:$0xf]  ;;  %553 = vst [vmem:[%s4395_s21 + $0x1d0] sm:$0xf] %v552_v52 }
  0x60   : > { %555 = vst [vmem:[%s4395_s21 + $0x1d4] sm:$0xf] %v554_v53  ;;  %557 = vst [vmem:[%s4395_s21 + $0x1d8] sm:$0xf] %v556_v54  ;;  %v558_v55 = vld [vmem:[%s4388_s20 + $0x3b8] sm:$0xf] }
  0x61   : > { %v560_v56 = vld [vmem:[%s4388_s20 + $0x3c0] sm:$0xf]  ;;  %v562_v57 = vld [vmem:[%s4388_s20 + $0x3c8] sm:$0xf]  ;;  %559 = vst [vmem:[%s4395_s21 + $0x1dc] sm:$0xf] %v558_v55 }
  0x62   : > { %561 = vst [vmem:[%s4395_s21 + $0x1e0] sm:$0xf] %v560_v56  ;;  %563 = vst [vmem:[%s4395_s21 + $0x1e4] sm:$0xf] %v562_v57  ;;  %v564_v58 = vld [vmem:[%s4388_s20 + $0x3d0] sm:$0xf] }
  0x63   : > { %v566_v59 = vld [vmem:[%s4388_s20 + $0x3d8] sm:$0xf]  ;;  %v568_v60 = vld [vmem:[%s4388_s20 + $0x3e0] sm:$0xf]  ;;  %565 = vst [vmem:[%s4395_s21 + $0x1e8] sm:$0xf] %v564_v58 }
  0x64   : > { %567 = vst [vmem:[%s4395_s21 + $0x1ec] sm:$0xf] %v566_v59  ;;  %569 = vst [vmem:[%s4395_s21 + $0x1f0] sm:$0xf] %v568_v60  ;;  %v570_v61 = vld [vmem:[%s4388_s20 + $0x3e8] sm:$0xf] }
  0x65   : > { %v572_v62 = vld [vmem:[%s4388_s20 + $0x3f0] sm:$0xf]  ;;  %v574_v63 = vld [vmem:[%s4388_s20 + $0x3f8] sm:$0xf]  ;;  %571 = vst [vmem:[%s4395_s21 + $0x1f4] sm:$0xf] %v570_v61 }
  0x66   : > { %573 = vst [vmem:[%s4395_s21 + $0x1f8] sm:$0xf] %v572_v62  ;;  %575 = vst [vmem:[%s4395_s21 + $0x1fc] sm:$0xf] %v574_v63  ;;  %v576_v0 = vld [vmem:[%s4388_s20 + $0x400] sm:$0xf] }
  0x67   : > { %v578_v1 = vld [vmem:[%s4388_s20 + $0x408] sm:$0xf]  ;;  %v580_v2 = vld [vmem:[%s4388_s20 + $0x410] sm:$0xf]  ;;  %577 = vst [vmem:[%s4395_s21 + $0x200] sm:$0xf] %v576_v0 }
  0x68   : > { %579 = vst [vmem:[%s4395_s21 + $0x204] sm:$0xf] %v578_v1  ;;  %581 = vst [vmem:[%s4395_s21 + $0x208] sm:$0xf] %v580_v2  ;;  %v582_v3 = vld [vmem:[%s4388_s20 + $0x418] sm:$0xf] }
  0x69   : > { %v584_v4 = vld [vmem:[%s4388_s20 + $0x420] sm:$0xf]  ;;  %v586_v5 = vld [vmem:[%s4388_s20 + $0x428] sm:$0xf]  ;;  %583 = vst [vmem:[%s4395_s21 + $0x20c] sm:$0xf] %v582_v3 }
  0x6a   : > { %585 = vst [vmem:[%s4395_s21 + $0x210] sm:$0xf] %v584_v4  ;;  %587 = vst [vmem:[%s4395_s21 + $0x214] sm:$0xf] %v586_v5  ;;  %v588_v6 = vld [vmem:[%s4388_s20 + $0x430] sm:$0xf] }
  0x6b   : > { %v590_v7 = vld [vmem:[%s4388_s20 + $0x438] sm:$0xf]  ;;  %v592_v8 = vld [vmem:[%s4388_s20 + $0x440] sm:$0xf]  ;;  %589 = vst [vmem:[%s4395_s21 + $0x218] sm:$0xf] %v588_v6 }
  0x6c   : > { %591 = vst [vmem:[%s4395_s21 + $0x21c] sm:$0xf] %v590_v7  ;;  %593 = vst [vmem:[%s4395_s21 + $0x220] sm:$0xf] %v592_v8  ;;  %v594_v9 = vld [vmem:[%s4388_s20 + $0x448] sm:$0xf] }
  0x6d   : > { %v596_v10 = vld [vmem:[%s4388_s20 + $0x450] sm:$0xf]  ;;  %v598_v11 = vld [vmem:[%s4388_s20 + $0x458] sm:$0xf]  ;;  %595 = vst [vmem:[%s4395_s21 + $0x224] sm:$0xf] %v594_v9 }
  0x6e   : > { %597 = vst [vmem:[%s4395_s21 + $0x228] sm:$0xf] %v596_v10  ;;  %599 = vst [vmem:[%s4395_s21 + $0x22c] sm:$0xf] %v598_v11  ;;  %v600_v12 = vld [vmem:[%s4388_s20 + $0x460] sm:$0xf] }
  0x6f   : > { %v602_v13 = vld [vmem:[%s4388_s20 + $0x468] sm:$0xf]  ;;  %v604_v14 = vld [vmem:[%s4388_s20 + $0x470] sm:$0xf]  ;;  %601 = vst [vmem:[%s4395_s21 + $0x230] sm:$0xf] %v600_v12 }
  0x70   : > { %603 = vst [vmem:[%s4395_s21 + $0x234] sm:$0xf] %v602_v13  ;;  %605 = vst [vmem:[%s4395_s21 + $0x238] sm:$0xf] %v604_v14  ;;  %v606_v15 = vld [vmem:[%s4388_s20 + $0x478] sm:$0xf] }
  0x71   : > { %v608_v16 = vld [vmem:[%s4388_s20 + $0x480] sm:$0xf]  ;;  %v610_v17 = vld [vmem:[%s4388_s20 + $0x488] sm:$0xf]  ;;  %607 = vst [vmem:[%s4395_s21 + $0x23c] sm:$0xf] %v606_v15 }
  0x72   : > { %609 = vst [vmem:[%s4395_s21 + $0x240] sm:$0xf] %v608_v16  ;;  %611 = vst [vmem:[%s4395_s21 + $0x244] sm:$0xf] %v610_v17  ;;  %v612_v18 = vld [vmem:[%s4388_s20 + $0x490] sm:$0xf] }
  0x73   : > { %v614_v19 = vld [vmem:[%s4388_s20 + $0x498] sm:$0xf]  ;;  %v616_v20 = vld [vmem:[%s4388_s20 + $0x4a0] sm:$0xf]  ;;  %613 = vst [vmem:[%s4395_s21 + $0x248] sm:$0xf] %v612_v18 }
  0x74   : > { %615 = vst [vmem:[%s4395_s21 + $0x24c] sm:$0xf] %v614_v19  ;;  %617 = vst [vmem:[%s4395_s21 + $0x250] sm:$0xf] %v616_v20  ;;  %v618_v21 = vld [vmem:[%s4388_s20 + $0x4a8] sm:$0xf] }
  0x75   : > { %v620_v22 = vld [vmem:[%s4388_s20 + $0x4b0] sm:$0xf]  ;;  %v622_v23 = vld [vmem:[%s4388_s20 + $0x4b8] sm:$0xf]  ;;  %619 = vst [vmem:[%s4395_s21 + $0x254] sm:$0xf] %v618_v21 }
  0x76   : > { %621 = vst [vmem:[%s4395_s21 + $0x258] sm:$0xf] %v620_v22  ;;  %623 = vst [vmem:[%s4395_s21 + $0x25c] sm:$0xf] %v622_v23  ;;  %v624_v24 = vld [vmem:[%s4388_s20 + $0x4c0] sm:$0xf] }
  0x77   : > { %v626_v25 = vld [vmem:[%s4388_s20 + $0x4c8] sm:$0xf]  ;;  %v628_v26 = vld [vmem:[%s4388_s20 + $0x4d0] sm:$0xf]  ;;  %625 = vst [vmem:[%s4395_s21 + $0x260] sm:$0xf] %v624_v24 }
  0x78   : > { %627 = vst [vmem:[%s4395_s21 + $0x264] sm:$0xf] %v626_v25  ;;  %629 = vst [vmem:[%s4395_s21 + $0x268] sm:$0xf] %v628_v26  ;;  %v630_v27 = vld [vmem:[%s4388_s20 + $0x4d8] sm:$0xf] }
  0x79   : > { %v632_v28 = vld [vmem:[%s4388_s20 + $0x4e0] sm:$0xf]  ;;  %v634_v29 = vld [vmem:[%s4388_s20 + $0x4e8] sm:$0xf]  ;;  %631 = vst [vmem:[%s4395_s21 + $0x26c] sm:$0xf] %v630_v27 }
  0x7a   : > { %633 = vst [vmem:[%s4395_s21 + $0x270] sm:$0xf] %v632_v28  ;;  %635 = vst [vmem:[%s4395_s21 + $0x274] sm:$0xf] %v634_v29  ;;  %v636_v30 = vld [vmem:[%s4388_s20 + $0x4f0] sm:$0xf] }
  0x7b   : > { %v638_v31 = vld [vmem:[%s4388_s20 + $0x4f8] sm:$0xf]  ;;  %v640_v32 = vld [vmem:[%s4388_s20 + $0x500] sm:$0xf]  ;;  %637 = vst [vmem:[%s4395_s21 + $0x278] sm:$0xf] %v636_v30 }
  0x7c   : > { %639 = vst [vmem:[%s4395_s21 + $0x27c] sm:$0xf] %v638_v31  ;;  %641 = vst [vmem:[%s4395_s21 + $0x280] sm:$0xf] %v640_v32  ;;  %v642_v33 = vld [vmem:[%s4388_s20 + $0x508] sm:$0xf] }
  0x7d   : > { %v644_v34 = vld [vmem:[%s4388_s20 + $0x510] sm:$0xf]  ;;  %v646_v35 = vld [vmem:[%s4388_s20 + $0x518] sm:$0xf]  ;;  %643 = vst [vmem:[%s4395_s21 + $0x284] sm:$0xf] %v642_v33 }
  0x7e   : > { %645 = vst [vmem:[%s4395_s21 + $0x288] sm:$0xf] %v644_v34  ;;  %647 = vst [vmem:[%s4395_s21 + $0x28c] sm:$0xf] %v646_v35  ;;  %v648_v36 = vld [vmem:[%s4388_s20 + $0x520] sm:$0xf] }
  0x7f   : > { %v650_v37 = vld [vmem:[%s4388_s20 + $0x528] sm:$0xf]  ;;  %v652_v38 = vld [vmem:[%s4388_s20 + $0x530] sm:$0xf]  ;;  %649 = vst [vmem:[%s4395_s21 + $0x290] sm:$0xf] %v648_v36 }
  0x80   : > { %651 = vst [vmem:[%s4395_s21 + $0x294] sm:$0xf] %v650_v37  ;;  %653 = vst [vmem:[%s4395_s21 + $0x298] sm:$0xf] %v652_v38  ;;  %v654_v39 = vld [vmem:[%s4388_s20 + $0x538] sm:$0xf] }
  0x81   : > { %v656_v40 = vld [vmem:[%s4388_s20 + $0x540] sm:$0xf]  ;;  %v658_v41 = vld [vmem:[%s4388_s20 + $0x548] sm:$0xf]  ;;  %655 = vst [vmem:[%s4395_s21 + $0x29c] sm:$0xf] %v654_v39 }
  0x82   : > { %657 = vst [vmem:[%s4395_s21 + $0x2a0] sm:$0xf] %v656_v40  ;;  %659 = vst [vmem:[%s4395_s21 + $0x2a4] sm:$0xf] %v658_v41  ;;  %v660_v42 = vld [vmem:[%s4388_s20 + $0x550] sm:$0xf] }
  0x83   : > { %v662_v43 = vld [vmem:[%s4388_s20 + $0x558] sm:$0xf]  ;;  %v664_v44 = vld [vmem:[%s4388_s20 + $0x560] sm:$0xf]  ;;  %661 = vst [vmem:[%s4395_s21 + $0x2a8] sm:$0xf] %v660_v42 }
  0x84   : > { %663 = vst [vmem:[%s4395_s21 + $0x2ac] sm:$0xf] %v662_v43  ;;  %665 = vst [vmem:[%s4395_s21 + $0x2b0] sm:$0xf] %v664_v44  ;;  %v666_v45 = vld [vmem:[%s4388_s20 + $0x568] sm:$0xf] }
  0x85   : > { %v668_v46 = vld [vmem:[%s4388_s20 + $0x570] sm:$0xf]  ;;  %v670_v47 = vld [vmem:[%s4388_s20 + $0x578] sm:$0xf]  ;;  %667 = vst [vmem:[%s4395_s21 + $0x2b4] sm:$0xf] %v666_v45 }
  0x86   : > { %669 = vst [vmem:[%s4395_s21 + $0x2b8] sm:$0xf] %v668_v46  ;;  %671 = vst [vmem:[%s4395_s21 + $0x2bc] sm:$0xf] %v670_v47  ;;  %v672_v48 = vld [vmem:[%s4388_s20 + $0x580] sm:$0xf] }
  0x87   : > { %v674_v49 = vld [vmem:[%s4388_s20 + $0x588] sm:$0xf]  ;;  %v676_v50 = vld [vmem:[%s4388_s20 + $0x590] sm:$0xf]  ;;  %673 = vst [vmem:[%s4395_s21 + $0x2c0] sm:$0xf] %v672_v48 }
  0x88   : > { %675 = vst [vmem:[%s4395_s21 + $0x2c4] sm:$0xf] %v674_v49  ;;  %677 = vst [vmem:[%s4395_s21 + $0x2c8] sm:$0xf] %v676_v50  ;;  %v678_v51 = vld [vmem:[%s4388_s20 + $0x598] sm:$0xf] }
  0x89   : > { %v680_v52 = vld [vmem:[%s4388_s20 + $0x5a0] sm:$0xf]  ;;  %v682_v53 = vld [vmem:[%s4388_s20 + $0x5a8] sm:$0xf]  ;;  %679 = vst [vmem:[%s4395_s21 + $0x2cc] sm:$0xf] %v678_v51 }
  0x8a   : > { %681 = vst [vmem:[%s4395_s21 + $0x2d0] sm:$0xf] %v680_v52  ;;  %683 = vst [vmem:[%s4395_s21 + $0x2d4] sm:$0xf] %v682_v53  ;;  %v684_v54 = vld [vmem:[%s4388_s20 + $0x5b0] sm:$0xf] }
  0x8b   : > { %v686_v55 = vld [vmem:[%s4388_s20 + $0x5b8] sm:$0xf]  ;;  %v688_v56 = vld [vmem:[%s4388_s20 + $0x5c0] sm:$0xf]  ;;  %685 = vst [vmem:[%s4395_s21 + $0x2d8] sm:$0xf] %v684_v54 }
  0x8c   : > { %687 = vst [vmem:[%s4395_s21 + $0x2dc] sm:$0xf] %v686_v55  ;;  %689 = vst [vmem:[%s4395_s21 + $0x2e0] sm:$0xf] %v688_v56  ;;  %v690_v57 = vld [vmem:[%s4388_s20 + $0x5c8] sm:$0xf] }
  0x8d   : > { %v692_v58 = vld [vmem:[%s4388_s20 + $0x5d0] sm:$0xf]  ;;  %v694_v59 = vld [vmem:[%s4388_s20 + $0x5d8] sm:$0xf]  ;;  %691 = vst [vmem:[%s4395_s21 + $0x2e4] sm:$0xf] %v690_v57 }
  0x8e   : > { %693 = vst [vmem:[%s4395_s21 + $0x2e8] sm:$0xf] %v692_v58  ;;  %695 = vst [vmem:[%s4395_s21 + $0x2ec] sm:$0xf] %v694_v59  ;;  %v696_v60 = vld [vmem:[%s4388_s20 + $0x5e0] sm:$0xf] }
  0x8f   : > { %v698_v61 = vld [vmem:[%s4388_s20 + $0x5e8] sm:$0xf]  ;;  %v700_v62 = vld [vmem:[%s4388_s20 + $0x5f0] sm:$0xf]  ;;  %697 = vst [vmem:[%s4395_s21 + $0x2f0] sm:$0xf] %v696_v60 }
  0x90   : > { %699 = vst [vmem:[%s4395_s21 + $0x2f4] sm:$0xf] %v698_v61  ;;  %701 = vst [vmem:[%s4395_s21 + $0x2f8] sm:$0xf] %v700_v62  ;;  %v702_v63 = vld [vmem:[%s4388_s20 + $0x5f8] sm:$0xf] }
  0x91   : > { %v704_v0 = vld [vmem:[%s4388_s20 + $0x600] sm:$0xf]  ;;  %v706_v1 = vld [vmem:[%s4388_s20 + $0x608] sm:$0xf]  ;;  %703 = vst [vmem:[%s4395_s21 + $0x2fc] sm:$0xf] %v702_v63 }
  0x92   : > { %705 = vst [vmem:[%s4395_s21 + $0x300] sm:$0xf] %v704_v0  ;;  %707 = vst [vmem:[%s4395_s21 + $0x304] sm:$0xf] %v706_v1  ;;  %v708_v2 = vld [vmem:[%s4388_s20 + $0x610] sm:$0xf] }
  0x93   : > { %v710_v3 = vld [vmem:[%s4388_s20 + $0x618] sm:$0xf]  ;;  %v712_v4 = vld [vmem:[%s4388_s20 + $0x620] sm:$0xf]  ;;  %709 = vst [vmem:[%s4395_s21 + $0x308] sm:$0xf] %v708_v2 }
  0x94   : > { %711 = vst [vmem:[%s4395_s21 + $0x30c] sm:$0xf] %v710_v3  ;;  %713 = vst [vmem:[%s4395_s21 + $0x310] sm:$0xf] %v712_v4  ;;  %v714_v5 = vld [vmem:[%s4388_s20 + $0x628] sm:$0xf] }
  0x95   : > { %v716_v6 = vld [vmem:[%s4388_s20 + $0x630] sm:$0xf]  ;;  %v718_v7 = vld [vmem:[%s4388_s20 + $0x638] sm:$0xf]  ;;  %715 = vst [vmem:[%s4395_s21 + $0x314] sm:$0xf] %v714_v5 }
  0x96   : > { %717 = vst [vmem:[%s4395_s21 + $0x318] sm:$0xf] %v716_v6  ;;  %719 = vst [vmem:[%s4395_s21 + $0x31c] sm:$0xf] %v718_v7  ;;  %v720_v8 = vld [vmem:[%s4388_s20 + $0x640] sm:$0xf] }
  0x97   : > { %v722_v9 = vld [vmem:[%s4388_s20 + $0x648] sm:$0xf]  ;;  %v724_v10 = vld [vmem:[%s4388_s20 + $0x650] sm:$0xf]  ;;  %721 = vst [vmem:[%s4395_s21 + $0x320] sm:$0xf] %v720_v8 }
  0x98   : > { %723 = vst [vmem:[%s4395_s21 + $0x324] sm:$0xf] %v722_v9  ;;  %725 = vst [vmem:[%s4395_s21 + $0x328] sm:$0xf] %v724_v10  ;;  %v726_v11 = vld [vmem:[%s4388_s20 + $0x658] sm:$0xf] }
  0x99   : > { %v728_v12 = vld [vmem:[%s4388_s20 + $0x660] sm:$0xf]  ;;  %v730_v13 = vld [vmem:[%s4388_s20 + $0x668] sm:$0xf]  ;;  %727 = vst [vmem:[%s4395_s21 + $0x32c] sm:$0xf] %v726_v11 }
  0x9a   : > { %729 = vst [vmem:[%s4395_s21 + $0x330] sm:$0xf] %v728_v12  ;;  %731 = vst [vmem:[%s4395_s21 + $0x334] sm:$0xf] %v730_v13  ;;  %v732_v14 = vld [vmem:[%s4388_s20 + $0x670] sm:$0xf] }
  0x9b   : > { %v734_v15 = vld [vmem:[%s4388_s20 + $0x678] sm:$0xf]  ;;  %v736_v16 = vld [vmem:[%s4388_s20 + $0x680] sm:$0xf]  ;;  %733 = vst [vmem:[%s4395_s21 + $0x338] sm:$0xf] %v732_v14 }
  0x9c   : > { %735 = vst [vmem:[%s4395_s21 + $0x33c] sm:$0xf] %v734_v15  ;;  %737 = vst [vmem:[%s4395_s21 + $0x340] sm:$0xf] %v736_v16  ;;  %v738_v17 = vld [vmem:[%s4388_s20 + $0x688] sm:$0xf] }
  0x9d   : > { %v740_v18 = vld [vmem:[%s4388_s20 + $0x690] sm:$0xf]  ;;  %v742_v19 = vld [vmem:[%s4388_s20 + $0x698] sm:$0xf]  ;;  %739 = vst [vmem:[%s4395_s21 + $0x344] sm:$0xf] %v738_v17 }
  0x9e   : > { %741 = vst [vmem:[%s4395_s21 + $0x348] sm:$0xf] %v740_v18  ;;  %743 = vst [vmem:[%s4395_s21 + $0x34c] sm:$0xf] %v742_v19  ;;  %v744_v20 = vld [vmem:[%s4388_s20 + $0x6a0] sm:$0xf] }
  0x9f   : > { %v746_v21 = vld [vmem:[%s4388_s20 + $0x6a8] sm:$0xf]  ;;  %v748_v22 = vld [vmem:[%s4388_s20 + $0x6b0] sm:$0xf]  ;;  %745 = vst [vmem:[%s4395_s21 + $0x350] sm:$0xf] %v744_v20 }
  0xa0   : > { %747 = vst [vmem:[%s4395_s21 + $0x354] sm:$0xf] %v746_v21  ;;  %749 = vst [vmem:[%s4395_s21 + $0x358] sm:$0xf] %v748_v22  ;;  %v750_v23 = vld [vmem:[%s4388_s20 + $0x6b8] sm:$0xf] }
  0xa1   : > { %v752_v24 = vld [vmem:[%s4388_s20 + $0x6c0] sm:$0xf]  ;;  %v754_v25 = vld [vmem:[%s4388_s20 + $0x6c8] sm:$0xf]  ;;  %751 = vst [vmem:[%s4395_s21 + $0x35c] sm:$0xf] %v750_v23 }
  0xa2   : > { %753 = vst [vmem:[%s4395_s21 + $0x360] sm:$0xf] %v752_v24  ;;  %755 = vst [vmem:[%s4395_s21 + $0x364] sm:$0xf] %v754_v25  ;;  %v756_v26 = vld [vmem:[%s4388_s20 + $0x6d0] sm:$0xf] }
  0xa3   : > { %v758_v27 = vld [vmem:[%s4388_s20 + $0x6d8] sm:$0xf]  ;;  %v760_v28 = vld [vmem:[%s4388_s20 + $0x6e0] sm:$0xf]  ;;  %757 = vst [vmem:[%s4395_s21 + $0x368] sm:$0xf] %v756_v26 }
  0xa4   : > { %759 = vst [vmem:[%s4395_s21 + $0x36c] sm:$0xf] %v758_v27  ;;  %761 = vst [vmem:[%s4395_s21 + $0x370] sm:$0xf] %v760_v28  ;;  %v762_v29 = vld [vmem:[%s4388_s20 + $0x6e8] sm:$0xf] }
  0xa5   : > { %v764_v30 = vld [vmem:[%s4388_s20 + $0x6f0] sm:$0xf]  ;;  %v766_v31 = vld [vmem:[%s4388_s20 + $0x6f8] sm:$0xf]  ;;  %763 = vst [vmem:[%s4395_s21 + $0x374] sm:$0xf] %v762_v29 }
  0xa6   : > { %765 = vst [vmem:[%s4395_s21 + $0x378] sm:$0xf] %v764_v30  ;;  %767 = vst [vmem:[%s4395_s21 + $0x37c] sm:$0xf] %v766_v31  ;;  %v768_v32 = vld [vmem:[%s4388_s20 + $0x700] sm:$0xf] }
  0xa7   : > { %v770_v33 = vld [vmem:[%s4388_s20 + $0x708] sm:$0xf]  ;;  %v772_v34 = vld [vmem:[%s4388_s20 + $0x710] sm:$0xf]  ;;  %769 = vst [vmem:[%s4395_s21 + $0x380] sm:$0xf] %v768_v32 }
  0xa8   : > { %771 = vst [vmem:[%s4395_s21 + $0x384] sm:$0xf] %v770_v33  ;;  %773 = vst [vmem:[%s4395_s21 + $0x388] sm:$0xf] %v772_v34  ;;  %v774_v35 = vld [vmem:[%s4388_s20 + $0x718] sm:$0xf] }
  0xa9   : > { %v776_v36 = vld [vmem:[%s4388_s20 + $0x720] sm:$0xf]  ;;  %v778_v37 = vld [vmem:[%s4388_s20 + $0x728] sm:$0xf]  ;;  %775 = vst [vmem:[%s4395_s21 + $0x38c] sm:$0xf] %v774_v35 }
  0xaa   : > { %777 = vst [vmem:[%s4395_s21 + $0x390] sm:$0xf] %v776_v36  ;;  %779 = vst [vmem:[%s4395_s21 + $0x394] sm:$0xf] %v778_v37  ;;  %v780_v38 = vld [vmem:[%s4388_s20 + $0x730] sm:$0xf] }
  0xab   : > { %v782_v39 = vld [vmem:[%s4388_s20 + $0x738] sm:$0xf]  ;;  %v784_v40 = vld [vmem:[%s4388_s20 + $0x740] sm:$0xf]  ;;  %781 = vst [vmem:[%s4395_s21 + $0x398] sm:$0xf] %v780_v38 }
  0xac   : > { %783 = vst [vmem:[%s4395_s21 + $0x39c] sm:$0xf] %v782_v39  ;;  %785 = vst [vmem:[%s4395_s21 + $0x3a0] sm:$0xf] %v784_v40  ;;  %v786_v41 = vld [vmem:[%s4388_s20 + $0x748] sm:$0xf] }
  0xad   : > { %v788_v42 = vld [vmem:[%s4388_s20 + $0x750] sm:$0xf]  ;;  %v790_v43 = vld [vmem:[%s4388_s20 + $0x758] sm:$0xf]  ;;  %787 = vst [vmem:[%s4395_s21 + $0x3a4] sm:$0xf] %v786_v41 }
  0xae   : > { %789 = vst [vmem:[%s4395_s21 + $0x3a8] sm:$0xf] %v788_v42  ;;  %791 = vst [vmem:[%s4395_s21 + $0x3ac] sm:$0xf] %v790_v43  ;;  %v792_v44 = vld [vmem:[%s4388_s20 + $0x760] sm:$0xf] }
  0xaf   : > { %v794_v45 = vld [vmem:[%s4388_s20 + $0x768] sm:$0xf]  ;;  %v796_v46 = vld [vmem:[%s4388_s20 + $0x770] sm:$0xf]  ;;  %793 = vst [vmem:[%s4395_s21 + $0x3b0] sm:$0xf] %v792_v44 }
  0xb0   : > { %795 = vst [vmem:[%s4395_s21 + $0x3b4] sm:$0xf] %v794_v45  ;;  %797 = vst [vmem:[%s4395_s21 + $0x3b8] sm:$0xf] %v796_v46  ;;  %v798_v47 = vld [vmem:[%s4388_s20 + $0x778] sm:$0xf] }
  0xb1   : > { %v800_v48 = vld [vmem:[%s4388_s20 + $0x780] sm:$0xf]  ;;  %v802_v49 = vld [vmem:[%s4388_s20 + $0x788] sm:$0xf]  ;;  %799 = vst [vmem:[%s4395_s21 + $0x3bc] sm:$0xf] %v798_v47 }
  0xb2   : > { %801 = vst [vmem:[%s4395_s21 + $0x3c0] sm:$0xf] %v800_v48  ;;  %803 = vst [vmem:[%s4395_s21 + $0x3c4] sm:$0xf] %v802_v49  ;;  %v804_v50 = vld [vmem:[%s4388_s20 + $0x790] sm:$0xf] }
  0xb3   : > { %v806_v51 = vld [vmem:[%s4388_s20 + $0x798] sm:$0xf]  ;;  %v808_v52 = vld [vmem:[%s4388_s20 + $0x7a0] sm:$0xf]  ;;  %805 = vst [vmem:[%s4395_s21 + $0x3c8] sm:$0xf] %v804_v50 }
  0xb4   : > { %807 = vst [vmem:[%s4395_s21 + $0x3cc] sm:$0xf] %v806_v51  ;;  %809 = vst [vmem:[%s4395_s21 + $0x3d0] sm:$0xf] %v808_v52  ;;  %v810_v53 = vld [vmem:[%s4388_s20 + $0x7a8] sm:$0xf] }
  0xb5   : > { %v812_v54 = vld [vmem:[%s4388_s20 + $0x7b0] sm:$0xf]  ;;  %v814_v55 = vld [vmem:[%s4388_s20 + $0x7b8] sm:$0xf]  ;;  %811 = vst [vmem:[%s4395_s21 + $0x3d4] sm:$0xf] %v810_v53 }
  0xb6   : > { %813 = vst [vmem:[%s4395_s21 + $0x3d8] sm:$0xf] %v812_v54  ;;  %815 = vst [vmem:[%s4395_s21 + $0x3dc] sm:$0xf] %v814_v55  ;;  %v816_v56 = vld [vmem:[%s4388_s20 + $0x7c0] sm:$0xf] }
  0xb7   : > { %v818_v57 = vld [vmem:[%s4388_s20 + $0x7c8] sm:$0xf]  ;;  %v820_v58 = vld [vmem:[%s4388_s20 + $0x7d0] sm:$0xf]  ;;  %817 = vst [vmem:[%s4395_s21 + $0x3e0] sm:$0xf] %v816_v56 }
  0xb8   : > { %819 = vst [vmem:[%s4395_s21 + $0x3e4] sm:$0xf] %v818_v57  ;;  %821 = vst [vmem:[%s4395_s21 + $0x3e8] sm:$0xf] %v820_v58  ;;  %v822_v59 = vld [vmem:[%s4388_s20 + $0x7d8] sm:$0xf] }
  0xb9   : > { %v824_v60 = vld [vmem:[%s4388_s20 + $0x7e0] sm:$0xf]  ;;  %v826_v61 = vld [vmem:[%s4388_s20 + $0x7e8] sm:$0xf]  ;;  %823 = vst [vmem:[%s4395_s21 + $0x3ec] sm:$0xf] %v822_v59 }
  0xba   : > { %825 = vst [vmem:[%s4395_s21 + $0x3f0] sm:$0xf] %v824_v60  ;;  %827 = vst [vmem:[%s4395_s21 + $0x3f4] sm:$0xf] %v826_v61  ;;  %v828_v62 = vld [vmem:[%s4388_s20 + $0x7f0] sm:$0xf] }
  0xbb   : > { %v830_v63 = vld [vmem:[%s4388_s20 + $0x7f8] sm:$0xf]  ;;  %v832_v0 = vld [vmem:[%s4388_s20 + $0x800] sm:$0xf]  ;;  %829 = vst [vmem:[%s4395_s21 + $0x3f8] sm:$0xf] %v828_v62 }
  0xbc   : > { %831 = vst [vmem:[%s4395_s21 + $0x3fc] sm:$0xf] %v830_v63  ;;  %833 = vst [vmem:[%s4395_s21 + $0x400] sm:$0xf] %v832_v0  ;;  %v834_v1 = vld [vmem:[%s4388_s20 + $0x808] sm:$0xf] }
  0xbd   : > { %v836_v2 = vld [vmem:[%s4388_s20 + $0x810] sm:$0xf]  ;;  %v838_v3 = vld [vmem:[%s4388_s20 + $0x818] sm:$0xf]  ;;  %835 = vst [vmem:[%s4395_s21 + $0x404] sm:$0xf] %v834_v1 }
  0xbe   : > { %837 = vst [vmem:[%s4395_s21 + $0x408] sm:$0xf] %v836_v2  ;;  %839 = vst [vmem:[%s4395_s21 + $0x40c] sm:$0xf] %v838_v3  ;;  %v840_v4 = vld [vmem:[%s4388_s20 + $0x820] sm:$0xf] }
  0xbf   : > { %v842_v5 = vld [vmem:[%s4388_s20 + $0x828] sm:$0xf]  ;;  %v844_v6 = vld [vmem:[%s4388_s20 + $0x830] sm:$0xf]  ;;  %841 = vst [vmem:[%s4395_s21 + $0x410] sm:$0xf] %v840_v4 }
  0xc0   : > { %843 = vst [vmem:[%s4395_s21 + $0x414] sm:$0xf] %v842_v5  ;;  %845 = vst [vmem:[%s4395_s21 + $0x418] sm:$0xf] %v844_v6  ;;  %v846_v7 = vld [vmem:[%s4388_s20 + $0x838] sm:$0xf] }
  0xc1   : > { %v848_v8 = vld [vmem:[%s4388_s20 + $0x840] sm:$0xf]  ;;  %v850_v9 = vld [vmem:[%s4388_s20 + $0x848] sm:$0xf]  ;;  %847 = vst [vmem:[%s4395_s21 + $0x41c] sm:$0xf] %v846_v7 }
  0xc2   : > { %849 = vst [vmem:[%s4395_s21 + $0x420] sm:$0xf] %v848_v8  ;;  %851 = vst [vmem:[%s4395_s21 + $0x424] sm:$0xf] %v850_v9  ;;  %v852_v10 = vld [vmem:[%s4388_s20 + $0x850] sm:$0xf] }
  0xc3   : > { %v854_v11 = vld [vmem:[%s4388_s20 + $0x858] sm:$0xf]  ;;  %v856_v12 = vld [vmem:[%s4388_s20 + $0x860] sm:$0xf]  ;;  %853 = vst [vmem:[%s4395_s21 + $0x428] sm:$0xf] %v852_v10 }
  0xc4   : > { %855 = vst [vmem:[%s4395_s21 + $0x42c] sm:$0xf] %v854_v11  ;;  %857 = vst [vmem:[%s4395_s21 + $0x430] sm:$0xf] %v856_v12  ;;  %v858_v13 = vld [vmem:[%s4388_s20 + $0x868] sm:$0xf] }
  0xc5   : > { %v860_v14 = vld [vmem:[%s4388_s20 + $0x870] sm:$0xf]  ;;  %v862_v15 = vld [vmem:[%s4388_s20 + $0x878] sm:$0xf]  ;;  %859 = vst [vmem:[%s4395_s21 + $0x434] sm:$0xf] %v858_v13 }
  0xc6   : > { %861 = vst [vmem:[%s4395_s21 + $0x438] sm:$0xf] %v860_v14  ;;  %863 = vst [vmem:[%s4395_s21 + $0x43c] sm:$0xf] %v862_v15  ;;  %v864_v16 = vld [vmem:[%s4388_s20 + $0x880] sm:$0xf] }
  0xc7   : > { %v866_v17 = vld [vmem:[%s4388_s20 + $0x888] sm:$0xf]  ;;  %v868_v18 = vld [vmem:[%s4388_s20 + $0x890] sm:$0xf]  ;;  %865 = vst [vmem:[%s4395_s21 + $0x440] sm:$0xf] %v864_v16 }
  0xc8   : > { %867 = vst [vmem:[%s4395_s21 + $0x444] sm:$0xf] %v866_v17  ;;  %869 = vst [vmem:[%s4395_s21 + $0x448] sm:$0xf] %v868_v18  ;;  %v870_v19 = vld [vmem:[%s4388_s20 + $0x898] sm:$0xf] }
  0xc9   : > { %v872_v20 = vld [vmem:[%s4388_s20 + $0x8a0] sm:$0xf]  ;;  %v874_v21 = vld [vmem:[%s4388_s20 + $0x8a8] sm:$0xf]  ;;  %871 = vst [vmem:[%s4395_s21 + $0x44c] sm:$0xf] %v870_v19 }
  0xca   : > { %873 = vst [vmem:[%s4395_s21 + $0x450] sm:$0xf] %v872_v20  ;;  %875 = vst [vmem:[%s4395_s21 + $0x454] sm:$0xf] %v874_v21  ;;  %v876_v22 = vld [vmem:[%s4388_s20 + $0x8b0] sm:$0xf] }
  0xcb   : > { %v878_v23 = vld [vmem:[%s4388_s20 + $0x8b8] sm:$0xf]  ;;  %v880_v24 = vld [vmem:[%s4388_s20 + $0x8c0] sm:$0xf]  ;;  %877 = vst [vmem:[%s4395_s21 + $0x458] sm:$0xf] %v876_v22 }
  0xcc   : > { %879 = vst [vmem:[%s4395_s21 + $0x45c] sm:$0xf] %v878_v23  ;;  %881 = vst [vmem:[%s4395_s21 + $0x460] sm:$0xf] %v880_v24  ;;  %v882_v25 = vld [vmem:[%s4388_s20 + $0x8c8] sm:$0xf] }
  0xcd   : > { %v884_v26 = vld [vmem:[%s4388_s20 + $0x8d0] sm:$0xf]  ;;  %v886_v27 = vld [vmem:[%s4388_s20 + $0x8d8] sm:$0xf]  ;;  %883 = vst [vmem:[%s4395_s21 + $0x464] sm:$0xf] %v882_v25 }
  0xce   : > { %885 = vst [vmem:[%s4395_s21 + $0x468] sm:$0xf] %v884_v26  ;;  %887 = vst [vmem:[%s4395_s21 + $0x46c] sm:$0xf] %v886_v27  ;;  %v888_v28 = vld [vmem:[%s4388_s20 + $0x8e0] sm:$0xf] }
  0xcf   : > { %v890_v29 = vld [vmem:[%s4388_s20 + $0x8e8] sm:$0xf]  ;;  %v892_v30 = vld [vmem:[%s4388_s20 + $0x8f0] sm:$0xf]  ;;  %889 = vst [vmem:[%s4395_s21 + $0x470] sm:$0xf] %v888_v28 }
  0xd0   : > { %891 = vst [vmem:[%s4395_s21 + $0x474] sm:$0xf] %v890_v29  ;;  %893 = vst [vmem:[%s4395_s21 + $0x478] sm:$0xf] %v892_v30  ;;  %v894_v31 = vld [vmem:[%s4388_s20 + $0x8f8] sm:$0xf] }
  0xd1   : > { %895 = vst [vmem:[%s4395_s21 + $0x47c] sm:$0xf] %v894_v31 }
  0xd2 PF: > { %1506 = sbr.rel (!%p4370_p3) target bundleno = 224 (0xe0), region = 77  ;;  %s1508_s22 = sand.u32 (%p4370_p3), 1, %s4278_s28  }
  0xd3   : > { %s3631_s23 = sshll.u32 (%p4370_p3), %s4286_s30, 2  ;;  %s3630_s24 = sshll.u32 (%p4370_p3), %s1508_s22, 6 }
  0xd4   : > { %s4975_s12 = scalar_lea.vmem (%p4370_p3), %s5259_s5, %s3631_s23  ;;  %s1510_s11 = scalar_lea.vmem (%p4370_p3), [#allocation3], %s3630_s24 }
  0xd5   : > { %v1528_v32 = vld [vmem:[%s4975_s12] sm:$0xf] (%p4370_p3)  ;;  %v1530_v33 = vld [vmem:[%s4975_s12 + $0x8] sm:$0xf] (%p4370_p3)  ;;  %v1532_v34 = vld [vmem:[%s4975_s12 + $0x10] sm:$0xf] (%p4370_p3) }
  0xd6   : > { %1529 = vst [vmem:[%s1510_s11] sm:$0xf] (%p4370_p3), %v1528_v32  ;;  %1531 = vst [vmem:[%s1510_s11 + $0x4] sm:$0xf] (%p4370_p3), %v1530_v33  ;;  %v1534_v35 = vld [vmem:[%s4975_s12 + $0x18] sm:$0xf] (%p4370_p3) }
  0xd7   : > { %v1536_v36 = vld [vmem:[%s4975_s12 + $0x20] sm:$0xf] (%p4370_p3)  ;;  %1533 = vst [vmem:[%s1510_s11 + $0x8] sm:$0xf] (%p4370_p3), %v1532_v34  ;;  %1535 = vst [vmem:[%s1510_s11 + $0xc] sm:$0xf] (%p4370_p3), %v1534_v35 }
  0xd8   : > { %1537 = vst [vmem:[%s1510_s11 + $0x10] sm:$0xf] (%p4370_p3), %v1536_v36  ;;  %v1538_v37 = vld [vmem:[%s4975_s12 + $0x28] sm:$0xf] (%p4370_p3)  ;;  %v1540_v38 = vld [vmem:[%s4975_s12 + $0x30] sm:$0xf] (%p4370_p3) }
  0xd9   : > { %v1542_v39 = vld [vmem:[%s4975_s12 + $0x38] sm:$0xf]  ;;  %1539 = vst [vmem:[%s1510_s11 + $0x14] sm:$0xf] %v1538_v37  ;;  %1541 = vst [vmem:[%s1510_s11 + $0x18] sm:$0xf] %v1540_v38 }
  0xda   : > { %1543 = vst [vmem:[%s1510_s11 + $0x1c] sm:$0xf] %v1542_v39  ;;  %v1544_v40 = vld [vmem:[%s4975_s12 + $0x40] sm:$0xf]  ;;  %v1546_v41 = vld [vmem:[%s4975_s12 + $0x48] sm:$0xf] }
  0xdb   : > { %v1548_v42 = vld [vmem:[%s4975_s12 + $0x50] sm:$0xf]  ;;  %1545 = vst [vmem:[%s1510_s11 + $0x20] sm:$0xf] %v1544_v40  ;;  %1547 = vst [vmem:[%s1510_s11 + $0x24] sm:$0xf] %v1546_v41 }
  0xdc   : > { %1549 = vst [vmem:[%s1510_s11 + $0x28] sm:$0xf] %v1548_v42  ;;  %v1550_v43 = vld [vmem:[%s4975_s12 + $0x58] sm:$0xf]  ;;  %v1552_v44 = vld [vmem:[%s4975_s12 + $0x60] sm:$0xf] }
  0xdd   : > { %v1554_v45 = vld [vmem:[%s4975_s12 + $0x68] sm:$0xf]  ;;  %1551 = vst [vmem:[%s1510_s11 + $0x2c] sm:$0xf] %v1550_v43  ;;  %1553 = vst [vmem:[%s1510_s11 + $0x30] sm:$0xf] %v1552_v44 }
  0xde   : > { %1555 = vst [vmem:[%s1510_s11 + $0x34] sm:$0xf] %v1554_v45  ;;  %v1556_v46 = vld [vmem:[%s4975_s12 + $0x70] sm:$0xf]  ;;  %v1558_v47 = vld [vmem:[%s4975_s12 + $0x78] sm:$0xf] }
  0xdf   : > { %1557 = vst [vmem:[%s1510_s11 + $0x38] sm:$0xf] %v1556_v46  ;;  %1559 = vst [vmem:[%s1510_s11 + $0x3c] sm:$0xf] %v1558_v47 }
  0xe0 PF: > { %p3632_p6 = scmp.ge.s32.totalorder %s4290_s9, 1  ;;  %p1625_p7 = scmp.lt.s32.totalorder %s4290_s9, 3 }
  0xe2   : > { %p1626_p8 = pnand %p3632_p6, %p1625_p7 }
  0xe3   : > { %s1632_s13 = sand.u32 (!%p1626_p8), 1, %s4274_s27   ;;  %v4999_v48 = vld [vmem:[%s5254_s0] sm:$0xff] (!%p1626_p8)  ;;  %v5004_v49 = vld [vmem:[%s5254_s0 + $0x8] sm:$0xff] (!%p1626_p8)  ;;  %v5046_v17 = vld [vmem:[%s5254_s0 + $0x10] sm:$0xff] (!%p1626_p8)  ;;  %vm4293_vm0 = vmmov (!%p1626_p8), 0   ;;  %p1705_p9 = scmp.lt.s32.totalorder (!%p1626_p8), %s4282_s29, 1 }
  0xe4   : > { %1629 = sbr.rel (%p1626_p8) target bundleno = 622 (0x26e), region = 126  ;;  %v3636_v50 = vcombine.high (!%p1626_p8), %v4999_v48, %v4999_v48  ;;  %v3638_v51 = vcombine.high (!%p1626_p8), %v5004_v49, %v5004_v49  ;;  %v5053_v20 = vld [vmem:[%s5254_s0 + $0x18] sm:$0xff] (!%p1626_p8)  ;;  %v3635_v22 = vcombine.low (!%p1626_p8), %v4999_v48, %v4999_v48  ;;  %v3637_v23 = vcombine.low (!%p1626_p8), %v5004_v49, %v5004_v49  ;;  %s3633_s15 = sshll.u32 (!%p1626_p8), %s1632_s13, 6 }
  0xe5   : > { %s4039_s19 = smul.u32 (!%p1626_p8), 1152, %s1632_s13  ;;  %v3640_v26 = vcombine.high (!%p1626_p8), %v5046_v17, %v5046_v17  ;;  %v3642_v29 = vcombine.high (!%p1626_p8), %v5053_v20, %v5053_v20  ;;  %s5192_s27 = scalar_lea.vmem (!%p1626_p8), [#allocation3], %s3633_s15 }
  0xe6   : > { %2986 = vmatprep.mubr.bf16.mxu0 (!%p1626_p8), %v3636_v50  ;;  %3026 = vmatprep.mubr.bf16.mxu1 (!%p1626_p8), %v3638_v51 }
  0xe7   : > { %s5012_s20 = scalar_lea.vmem (!%p1626_p8), [#allocation2], %s4039_s19 }
  0xe8   : > { %v4082_v52 = vld [vmem:[%s5012_s20 + $0x40] sm:$0xff] (!%p1626_p8)   ;;  %v4086_v56 = vld [vmem:[%s5012_s20 + $0x48] sm:$0xff] (!%p1626_p8)   ;;  %v4090_v60 = vld [vmem:[%s5012_s20 + $0x50] sm:$0xff] (!%p1626_p8)  }
  0xe9   : > { %v4083_v53 = vld [vmem:[%s5012_s20 + $0xc0] sm:$0xff] (!%p1626_p8)   ;;  %3811 = vmatprep.subr.bf16.mxu0 (!%p1626_p8), %v4082_v52  ;;  %v4087_v57 = vld [vmem:[%s5012_s20 + $0xc8] sm:$0xff] (!%p1626_p8)   ;;  %v4091_v61 = vld [vmem:[%s5012_s20 + $0xd0] sm:$0xff] (!%p1626_p8)  }
  0xea   : > { %v4084_v54 = vld [vmem:[%s5012_s20] sm:$0xff] (!%p1626_p8)   ;;  %3833 = vmatprep.subr.bf16.mxu1 (!%p1626_p8), %v4083_v53  ;;  %v4088_v58 = vld [vmem:[%s5012_s20 + $0x8] sm:$0xff] (!%p1626_p8)   ;;  %v4092_v62 = vld [vmem:[%s5012_s20 + $0x10] sm:$0xff] (!%p1626_p8)  }
  0xeb   : > { %v4085_v55 = vld [vmem:[%s5012_s20 + $0x80] sm:$0xff]   ;;  %3812 = vmatpush3.bf16.msra.mxu0 %v4084_v54  ;;  %v4089_v59 = vld [vmem:[%s5012_s20 + $0x88] sm:$0xff]   ;;  %v4093_v63 = vld [vmem:[%s5012_s20 + $0x90] sm:$0xff]   ;;  %s5271_s29 = smov (!%p1705_p9, %s4282_s29), 1 }
  0xec   : > { %3834 = vmatpush3.bf16.msra.mxu1 %v4085_v55  ;;  %3813 = vmatprep.subr.bf16.mxu0 %v4086_v56  ;;  %v4094_v0 = vld [vmem:[%s5012_s20 + $0x58] sm:$0xff]   ;;  %v4098_v4 = vld [vmem:[%s5012_s20 + $0x60] sm:$0xff]   ;;  %v4102_v8 = vld [vmem:[%s5012_s20 + $0x68] sm:$0xff]   ;;  %s1717_s25 = scalar_lea.vmem %s5260_s6, %s5271_s29  ;;  %s1707_s11 = scalar_lea.vmem %s5256_s2, %s5271_s29 }
  0xed   : > { %3835 = vmatprep.subr.bf16.mxu1 %v4087_v57  ;;  %v4095_v1 = vld [vmem:[%s5012_s20 + $0xd8] sm:$0xff]   ;;  %v4099_v5 = vld [vmem:[%s5012_s20 + $0xe0] sm:$0xff]   ;;  %v4103_v9 = vld [vmem:[%s5012_s20 + $0xe8] sm:$0xff]   ;;  %s1720_s17 = scalar_lea.vmem %s5261_s7, %s5271_s29  ;;  %s3634_s13 = sshll.u32 %s5271_s29, 2 }
  0xee   : > { %v4096_v2 = vld [vmem:[%s5012_s20 + $0x18] sm:$0xff]   ;;  %v4100_v6 = vld [vmem:[%s5012_s20 + $0x20] sm:$0xff]   ;;  %v4104_v10 = vld [vmem:[%s5012_s20 + $0x28] sm:$0xff]   ;;  %s1728_s23 = scalar_lea.vmem %s5262_s8, %s3634_s13 }
  0xef   : > { %3814 = vmatpush3.bf16.msra.mxu0 %v4088_v58  ;;  %v4097_v3 = vld [vmem:[%s5012_s20 + $0x98] sm:$0xff]   ;;  %v4101_v7 = vld [vmem:[%s5012_s20 + $0xa0] sm:$0xff]   ;;  %v4105_v11 = vld [vmem:[%s5012_s20 + $0xa8] sm:$0xff]  }
  0xf0   : > { %3836 = vmatpush3.bf16.msra.mxu1 %v4089_v59  ;;  %3815 = vmatprep.subr.bf16.mxu0 %v4090_v60  ;;  %v4106_v12 = vld [vmem:[%s5012_s20 + $0x70] sm:$0xff]   ;;  %v4110_v16 = vld [vmem:[%s5012_s20 + $0x78] sm:$0xff]   ;;  %v4118_v24 = vld [vmem:[%s5012_s20 + $0x140] sm:$0xff]   ;;  %v3639_v59 = vcombine.low %v5046_v17, %v5046_v17 }
  0xf1   : > { %3837 = vmatprep.subr.bf16.mxu1 %v4091_v61  ;;  %v4107_v13 = vld [vmem:[%s5012_s20 + $0xf0] sm:$0xff]   ;;  %v4111_v18 = vld [vmem:[%s5012_s20 + $0xf8] sm:$0xff]   ;;  %v4119_v25 = vld [vmem:[%s5012_s20 + $0x100] sm:$0xff]  }
  0xf2   : > { %v4108_v14 = vld [vmem:[%s5012_s20 + $0x30] sm:$0xff]   ;;  %v4112_v19 = vld [vmem:[%s5012_s20 + $0x38] sm:$0xff]   ;;  %v4120_v27 = vld [vmem:[%s5012_s20 + $0x1c0] sm:$0xff]  }
  0xf3   : > { %3816 = vmatpush3.bf16.msra.mxu0 %v4092_v62  ;;  %v4109_v15 = vld [vmem:[%s5012_s20 + $0xb0] sm:$0xff]   ;;  %v4113_v21 = vld [vmem:[%s5012_s20 + $0xb8] sm:$0xff]   ;;  %v4121_v28 = vld [vmem:[%s5012_s20 + $0x180] sm:$0xff]   ;;  %v3641_v62 = vcombine.low %v5053_v20, %v5053_v20 }
  0xf4   : > { %3838 = vmatpush3.bf16.msra.mxu1 %v4093_v63  ;;  %3817 = vmatprep.subr.bf16.mxu0 %v4094_v0  ;;  %v4122_v30 = vld [vmem:[%s5012_s20 + $0x148] sm:$0xff]   ;;  %v4126_v34 = vld [vmem:[%s5012_s20 + $0x150] sm:$0xff]   ;;  %v4130_v38 = vld [vmem:[%s5012_s20 + $0x158] sm:$0xff]  }
  0xf5   : > { %3839 = vmatprep.subr.bf16.mxu1 %v4095_v1  ;;  %v4123_v31 = vld [vmem:[%s5012_s20 + $0x108] sm:$0xff]   ;;  %v4127_v35 = vld [vmem:[%s5012_s20 + $0x110] sm:$0xff]   ;;  %v4131_v39 = vld [vmem:[%s5012_s20 + $0x118] sm:$0xff]  }
  0xf6   : > { %v4124_v32 = vld [vmem:[%s5012_s20 + $0x1c8] sm:$0xff]   ;;  %v4128_v36 = vld [vmem:[%s5012_s20 + $0x1d0] sm:$0xff]   ;;  %v4132_v40 = vld [vmem:[%s5012_s20 + $0x1d8] sm:$0xff]  }
  0xf7   : > { %3818 = vmatpush3.bf16.msra.mxu0 %v4096_v2  ;;  %v4125_v33 = vld [vmem:[%s5012_s20 + $0x188] sm:$0xff]   ;;  %v4129_v37 = vld [vmem:[%s5012_s20 + $0x190] sm:$0xff]   ;;  %v4133_v41 = vld [vmem:[%s5012_s20 + $0x198] sm:$0xff]  }
  0xf8   : > { %3840 = vmatpush3.bf16.msra.mxu1 %v4097_v3  ;;  %3819 = vmatprep.subr.bf16.mxu0 %v4098_v4  ;;  %v4134_v42 = vld [vmem:[%s5012_s20 + $0x160] sm:$0xff]   ;;  %v4138_v46 = vld [vmem:[%s5012_s20 + $0x168] sm:$0xff]   ;;  %v4142_v50 = vld [vmem:[%s5012_s20 + $0x170] sm:$0xff]  }
  0xf9   : > { %3841 = vmatprep.subr.bf16.mxu1 %v4099_v5  ;;  %v4135_v43 = vld [vmem:[%s5012_s20 + $0x120] sm:$0xff]   ;;  %v4139_v47 = vld [vmem:[%s5012_s20 + $0x128] sm:$0xff]   ;;  %v4143_v51 = vld [vmem:[%s5012_s20 + $0x130] sm:$0xff]  }
  0xfa   : > { %v4136_v44 = vld [vmem:[%s5012_s20 + $0x1e0] sm:$0xff]   ;;  %v4140_v48 = vld [vmem:[%s5012_s20 + $0x1e8] sm:$0xff]   ;;  %v4144_v52 = vld [vmem:[%s5012_s20 + $0x1f0] sm:$0xff]  }
  0xfb   : > { %3820 = vmatpush3.bf16.msra.mxu0 %v4100_v6  ;;  %v4137_v45 = vld [vmem:[%s5012_s20 + $0x1a0] sm:$0xff]   ;;  %v4141_v49 = vld [vmem:[%s5012_s20 + $0x1a8] sm:$0xff]   ;;  %v4145_v53 = vld [vmem:[%s5012_s20 + $0x1b0] sm:$0xff]  }
  0xfc   : > { %3842 = vmatpush3.bf16.msra.mxu1 %v4101_v7  ;;  %3821 = vmatprep.subr.bf16.mxu0 %v4102_v8  ;;  %v4146_v54 = vld [vmem:[%s5012_s20 + $0x178] sm:$0xff]   ;;  %v5096_v55 = vld [vmem:[%s5254_s0 + $0x20] sm:$0xff]  ;;  %v5103_v58 = vld [vmem:[%s5254_s0 + $0x28] sm:$0xff] }
  0xfd   : > { %3843 = vmatprep.subr.bf16.mxu1 %v4103_v9  ;;  %v4147_v56 = vld [vmem:[%s5012_s20 + $0x138] sm:$0xff]   ;;  %v4152_v61 = vld [vmem:[%s5012_s20 + $0x240] sm:$0xff]   ;;  %v3644_v0 = vcombine.high %v5096_v55, %v5096_v55  ;;  %v3646_v3 = vcombine.high %v5103_v58, %v5103_v58  ;;  %v4158_v4 = vld [vmem:[%s5012_s20 + $0x248] sm:$0xff]  }
  0xfe   : > { %v4148_v57 = vld [vmem:[%s5012_s20 + $0x1f8] sm:$0xff]   ;;  %v4155_v63 = vld [vmem:[%s5012_s20 + $0x200] sm:$0xff]   ;;  %v4159_v5 = vld [vmem:[%s5012_s20 + $0x208] sm:$0xff]  }
  0xff   : > { %3822 = vmatpush3.bf16.msra.mxu0 %v4104_v10  ;;  %v4151_v60 = vld [vmem:[%s5012_s20 + $0x1b8] sm:$0xff]   ;;  %v4156_v1 = vld [vmem:[%s5012_s20 + $0x2c0] sm:$0xff]   ;;  %v4160_v6 = vld [vmem:[%s5012_s20 + $0x2c8] sm:$0xff]  }
 0x100   : > { %3844 = vmatpush3.bf16.msra.mxu1 %v4105_v11  ;;  %3823 = vmatprep.subr.bf16.mxu0 %v4106_v12  ;;  %v4157_v2 = vld [vmem:[%s5012_s20 + $0x280] sm:$0xff]   ;;  %v4161_v7 = vld [vmem:[%s5012_s20 + $0x288] sm:$0xff]   ;;  %v4162_v8 = vld [vmem:[%s5012_s20 + $0x250] sm:$0xff]  }
 0x101   : > { %3845 = vmatprep.subr.bf16.mxu1 %v4107_v13  ;;  %v4163_v9 = vld [vmem:[%s5012_s20 + $0x210] sm:$0xff]   ;;  %v4166_v12 = vld [vmem:[%s5012_s20 + $0x258] sm:$0xff]   ;;  %v4171_v17 = vld [vmem:[%s5012_s20 + $0x220] sm:$0xff]  }
 0x102   : > { %v4164_v10 = vld [vmem:[%s5012_s20 + $0x2d0] sm:$0xff]   ;;  %v4167_v13 = vld [vmem:[%s5012_s20 + $0x218] sm:$0xff]   ;;  %v4174_v20 = vld [vmem:[%s5012_s20 + $0x268] sm:$0xff]  }
 0x103   : > { %3824 = vmatpush3.bf16.msra.mxu0 %v4108_v14  ;;  %v4165_v11 = vld [vmem:[%s5012_s20 + $0x290] sm:$0xff]   ;;  %v4168_v14 = vld [vmem:[%s5012_s20 + $0x2d8] sm:$0xff]  }
 0x104   : > { %3846 = vmatpush3.bf16.msra.mxu1 %v4109_v15  ;;  %3825 = vmatprep.subr.bf16.mxu0 %v4110_v16  ;;  %v4169_v15 = vld [vmem:[%s5012_s20 + $0x298] sm:$0xff]   ;;  %v4170_v16 = vld [vmem:[%s5012_s20 + $0x260] sm:$0xff]  }
 0x105   : > { %3847 = vmatprep.subr.bf16.mxu1 %v4111_v18  ;;  %v4172_v18 = vld [vmem:[%s5012_s20 + $0x2e0] sm:$0xff]  }
 0x107   : > { %3826 = vmatpush3.bf16.msra.mxu0 %v4112_v19  ;;  %v4173_v19 = vld [vmem:[%s5012_s20 + $0x2a0] sm:$0xff]  }
 0x108   : > { %3848 = vmatpush3.bf16.msra.mxu1 %v4113_v21  ;;  %3855 = vmatprep.subr.bf16.mxu0 %v4118_v24  ;;  %v4175_v21 = vld [vmem:[%s5012_s20 + $0x228] sm:$0xff]   ;;  %v4178_v24 = vld [vmem:[%s5012_s20 + $0x270] sm:$0xff]  }
 0x109   : > { %3877 = vmatprep.subr.bf16.mxu1 %v4120_v27  ;;  %v4181_v27 = vld [vmem:[%s5012_s20 + $0x2b0] sm:$0xff]  }
 0x10a   : > { %2987 = vmatmul.mubr.bf16.vlgmr.msra.gmra.mrb[0].mxu0 %v3635_v22  ;;  %v4176_v22 = vld [vmem:[%s5012_s20 + $0x2e8] sm:$0xff]  }
 0x10b   : > { %3027 = vmatmul.mubr.bf16.vlgmr.msra.gmra.mrb[0].mxu1 %v3637_v23  ;;  %3856 = vmatpush3.bf16.msra.mxu0 %v4119_v25  ;;  %v4177_v23 = vld [vmem:[%s5012_s20 + $0x2a8] sm:$0xff]   ;;  %v4179_v25 = vld [vmem:[%s5012_s20 + $0x230] sm:$0xff]  }
 0x10c   : > { %3066 = vmatprep.mubr.bf16.mxu0 %v3640_v26  ;;  %3878 = vmatpush3.bf16.msra.mxu1 %v4121_v28  ;;  %v4180_v26 = vld [vmem:[%s5012_s20 + $0x2f0] sm:$0xff]   ;;  %v4182_v28 = vld [vmem:[%s5012_s20 + $0x278] sm:$0xff]  }
 0x10d   : > { %3857 = vmatprep.subr.bf16.mxu0 %v4122_v30  ;;  %3106 = vmatprep.mubr.bf16.mxu1 %v3642_v29  ;;  %v4183_v29 = vld [vmem:[%s5012_s20 + $0x238] sm:$0xff]  }
 0x10e   : > { %3879 = vmatprep.subr.bf16.mxu1 %v4124_v32  ;;  %v4184_v30 = vld [vmem:[%s5012_s20 + $0x2f8] sm:$0xff]  }
 0x10f   : > { %3858 = vmatpush3.bf16.msra.mxu0 %v4123_v31  ;;  %v3643_v31 = vcombine.low %v5096_v55, %v5096_v55  ;;  %v4187_v32 = vld [vmem:[%s5012_s20 + $0x2b8] sm:$0xff]   ;;  %v4211_v55 = vld [vmem:[%s5012_s20 + $0x328] sm:$0xff]  }
 0x110   : > { %3880 = vmatpush3.bf16.msra.mxu1 %v4125_v33  ;;  %3859 = vmatprep.subr.bf16.mxu0 %v4126_v34  ;;  %v4188_v33 = vld [vmem:[%s5012_s20 + $0x340] sm:$0xff]   ;;  %v3645_v34 = vcombine.low %v5103_v58, %v5103_v58  ;;  %v4214_v58 = vld [vmem:[%s5012_s20 + $0x370] sm:$0xff]  }
 0x111   : > { %3881 = vmatprep.subr.bf16.mxu1 %v4128_v36  ;;  %v4192_v36 = vld [vmem:[%s5012_s20 + $0x3c0] sm:$0xff]  }
 0x113   : > { %3860 = vmatpush3.bf16.msra.mxu0 %v4127_v35  ;;  %v4191_v35 = vld [vmem:[%s5012_s20 + $0x300] sm:$0xff]  }
 0x114   : > { %3882 = vmatpush3.bf16.msra.mxu1 %v4129_v37  ;;  %3861 = vmatprep.subr.bf16.mxu0 %v4130_v38  ;;  %v4193_v37 = vld [vmem:[%s5012_s20 + $0x380] sm:$0xff]   ;;  %v4194_v38 = vld [vmem:[%s5012_s20 + $0x348] sm:$0xff]  }
 0x115   : > { %3883 = vmatprep.subr.bf16.mxu1 %v4132_v40  ;;  %v4196_v40 = vld [vmem:[%s5012_s20 + $0x3c8] sm:$0xff]  }
 0x117   : > { %3862 = vmatpush3.bf16.msra.mxu0 %v4131_v39  ;;  %v4195_v39 = vld [vmem:[%s5012_s20 + $0x308] sm:$0xff]  }
 0x118   : > { %3884 = vmatpush3.bf16.msra.mxu1 %v4133_v41  ;;  %3863 = vmatprep.subr.bf16.mxu0 %v4134_v42  ;;  %v4197_v41 = vld [vmem:[%s5012_s20 + $0x388] sm:$0xff]   ;;  %v4198_v42 = vld [vmem:[%s5012_s20 + $0x350] sm:$0xff]  }
 0x119   : > { %3885 = vmatprep.subr.bf16.mxu1 %v4136_v44  ;;  %v4200_v44 = vld [vmem:[%s5012_s20 + $0x3d0] sm:$0xff]  }
 0x11b   : > { %3864 = vmatpush3.bf16.msra.mxu0 %v4135_v43  ;;  %v4199_v43 = vld [vmem:[%s5012_s20 + $0x310] sm:$0xff]  }
 0x11c   : > { %3886 = vmatpush3.bf16.msra.mxu1 %v4137_v45  ;;  %3865 = vmatprep.subr.bf16.mxu0 %v4138_v46  ;;  %v4201_v45 = vld [vmem:[%s5012_s20 + $0x390] sm:$0xff]   ;;  %v4202_v46 = vld [vmem:[%s5012_s20 + $0x358] sm:$0xff]  }
 0x11d   : > { %3887 = vmatprep.subr.bf16.mxu1 %v4140_v48  ;;  %v4204_v48 = vld [vmem:[%s5012_s20 + $0x3d8] sm:$0xff]  }
 0x11f   : > { %3866 = vmatpush3.bf16.msra.mxu0 %v4139_v47  ;;  %v4203_v47 = vld [vmem:[%s5012_s20 + $0x318] sm:$0xff]  }
 0x120   : > { %3888 = vmatpush3.bf16.msra.mxu1 %v4141_v49  ;;  %3867 = vmatprep.subr.bf16.mxu0 %v4142_v50  ;;  %v4205_v49 = vld [vmem:[%s5012_s20 + $0x398] sm:$0xff]   ;;  %v4206_v50 = vld [vmem:[%s5012_s20 + $0x360] sm:$0xff]  }
 0x121   : > { %3889 = vmatprep.subr.bf16.mxu1 %v4144_v52  ;;  %v4208_v52 = vld [vmem:[%s5012_s20 + $0x3e0] sm:$0xff]  }
 0x123   : > { %3868 = vmatpush3.bf16.msra.mxu0 %v4143_v51  ;;  %v4207_v51 = vld [vmem:[%s5012_s20 + $0x320] sm:$0xff]  }
 0x124   : > { %3890 = vmatpush3.bf16.msra.mxu1 %v4145_v53  ;;  %3869 = vmatprep.subr.bf16.mxu0 %v4146_v54  ;;  %v4209_v53 = vld [vmem:[%s5012_s20 + $0x3a0] sm:$0xff]   ;;  %v4210_v54 = vld [vmem:[%s5012_s20 + $0x368] sm:$0xff]  }
 0x125   : > { %3891 = vmatprep.subr.bf16.mxu1 %v4148_v57  ;;  %v4213_v57 = vld [vmem:[%s5012_s20 + $0x3a8] sm:$0xff]  }
 0x127   : > { %3870 = vmatpush3.bf16.msra.mxu0 %v4147_v56  ;;  %v4212_v56 = vld [vmem:[%s5012_s20 + $0x3e8] sm:$0xff]  }
 0x128   : > { %3892 = vmatpush3.bf16.msra.mxu1 %v4151_v60  ;;  %3899 = vmatprep.subr.bf16.mxu0 %v4152_v61  ;;  %v4216_v60 = vld [vmem:[%s5012_s20 + $0x3f0] sm:$0xff]  }
 0x129   : > { %3921 = vmatprep.subr.bf16.mxu1 %v4156_v1  ;;  %v4217_v61 = vld [vmem:[%s5012_s20 + $0x3b0] sm:$0xff]  }
 0x12a   : > { %3067 = vmatmul.mubr.bf16.vlgmr.msra.gmra.mrb[4].mxu0 %v3639_v59  ;;  %v4215_v59 = vld [vmem:[%s5012_s20 + $0x330] sm:$0xff]  }
 0x12b   : > { %3900 = vmatpush3.bf16.msra.mxu0 %v4155_v63  ;;  %3107 = vmatmul.mubr.bf16.vlgmr.msra.gmra.mrb[4].mxu1 %v3641_v62  ;;  %v4218_v62 = vld [vmem:[%s5012_s20 + $0x378] sm:$0xff]   ;;  %v1736_v1 = vld [vmem:[%s5254_s0 + $0x30] sm:$0xff] }
 0x12c   : > { %3146 = vmatprep.mubr.bf16.mxu0 %v3644_v0  ;;  %3922 = vmatpush3.bf16.msra.mxu1 %v4157_v2  ;;  %v4219_v63 = vld [vmem:[%s5012_s20 + $0x338] sm:$0xff]   ;;  %v3647_v2 = vcombine.low %v1736_v1, %v1736_v1 }
 0x12d   : > { %3901 = vmatprep.subr.bf16.mxu0 %v4158_v4  ;;  %3186 = vmatprep.mubr.bf16.mxu1 %v3646_v3  ;;  %v4220_v0 = vld [vmem:[%s5012_s20 + $0x3f8] sm:$0xff]   ;;  %v3648_v3 = vcombine.high %v1736_v1, %v1736_v1 }
 0x12e   : > { %3923 = vmatprep.subr.bf16.mxu1 %v4160_v6  ;;  %v4223_v4 = vld [vmem:[%s5012_s20 + $0x3b8] sm:$0xff]  }
 0x12f   : > { %3902 = vmatpush3.bf16.msra.mxu0 %v4159_v5  ;;  %v4224_v5 = vld [vmem:[%s5012_s20 + $0x440] sm:$0xff]   ;;  %v1737_v6 = vld [vmem:[%s5254_s0 + $0x38] sm:$0xff] }
 0x130   : > { %3924 = vmatpush3.bf16.msra.mxu1 %v4161_v7  ;;  %3903 = vmatprep.subr.bf16.mxu0 %v4162_v8  ;;  %v3649_v7 = vcombine.low %v1737_v6, %v1737_v6  ;;  %v3650_v8 = vcombine.high %v1737_v6, %v1737_v6 }
 0x131   : > { %3925 = vmatprep.subr.bf16.mxu1 %v4164_v10  ;;  %v4228_v10 = vld [vmem:[%s5192_s27] sm:$0xff]  }
 0x133   : > { %3904 = vmatpush3.bf16.msra.mxu0 %v4163_v9  ;;  %v4227_v9 = vld [vmem:[%s5012_s20 + $0x400] sm:$0xff]  }
 0x134   : > { %3926 = vmatpush3.bf16.msra.mxu1 %v4165_v11  ;;  %3905 = vmatprep.subr.bf16.mxu0 %v4166_v12  ;;  %v4229_v11 = vld [vmem:[%s5012_s20 + $0x448] sm:$0xff]   ;;  %v4292_v12 = vmov 0.0  }
 0x135   : > { %3927 = vmatprep.subr.bf16.mxu1 %v4168_v14  ;;  %v4231_v14 = vld [vmem:[%s5192_s27 + $0x8] sm:$0xff]  }
 0x137   : > { %3906 = vmatpush3.bf16.msra.mxu0 %v4167_v13  ;;  %v4230_v13 = vld [vmem:[%s5012_s20 + $0x408] sm:$0xff]  }
 0x138   : > { %3928 = vmatpush3.bf16.msra.mxu1 %v4169_v15  ;;  %3907 = vmatprep.subr.bf16.mxu0 %v4170_v16  ;;  %v4232_v15 = vld [vmem:[%s5012_s20 + $0x450] sm:$0xff]  }
 0x139   : > { %3929 = vmatprep.subr.bf16.mxu1 %v4172_v18  ;;  %v4233_v16 = vld [vmem:[%s5012_s20 + $0x410] sm:$0xff]   ;;  %v4235_v18 = vld [vmem:[%s5012_s20 + $0x458] sm:$0xff]  }
 0x13b   : > { %3908 = vmatpush3.bf16.msra.mxu0 %v4171_v17  ;;  %v4234_v17 = vld [vmem:[%s5192_s27 + $0x10] sm:$0xff]  }
 0x13c   : > { %3930 = vmatpush3.bf16.msra.mxu1 %v4173_v19  ;;  %3909 = vmatprep.subr.bf16.mxu0 %v4174_v20  ;;  %v4236_v19 = vld [vmem:[%s5012_s20 + $0x418] sm:$0xff]   ;;  %v4238_v20 = vld [vmem:[%s5012_s20 + $0x460] sm:$0xff]  }
 0x13d   : > { %3931 = vmatprep.subr.bf16.mxu1 %v4176_v22  ;;  %v4239_v22 = vld [vmem:[%s5012_s20 + $0x420] sm:$0xff]  }
 0x13f   : > { %3910 = vmatpush3.bf16.msra.mxu0 %v4175_v21  ;;  %v4237_v21 = vld [vmem:[%s5192_s27 + $0x18] sm:$0xff]  }
 0x140   : > { %3932 = vmatpush3.bf16.msra.mxu1 %v4177_v23  ;;  %3911 = vmatprep.subr.bf16.mxu0 %v4178_v24  ;;  %v4241_v23 = vld [vmem:[%s5012_s20 + $0x468] sm:$0xff]   ;;  %v4240_v24 = vld [vmem:[%s5192_s27 + $0x20] sm:$0xff]  }
 0x141   : > { %3933 = vmatprep.subr.bf16.mxu1 %v4180_v26  ;;  %v4244_v26 = vld [vmem:[%s5012_s20 + $0x470] sm:$0xff]  }
 0x143   : > { %3912 = vmatpush3.bf16.msra.mxu0 %v4179_v25  ;;  %v4242_v25 = vld [vmem:[%s5012_s20 + $0x428] sm:$0xff]  }
 0x144   : > { %3934 = vmatpush3.bf16.msra.mxu1 %v4181_v27  ;;  %3913 = vmatprep.subr.bf16.mxu0 %v4182_v28  ;;  %v4243_v27 = vld [vmem:[%s5192_s27 + $0x28] sm:$0xff]   ;;  %v1738_v28 = vld [vmem:[%s5254_s0 + $0x40] sm:$0xff] }
 0x145   : > { %3935 = vmatprep.subr.bf16.mxu1 %v4184_v30  ;;  %v3652_v30 = vcombine.high %v1738_v28, %v1738_v28 }
 0x147   : > { %3914 = vmatpush3.bf16.msra.mxu0 %v4183_v29  ;;  %v4245_v29 = vld [vmem:[%s5012_s20 + $0x430] sm:$0xff]  }
 0x148   : > { %3936 = vmatpush3.bf16.msra.mxu1 %v4187_v32  ;;  %3943 = vmatprep.subr.bf16.mxu0 %v4188_v33  ;;  %v4246_v32 = vld [vmem:[%s5192_s27 + $0x30] sm:$0xff]   ;;  %v4248_v33 = vld [vmem:[%s5012_s20 + $0x438] sm:$0xff]  }
 0x149   : > { %3965 = vmatprep.subr.bf16.mxu1 %v4192_v36  ;;  %v3330_v36 = vld [vmem:[%s5258_s4] sm:$0xf] }
 0x14a   : > { %3147 = vmatmul.mubr.bf16.vlgmr.msra.gmra.mrb[8].mxu0 %v3643_v31  ;;  %v4247_v31 = vld [vmem:[%s5012_s20 + $0x478] sm:$0xff]  }
 0x14b   : > { %3944 = vmatpush3.bf16.msra.mxu0 %v4191_v35  ;;  %3187 = vmatmul.mubr.bf16.vlgmr.msra.gmra.mrb[8].mxu1 %v3645_v34  ;;  %v4251_v34 = vld [vmem:[%s5192_s27 + $0x38] sm:$0xff]   ;;  %v3651_v35 = vcombine.low %v1738_v28, %v1738_v28  ;;  %s1710_s27 = scalar_lea.vmem %s5257_s3, %s5271_s29  ;;  %v3808_v28 = vld [vmem:[%s1720_s17] ss:$0 sm:$0xff] }
 0x14c   : > { %3966 = vmatpush3.bf16.msra.mxu1 %v4193_v37  ;;  %3945 = vmatprep.subr.bf16.mxu0 %v4194_v38 }
 0x14d   : > { %3967 = vmatprep.subr.bf16.mxu1 %v4196_v40  ;;  %3226 = vmatprep.mubr.bf16.mxu0 %v3648_v3 }
 0x14e   : > { %3266 = vmatprep.mubr.bf16.mxu1 %v3650_v8 }
 0x14f   : > { %3946 = vmatpush3.bf16.msra.mxu0 %v4195_v39 }
 0x150   : > { %3968 = vmatpush3.bf16.msra.mxu1 %v4197_v41  ;;  %3947 = vmatprep.subr.bf16.mxu0 %v4198_v42 }
 0x151   : > { %3969 = vmatprep.subr.bf16.mxu1 %v4200_v44 }
 0x153   : > { %3948 = vmatpush3.bf16.msra.mxu0 %v4199_v43 }
 0x154   : > { %3970 = vmatpush3.bf16.msra.mxu1 %v4201_v45  ;;  %3949 = vmatprep.subr.bf16.mxu0 %v4202_v46 }
 0x155   : > { %3971 = vmatprep.subr.bf16.mxu1 %v4204_v48 }
 0x157   : > { %3950 = vmatpush3.bf16.msra.mxu0 %v4203_v47 }
 0x158   : > { %3972 = vmatpush3.bf16.msra.mxu1 %v4205_v49  ;;  %3951 = vmatprep.subr.bf16.mxu0 %v4206_v50 }
 0x159   : > { %3973 = vmatprep.subr.bf16.mxu1 %v4208_v52 }
 0x15b   : > { %3952 = vmatpush3.bf16.msra.mxu0 %v4207_v51 }
 0x15c   : > { %3974 = vmatpush3.bf16.msra.mxu1 %v4209_v53  ;;  %3953 = vmatprep.subr.bf16.mxu0 %v4210_v54 }
 0x15d   : > { %3975 = vmatprep.subr.bf16.mxu1 %v4212_v56 }
 0x15f   : > { %3954 = vmatpush3.bf16.msra.mxu0 %v4211_v55 }
 0x160   : > { %3976 = vmatpush3.bf16.msra.mxu1 %v4213_v57  ;;  %3955 = vmatprep.subr.bf16.mxu0 %v4214_v58 }
 0x161   : > { %3977 = vmatprep.subr.bf16.mxu1 %v4216_v60 }
 0x163   : > { %3956 = vmatpush3.bf16.msra.mxu0 %v4215_v59 }
 0x164   : > { %3978 = vmatpush3.bf16.msra.mxu1 %v4217_v61  ;;  %3957 = vmatprep.subr.bf16.mxu0 %v4218_v62 }
 0x165   : > { %3979 = vmatprep.subr.bf16.mxu1 %v4220_v0 }
 0x167   : > { %3958 = vmatpush3.bf16.msra.mxu0 %v4219_v63 }
 0x168   : > { %3980 = vmatpush3.bf16.msra.mxu1 %v4223_v4  ;;  %3987 = vmatprep.subr.bf16.mxu0 %v4224_v5 }
 0x169   : > { %4018 = vmatprep.subr.bf16.mxu1 %v4292_v12 }
 0x16a   : > { %3227 = vmatmul.mubr.bf16.vlgmr.msra.gmra.mrb[12].mxu0 %v3647_v2 }
 0x16b   : > { %3988 = vmatpush3.bf16.msra.mxu0 %v4227_v9  ;;  %3267 = vmatmul.mubr.bf16.vlgmr.msra.gmra.mrb[12].mxu1 %v3649_v7 }
 0x16c   : > { %4019 = vmatpush3.bf16.msra.mxu1 %v4228_v10  ;;  %3989 = vmatprep.subr.bf16.mxu0 %v4229_v11 }
 0x16d   : > { %4020 = vmatprep.subr.bf16.mxu1 %v4292_v12  ;;  %4034 = vmatprep.mubr.msk.bf16.mxu1 %vm4293_vm0, %v4292_v12 }
 0x16e   : > { %3306 = vmatprep.mubr.bf16.mxu0 %v3652_v30 }
 0x16f   : > { %3990 = vmatpush3.bf16.msra.mxu0 %v4230_v13 }
 0x170   : > { %3991 = vmatprep.subr.bf16.mxu0 %v4232_v15  ;;  %4021 = vmatpush3.bf16.msra.mxu1 %v4231_v14 }
 0x171   : > { %4022 = vmatprep.subr.bf16.mxu1 %v4292_v12 }
 0x173   : > { %3992 = vmatpush3.bf16.msra.mxu0 %v4233_v16 }
 0x174   : > { %3993 = vmatprep.subr.bf16.mxu0 %v4235_v18  ;;  %4023 = vmatpush3.bf16.msra.mxu1 %v4234_v17 }
 0x175   : > { %4024 = vmatprep.subr.bf16.mxu1 %v4292_v12 }
 0x177   : > { %3994 = vmatpush3.bf16.msra.mxu0 %v4236_v19 }
 0x178   : > { %3995 = vmatprep.subr.bf16.mxu0 %v4238_v20  ;;  %4025 = vmatpush3.bf16.msra.mxu1 %v4237_v21  ;;  %v3807_v21 = vld [vmem:[%s1717_s25] ss:$0 sm:$0xff] }
 0x179   : > { %4026 = vmatprep.subr.bf16.mxu1 %v4292_v12 }
 0x17b   : > { %3996 = vmatpush3.bf16.msra.mxu0 %v4239_v22 }
 0x17c   : > { %3997 = vmatprep.subr.bf16.mxu0 %v4241_v23  ;;  %4027 = vmatpush3.bf16.msra.mxu1 %v4240_v24 }
 0x17d   : > { %4028 = vmatprep.subr.bf16.mxu1 %v4292_v12 }
 0x17f   : > { %3998 = vmatpush3.bf16.msra.mxu0 %v4242_v25 }
 0x180   : > { %3999 = vmatprep.subr.bf16.mxu0 %v4244_v26  ;;  %4029 = vmatpush3.bf16.msra.mxu1 %v4243_v27  ;;  %v3797_v26 = vld [vmem:[%s1707_s11] ss:$0 sm:$0xff] }
 0x181   : > { %4030 = vmatprep.subr.bf16.mxu1 %v4292_v12 }
 0x183   : > { %4000 = vmatpush3.bf16.msra.mxu0 %v4245_v29 }
 0x184   : > { %4001 = vmatprep.subr.bf16.mxu0 %v4247_v31  ;;  %4031 = vmatpush3.bf16.msra.mxu1 %v4246_v32 }
 0x185   : > { %4032 = vmatprep.subr.bf16.mxu1 %v4292_v12 }
 0x187   : > { %4002 = vmatpush3.bf16.msra.mxu0 %v4248_v33  ;;  %v3798_v33 = vld [vmem:[%s1710_s27] ss:$0 sm:$0xff] }
 0x188   : > { %4033 = vmatpush3.bf16.msra.mxu1 %v4251_v34 }
 0x18a   : > { %3307 = vmatmul.mubr.bf16.vlgmr.msra.gmra.mrb[16].mxu0 %v3651_v35 }
 0x18b   : > { %4035 = vmatmul.mubr.bf16.vlgmr.msra.gmra.mrb[16].mxu1 %v3330_v36 }
 0x1dd   : > { %v3827_v37 = vpop.f32.mrb[0].mxu0 }
 0x1de   : > { %v3849_v38 = vpop.f32.mrb[0].mxu1  ;;  %v3828_v39 = vpop.f32.mrb[1].mxu0 }
 0x1df   : > { %v3829_v40 = vadd.f32 %v3828_v39, %v3827_v37  ;;  %v3850_v41 = vpop.f32.mrb[1].mxu1  ;;  %v3830_v42 = vpop.f32.mrb[2].mxu0 }
 0x1e0   : > { %v3851_v43 = vadd.f32 %v3850_v41, %v3849_v38  ;;  %v3831_v44 = vpop.f32.mrb[3].mxu0  ;;  %v3852_v45 = vpop.f32.mrb[2].mxu1 }
 0x1e1   : > { %v3853_v46 = vpop.f32.mrb[3].mxu1 }
 0x1e2   : > { %v3029_v47 = vadd.f32 %v3851_v43, %v3829_v40 }
 0x1fd   : > { %v3871_v48 = vpop.f32.mrb[4].mxu0 }
 0x1fe   : > { %v3872_v49 = vpop.f32.mrb[5].mxu0  ;;  %v3893_v52 = vpop.f32.mrb[4].mxu1 }
 0x1ff   : > { %v3873_v50 = vadd.f32 %v3872_v49, %v3871_v48  ;;  %v3874_v51 = vpop.f32.mrb[6].mxu0  ;;  %v3894_v54 = vpop.f32.mrb[5].mxu1 }
 0x200   : > { %v3875_v53 = vpop.f32.mrb[7].mxu0  ;;  %v3895_v56 = vadd.f32 %v3894_v54, %v3893_v52  ;;  %v3896_v57 = vpop.f32.mrb[6].mxu1 }
 0x201   : > { %v3069_v55 = vadd.f32 %v3873_v50, %v3029_v47  ;;  %v3897_v58 = vpop.f32.mrb[7].mxu1 }
 0x203   : > { %v3109_v59 = vadd.f32 %v3895_v56, %v3069_v55 }
 0x21d   : > { %v3915_v60 = vpop.f32.mrb[8].mxu0 }
 0x21e   : > { %v3916_v61 = vpop.f32.mrb[9].mxu0  ;;  %v3937_v0 = vpop.f32.mrb[8].mxu1 }
 0x21f   : > { %v3917_v62 = vadd.f32 %v3916_v61, %v3915_v60  ;;  %v3918_v63 = vpop.f32.mrb[10].mxu0  ;;  %v3938_v2 = vpop.f32.mrb[9].mxu1 }
 0x220   : > { %v3919_v1 = vpop.f32.mrb[11].mxu0  ;;  %v3939_v4 = vadd.f32 %v3938_v2, %v3937_v0  ;;  %v3940_v5 = vpop.f32.mrb[10].mxu1 }
 0x221   : > { %v3149_v3 = vadd.f32 %v3917_v62, %v3109_v59  ;;  %v3941_v6 = vpop.f32.mrb[11].mxu1 }
 0x223   : > { %v3189_v7 = vadd.f32 %v3939_v4, %v3149_v3 }
 0x23d   : > { %v3959_v8 = vpop.f32.mrb[12].mxu0 }
 0x23e   : > { %v3960_v9 = vpop.f32.mrb[13].mxu0  ;;  %v3981_v12 = vpop.f32.mrb[12].mxu1 }
 0x23f   : > { %v3961_v10 = vadd.f32 %v3960_v9, %v3959_v8  ;;  %v3962_v11 = vpop.f32.mrb[14].mxu0  ;;  %v3982_v14 = vpop.f32.mrb[13].mxu1 }
 0x240   : > { %v3963_v13 = vpop.f32.mrb[15].mxu0  ;;  %v3983_v16 = vadd.f32 %v3982_v14, %v3981_v12  ;;  %v3984_v17 = vpop.f32.mrb[14].mxu1 }
 0x241   : > { %v3229_v15 = vadd.f32 %v3961_v10, %v3189_v7  ;;  %v3985_v18 = vpop.f32.mrb[15].mxu1 }
 0x243   : > { %v3269_v19 = vadd.f32 %v3983_v16, %v3229_v15 }
 0x25d   : > { %v4003_v20 = vpop.f32.mrb[16].mxu0 }
 0x25e   : > { %v4004_v22 = vpop.f32.mrb[17].mxu0  ;;  %v3429_v25 = vpop.f32.mrb[16].mxu1 }
 0x25f   : > { %v4005_v23 = vadd.f32 %v4004_v22, %v4003_v20  ;;  %v4006_v24 = vpop.f32.mrb[18].mxu0  ;;  %v3442_v27 = vmul.f32 %v3807_v21, %v3429_v25  ;;  %v4036_v30 = vpop.f32.mrb[17].mxu1 }
 0x260   : > { %v4007_v29 = vpop.f32.mrb[19].mxu0  ;;  %v3432_v32 = vpop.f32.mrb[18].mxu1 }
 0x261   : > { %v3309_v31 = vadd.f32 %v4005_v23, %v3269_v19  ;;  %v4037_v34 = vpop.f32.mrb[19].mxu1  ;;  %v3450_v36 = vadd.f32 %v3808_v28, %v3442_v27 }
 0x263   : > { %v3321_v35 = vmul.f32 %v3797_v26, %v3309_v31 }
 0x265   : > { %v3329_v37 = vadd.f32 %v3798_v33, %v3321_v35 }
 0x267   : > { %v3451_v38 = vadd.f32 %v3450_v36, %v3329_v37 }
 0x269   : > { %v3452_v39 = vmax.f32 %v3451_v38, 0.0 }
 0x26b   : > { %v3453_v40 = vpack.c.bf16 %v3452_v39, %v3452_v39 }
 0x26d   : > { %3454 = vst [vmem:[%s1728_s23] sm:$0xf] %v3453_v40 }
 0x26e PF: > { %s18_s9 = sadd.s32 1, %s4290_s9   ;;  %s5264_s27 = smov %s4278_s28 }
 0x26f   : > { %p15_p10 = scmp.ge.s32.totalorder %s18_s9, 4   ;;  %s5265_s28 = smov %s4378_s14 }
 0x270   : > { %s5266_s29 = smov %s4286_s30  ;;  %s5267_s30 = smov %s5269_s10 }
 0x271   :  { %17 = sbr.rel (!%p15_p10) target bundleno = 3 (0x3), region = 195 }

// kernel: resnet_forward.18
= control target key start
LH: loop header
LB: loop body
LE: loop exit
PB: predicated region body
PF: predicated region fallthrough
CT: control target
= control target key end

     0   :  { %s3868_s18 = smov 0   ;;  %s3870_s19 = smov 0   ;;  %s4723_s0 = inlined_call_operand.vmem [shape: bf16[2,1,1,9,512], index: 0, kind: input, shape index: {}, may-alias: {0,5}]   ;;  %s4724_s1 = inlined_call_operand.vmem [shape: bf16[2,2304], index: 1, kind: input, shape index: {}]   ;;  %s4725_s2 = inlined_call_operand.vmem [shape: bf16[2304,512], index: 2, kind: input, shape index: {}]   ;;  %s4726_s3 = inlined_call_operand.vmem [shape: f32[1,512], index: 3, kind: input, shape index: {}]   ;;  %s4727_s4 = inlined_call_operand.vmem [shape: f32[1,512], index: 4, kind: input, shape index: {}]   ;;  %s4728_s5 = inlined_call_operand.vmem [shape: bf16[2,1,1,9,512], index: 5, kind: output, shape index: {}, may-alias: {0,5}]  }
   0x1   :  { %s3872_s0 = smov 0   ;;  %s3874_s20 = smov 0  }
   0x2   :  { %s3876_s21 = smov 0  }
   0x3 LB: > { %s25_s22 = sadd.s32 1, %s3831_s20  ;;  %s3253_s23 = sadd.s32 4294967295, %s3835_s21   ;;  %s3835_s21 = sphi %s3876_s21, %s16_s21   ;;  %s3831_s20 = sphi %s3874_s20, %s4733_s20   ;;  %s3827_s0 = sphi %s3872_s0, %s4732_s0   ;;  %s3823_s19 = sphi %s3870_s19, %s4731_s19   ;;  %s3819_s18 = sphi %s3868_s18, %s4730_s18  }
   0x4   : > { %p26_p0 = scmp.ge.s32.totalorder %s25_s22, 4  ;;  %p68_p1 = scmp.ne.s32.totalorder %s3823_s19, %s3819_s18 }
   0x5   : > { %p69_p2 = scmp.eq.s32.totalorder %s3835_s21, 0  ;;  %p152_p4 = scmp.eq.s32.totalorder %s3253_s23, 3 }
   0x6   : > { %s4735_s22 = smov (%p26_p0, %s25_s22), 0  ;;  %s61_s25 = sadd.s32 1, %s3823_s19 }
   0x7   : > { %p70_p3 = por %p69_p2, %p68_p1  ;;  %s58_s24 = ssub.s32 %s3831_s20, %s4735_s22 }
   0x8   : > { %p59_p5 = scmp.eq.s32.totalorder %s58_s24, 0  ;;  %p3903_p6 = por %p152_p4, %p68_p1 }
   0x9   : > { %p3257_p7 = scmp.ge.s32.totalorder %s3835_s21, 4 }
   0xa   : > { %s3908_s27 = scalar_select %p59_p5, %s3823_s19, %s61_s25  }
   0xb   : > { %181 = sbr.rel (%p3257_p7) target bundleno = 214 (0xd6), region = 20 }
  0x12   : > { %184 = sbr.rel (!%p70_p3) target bundleno = 214 (0xd6), region = 24  ;;  %s186_s28 = sand.u32 (%p70_p3), 1, %s3823_s19  }
  0x13   : > { %s3258_s29 = sshll.u32 (%p70_p3), %s3831_s20, 2  ;;  %s3608_s30 = smul.u32 (%p70_p3), 1152, %s186_s28 }
  0x14   : > { %s3916_s8 = scalar_lea.vmem (%p70_p3), %s4725_s2, %s3258_s29 }
  0x15   : > { %v206_v0 = vld [vmem:[%s3916_s8] sm:$0xf] (%p70_p3)  ;;  %v208_v1 = vld [vmem:[%s3916_s8 + $0x10] sm:$0xf] (%p70_p3)  ;;  %s3923_s9 = scalar_lea.vmem (%p70_p3), [#allocation2], %s3608_s30 }
  0x16   : > { %v210_v2 = vld [vmem:[%s3916_s8 + $0x20] sm:$0xf] (%p70_p3)  ;;  %v212_v3 = vld [vmem:[%s3916_s8 + $0x30] sm:$0xf] (%p70_p3)  ;;  %207 = vst [vmem:[%s3923_s9] sm:$0xf] (%p70_p3), %v206_v0 }
  0x17   : > { %v214_v4 = vld [vmem:[%s3916_s8 + $0x40] sm:$0xf] (%p70_p3)  ;;  %209 = vst [vmem:[%s3923_s9 + $0x4] sm:$0xf] (%p70_p3), %v208_v1  ;;  %211 = vst [vmem:[%s3923_s9 + $0x8] sm:$0xf] (%p70_p3), %v210_v2 }
  0x18   : > { %213 = vst [vmem:[%s3923_s9 + $0xc] sm:$0xf] (%p70_p3), %v212_v3  ;;  %215 = vst [vmem:[%s3923_s9 + $0x10] sm:$0xf] (%p70_p3), %v214_v4  ;;  %v216_v5 = vld [vmem:[%s3916_s8 + $0x50] sm:$0xf] (%p70_p3) }
  0x19   : > { %v218_v6 = vld [vmem:[%s3916_s8 + $0x60] sm:$0xf]  ;;  %v220_v7 = vld [vmem:[%s3916_s8 + $0x70] sm:$0xf]  ;;  %217 = vst [vmem:[%s3923_s9 + $0x14] sm:$0xf] %v216_v5 }
  0x1a   : > { %219 = vst [vmem:[%s3923_s9 + $0x18] sm:$0xf] %v218_v6  ;;  %221 = vst [vmem:[%s3923_s9 + $0x1c] sm:$0xf] %v220_v7  ;;  %v222_v8 = vld [vmem:[%s3916_s8 + $0x80] sm:$0xf] }
  0x1b   : > { %v224_v9 = vld [vmem:[%s3916_s8 + $0x90] sm:$0xf]  ;;  %v226_v10 = vld [vmem:[%s3916_s8 + $0xa0] sm:$0xf]  ;;  %223 = vst [vmem:[%s3923_s9 + $0x20] sm:$0xf] %v222_v8 }
  0x1c   : > { %225 = vst [vmem:[%s3923_s9 + $0x24] sm:$0xf] %v224_v9  ;;  %227 = vst [vmem:[%s3923_s9 + $0x28] sm:$0xf] %v226_v10  ;;  %v228_v11 = vld [vmem:[%s3916_s8 + $0xb0] sm:$0xf] }
  0x1d   : > { %v230_v12 = vld [vmem:[%s3916_s8 + $0xc0] sm:$0xf]  ;;  %v232_v13 = vld [vmem:[%s3916_s8 + $0xd0] sm:$0xf]  ;;  %229 = vst [vmem:[%s3923_s9 + $0x2c] sm:$0xf] %v228_v11 }
  0x1e   : > { %231 = vst [vmem:[%s3923_s9 + $0x30] sm:$0xf] %v230_v12  ;;  %233 = vst [vmem:[%s3923_s9 + $0x34] sm:$0xf] %v232_v13  ;;  %v234_v14 = vld [vmem:[%s3916_s8 + $0xe0] sm:$0xf] }
  0x1f   : > { %v236_v15 = vld [vmem:[%s3916_s8 + $0xf0] sm:$0xf]  ;;  %v238_v16 = vld [vmem:[%s3916_s8 + $0x100] sm:$0xf]  ;;  %235 = vst [vmem:[%s3923_s9 + $0x38] sm:$0xf] %v234_v14 }
  0x20   : > { %237 = vst [vmem:[%s3923_s9 + $0x3c] sm:$0xf] %v236_v15  ;;  %239 = vst [vmem:[%s3923_s9 + $0x40] sm:$0xf] %v238_v16  ;;  %v240_v17 = vld [vmem:[%s3916_s8 + $0x110] sm:$0xf] }
  0x21   : > { %v242_v18 = vld [vmem:[%s3916_s8 + $0x120] sm:$0xf]  ;;  %v244_v19 = vld [vmem:[%s3916_s8 + $0x130] sm:$0xf]  ;;  %241 = vst [vmem:[%s3923_s9 + $0x44] sm:$0xf] %v240_v17 }
  0x22   : > { %243 = vst [vmem:[%s3923_s9 + $0x48] sm:$0xf] %v242_v18  ;;  %245 = vst [vmem:[%s3923_s9 + $0x4c] sm:$0xf] %v244_v19  ;;  %v246_v20 = vld [vmem:[%s3916_s8 + $0x140] sm:$0xf] }
  0x23   : > { %v248_v21 = vld [vmem:[%s3916_s8 + $0x150] sm:$0xf]  ;;  %v250_v22 = vld [vmem:[%s3916_s8 + $0x160] sm:$0xf]  ;;  %247 = vst [vmem:[%s3923_s9 + $0x50] sm:$0xf] %v246_v20 }
  0x24   : > { %249 = vst [vmem:[%s3923_s9 + $0x54] sm:$0xf] %v248_v21  ;;  %251 = vst [vmem:[%s3923_s9 + $0x58] sm:$0xf] %v250_v22  ;;  %v252_v23 = vld [vmem:[%s3916_s8 + $0x170] sm:$0xf] }
  0x25   : > { %v254_v24 = vld [vmem:[%s3916_s8 + $0x180] sm:$0xf]  ;;  %v256_v25 = vld [vmem:[%s3916_s8 + $0x190] sm:$0xf]  ;;  %253 = vst [vmem:[%s3923_s9 + $0x5c] sm:$0xf] %v252_v23 }
  0x26   : > { %255 = vst [vmem:[%s3923_s9 + $0x60] sm:$0xf] %v254_v24  ;;  %257 = vst [vmem:[%s3923_s9 + $0x64] sm:$0xf] %v256_v25  ;;  %v258_v26 = vld [vmem:[%s3916_s8 + $0x1a0] sm:$0xf] }
  0x27   : > { %v260_v27 = vld [vmem:[%s3916_s8 + $0x1b0] sm:$0xf]  ;;  %v262_v28 = vld [vmem:[%s3916_s8 + $0x1c0] sm:$0xf]  ;;  %259 = vst [vmem:[%s3923_s9 + $0x68] sm:$0xf] %v258_v26 }
  0x28   : > { %261 = vst [vmem:[%s3923_s9 + $0x6c] sm:$0xf] %v260_v27  ;;  %263 = vst [vmem:[%s3923_s9 + $0x70] sm:$0xf] %v262_v28  ;;  %v264_v29 = vld [vmem:[%s3916_s8 + $0x1d0] sm:$0xf] }
  0x29   : > { %v266_v30 = vld [vmem:[%s3916_s8 + $0x1e0] sm:$0xf]  ;;  %v268_v31 = vld [vmem:[%s3916_s8 + $0x1f0] sm:$0xf]  ;;  %265 = vst [vmem:[%s3923_s9 + $0x74] sm:$0xf] %v264_v29 }
  0x2a   : > { %267 = vst [vmem:[%s3923_s9 + $0x78] sm:$0xf] %v266_v30  ;;  %269 = vst [vmem:[%s3923_s9 + $0x7c] sm:$0xf] %v268_v31  ;;  %v270_v32 = vld [vmem:[%s3916_s8 + $0x200] sm:$0xf] }
  0x2b   : > { %v272_v33 = vld [vmem:[%s3916_s8 + $0x210] sm:$0xf]  ;;  %v274_v34 = vld [vmem:[%s3916_s8 + $0x220] sm:$0xf]  ;;  %271 = vst [vmem:[%s3923_s9 + $0x80] sm:$0xf] %v270_v32 }
  0x2c   : > { %273 = vst [vmem:[%s3923_s9 + $0x84] sm:$0xf] %v272_v33  ;;  %275 = vst [vmem:[%s3923_s9 + $0x88] sm:$0xf] %v274_v34  ;;  %v276_v35 = vld [vmem:[%s3916_s8 + $0x230] sm:$0xf] }
  0x2d   : > { %v278_v36 = vld [vmem:[%s3916_s8 + $0x240] sm:$0xf]  ;;  %v280_v37 = vld [vmem:[%s3916_s8 + $0x250] sm:$0xf]  ;;  %277 = vst [vmem:[%s3923_s9 + $0x8c] sm:$0xf] %v276_v35 }
  0x2e   : > { %279 = vst [vmem:[%s3923_s9 + $0x90] sm:$0xf] %v278_v36  ;;  %281 = vst [vmem:[%s3923_s9 + $0x94] sm:$0xf] %v280_v37  ;;  %v282_v38 = vld [vmem:[%s3916_s8 + $0x260] sm:$0xf] }
  0x2f   : > { %v284_v39 = vld [vmem:[%s3916_s8 + $0x270] sm:$0xf]  ;;  %v286_v40 = vld [vmem:[%s3916_s8 + $0x280] sm:$0xf]  ;;  %283 = vst [vmem:[%s3923_s9 + $0x98] sm:$0xf] %v282_v38 }
  0x30   : > { %285 = vst [vmem:[%s3923_s9 + $0x9c] sm:$0xf] %v284_v39  ;;  %287 = vst [vmem:[%s3923_s9 + $0xa0] sm:$0xf] %v286_v40  ;;  %v288_v41 = vld [vmem:[%s3916_s8 + $0x290] sm:$0xf] }
  0x31   : > { %v290_v42 = vld [vmem:[%s3916_s8 + $0x2a0] sm:$0xf]  ;;  %v292_v43 = vld [vmem:[%s3916_s8 + $0x2b0] sm:$0xf]  ;;  %289 = vst [vmem:[%s3923_s9 + $0xa4] sm:$0xf] %v288_v41 }
  0x32   : > { %291 = vst [vmem:[%s3923_s9 + $0xa8] sm:$0xf] %v290_v42  ;;  %293 = vst [vmem:[%s3923_s9 + $0xac] sm:$0xf] %v292_v43  ;;  %v294_v44 = vld [vmem:[%s3916_s8 + $0x2c0] sm:$0xf] }
  0x33   : > { %v296_v45 = vld [vmem:[%s3916_s8 + $0x2d0] sm:$0xf]  ;;  %v298_v46 = vld [vmem:[%s3916_s8 + $0x2e0] sm:$0xf]  ;;  %295 = vst [vmem:[%s3923_s9 + $0xb0] sm:$0xf] %v294_v44 }
  0x34   : > { %297 = vst [vmem:[%s3923_s9 + $0xb4] sm:$0xf] %v296_v45  ;;  %299 = vst [vmem:[%s3923_s9 + $0xb8] sm:$0xf] %v298_v46  ;;  %v300_v47 = vld [vmem:[%s3916_s8 + $0x2f0] sm:$0xf] }
  0x35   : > { %v302_v48 = vld [vmem:[%s3916_s8 + $0x300] sm:$0xf]  ;;  %v304_v49 = vld [vmem:[%s3916_s8 + $0x310] sm:$0xf]  ;;  %301 = vst [vmem:[%s3923_s9 + $0xbc] sm:$0xf] %v300_v47 }
  0x36   : > { %303 = vst [vmem:[%s3923_s9 + $0xc0] sm:$0xf] %v302_v48  ;;  %305 = vst [vmem:[%s3923_s9 + $0xc4] sm:$0xf] %v304_v49  ;;  %v306_v50 = vld [vmem:[%s3916_s8 + $0x320] sm:$0xf] }
  0x37   : > { %v308_v51 = vld [vmem:[%s3916_s8 + $0x330] sm:$0xf]  ;;  %v310_v52 = vld [vmem:[%s3916_s8 + $0x340] sm:$0xf]  ;;  %307 = vst [vmem:[%s3923_s9 + $0xc8] sm:$0xf] %v306_v50 }
  0x38   : > { %309 = vst [vmem:[%s3923_s9 + $0xcc] sm:$0xf] %v308_v51  ;;  %311 = vst [vmem:[%s3923_s9 + $0xd0] sm:$0xf] %v310_v52  ;;  %v312_v53 = vld [vmem:[%s3916_s8 + $0x350] sm:$0xf] }
  0x39   : > { %v314_v54 = vld [vmem:[%s3916_s8 + $0x360] sm:$0xf]  ;;  %v316_v55 = vld [vmem:[%s3916_s8 + $0x370] sm:$0xf]  ;;  %313 = vst [vmem:[%s3923_s9 + $0xd4] sm:$0xf] %v312_v53 }
  0x3a   : > { %315 = vst [vmem:[%s3923_s9 + $0xd8] sm:$0xf] %v314_v54  ;;  %317 = vst [vmem:[%s3923_s9 + $0xdc] sm:$0xf] %v316_v55  ;;  %v318_v56 = vld [vmem:[%s3916_s8 + $0x380] sm:$0xf] }
  0x3b   : > { %v320_v57 = vld [vmem:[%s3916_s8 + $0x390] sm:$0xf]  ;;  %v322_v58 = vld [vmem:[%s3916_s8 + $0x3a0] sm:$0xf]  ;;  %319 = vst [vmem:[%s3923_s9 + $0xe0] sm:$0xf] %v318_v56 }
  0x3c   : > { %321 = vst [vmem:[%s3923_s9 + $0xe4] sm:$0xf] %v320_v57  ;;  %323 = vst [vmem:[%s3923_s9 + $0xe8] sm:$0xf] %v322_v58  ;;  %v324_v59 = vld [vmem:[%s3916_s8 + $0x3b0] sm:$0xf] }
  0x3d   : > { %v326_v60 = vld [vmem:[%s3916_s8 + $0x3c0] sm:$0xf]  ;;  %v328_v61 = vld [vmem:[%s3916_s8 + $0x3d0] sm:$0xf]  ;;  %325 = vst [vmem:[%s3923_s9 + $0xec] sm:$0xf] %v324_v59 }
  0x3e   : > { %327 = vst [vmem:[%s3923_s9 + $0xf0] sm:$0xf] %v326_v60  ;;  %329 = vst [vmem:[%s3923_s9 + $0xf4] sm:$0xf] %v328_v61  ;;  %v330_v62 = vld [vmem:[%s3916_s8 + $0x3e0] sm:$0xf] }
  0x3f   : > { %v332_v63 = vld [vmem:[%s3916_s8 + $0x3f0] sm:$0xf]  ;;  %v334_v0 = vld [vmem:[%s3916_s8 + $0x400] sm:$0xf]  ;;  %331 = vst [vmem:[%s3923_s9 + $0xf8] sm:$0xf] %v330_v62 }
  0x40   : > { %333 = vst [vmem:[%s3923_s9 + $0xfc] sm:$0xf] %v332_v63  ;;  %335 = vst [vmem:[%s3923_s9 + $0x100] sm:$0xf] %v334_v0  ;;  %v336_v1 = vld [vmem:[%s3916_s8 + $0x410] sm:$0xf] }
  0x41   : > { %v338_v2 = vld [vmem:[%s3916_s8 + $0x420] sm:$0xf]  ;;  %v340_v3 = vld [vmem:[%s3916_s8 + $0x430] sm:$0xf]  ;;  %337 = vst [vmem:[%s3923_s9 + $0x104] sm:$0xf] %v336_v1 }
  0x42   : > { %339 = vst [vmem:[%s3923_s9 + $0x108] sm:$0xf] %v338_v2  ;;  %341 = vst [vmem:[%s3923_s9 + $0x10c] sm:$0xf] %v340_v3  ;;  %v342_v4 = vld [vmem:[%s3916_s8 + $0x440] sm:$0xf] }
  0x43   : > { %v344_v5 = vld [vmem:[%s3916_s8 + $0x450] sm:$0xf]  ;;  %v346_v6 = vld [vmem:[%s3916_s8 + $0x460] sm:$0xf]  ;;  %343 = vst [vmem:[%s3923_s9 + $0x110] sm:$0xf] %v342_v4 }
  0x44   : > { %345 = vst [vmem:[%s3923_s9 + $0x114] sm:$0xf] %v344_v5  ;;  %347 = vst [vmem:[%s3923_s9 + $0x118] sm:$0xf] %v346_v6  ;;  %v348_v7 = vld [vmem:[%s3916_s8 + $0x470] sm:$0xf] }
  0x45   : > { %v350_v8 = vld [vmem:[%s3916_s8 + $0x480] sm:$0xf]  ;;  %v352_v9 = vld [vmem:[%s3916_s8 + $0x490] sm:$0xf]  ;;  %349 = vst [vmem:[%s3923_s9 + $0x11c] sm:$0xf] %v348_v7 }
  0x46   : > { %351 = vst [vmem:[%s3923_s9 + $0x120] sm:$0xf] %v350_v8  ;;  %353 = vst [vmem:[%s3923_s9 + $0x124] sm:$0xf] %v352_v9  ;;  %v354_v10 = vld [vmem:[%s3916_s8 + $0x4a0] sm:$0xf] }
  0x47   : > { %v356_v11 = vld [vmem:[%s3916_s8 + $0x4b0] sm:$0xf]  ;;  %v358_v12 = vld [vmem:[%s3916_s8 + $0x4c0] sm:$0xf]  ;;  %355 = vst [vmem:[%s3923_s9 + $0x128] sm:$0xf] %v354_v10 }
  0x48   : > { %357 = vst [vmem:[%s3923_s9 + $0x12c] sm:$0xf] %v356_v11  ;;  %359 = vst [vmem:[%s3923_s9 + $0x130] sm:$0xf] %v358_v12  ;;  %v360_v13 = vld [vmem:[%s3916_s8 + $0x4d0] sm:$0xf] }
  0x49   : > { %v362_v14 = vld [vmem:[%s3916_s8 + $0x4e0] sm:$0xf]  ;;  %v364_v15 = vld [vmem:[%s3916_s8 + $0x4f0] sm:$0xf]  ;;  %361 = vst [vmem:[%s3923_s9 + $0x134] sm:$0xf] %v360_v13 }
  0x4a   : > { %363 = vst [vmem:[%s3923_s9 + $0x138] sm:$0xf] %v362_v14  ;;  %365 = vst [vmem:[%s3923_s9 + $0x13c] sm:$0xf] %v364_v15  ;;  %v366_v16 = vld [vmem:[%s3916_s8 + $0x500] sm:$0xf] }
  0x4b   : > { %v368_v17 = vld [vmem:[%s3916_s8 + $0x510] sm:$0xf]  ;;  %v370_v18 = vld [vmem:[%s3916_s8 + $0x520] sm:$0xf]  ;;  %367 = vst [vmem:[%s3923_s9 + $0x140] sm:$0xf] %v366_v16 }
  0x4c   : > { %369 = vst [vmem:[%s3923_s9 + $0x144] sm:$0xf] %v368_v17  ;;  %371 = vst [vmem:[%s3923_s9 + $0x148] sm:$0xf] %v370_v18  ;;  %v372_v19 = vld [vmem:[%s3916_s8 + $0x530] sm:$0xf] }
  0x4d   : > { %v374_v20 = vld [vmem:[%s3916_s8 + $0x540] sm:$0xf]  ;;  %v376_v21 = vld [vmem:[%s3916_s8 + $0x550] sm:$0xf]  ;;  %373 = vst [vmem:[%s3923_s9 + $0x14c] sm:$0xf] %v372_v19 }
  0x4e   : > { %375 = vst [vmem:[%s3923_s9 + $0x150] sm:$0xf] %v374_v20  ;;  %377 = vst [vmem:[%s3923_s9 + $0x154] sm:$0xf] %v376_v21  ;;  %v378_v22 = vld [vmem:[%s3916_s8 + $0x560] sm:$0xf] }
  0x4f   : > { %v380_v23 = vld [vmem:[%s3916_s8 + $0x570] sm:$0xf]  ;;  %v382_v24 = vld [vmem:[%s3916_s8 + $0x580] sm:$0xf]  ;;  %379 = vst [vmem:[%s3923_s9 + $0x158] sm:$0xf] %v378_v22 }
  0x50   : > { %381 = vst [vmem:[%s3923_s9 + $0x15c] sm:$0xf] %v380_v23  ;;  %383 = vst [vmem:[%s3923_s9 + $0x160] sm:$0xf] %v382_v24  ;;  %v384_v25 = vld [vmem:[%s3916_s8 + $0x590] sm:$0xf] }
  0x51   : > { %v386_v26 = vld [vmem:[%s3916_s8 + $0x5a0] sm:$0xf]  ;;  %v388_v27 = vld [vmem:[%s3916_s8 + $0x5b0] sm:$0xf]  ;;  %385 = vst [vmem:[%s3923_s9 + $0x164] sm:$0xf] %v384_v25 }
  0x52   : > { %387 = vst [vmem:[%s3923_s9 + $0x168] sm:$0xf] %v386_v26  ;;  %389 = vst [vmem:[%s3923_s9 + $0x16c] sm:$0xf] %v388_v27  ;;  %v390_v28 = vld [vmem:[%s3916_s8 + $0x5c0] sm:$0xf] }
  0x53   : > { %v392_v29 = vld [vmem:[%s3916_s8 + $0x5d0] sm:$0xf]  ;;  %v394_v30 = vld [vmem:[%s3916_s8 + $0x5e0] sm:$0xf]  ;;  %391 = vst [vmem:[%s3923_s9 + $0x170] sm:$0xf] %v390_v28 }
  0x54   : > { %393 = vst [vmem:[%s3923_s9 + $0x174] sm:$0xf] %v392_v29  ;;  %395 = vst [vmem:[%s3923_s9 + $0x178] sm:$0xf] %v394_v30  ;;  %v396_v31 = vld [vmem:[%s3916_s8 + $0x5f0] sm:$0xf] }
  0x55   : > { %v398_v32 = vld [vmem:[%s3916_s8 + $0x600] sm:$0xf]  ;;  %v400_v33 = vld [vmem:[%s3916_s8 + $0x610] sm:$0xf]  ;;  %397 = vst [vmem:[%s3923_s9 + $0x17c] sm:$0xf] %v396_v31 }
  0x56   : > { %399 = vst [vmem:[%s3923_s9 + $0x180] sm:$0xf] %v398_v32  ;;  %401 = vst [vmem:[%s3923_s9 + $0x184] sm:$0xf] %v400_v33  ;;  %v402_v34 = vld [vmem:[%s3916_s8 + $0x620] sm:$0xf] }
  0x57   : > { %v404_v35 = vld [vmem:[%s3916_s8 + $0x630] sm:$0xf]  ;;  %v406_v36 = vld [vmem:[%s3916_s8 + $0x640] sm:$0xf]  ;;  %403 = vst [vmem:[%s3923_s9 + $0x188] sm:$0xf] %v402_v34 }
  0x58   : > { %405 = vst [vmem:[%s3923_s9 + $0x18c] sm:$0xf] %v404_v35  ;;  %407 = vst [vmem:[%s3923_s9 + $0x190] sm:$0xf] %v406_v36  ;;  %v408_v37 = vld [vmem:[%s3916_s8 + $0x650] sm:$0xf] }
  0x59   : > { %v410_v38 = vld [vmem:[%s3916_s8 + $0x660] sm:$0xf]  ;;  %v412_v39 = vld [vmem:[%s3916_s8 + $0x670] sm:$0xf]  ;;  %409 = vst [vmem:[%s3923_s9 + $0x194] sm:$0xf] %v408_v37 }
  0x5a   : > { %411 = vst [vmem:[%s3923_s9 + $0x198] sm:$0xf] %v410_v38  ;;  %413 = vst [vmem:[%s3923_s9 + $0x19c] sm:$0xf] %v412_v39  ;;  %v414_v40 = vld [vmem:[%s3916_s8 + $0x680] sm:$0xf] }
  0x5b   : > { %v416_v41 = vld [vmem:[%s3916_s8 + $0x690] sm:$0xf]  ;;  %v418_v42 = vld [vmem:[%s3916_s8 + $0x6a0] sm:$0xf]  ;;  %415 = vst [vmem:[%s3923_s9 + $0x1a0] sm:$0xf] %v414_v40 }
  0x5c   : > { %417 = vst [vmem:[%s3923_s9 + $0x1a4] sm:$0xf] %v416_v41  ;;  %419 = vst [vmem:[%s3923_s9 + $0x1a8] sm:$0xf] %v418_v42  ;;  %v420_v43 = vld [vmem:[%s3916_s8 + $0x6b0] sm:$0xf] }
  0x5d   : > { %v422_v44 = vld [vmem:[%s3916_s8 + $0x6c0] sm:$0xf]  ;;  %v424_v45 = vld [vmem:[%s3916_s8 + $0x6d0] sm:$0xf]  ;;  %421 = vst [vmem:[%s3923_s9 + $0x1ac] sm:$0xf] %v420_v43 }
  0x5e   : > { %423 = vst [vmem:[%s3923_s9 + $0x1b0] sm:$0xf] %v422_v44  ;;  %425 = vst [vmem:[%s3923_s9 + $0x1b4] sm:$0xf] %v424_v45  ;;  %v426_v46 = vld [vmem:[%s3916_s8 + $0x6e0] sm:$0xf] }
  0x5f   : > { %v428_v47 = vld [vmem:[%s3916_s8 + $0x6f0] sm:$0xf]  ;;  %v430_v48 = vld [vmem:[%s3916_s8 + $0x700] sm:$0xf]  ;;  %427 = vst [vmem:[%s3923_s9 + $0x1b8] sm:$0xf] %v426_v46 }
  0x60   : > { %429 = vst [vmem:[%s3923_s9 + $0x1bc] sm:$0xf] %v428_v47  ;;  %431 = vst [vmem:[%s3923_s9 + $0x1c0] sm:$0xf] %v430_v48  ;;  %v432_v49 = vld [vmem:[%s3916_s8 + $0x710] sm:$0xf] }
  0x61   : > { %v434_v50 = vld [vmem:[%s3916_s8 + $0x720] sm:$0xf]  ;;  %v436_v51 = vld [vmem:[%s3916_s8 + $0x730] sm:$0xf]  ;;  %433 = vst [vmem:[%s3923_s9 + $0x1c4] sm:$0xf] %v432_v49 }
  0x62   : > { %435 = vst [vmem:[%s3923_s9 + $0x1c8] sm:$0xf] %v434_v50  ;;  %437 = vst [vmem:[%s3923_s9 + $0x1cc] sm:$0xf] %v436_v51  ;;  %v438_v52 = vld [vmem:[%s3916_s8 + $0x740] sm:$0xf] }
  0x63   : > { %v440_v53 = vld [vmem:[%s3916_s8 + $0x750] sm:$0xf]  ;;  %v442_v54 = vld [vmem:[%s3916_s8 + $0x760] sm:$0xf]  ;;  %439 = vst [vmem:[%s3923_s9 + $0x1d0] sm:$0xf] %v438_v52 }
  0x64   : > { %441 = vst [vmem:[%s3923_s9 + $0x1d4] sm:$0xf] %v440_v53  ;;  %443 = vst [vmem:[%s3923_s9 + $0x1d8] sm:$0xf] %v442_v54  ;;  %v444_v55 = vld [vmem:[%s3916_s8 + $0x770] sm:$0xf] }
  0x65   : > { %v446_v56 = vld [vmem:[%s3916_s8 + $0x780] sm:$0xf]  ;;  %v448_v57 = vld [vmem:[%s3916_s8 + $0x790] sm:$0xf]  ;;  %445 = vst [vmem:[%s3923_s9 + $0x1dc] sm:$0xf] %v444_v55 }
  0x66   : > { %447 = vst [vmem:[%s3923_s9 + $0x1e0] sm:$0xf] %v446_v56  ;;  %449 = vst [vmem:[%s3923_s9 + $0x1e4] sm:$0xf] %v448_v57  ;;  %v450_v58 = vld [vmem:[%s3916_s8 + $0x7a0] sm:$0xf] }
  0x67   : > { %v452_v59 = vld [vmem:[%s3916_s8 + $0x7b0] sm:$0xf]  ;;  %v454_v60 = vld [vmem:[%s3916_s8 + $0x7c0] sm:$0xf]  ;;  %451 = vst [vmem:[%s3923_s9 + $0x1e8] sm:$0xf] %v450_v58 }
  0x68   : > { %453 = vst [vmem:[%s3923_s9 + $0x1ec] sm:$0xf] %v452_v59  ;;  %455 = vst [vmem:[%s3923_s9 + $0x1f0] sm:$0xf] %v454_v60  ;;  %v456_v61 = vld [vmem:[%s3916_s8 + $0x7d0] sm:$0xf] }
  0x69   : > { %v458_v62 = vld [vmem:[%s3916_s8 + $0x7e0] sm:$0xf]  ;;  %v460_v63 = vld [vmem:[%s3916_s8 + $0x7f0] sm:$0xf]  ;;  %457 = vst [vmem:[%s3923_s9 + $0x1f4] sm:$0xf] %v456_v61 }
  0x6a   : > { %459 = vst [vmem:[%s3923_s9 + $0x1f8] sm:$0xf] %v458_v62  ;;  %461 = vst [vmem:[%s3923_s9 + $0x1fc] sm:$0xf] %v460_v63  ;;  %v462_v0 = vld [vmem:[%s3916_s8 + $0x800] sm:$0xf] }
  0x6b   : > { %v464_v1 = vld [vmem:[%s3916_s8 + $0x810] sm:$0xf]  ;;  %v466_v2 = vld [vmem:[%s3916_s8 + $0x820] sm:$0xf]  ;;  %463 = vst [vmem:[%s3923_s9 + $0x200] sm:$0xf] %v462_v0 }
  0x6c   : > { %465 = vst [vmem:[%s3923_s9 + $0x204] sm:$0xf] %v464_v1  ;;  %467 = vst [vmem:[%s3923_s9 + $0x208] sm:$0xf] %v466_v2  ;;  %v468_v3 = vld [vmem:[%s3916_s8 + $0x830] sm:$0xf] }
  0x6d   : > { %v470_v4 = vld [vmem:[%s3916_s8 + $0x840] sm:$0xf]  ;;  %v472_v5 = vld [vmem:[%s3916_s8 + $0x850] sm:$0xf]  ;;  %469 = vst [vmem:[%s3923_s9 + $0x20c] sm:$0xf] %v468_v3 }
  0x6e   : > { %471 = vst [vmem:[%s3923_s9 + $0x210] sm:$0xf] %v470_v4  ;;  %473 = vst [vmem:[%s3923_s9 + $0x214] sm:$0xf] %v472_v5  ;;  %v474_v6 = vld [vmem:[%s3916_s8 + $0x860] sm:$0xf] }
  0x6f   : > { %v476_v7 = vld [vmem:[%s3916_s8 + $0x870] sm:$0xf]  ;;  %v478_v8 = vld [vmem:[%s3916_s8 + $0x880] sm:$0xf]  ;;  %475 = vst [vmem:[%s3923_s9 + $0x218] sm:$0xf] %v474_v6 }
  0x70   : > { %477 = vst [vmem:[%s3923_s9 + $0x21c] sm:$0xf] %v476_v7  ;;  %479 = vst [vmem:[%s3923_s9 + $0x220] sm:$0xf] %v478_v8  ;;  %v480_v9 = vld [vmem:[%s3916_s8 + $0x890] sm:$0xf] }
  0x71   : > { %v482_v10 = vld [vmem:[%s3916_s8 + $0x8a0] sm:$0xf]  ;;  %v484_v11 = vld [vmem:[%s3916_s8 + $0x8b0] sm:$0xf]  ;;  %481 = vst [vmem:[%s3923_s9 + $0x224] sm:$0xf] %v480_v9 }
  0x72   : > { %483 = vst [vmem:[%s3923_s9 + $0x228] sm:$0xf] %v482_v10  ;;  %485 = vst [vmem:[%s3923_s9 + $0x22c] sm:$0xf] %v484_v11  ;;  %v486_v12 = vld [vmem:[%s3916_s8 + $0x8c0] sm:$0xf] }
  0x73   : > { %v488_v13 = vld [vmem:[%s3916_s8 + $0x8d0] sm:$0xf]  ;;  %v490_v14 = vld [vmem:[%s3916_s8 + $0x8e0] sm:$0xf]  ;;  %487 = vst [vmem:[%s3923_s9 + $0x230] sm:$0xf] %v486_v12 }
  0x74   : > { %489 = vst [vmem:[%s3923_s9 + $0x234] sm:$0xf] %v488_v13  ;;  %491 = vst [vmem:[%s3923_s9 + $0x238] sm:$0xf] %v490_v14  ;;  %v492_v15 = vld [vmem:[%s3916_s8 + $0x8f0] sm:$0xf] }
  0x75   : > { %v494_v16 = vld [vmem:[%s3916_s8 + $0x900] sm:$0xf]  ;;  %v496_v17 = vld [vmem:[%s3916_s8 + $0x910] sm:$0xf]  ;;  %493 = vst [vmem:[%s3923_s9 + $0x23c] sm:$0xf] %v492_v15 }
  0x76   : > { %495 = vst [vmem:[%s3923_s9 + $0x240] sm:$0xf] %v494_v16  ;;  %497 = vst [vmem:[%s3923_s9 + $0x244] sm:$0xf] %v496_v17  ;;  %v498_v18 = vld [vmem:[%s3916_s8 + $0x920] sm:$0xf] }
  0x77   : > { %v500_v19 = vld [vmem:[%s3916_s8 + $0x930] sm:$0xf]  ;;  %v502_v20 = vld [vmem:[%s3916_s8 + $0x940] sm:$0xf]  ;;  %499 = vst [vmem:[%s3923_s9 + $0x248] sm:$0xf] %v498_v18 }
  0x78   : > { %501 = vst [vmem:[%s3923_s9 + $0x24c] sm:$0xf] %v500_v19  ;;  %503 = vst [vmem:[%s3923_s9 + $0x250] sm:$0xf] %v502_v20  ;;  %v504_v21 = vld [vmem:[%s3916_s8 + $0x950] sm:$0xf] }
  0x79   : > { %v506_v22 = vld [vmem:[%s3916_s8 + $0x960] sm:$0xf]  ;;  %v508_v23 = vld [vmem:[%s3916_s8 + $0x970] sm:$0xf]  ;;  %505 = vst [vmem:[%s3923_s9 + $0x254] sm:$0xf] %v504_v21 }
  0x7a   : > { %507 = vst [vmem:[%s3923_s9 + $0x258] sm:$0xf] %v506_v22  ;;  %509 = vst [vmem:[%s3923_s9 + $0x25c] sm:$0xf] %v508_v23  ;;  %v510_v24 = vld [vmem:[%s3916_s8 + $0x980] sm:$0xf] }
  0x7b   : > { %v512_v25 = vld [vmem:[%s3916_s8 + $0x990] sm:$0xf]  ;;  %v514_v26 = vld [vmem:[%s3916_s8 + $0x9a0] sm:$0xf]  ;;  %511 = vst [vmem:[%s3923_s9 + $0x260] sm:$0xf] %v510_v24 }
  0x7c   : > { %513 = vst [vmem:[%s3923_s9 + $0x264] sm:$0xf] %v512_v25  ;;  %515 = vst [vmem:[%s3923_s9 + $0x268] sm:$0xf] %v514_v26  ;;  %v516_v27 = vld [vmem:[%s3916_s8 + $0x9b0] sm:$0xf] }
  0x7d   : > { %v518_v28 = vld [vmem:[%s3916_s8 + $0x9c0] sm:$0xf]  ;;  %v520_v29 = vld [vmem:[%s3916_s8 + $0x9d0] sm:$0xf]  ;;  %517 = vst [vmem:[%s3923_s9 + $0x26c] sm:$0xf] %v516_v27 }
  0x7e   : > { %519 = vst [vmem:[%s3923_s9 + $0x270] sm:$0xf] %v518_v28  ;;  %521 = vst [vmem:[%s3923_s9 + $0x274] sm:$0xf] %v520_v29  ;;  %v522_v30 = vld [vmem:[%s3916_s8 + $0x9e0] sm:$0xf] }
  0x7f   : > { %v524_v31 = vld [vmem:[%s3916_s8 + $0x9f0] sm:$0xf]  ;;  %v526_v32 = vld [vmem:[%s3916_s8 + $0xa00] sm:$0xf]  ;;  %523 = vst [vmem:[%s3923_s9 + $0x278] sm:$0xf] %v522_v30 }
  0x80   : > { %525 = vst [vmem:[%s3923_s9 + $0x27c] sm:$0xf] %v524_v31  ;;  %527 = vst [vmem:[%s3923_s9 + $0x280] sm:$0xf] %v526_v32  ;;  %v528_v33 = vld [vmem:[%s3916_s8 + $0xa10] sm:$0xf] }
  0x81   : > { %v530_v34 = vld [vmem:[%s3916_s8 + $0xa20] sm:$0xf]  ;;  %v532_v35 = vld [vmem:[%s3916_s8 + $0xa30] sm:$0xf]  ;;  %529 = vst [vmem:[%s3923_s9 + $0x284] sm:$0xf] %v528_v33 }
  0x82   : > { %531 = vst [vmem:[%s3923_s9 + $0x288] sm:$0xf] %v530_v34  ;;  %533 = vst [vmem:[%s3923_s9 + $0x28c] sm:$0xf] %v532_v35  ;;  %v534_v36 = vld [vmem:[%s3916_s8 + $0xa40] sm:$0xf] }
  0x83   : > { %v536_v37 = vld [vmem:[%s3916_s8 + $0xa50] sm:$0xf]  ;;  %v538_v38 = vld [vmem:[%s3916_s8 + $0xa60] sm:$0xf]  ;;  %535 = vst [vmem:[%s3923_s9 + $0x290] sm:$0xf] %v534_v36 }
  0x84   : > { %537 = vst [vmem:[%s3923_s9 + $0x294] sm:$0xf] %v536_v37  ;;  %539 = vst [vmem:[%s3923_s9 + $0x298] sm:$0xf] %v538_v38  ;;  %v540_v39 = vld [vmem:[%s3916_s8 + $0xa70] sm:$0xf] }
  0x85   : > { %v542_v40 = vld [vmem:[%s3916_s8 + $0xa80] sm:$0xf]  ;;  %v544_v41 = vld [vmem:[%s3916_s8 + $0xa90] sm:$0xf]  ;;  %541 = vst [vmem:[%s3923_s9 + $0x29c] sm:$0xf] %v540_v39 }
  0x86   : > { %543 = vst [vmem:[%s3923_s9 + $0x2a0] sm:$0xf] %v542_v40  ;;  %545 = vst [vmem:[%s3923_s9 + $0x2a4] sm:$0xf] %v544_v41  ;;  %v546_v42 = vld [vmem:[%s3916_s8 + $0xaa0] sm:$0xf] }
  0x87   : > { %v548_v43 = vld [vmem:[%s3916_s8 + $0xab0] sm:$0xf]  ;;  %v550_v44 = vld [vmem:[%s3916_s8 + $0xac0] sm:$0xf]  ;;  %547 = vst [vmem:[%s3923_s9 + $0x2a8] sm:$0xf] %v546_v42 }
  0x88   : > { %549 = vst [vmem:[%s3923_s9 + $0x2ac] sm:$0xf] %v548_v43  ;;  %551 = vst [vmem:[%s3923_s9 + $0x2b0] sm:$0xf] %v550_v44  ;;  %v552_v45 = vld [vmem:[%s3916_s8 + $0xad0] sm:$0xf] }
  0x89   : > { %v554_v46 = vld [vmem:[%s3916_s8 + $0xae0] sm:$0xf]  ;;  %v556_v47 = vld [vmem:[%s3916_s8 + $0xaf0] sm:$0xf]  ;;  %553 = vst [vmem:[%s3923_s9 + $0x2b4] sm:$0xf] %v552_v45 }
  0x8a   : > { %555 = vst [vmem:[%s3923_s9 + $0x2b8] sm:$0xf] %v554_v46  ;;  %557 = vst [vmem:[%s3923_s9 + $0x2bc] sm:$0xf] %v556_v47  ;;  %v558_v48 = vld [vmem:[%s3916_s8 + $0xb00] sm:$0xf] }
  0x8b   : > { %v560_v49 = vld [vmem:[%s3916_s8 + $0xb10] sm:$0xf]  ;;  %v562_v50 = vld [vmem:[%s3916_s8 + $0xb20] sm:$0xf]  ;;  %559 = vst [vmem:[%s3923_s9 + $0x2c0] sm:$0xf] %v558_v48 }
  0x8c   : > { %561 = vst [vmem:[%s3923_s9 + $0x2c4] sm:$0xf] %v560_v49  ;;  %563 = vst [vmem:[%s3923_s9 + $0x2c8] sm:$0xf] %v562_v50  ;;  %v564_v51 = vld [vmem:[%s3916_s8 + $0xb30] sm:$0xf] }
  0x8d   : > { %v566_v52 = vld [vmem:[%s3916_s8 + $0xb40] sm:$0xf]  ;;  %v568_v53 = vld [vmem:[%s3916_s8 + $0xb50] sm:$0xf]  ;;  %565 = vst [vmem:[%s3923_s9 + $0x2cc] sm:$0xf] %v564_v51 }
  0x8e   : > { %567 = vst [vmem:[%s3923_s9 + $0x2d0] sm:$0xf] %v566_v52  ;;  %569 = vst [vmem:[%s3923_s9 + $0x2d4] sm:$0xf] %v568_v53  ;;  %v570_v54 = vld [vmem:[%s3916_s8 + $0xb60] sm:$0xf] }
  0x8f   : > { %v572_v55 = vld [vmem:[%s3916_s8 + $0xb70] sm:$0xf]  ;;  %v574_v56 = vld [vmem:[%s3916_s8 + $0xb80] sm:$0xf]  ;;  %571 = vst [vmem:[%s3923_s9 + $0x2d8] sm:$0xf] %v570_v54 }
  0x90   : > { %573 = vst [vmem:[%s3923_s9 + $0x2dc] sm:$0xf] %v572_v55  ;;  %575 = vst [vmem:[%s3923_s9 + $0x2e0] sm:$0xf] %v574_v56  ;;  %v576_v57 = vld [vmem:[%s3916_s8 + $0xb90] sm:$0xf] }
  0x91   : > { %v578_v58 = vld [vmem:[%s3916_s8 + $0xba0] sm:$0xf]  ;;  %v580_v59 = vld [vmem:[%s3916_s8 + $0xbb0] sm:$0xf]  ;;  %577 = vst [vmem:[%s3923_s9 + $0x2e4] sm:$0xf] %v576_v57 }
  0x92   : > { %579 = vst [vmem:[%s3923_s9 + $0x2e8] sm:$0xf] %v578_v58  ;;  %581 = vst [vmem:[%s3923_s9 + $0x2ec] sm:$0xf] %v580_v59  ;;  %v582_v60 = vld [vmem:[%s3916_s8 + $0xbc0] sm:$0xf] }
  0x93   : > { %v584_v61 = vld [vmem:[%s3916_s8 + $0xbd0] sm:$0xf]  ;;  %v586_v62 = vld [vmem:[%s3916_s8 + $0xbe0] sm:$0xf]  ;;  %583 = vst [vmem:[%s3923_s9 + $0x2f0] sm:$0xf] %v582_v60 }
  0x94   : > { %585 = vst [vmem:[%s3923_s9 + $0x2f4] sm:$0xf] %v584_v61  ;;  %587 = vst [vmem:[%s3923_s9 + $0x2f8] sm:$0xf] %v586_v62  ;;  %v588_v63 = vld [vmem:[%s3916_s8 + $0xbf0] sm:$0xf] }
  0x95   : > { %v590_v0 = vld [vmem:[%s3916_s8 + $0xc00] sm:$0xf]  ;;  %v592_v1 = vld [vmem:[%s3916_s8 + $0xc10] sm:$0xf]  ;;  %589 = vst [vmem:[%s3923_s9 + $0x2fc] sm:$0xf] %v588_v63 }
  0x96   : > { %591 = vst [vmem:[%s3923_s9 + $0x300] sm:$0xf] %v590_v0  ;;  %593 = vst [vmem:[%s3923_s9 + $0x304] sm:$0xf] %v592_v1  ;;  %v594_v2 = vld [vmem:[%s3916_s8 + $0xc20] sm:$0xf] }
  0x97   : > { %v596_v3 = vld [vmem:[%s3916_s8 + $0xc30] sm:$0xf]  ;;  %v598_v4 = vld [vmem:[%s3916_s8 + $0xc40] sm:$0xf]  ;;  %595 = vst [vmem:[%s3923_s9 + $0x308] sm:$0xf] %v594_v2 }
  0x98   : > { %597 = vst [vmem:[%s3923_s9 + $0x30c] sm:$0xf] %v596_v3  ;;  %599 = vst [vmem:[%s3923_s9 + $0x310] sm:$0xf] %v598_v4  ;;  %v600_v5 = vld [vmem:[%s3916_s8 + $0xc50] sm:$0xf] }
  0x99   : > { %v602_v6 = vld [vmem:[%s3916_s8 + $0xc60] sm:$0xf]  ;;  %v604_v7 = vld [vmem:[%s3916_s8 + $0xc70] sm:$0xf]  ;;  %601 = vst [vmem:[%s3923_s9 + $0x314] sm:$0xf] %v600_v5 }
  0x9a   : > { %603 = vst [vmem:[%s3923_s9 + $0x318] sm:$0xf] %v602_v6  ;;  %605 = vst [vmem:[%s3923_s9 + $0x31c] sm:$0xf] %v604_v7  ;;  %v606_v8 = vld [vmem:[%s3916_s8 + $0xc80] sm:$0xf] }
  0x9b   : > { %v608_v9 = vld [vmem:[%s3916_s8 + $0xc90] sm:$0xf]  ;;  %v610_v10 = vld [vmem:[%s3916_s8 + $0xca0] sm:$0xf]  ;;  %607 = vst [vmem:[%s3923_s9 + $0x320] sm:$0xf] %v606_v8 }
  0x9c   : > { %609 = vst [vmem:[%s3923_s9 + $0x324] sm:$0xf] %v608_v9  ;;  %611 = vst [vmem:[%s3923_s9 + $0x328] sm:$0xf] %v610_v10  ;;  %v612_v11 = vld [vmem:[%s3916_s8 + $0xcb0] sm:$0xf] }
  0x9d   : > { %v614_v12 = vld [vmem:[%s3916_s8 + $0xcc0] sm:$0xf]  ;;  %v616_v13 = vld [vmem:[%s3916_s8 + $0xcd0] sm:$0xf]  ;;  %613 = vst [vmem:[%s3923_s9 + $0x32c] sm:$0xf] %v612_v11 }
  0x9e   : > { %615 = vst [vmem:[%s3923_s9 + $0x330] sm:$0xf] %v614_v12  ;;  %617 = vst [vmem:[%s3923_s9 + $0x334] sm:$0xf] %v616_v13  ;;  %v618_v14 = vld [vmem:[%s3916_s8 + $0xce0] sm:$0xf] }
  0x9f   : > { %v620_v15 = vld [vmem:[%s3916_s8 + $0xcf0] sm:$0xf]  ;;  %v622_v16 = vld [vmem:[%s3916_s8 + $0xd00] sm:$0xf]  ;;  %619 = vst [vmem:[%s3923_s9 + $0x338] sm:$0xf] %v618_v14 }
  0xa0   : > { %621 = vst [vmem:[%s3923_s9 + $0x33c] sm:$0xf] %v620_v15  ;;  %623 = vst [vmem:[%s3923_s9 + $0x340] sm:$0xf] %v622_v16  ;;  %v624_v17 = vld [vmem:[%s3916_s8 + $0xd10] sm:$0xf] }
  0xa1   : > { %v626_v18 = vld [vmem:[%s3916_s8 + $0xd20] sm:$0xf]  ;;  %v628_v19 = vld [vmem:[%s3916_s8 + $0xd30] sm:$0xf]  ;;  %625 = vst [vmem:[%s3923_s9 + $0x344] sm:$0xf] %v624_v17 }
  0xa2   : > { %627 = vst [vmem:[%s3923_s9 + $0x348] sm:$0xf] %v626_v18  ;;  %629 = vst [vmem:[%s3923_s9 + $0x34c] sm:$0xf] %v628_v19  ;;  %v630_v20 = vld [vmem:[%s3916_s8 + $0xd40] sm:$0xf] }
  0xa3   : > { %v632_v21 = vld [vmem:[%s3916_s8 + $0xd50] sm:$0xf]  ;;  %v634_v22 = vld [vmem:[%s3916_s8 + $0xd60] sm:$0xf]  ;;  %631 = vst [vmem:[%s3923_s9 + $0x350] sm:$0xf] %v630_v20 }
  0xa4   : > { %633 = vst [vmem:[%s3923_s9 + $0x354] sm:$0xf] %v632_v21  ;;  %635 = vst [vmem:[%s3923_s9 + $0x358] sm:$0xf] %v634_v22  ;;  %v636_v23 = vld [vmem:[%s3916_s8 + $0xd70] sm:$0xf] }
  0xa5   : > { %v638_v24 = vld [vmem:[%s3916_s8 + $0xd80] sm:$0xf]  ;;  %v640_v25 = vld [vmem:[%s3916_s8 + $0xd90] sm:$0xf]  ;;  %637 = vst [vmem:[%s3923_s9 + $0x35c] sm:$0xf] %v636_v23 }
  0xa6   : > { %639 = vst [vmem:[%s3923_s9 + $0x360] sm:$0xf] %v638_v24  ;;  %641 = vst [vmem:[%s3923_s9 + $0x364] sm:$0xf] %v640_v25  ;;  %v642_v26 = vld [vmem:[%s3916_s8 + $0xda0] sm:$0xf] }
  0xa7   : > { %v644_v27 = vld [vmem:[%s3916_s8 + $0xdb0] sm:$0xf]  ;;  %v646_v28 = vld [vmem:[%s3916_s8 + $0xdc0] sm:$0xf]  ;;  %643 = vst [vmem:[%s3923_s9 + $0x368] sm:$0xf] %v642_v26 }
  0xa8   : > { %645 = vst [vmem:[%s3923_s9 + $0x36c] sm:$0xf] %v644_v27  ;;  %647 = vst [vmem:[%s3923_s9 + $0x370] sm:$0xf] %v646_v28  ;;  %v648_v29 = vld [vmem:[%s3916_s8 + $0xdd0] sm:$0xf] }
  0xa9   : > { %v650_v30 = vld [vmem:[%s3916_s8 + $0xde0] sm:$0xf]  ;;  %v652_v31 = vld [vmem:[%s3916_s8 + $0xdf0] sm:$0xf]  ;;  %649 = vst [vmem:[%s3923_s9 + $0x374] sm:$0xf] %v648_v29 }
  0xaa   : > { %651 = vst [vmem:[%s3923_s9 + $0x378] sm:$0xf] %v650_v30  ;;  %653 = vst [vmem:[%s3923_s9 + $0x37c] sm:$0xf] %v652_v31  ;;  %v654_v32 = vld [vmem:[%s3916_s8 + $0xe00] sm:$0xf] }
  0xab   : > { %v656_v33 = vld [vmem:[%s3916_s8 + $0xe10] sm:$0xf]  ;;  %v658_v34 = vld [vmem:[%s3916_s8 + $0xe20] sm:$0xf]  ;;  %655 = vst [vmem:[%s3923_s9 + $0x380] sm:$0xf] %v654_v32 }
  0xac   : > { %657 = vst [vmem:[%s3923_s9 + $0x384] sm:$0xf] %v656_v33  ;;  %659 = vst [vmem:[%s3923_s9 + $0x388] sm:$0xf] %v658_v34  ;;  %v660_v35 = vld [vmem:[%s3916_s8 + $0xe30] sm:$0xf] }
  0xad   : > { %v662_v36 = vld [vmem:[%s3916_s8 + $0xe40] sm:$0xf]  ;;  %v664_v37 = vld [vmem:[%s3916_s8 + $0xe50] sm:$0xf]  ;;  %661 = vst [vmem:[%s3923_s9 + $0x38c] sm:$0xf] %v660_v35 }
  0xae   : > { %663 = vst [vmem:[%s3923_s9 + $0x390] sm:$0xf] %v662_v36  ;;  %665 = vst [vmem:[%s3923_s9 + $0x394] sm:$0xf] %v664_v37  ;;  %v666_v38 = vld [vmem:[%s3916_s8 + $0xe60] sm:$0xf] }
  0xaf   : > { %v668_v39 = vld [vmem:[%s3916_s8 + $0xe70] sm:$0xf]  ;;  %v670_v40 = vld [vmem:[%s3916_s8 + $0xe80] sm:$0xf]  ;;  %667 = vst [vmem:[%s3923_s9 + $0x398] sm:$0xf] %v666_v38 }
  0xb0   : > { %669 = vst [vmem:[%s3923_s9 + $0x39c] sm:$0xf] %v668_v39  ;;  %671 = vst [vmem:[%s3923_s9 + $0x3a0] sm:$0xf] %v670_v40  ;;  %v672_v41 = vld [vmem:[%s3916_s8 + $0xe90] sm:$0xf] }
  0xb1   : > { %v674_v42 = vld [vmem:[%s3916_s8 + $0xea0] sm:$0xf]  ;;  %v676_v43 = vld [vmem:[%s3916_s8 + $0xeb0] sm:$0xf]  ;;  %673 = vst [vmem:[%s3923_s9 + $0x3a4] sm:$0xf] %v672_v41 }
  0xb2   : > { %675 = vst [vmem:[%s3923_s9 + $0x3a8] sm:$0xf] %v674_v42  ;;  %677 = vst [vmem:[%s3923_s9 + $0x3ac] sm:$0xf] %v676_v43  ;;  %v678_v44 = vld [vmem:[%s3916_s8 + $0xec0] sm:$0xf] }
  0xb3   : > { %v680_v45 = vld [vmem:[%s3916_s8 + $0xed0] sm:$0xf]  ;;  %v682_v46 = vld [vmem:[%s3916_s8 + $0xee0] sm:$0xf]  ;;  %679 = vst [vmem:[%s3923_s9 + $0x3b0] sm:$0xf] %v678_v44 }
  0xb4   : > { %681 = vst [vmem:[%s3923_s9 + $0x3b4] sm:$0xf] %v680_v45  ;;  %683 = vst [vmem:[%s3923_s9 + $0x3b8] sm:$0xf] %v682_v46  ;;  %v684_v47 = vld [vmem:[%s3916_s8 + $0xef0] sm:$0xf] }
  0xb5   : > { %v686_v48 = vld [vmem:[%s3916_s8 + $0xf00] sm:$0xf]  ;;  %v688_v49 = vld [vmem:[%s3916_s8 + $0xf10] sm:$0xf]  ;;  %685 = vst [vmem:[%s3923_s9 + $0x3bc] sm:$0xf] %v684_v47 }
  0xb6   : > { %687 = vst [vmem:[%s3923_s9 + $0x3c0] sm:$0xf] %v686_v48  ;;  %689 = vst [vmem:[%s3923_s9 + $0x3c4] sm:$0xf] %v688_v49  ;;  %v690_v50 = vld [vmem:[%s3916_s8 + $0xf20] sm:$0xf] }
  0xb7   : > { %v692_v51 = vld [vmem:[%s3916_s8 + $0xf30] sm:$0xf]  ;;  %v694_v52 = vld [vmem:[%s3916_s8 + $0xf40] sm:$0xf]  ;;  %691 = vst [vmem:[%s3923_s9 + $0x3c8] sm:$0xf] %v690_v50 }
  0xb8   : > { %693 = vst [vmem:[%s3923_s9 + $0x3cc] sm:$0xf] %v692_v51  ;;  %695 = vst [vmem:[%s3923_s9 + $0x3d0] sm:$0xf] %v694_v52  ;;  %v696_v53 = vld [vmem:[%s3916_s8 + $0xf50] sm:$0xf] }
  0xb9   : > { %v698_v54 = vld [vmem:[%s3916_s8 + $0xf60] sm:$0xf]  ;;  %v700_v55 = vld [vmem:[%s3916_s8 + $0xf70] sm:$0xf]  ;;  %697 = vst [vmem:[%s3923_s9 + $0x3d4] sm:$0xf] %v696_v53 }
  0xba   : > { %699 = vst [vmem:[%s3923_s9 + $0x3d8] sm:$0xf] %v698_v54  ;;  %701 = vst [vmem:[%s3923_s9 + $0x3dc] sm:$0xf] %v700_v55  ;;  %v702_v56 = vld [vmem:[%s3916_s8 + $0xf80] sm:$0xf] }
  0xbb   : > { %v704_v57 = vld [vmem:[%s3916_s8 + $0xf90] sm:$0xf]  ;;  %v706_v58 = vld [vmem:[%s3916_s8 + $0xfa0] sm:$0xf]  ;;  %703 = vst [vmem:[%s3923_s9 + $0x3e0] sm:$0xf] %v702_v56 }
  0xbc   : > { %705 = vst [vmem:[%s3923_s9 + $0x3e4] sm:$0xf] %v704_v57  ;;  %707 = vst [vmem:[%s3923_s9 + $0x3e8] sm:$0xf] %v706_v58  ;;  %v708_v59 = vld [vmem:[%s3916_s8 + $0xfb0] sm:$0xf] }
  0xbd   : > { %v710_v60 = vld [vmem:[%s3916_s8 + $0xfc0] sm:$0xf]  ;;  %v712_v61 = vld [vmem:[%s3916_s8 + $0xfd0] sm:$0xf]  ;;  %709 = vst [vmem:[%s3923_s9 + $0x3ec] sm:$0xf] %v708_v59 }
  0xbe   : > { %711 = vst [vmem:[%s3923_s9 + $0x3f0] sm:$0xf] %v710_v60  ;;  %713 = vst [vmem:[%s3923_s9 + $0x3f4] sm:$0xf] %v712_v61  ;;  %v714_v62 = vld [vmem:[%s3916_s8 + $0xfe0] sm:$0xf] }
  0xbf   : > { %v716_v63 = vld [vmem:[%s3916_s8 + $0xff0] sm:$0xf]  ;;  %v718_v0 = vld [vmem:[%s3916_s8 + $0x1000] sm:$0xf]  ;;  %715 = vst [vmem:[%s3923_s9 + $0x3f8] sm:$0xf] %v714_v62 }
  0xc0   : > { %717 = vst [vmem:[%s3923_s9 + $0x3fc] sm:$0xf] %v716_v63  ;;  %719 = vst [vmem:[%s3923_s9 + $0x400] sm:$0xf] %v718_v0  ;;  %v720_v1 = vld [vmem:[%s3916_s8 + $0x1010] sm:$0xf] }
  0xc1   : > { %v722_v2 = vld [vmem:[%s3916_s8 + $0x1020] sm:$0xf]  ;;  %v724_v3 = vld [vmem:[%s3916_s8 + $0x1030] sm:$0xf]  ;;  %721 = vst [vmem:[%s3923_s9 + $0x404] sm:$0xf] %v720_v1 }
  0xc2   : > { %723 = vst [vmem:[%s3923_s9 + $0x408] sm:$0xf] %v722_v2  ;;  %725 = vst [vmem:[%s3923_s9 + $0x40c] sm:$0xf] %v724_v3  ;;  %v726_v4 = vld [vmem:[%s3916_s8 + $0x1040] sm:$0xf] }
  0xc3   : > { %v728_v5 = vld [vmem:[%s3916_s8 + $0x1050] sm:$0xf]  ;;  %v730_v6 = vld [vmem:[%s3916_s8 + $0x1060] sm:$0xf]  ;;  %727 = vst [vmem:[%s3923_s9 + $0x410] sm:$0xf] %v726_v4 }
  0xc4   : > { %729 = vst [vmem:[%s3923_s9 + $0x414] sm:$0xf] %v728_v5  ;;  %731 = vst [vmem:[%s3923_s9 + $0x418] sm:$0xf] %v730_v6  ;;  %v732_v7 = vld [vmem:[%s3916_s8 + $0x1070] sm:$0xf] }
  0xc5   : > { %v734_v8 = vld [vmem:[%s3916_s8 + $0x1080] sm:$0xf]  ;;  %v736_v9 = vld [vmem:[%s3916_s8 + $0x1090] sm:$0xf]  ;;  %733 = vst [vmem:[%s3923_s9 + $0x41c] sm:$0xf] %v732_v7 }
  0xc6   : > { %735 = vst [vmem:[%s3923_s9 + $0x420] sm:$0xf] %v734_v8  ;;  %737 = vst [vmem:[%s3923_s9 + $0x424] sm:$0xf] %v736_v9  ;;  %v738_v10 = vld [vmem:[%s3916_s8 + $0x10a0] sm:$0xf] }
  0xc7   : > { %v740_v11 = vld [vmem:[%s3916_s8 + $0x10b0] sm:$0xf]  ;;  %v742_v12 = vld [vmem:[%s3916_s8 + $0x10c0] sm:$0xf]  ;;  %739 = vst [vmem:[%s3923_s9 + $0x428] sm:$0xf] %v738_v10 }
  0xc8   : > { %741 = vst [vmem:[%s3923_s9 + $0x42c] sm:$0xf] %v740_v11  ;;  %743 = vst [vmem:[%s3923_s9 + $0x430] sm:$0xf] %v742_v12  ;;  %v744_v13 = vld [vmem:[%s3916_s8 + $0x10d0] sm:$0xf] }
  0xc9   : > { %v746_v14 = vld [vmem:[%s3916_s8 + $0x10e0] sm:$0xf]  ;;  %v748_v15 = vld [vmem:[%s3916_s8 + $0x10f0] sm:$0xf]  ;;  %745 = vst [vmem:[%s3923_s9 + $0x434] sm:$0xf] %v744_v13 }
  0xca   : > { %747 = vst [vmem:[%s3923_s9 + $0x438] sm:$0xf] %v746_v14  ;;  %749 = vst [vmem:[%s3923_s9 + $0x43c] sm:$0xf] %v748_v15  ;;  %v750_v16 = vld [vmem:[%s3916_s8 + $0x1100] sm:$0xf] }
  0xcb   : > { %v752_v17 = vld [vmem:[%s3916_s8 + $0x1110] sm:$0xf]  ;;  %v754_v18 = vld [vmem:[%s3916_s8 + $0x1120] sm:$0xf]  ;;  %751 = vst [vmem:[%s3923_s9 + $0x440] sm:$0xf] %v750_v16 }
  0xcc   : > { %753 = vst [vmem:[%s3923_s9 + $0x444] sm:$0xf] %v752_v17  ;;  %755 = vst [vmem:[%s3923_s9 + $0x448] sm:$0xf] %v754_v18  ;;  %v756_v19 = vld [vmem:[%s3916_s8 + $0x1130] sm:$0xf] }
  0xcd   : > { %v758_v20 = vld [vmem:[%s3916_s8 + $0x1140] sm:$0xf]  ;;  %v760_v21 = vld [vmem:[%s3916_s8 + $0x1150] sm:$0xf]  ;;  %757 = vst [vmem:[%s3923_s9 + $0x44c] sm:$0xf] %v756_v19 }
  0xce   : > { %759 = vst [vmem:[%s3923_s9 + $0x450] sm:$0xf] %v758_v20  ;;  %761 = vst [vmem:[%s3923_s9 + $0x454] sm:$0xf] %v760_v21  ;;  %v762_v22 = vld [vmem:[%s3916_s8 + $0x1160] sm:$0xf] }
  0xcf   : > { %v764_v23 = vld [vmem:[%s3916_s8 + $0x1170] sm:$0xf]  ;;  %v766_v24 = vld [vmem:[%s3916_s8 + $0x1180] sm:$0xf]  ;;  %763 = vst [vmem:[%s3923_s9 + $0x458] sm:$0xf] %v762_v22 }
  0xd0   : > { %765 = vst [vmem:[%s3923_s9 + $0x45c] sm:$0xf] %v764_v23  ;;  %767 = vst [vmem:[%s3923_s9 + $0x460] sm:$0xf] %v766_v24  ;;  %v768_v25 = vld [vmem:[%s3916_s8 + $0x1190] sm:$0xf] }
  0xd1   : > { %v770_v26 = vld [vmem:[%s3916_s8 + $0x11a0] sm:$0xf]  ;;  %v772_v27 = vld [vmem:[%s3916_s8 + $0x11b0] sm:$0xf]  ;;  %769 = vst [vmem:[%s3923_s9 + $0x464] sm:$0xf] %v768_v25 }
  0xd2   : > { %771 = vst [vmem:[%s3923_s9 + $0x468] sm:$0xf] %v770_v26  ;;  %773 = vst [vmem:[%s3923_s9 + $0x46c] sm:$0xf] %v772_v27  ;;  %v774_v28 = vld [vmem:[%s3916_s8 + $0x11c0] sm:$0xf] }
  0xd3   : > { %v776_v29 = vld [vmem:[%s3916_s8 + $0x11d0] sm:$0xf]  ;;  %v778_v30 = vld [vmem:[%s3916_s8 + $0x11e0] sm:$0xf]  ;;  %775 = vst [vmem:[%s3923_s9 + $0x470] sm:$0xf] %v774_v28 }
  0xd4   : > { %777 = vst [vmem:[%s3923_s9 + $0x474] sm:$0xf] %v776_v29  ;;  %779 = vst [vmem:[%s3923_s9 + $0x478] sm:$0xf] %v778_v30  ;;  %v780_v31 = vld [vmem:[%s3916_s8 + $0x11f0] sm:$0xf] }
  0xd5   : > { %781 = vst [vmem:[%s3923_s9 + $0x47c] sm:$0xf] %v780_v31 }
  0xd6 PF: > { %p3259_p8 = scmp.ge.s32.totalorder %s3835_s21, 1  ;;  %p1391_p9 = scmp.lt.s32.totalorder %s3835_s21, 5 }
  0xd8   : > { %p1392_p10 = pnand %p3259_p8, %p1391_p9 }
  0xd9   : > { %s1398_s10 = sand.u32 (!%p1392_p10), 1, %s3819_s18   ;;  %v1740_v32 = vlaneseq (!%p1392_p10)  ;;  %v3837_v33 = vmov (!%p1392_p10), 1966171168   ;;  %v1442_v36 = vld [vmem:[%s4724_s1] sm:$0xff] (!%p1392_p10)  ;;  %p1435_p11 = scmp.lt.s32.totalorder (!%p1392_p10), %s3827_s0, 3 }
  0xda   : > { %1395 = sbr.rel (%p1392_p10) target bundleno = 618 (0x26a), region = 73  ;;  %v1738_v34 = vunpack.c.l.s4 (!%p1392_p10), %v3837_v33  ;;  %v1736_v63 = vcombine.high (!%p1392_p10), %v1442_v36, %v1442_v36  ;;  %s1430_s8 = scalar_lea.vmem (!%p1392_p10), [#allocation3], %s1398_s10 }
  0xdb   : > { %s3609_s11 = smul.u32 (!%p1392_p10), 1152, %s1398_s10  ;;  %v1741_v35 = vshrl.u32 (!%p1392_p10), %v1740_v32, 7 }
  0xdc   : > { %v1739_v37 = vunpack.c.0.s8 (!%p1392_p10), %v1738_v34 }
  0xdd   : > { %s4504_s14 = scalar_lea.vmem (!%p1392_p10), [#allocation2], %s3609_s11 }
  0xde   : > { %v3651_v38 = vld [vmem:[%s4504_s14 + $0x40] sm:$0xff] (!%p1392_p10)   ;;  %v4508_v40 = vsub.s32 (!%p1392_p10), %v1739_v37, %v1741_v35  ;;  %v3655_v44 = vld [vmem:[%s4504_s14 + $0x48] sm:$0xff] (!%p1392_p10)   ;;  %v3659_v50 = vld [vmem:[%s4504_s14 + $0x50] sm:$0xff] (!%p1392_p10)  }
  0xdf   : > { %v3652_v39 = vld [vmem:[%s4504_s14 + $0xc0] sm:$0xff] (!%p1392_p10)   ;;  %3410 = vmatprep.subr.bf16.mxu0 (!%p1392_p10), %v3651_v38  ;;  %v3656_v45 = vld [vmem:[%s4504_s14 + $0xc8] sm:$0xff] (!%p1392_p10)   ;;  %v3660_v51 = vld [vmem:[%s4504_s14 + $0xd0] sm:$0xff] (!%p1392_p10)  }
  0xe0   : > { %v3653_v41 = vld [vmem:[%s4504_s14] sm:$0xff] (!%p1392_p10)   ;;  %3432 = vmatprep.subr.bf16.mxu1 (!%p1392_p10), %v3652_v39  ;;  %v1743_v43 = vrot.slane (!%p1392_p10), %v1442_v36, %v4508_v40  ;;  %v3657_v47 = vld [vmem:[%s4504_s14 + $0x8] sm:$0xff] (!%p1392_p10)   ;;  %v3661_v53 = vld [vmem:[%s4504_s14 + $0x10] sm:$0xff] (!%p1392_p10)   ;;  %v4535_v4 = vrot.slane (!%p1392_p10), %v1736_v63, %v4508_v40 }
  0xe1   : > { %v3654_v42 = vld [vmem:[%s4504_s14 + $0x80] sm:$0xff]   ;;  %3411 = vmatpush3.bf16.msra.mxu0 %v3653_v41  ;;  %v3658_v48 = vld [vmem:[%s4504_s14 + $0x88] sm:$0xff]   ;;  %v3662_v54 = vld [vmem:[%s4504_s14 + $0x90] sm:$0xff]   ;;  %s1436_s24 = scalar_select %p1435_p11, %s3827_s0, 3 }
  0xe2   : > { %3433 = vmatpush3.bf16.msra.mxu1 %v3654_v42  ;;  %v1751_v46 = vcombine.high %v1743_v43, %v1743_v43  ;;  %3412 = vmatprep.subr.bf16.mxu0 %v3655_v44  ;;  %v3663_v55 = vld [vmem:[%s4504_s14 + $0x58] sm:$0xff]   ;;  %v3667_v59 = vld [vmem:[%s4504_s14 + $0x60] sm:$0xff]   ;;  %v3671_v0 = vld [vmem:[%s4504_s14 + $0x68] sm:$0xff]   ;;  %v1752_v9 = vcombine.high %v4535_v4, %v4535_v4  ;;  %v1759_v11 = vrot.slane %v1743_v43, %v4508_v40  ;;  %s3192_s12 = scalar_lea.vmem (%p3903_p6), %s4728_s5, %s3827_s0 }
  0xe3   : > { %3434 = vmatprep.subr.bf16.mxu1 %v3656_v45  ;;  %v3664_v56 = vld [vmem:[%s4504_s14 + $0xd8] sm:$0xff]   ;;  %v3668_v60 = vld [vmem:[%s4504_s14 + $0xe0] sm:$0xff]   ;;  %v3672_v1 = vld [vmem:[%s4504_s14 + $0xe8] sm:$0xff]   ;;  %s1437_s29 = scalar_lea.vmem %s4726_s3, %s1436_s24  ;;  %s1440_s7 = scalar_lea.vmem %s4727_s4, %s1436_s24 }
  0xe4   : > { %v1773_v49 = vrot.slane %v1751_v46, %v4508_v40  ;;  %v3665_v57 = vld [vmem:[%s4504_s14 + $0x18] sm:$0xff]   ;;  %v3669_v61 = vld [vmem:[%s4504_s14 + $0x20] sm:$0xff]   ;;  %v3673_v2 = vld [vmem:[%s4504_s14 + $0x28] sm:$0xff]   ;;  %v1780_v15 = vrot.slane %v1752_v9, %v4508_v40  ;;  %v1781_v16 = vcombine.high %v1759_v11, %v1759_v11 }
  0xe5   : > { %3413 = vmatpush3.bf16.msra.mxu0 %v3657_v47  ;;  %v3666_v58 = vld [vmem:[%s4504_s14 + $0x98] sm:$0xff]   ;;  %v3670_v62 = vld [vmem:[%s4504_s14 + $0xa0] sm:$0xff]   ;;  %v3674_v3 = vld [vmem:[%s4504_s14 + $0xa8] sm:$0xff]  }
  0xe6   : > { %3435 = vmatpush3.bf16.msra.mxu1 %v3658_v48  ;;  %2770 = vmatprep.mubr.bf16.mxu0 %v1773_v49  ;;  %v1783_v52 = vcombine.high %v1773_v49, %v1773_v49  ;;  %v3675_v5 = vld [vmem:[%s4504_s14 + $0x70] sm:$0xff]   ;;  %v3679_v10 = vld [vmem:[%s4504_s14 + $0x78] sm:$0xff]   ;;  %v3684_v17 = vld [vmem:[%s4504_s14 + $0x140] sm:$0xff]   ;;  %v1784_v21 = vcombine.high %v1780_v15, %v1780_v15 }
  0xe7   : > { %3414 = vmatprep.subr.bf16.mxu0 %v3659_v50  ;;  %3436 = vmatprep.subr.bf16.mxu1 %v3660_v51  ;;  %v3676_v6 = vld [vmem:[%s4504_s14 + $0xf0] sm:$0xff]   ;;  %v3680_v12 = vld [vmem:[%s4504_s14 + $0xf8] sm:$0xff]   ;;  %v3685_v18 = vld [vmem:[%s4504_s14 + $0x100] sm:$0xff]  }
  0xe8   : > { %2810 = vmatprep.mubr.bf16.mxu1 %v1783_v52  ;;  %v3677_v7 = vld [vmem:[%s4504_s14 + $0x30] sm:$0xff]   ;;  %v3681_v13 = vld [vmem:[%s4504_s14 + $0x38] sm:$0xff]   ;;  %v3686_v19 = vld [vmem:[%s4504_s14 + $0x1c0] sm:$0xff]   ;;  %v1766_v52 = vrot.slane %v4535_v4, %v4508_v40 }
  0xe9   : > { %3415 = vmatpush3.bf16.msra.mxu0 %v3661_v53  ;;  %v3678_v8 = vld [vmem:[%s4504_s14 + $0xb0] sm:$0xff]   ;;  %v3682_v14 = vld [vmem:[%s4504_s14 + $0xb8] sm:$0xff]   ;;  %v3687_v20 = vld [vmem:[%s4504_s14 + $0x180] sm:$0xff]  }
  0xea   : > { %3437 = vmatpush3.bf16.msra.mxu1 %v3662_v54  ;;  %3416 = vmatprep.subr.bf16.mxu0 %v3663_v55  ;;  %v3688_v22 = vld [vmem:[%s4504_s14 + $0x148] sm:$0xff]   ;;  %v3692_v26 = vld [vmem:[%s4504_s14 + $0x150] sm:$0xff]   ;;  %v3696_v30 = vld [vmem:[%s4504_s14 + $0x158] sm:$0xff]  }
  0xeb   : > { %3438 = vmatprep.subr.bf16.mxu1 %v3664_v56  ;;  %v3689_v23 = vld [vmem:[%s4504_s14 + $0x108] sm:$0xff]   ;;  %v3693_v27 = vld [vmem:[%s4504_s14 + $0x110] sm:$0xff]   ;;  %v3697_v31 = vld [vmem:[%s4504_s14 + $0x118] sm:$0xff]  }
  0xec   : > { %v3690_v24 = vld [vmem:[%s4504_s14 + $0x1c8] sm:$0xff]   ;;  %v3694_v28 = vld [vmem:[%s4504_s14 + $0x1d0] sm:$0xff]   ;;  %v3698_v32 = vld [vmem:[%s4504_s14 + $0x1d8] sm:$0xff]  }
  0xed   : > { %3417 = vmatpush3.bf16.msra.mxu0 %v3665_v57  ;;  %v3691_v25 = vld [vmem:[%s4504_s14 + $0x188] sm:$0xff]   ;;  %v3695_v29 = vld [vmem:[%s4504_s14 + $0x190] sm:$0xff]   ;;  %v3699_v33 = vld [vmem:[%s4504_s14 + $0x198] sm:$0xff]  }
  0xee   : > { %3439 = vmatpush3.bf16.msra.mxu1 %v3666_v58  ;;  %3418 = vmatprep.subr.bf16.mxu0 %v3667_v59  ;;  %v3700_v34 = vld [vmem:[%s4504_s14 + $0x160] sm:$0xff]   ;;  %v4571_v37 = vld [vmem:[%s4724_s1 + $0x8] sm:$0xff]  ;;  %v3708_v45 = vld [vmem:[%s4504_s14 + $0x170] sm:$0xff]   ;;  %v1782_v58 = vcombine.high %v1766_v52, %v1766_v52 }
  0xef   : > { %3440 = vmatprep.subr.bf16.mxu1 %v3668_v60  ;;  %v3701_v35 = vld [vmem:[%s4504_s14 + $0x120] sm:$0xff]   ;;  %v3704_v39 = vld [vmem:[%s4504_s14 + $0x168] sm:$0xff]   ;;  %v4580_v44 = vrot.slane %v4571_v37, %v4508_v40  ;;  %v3709_v46 = vld [vmem:[%s4504_s14 + $0x130] sm:$0xff]  }
  0xf0   : > { %v3702_v36 = vld [vmem:[%s4504_s14 + $0x1e0] sm:$0xff]   ;;  %v3705_v41 = vld [vmem:[%s4504_s14 + $0x128] sm:$0xff]   ;;  %v3710_v47 = vld [vmem:[%s4504_s14 + $0x1f0] sm:$0xff]  }
  0xf1   : > { %3419 = vmatpush3.bf16.msra.mxu0 %v3669_v61  ;;  %v3703_v38 = vld [vmem:[%s4504_s14 + $0x1a0] sm:$0xff]   ;;  %v3706_v42 = vld [vmem:[%s4504_s14 + $0x1e8] sm:$0xff]   ;;  %v3711_v48 = vld [vmem:[%s4504_s14 + $0x1b0] sm:$0xff]   ;;  %v1800_v49 = vcombine.high %v4580_v44, %v4580_v44 }
  0xf2   : > { %3441 = vmatpush3.bf16.msra.mxu1 %v3670_v62  ;;  %3420 = vmatprep.subr.bf16.mxu0 %v3671_v0  ;;  %v3707_v43 = vld [vmem:[%s4504_s14 + $0x1a8] sm:$0xff]   ;;  %v3712_v50 = vld [vmem:[%s4504_s14 + $0x178] sm:$0xff]   ;;  %v3716_v56 = vld [vmem:[%s4504_s14 + $0x240] sm:$0xff]  }
  0xf3   : > { %3442 = vmatprep.subr.bf16.mxu1 %v3672_v1  ;;  %v3713_v51 = vld [vmem:[%s4504_s14 + $0x138] sm:$0xff]   ;;  %v1822_v55 = vrot.slane %v1800_v49, %v4508_v40  ;;  %v3717_v57 = vld [vmem:[%s4504_s14 + $0x200] sm:$0xff]   ;;  %v3720_v62 = vld [vmem:[%s4504_s14 + $0x248] sm:$0xff]  }
  0xf4   : > { %v3714_v53 = vld [vmem:[%s4504_s14 + $0x1f8] sm:$0xff]   ;;  %v3718_v59 = vld [vmem:[%s4504_s14 + $0x2c0] sm:$0xff]   ;;  %v3721_v63 = vld [vmem:[%s4504_s14 + $0x208] sm:$0xff]  }
  0xf5   : > { %3421 = vmatpush3.bf16.msra.mxu0 %v3673_v2  ;;  %v3715_v54 = vld [vmem:[%s4504_s14 + $0x1b8] sm:$0xff]   ;;  %v3719_v60 = vld [vmem:[%s4504_s14 + $0x280] sm:$0xff]   ;;  %v1832_v61 = vcombine.high %v1822_v55, %v1822_v55  ;;  %v3722_v0 = vld [vmem:[%s4504_s14 + $0x2c8] sm:$0xff]  }
  0xf6   : > { %3443 = vmatpush3.bf16.msra.mxu1 %v3674_v3  ;;  %3422 = vmatprep.subr.bf16.mxu0 %v3675_v5  ;;  %v3723_v1 = vld [vmem:[%s4504_s14 + $0x288] sm:$0xff]   ;;  %v3724_v2 = vld [vmem:[%s4504_s14 + $0x250] sm:$0xff]   ;;  %v3731_v9 = vld [vmem:[%s4504_s14 + $0x298] sm:$0xff]  }
  0xf7   : > { %3444 = vmatprep.subr.bf16.mxu1 %v3676_v6  ;;  %v3725_v3 = vld [vmem:[%s4504_s14 + $0x210] sm:$0xff]   ;;  %v3728_v6 = vld [vmem:[%s4504_s14 + $0x258] sm:$0xff]  }
  0xf8   : > { %v3726_v4 = vld [vmem:[%s4504_s14 + $0x2d0] sm:$0xff]   ;;  %v3763_v49 = vld [vmem:[%s4504_s14 + $0x398] sm:$0xff]  }
  0xf9   : > { %3423 = vmatpush3.bf16.msra.mxu0 %v3677_v7  ;;  %v3727_v5 = vld [vmem:[%s4504_s14 + $0x290] sm:$0xff]   ;;  %v3729_v7 = vld [vmem:[%s4504_s14 + $0x218] sm:$0xff]  }
  0xfa   : > { %3445 = vmatpush3.bf16.msra.mxu1 %v3678_v8  ;;  %3424 = vmatprep.subr.bf16.mxu0 %v3679_v10  ;;  %v3730_v8 = vld [vmem:[%s4504_s14 + $0x2d8] sm:$0xff]   ;;  %v3732_v10 = vld [vmem:[%s4504_s14 + $0x260] sm:$0xff]  }
  0xfb   : > { %3446 = vmatprep.subr.bf16.mxu1 %v3680_v12  ;;  %v3734_v12 = vld [vmem:[%s4504_s14 + $0x2e0] sm:$0xff]  }
  0xfd   : > { %3425 = vmatpush3.bf16.msra.mxu0 %v3681_v13  ;;  %v3735_v13 = vld [vmem:[%s4504_s14 + $0x2a0] sm:$0xff]  }
  0xfe   : > { %3447 = vmatpush3.bf16.msra.mxu1 %v3682_v14  ;;  %3454 = vmatprep.subr.bf16.mxu0 %v3684_v17  ;;  %v1785_v14 = vcombine.high %v4571_v37, %v4571_v37  ;;  %v3738_v17 = vld [vmem:[%s4504_s14 + $0x2e8] sm:$0xff]  }
  0xff   : > { %3476 = vmatprep.subr.bf16.mxu1 %v3686_v19  ;;  %v3752_v37 = vld [vmem:[%s4504_s14 + $0x348] sm:$0xff]  }
 0x100   : > { %2771 = vmatmul.mubr.bf16.vlgmr.msra.gmra.mrb[0].mxu0 %v1759_v11  ;;  %v3733_v11 = vld [vmem:[%s4504_s14 + $0x220] sm:$0xff]   ;;  %v4622_v19 = vrot.slane %v1785_v14, %v4508_v40  ;;  %v3260_v14 = vld.sshfl [vmem:[%s4724_s1 + $0x10] sm:$0x11 pattern:$0x75316420] }
 0x101   : > { %2811 = vmatmul.mubr.bf16.vlgmr.msra.gmra.mrb[0].mxu1 %v1781_v16  ;;  %3455 = vmatpush3.bf16.msra.mxu0 %v3685_v18  ;;  %v3737_v16 = vld [vmem:[%s4504_s14 + $0x228] sm:$0xff]  }
 0x102   : > { %2850 = vmatprep.mubr.bf16.mxu0 %v1780_v15  ;;  %3477 = vmatpush3.bf16.msra.mxu1 %v3687_v20  ;;  %v3736_v15 = vld [vmem:[%s4504_s14 + $0x268] sm:$0xff]   ;;  %v3740_v20 = vld [vmem:[%s4504_s14 + $0x270] sm:$0xff]  }
 0x103   : > { %3456 = vmatprep.subr.bf16.mxu0 %v3688_v22  ;;  %2890 = vmatprep.mubr.bf16.mxu1 %v1784_v21  ;;  %v3739_v18 = vld [vmem:[%s4504_s14 + $0x2a8] sm:$0xff]   ;;  %v3741_v21 = vld [vmem:[%s4504_s14 + $0x230] sm:$0xff]  }
 0x104   : > { %3478 = vmatprep.subr.bf16.mxu1 %v3690_v24  ;;  %v3742_v22 = vld [vmem:[%s4504_s14 + $0x2f0] sm:$0xff]   ;;  %v1801_v24 = vcombine.high %v4622_v19, %v4622_v19 }
 0x105   : > { %3457 = vmatpush3.bf16.msra.mxu0 %v3689_v23  ;;  %v3743_v23 = vld [vmem:[%s4504_s14 + $0x2b0] sm:$0xff]  }
 0x106   : > { %3479 = vmatpush3.bf16.msra.mxu1 %v3691_v25  ;;  %3458 = vmatprep.subr.bf16.mxu0 %v3692_v26  ;;  %v3744_v25 = vld [vmem:[%s4504_s14 + $0x278] sm:$0xff]  }
 0x107   : > { %3480 = vmatprep.subr.bf16.mxu1 %v3694_v28  ;;  %v3745_v26 = vld [vmem:[%s4504_s14 + $0x238] sm:$0xff]  }
 0x108   : > { %v3746_v28 = vld [vmem:[%s4504_s14 + $0x2f8] sm:$0xff]  }
 0x109   : > { %3459 = vmatpush3.bf16.msra.mxu0 %v3693_v27  ;;  %v1808_v27 = vrot.slane %v4580_v44, %v4508_v40  ;;  %v3758_v44 = vld [vmem:[%s4504_s14 + $0x3d0] sm:$0xff]  }
 0x10a   : > { %3481 = vmatpush3.bf16.msra.mxu1 %v3695_v29  ;;  %3460 = vmatprep.subr.bf16.mxu0 %v3696_v30  ;;  %v3747_v29 = vld [vmem:[%s4504_s14 + $0x2b8] sm:$0xff]   ;;  %v1829_v30 = vrot.slane %v1801_v24, %v4508_v40 }
 0x10b   : > { %3482 = vmatprep.subr.bf16.mxu1 %v3698_v32  ;;  %v3749_v32 = vld [vmem:[%s4504_s14 + $0x300] sm:$0xff]  }
 0x10d   : > { %3461 = vmatpush3.bf16.msra.mxu0 %v3697_v31  ;;  %v3748_v31 = vld [vmem:[%s4504_s14 + $0x340] sm:$0xff]  }
 0x10e   : > { %3483 = vmatpush3.bf16.msra.mxu1 %v3699_v33  ;;  %3462 = vmatprep.subr.bf16.mxu0 %v3700_v34  ;;  %v1830_v33 = vcombine.high %v1808_v27, %v1808_v27  ;;  %v3750_v34 = vld [vmem:[%s4504_s14 + $0x3c0] sm:$0xff]  }
 0x10f   : > { %3484 = vmatprep.subr.bf16.mxu1 %v3702_v36  ;;  %v1833_v36 = vcombine.high %v1829_v30, %v1829_v30 }
 0x111   : > { %3463 = vmatpush3.bf16.msra.mxu0 %v3701_v35  ;;  %v3751_v35 = vld [vmem:[%s4504_s14 + $0x380] sm:$0xff]  }
 0x112   : > { %3485 = vmatpush3.bf16.msra.mxu1 %v3703_v38  ;;  %3464 = vmatprep.subr.bf16.mxu0 %v3704_v39  ;;  %v3753_v38 = vld [vmem:[%s4504_s14 + $0x308] sm:$0xff]  }
 0x113   : > { %3486 = vmatprep.subr.bf16.mxu1 %v3706_v42  ;;  %v3754_v39 = vld [vmem:[%s4504_s14 + $0x3c8] sm:$0xff]   ;;  %v3756_v42 = vld [vmem:[%s4504_s14 + $0x350] sm:$0xff]  }
 0x115   : > { %3465 = vmatpush3.bf16.msra.mxu0 %v3705_v41  ;;  %v3755_v41 = vld [vmem:[%s4504_s14 + $0x388] sm:$0xff]  }
 0x116   : > { %3487 = vmatpush3.bf16.msra.mxu1 %v3707_v43  ;;  %3466 = vmatprep.subr.bf16.mxu0 %v3708_v45  ;;  %v3757_v43 = vld [vmem:[%s4504_s14 + $0x310] sm:$0xff]  }
 0x117   : > { %3488 = vmatprep.subr.bf16.mxu1 %v3710_v47  ;;  %v3759_v45 = vld [vmem:[%s4504_s14 + $0x390] sm:$0xff]   ;;  %v3761_v47 = vld [vmem:[%s4504_s14 + $0x318] sm:$0xff]  }
 0x119   : > { %3467 = vmatpush3.bf16.msra.mxu0 %v3709_v46  ;;  %v3760_v46 = vld [vmem:[%s4504_s14 + $0x358] sm:$0xff]  }
 0x11a   : > { %3489 = vmatpush3.bf16.msra.mxu1 %v3711_v48  ;;  %3468 = vmatprep.subr.bf16.mxu0 %v3712_v50  ;;  %v3762_v48 = vld [vmem:[%s4504_s14 + $0x3d8] sm:$0xff]   ;;  %v3764_v50 = vld [vmem:[%s4504_s14 + $0x360] sm:$0xff]  }
 0x11b   : > { %3490 = vmatprep.subr.bf16.mxu1 %v3714_v53  ;;  %v3767_v53 = vld [vmem:[%s4504_s14 + $0x3a0] sm:$0xff]  }
 0x11d   : > { %3469 = vmatpush3.bf16.msra.mxu0 %v3713_v51  ;;  %v3765_v51 = vld [vmem:[%s4504_s14 + $0x320] sm:$0xff]  }
 0x11e   : > { %3491 = vmatpush3.bf16.msra.mxu1 %v3715_v54  ;;  %3498 = vmatprep.subr.bf16.mxu0 %v3716_v56  ;;  %v3768_v54 = vld [vmem:[%s4504_s14 + $0x368] sm:$0xff]  }
 0x11f   : > { %3520 = vmatprep.subr.bf16.mxu1 %v3718_v59  ;;  %v3770_v56 = vld [vmem:[%s4504_s14 + $0x3e8] sm:$0xff]   ;;  %v3773_v59 = vld [vmem:[%s4504_s14 + $0x330] sm:$0xff]  }
 0x120   : > { %2851 = vmatmul.mubr.bf16.vlgmr.msra.gmra.mrb[4].mxu0 %v1766_v52  ;;  %v3766_v52 = vld [vmem:[%s4504_s14 + $0x3e0] sm:$0xff]  }
 0x121   : > { %3499 = vmatpush3.bf16.msra.mxu0 %v3717_v57  ;;  %2891 = vmatmul.mubr.bf16.vlgmr.msra.gmra.mrb[4].mxu1 %v1782_v58  ;;  %v3771_v57 = vld [vmem:[%s4504_s14 + $0x3a8] sm:$0xff]   ;;  %v3772_v58 = vld [vmem:[%s4504_s14 + $0x370] sm:$0xff]  }
 0x122   : > { %2930 = vmatprep.mubr.bf16.mxu0 %v1822_v55  ;;  %3521 = vmatpush3.bf16.msra.mxu1 %v3719_v60  ;;  %v3769_v55 = vld [vmem:[%s4504_s14 + $0x328] sm:$0xff]   ;;  %v3774_v60 = vld [vmem:[%s4504_s14 + $0x3f0] sm:$0xff]  }
 0x123   : > { %3500 = vmatprep.subr.bf16.mxu0 %v3720_v62  ;;  %2970 = vmatprep.mubr.bf16.mxu1 %v1832_v61  ;;  %v3775_v61 = vld [vmem:[%s4504_s14 + $0x3b0] sm:$0xff]   ;;  %v3776_v62 = vld [vmem:[%s4504_s14 + $0x378] sm:$0xff]  }
 0x124   : > { %3522 = vmatprep.subr.bf16.mxu1 %v3722_v0  ;;  %v1815_v0 = vrot.slane %v4622_v19, %v4508_v40  ;;  %v3793_v19 = vld [vmem:[%s4504_s14 + $0x470] sm:$0xff]  }
 0x125   : > { %3501 = vmatpush3.bf16.msra.mxu0 %v3721_v63  ;;  %v3777_v63 = vld [vmem:[%s4504_s14 + $0x338] sm:$0xff]  }
 0x126   : > { %3523 = vmatpush3.bf16.msra.mxu1 %v3723_v1  ;;  %3502 = vmatprep.subr.bf16.mxu0 %v3724_v2  ;;  %v3778_v1 = vld [vmem:[%s4504_s14 + $0x3f8] sm:$0xff]  }
 0x127   : > { %3524 = vmatprep.subr.bf16.mxu1 %v3726_v4  ;;  %v3780_v2 = vld [vmem:[%s4504_s14 + $0x3b8] sm:$0xff]   ;;  %v3782_v4 = vld [vmem:[%s4504_s14 + $0x400] sm:$0xff]  }
 0x129   : > { %3503 = vmatpush3.bf16.msra.mxu0 %v3725_v3  ;;  %v3781_v3 = vld [vmem:[%s4504_s14 + $0x440] sm:$0xff]  }
 0x12a   : > { %3525 = vmatpush3.bf16.msra.mxu1 %v3727_v5  ;;  %3504 = vmatprep.subr.bf16.mxu0 %v3728_v6  ;;  %v1831_v5 = vcombine.high %v1815_v0, %v1815_v0  ;;  %v3783_v6 = vld [vmem:[%s4504_s14 + $0x448] sm:$0xff]  }
 0x12b   : > { %3526 = vmatprep.subr.bf16.mxu1 %v3730_v8  ;;  %v3785_v8 = vld [vmem:[%s4504_s14 + $0x450] sm:$0xff]  }
 0x12d   : > { %3505 = vmatpush3.bf16.msra.mxu0 %v3729_v7  ;;  %v3784_v7 = vld [vmem:[%s4504_s14 + $0x408] sm:$0xff]  }
 0x12e   : > { %3527 = vmatpush3.bf16.msra.mxu1 %v3731_v9  ;;  %3506 = vmatprep.subr.bf16.mxu0 %v3732_v10  ;;  %v3786_v9 = vld [vmem:[%s4504_s14 + $0x410] sm:$0xff]   ;;  %v3787_v10 = vld [vmem:[%s4504_s14 + $0x458] sm:$0xff]  }
 0x12f   : > { %3528 = vmatprep.subr.bf16.mxu1 %v3734_v12  ;;  %v3789_v12 = vld [vmem:[%s4504_s14 + $0x460] sm:$0xff]  }
 0x131   : > { %3507 = vmatpush3.bf16.msra.mxu0 %v3733_v11  ;;  %v3788_v11 = vld [vmem:[%s4504_s14 + $0x418] sm:$0xff]  }
 0x132   : > { %3529 = vmatpush3.bf16.msra.mxu1 %v3735_v13  ;;  %3508 = vmatprep.subr.bf16.mxu0 %v3736_v15  ;;  %v3790_v13 = vld [vmem:[%s4504_s14 + $0x420] sm:$0xff]   ;;  %v3791_v15 = vld [vmem:[%s4504_s14 + $0x468] sm:$0xff]  }
 0x133   : > { %3530 = vmatprep.subr.bf16.mxu1 %v3738_v17 }
 0x135   : > { %3509 = vmatpush3.bf16.msra.mxu0 %v3737_v16  ;;  %v1841_v16 = vcombine.high %v3260_v14, %v3260_v14 }
 0x136   : > { %3531 = vmatpush3.bf16.msra.mxu1 %v3739_v18  ;;  %3510 = vmatprep.subr.bf16.mxu0 %v3740_v20  ;;  %v3792_v18 = vld [vmem:[%s4504_s14 + $0x428] sm:$0xff]   ;;  %v3794_v20 = vld [vmem:[%s4504_s14 + $0x430] sm:$0xff]  }
 0x137   : > { %3532 = vmatprep.subr.bf16.mxu1 %v3742_v22  ;;  %v1855_v17 = vrot.slane %v1841_v16, %v4508_v40  ;;  %v3796_v22 = vld [vmem:[%s4504_s14 + $0x438] sm:$0xff]  }
 0x139   : > { %3511 = vmatpush3.bf16.msra.mxu0 %v3741_v21  ;;  %v3795_v21 = vld [vmem:[%s4504_s14 + $0x478] sm:$0xff]  }
 0x13a   : > { %3533 = vmatpush3.bf16.msra.mxu1 %v3743_v23  ;;  %3512 = vmatprep.subr.bf16.mxu0 %v3744_v25  ;;  %v1848_v23 = vrot.slane %v3260_v14, %v4508_v40  ;;  %v3406_v14 = vld [vmem:[%s1440_s7] ss:$0 sm:$0xff] }
 0x13b   : > { %3534 = vmatprep.subr.bf16.mxu1 %v3746_v28 }
 0x13d   : > { %3513 = vmatpush3.bf16.msra.mxu0 %v3745_v26 }
 0x13e   : > { %3535 = vmatpush3.bf16.msra.mxu1 %v3747_v29  ;;  %3542 = vmatprep.subr.bf16.mxu0 %v3748_v31 }
 0x13f   : > { %3564 = vmatprep.subr.bf16.mxu1 %v3750_v34 }
 0x140   : > { %2931 = vmatmul.mubr.bf16.vlgmr.msra.gmra.mrb[8].mxu0 %v1808_v27 }
 0x141   : > { %3543 = vmatpush3.bf16.msra.mxu0 %v3749_v32  ;;  %2971 = vmatmul.mubr.bf16.vlgmr.msra.gmra.mrb[8].mxu1 %v1830_v33 }
 0x142   : > { %3010 = vmatprep.mubr.bf16.mxu0 %v1829_v30  ;;  %3565 = vmatpush3.bf16.msra.mxu1 %v3751_v35 }
 0x143   : > { %3544 = vmatprep.subr.bf16.mxu0 %v3752_v37  ;;  %3050 = vmatprep.mubr.bf16.mxu1 %v1833_v36 }
 0x144   : > { %3566 = vmatprep.subr.bf16.mxu1 %v3754_v39 }
 0x145   : > { %3545 = vmatpush3.bf16.msra.mxu0 %v3753_v38 }
 0x146   : > { %3567 = vmatpush3.bf16.msra.mxu1 %v3755_v41  ;;  %3546 = vmatprep.subr.bf16.mxu0 %v3756_v42 }
 0x147   : > { %3568 = vmatprep.subr.bf16.mxu1 %v3758_v44 }
 0x149   : > { %3547 = vmatpush3.bf16.msra.mxu0 %v3757_v43 }
 0x14a   : > { %3569 = vmatpush3.bf16.msra.mxu1 %v3759_v45  ;;  %3548 = vmatprep.subr.bf16.mxu0 %v3760_v46 }
 0x14b   : > { %3570 = vmatprep.subr.bf16.mxu1 %v3762_v48 }
 0x14d   : > { %3549 = vmatpush3.bf16.msra.mxu0 %v3761_v47 }
 0x14e   : > { %3571 = vmatpush3.bf16.msra.mxu1 %v3763_v49  ;;  %3550 = vmatprep.subr.bf16.mxu0 %v3764_v50 }
 0x14f   : > { %3572 = vmatprep.subr.bf16.mxu1 %v3766_v52 }
 0x151   : > { %3551 = vmatpush3.bf16.msra.mxu0 %v3765_v51 }
 0x152   : > { %3573 = vmatpush3.bf16.msra.mxu1 %v3767_v53  ;;  %3552 = vmatprep.subr.bf16.mxu0 %v3768_v54 }
 0x153   : > { %3574 = vmatprep.subr.bf16.mxu1 %v3770_v56 }
 0x155   : > { %3553 = vmatpush3.bf16.msra.mxu0 %v3769_v55 }
 0x156   : > { %3575 = vmatpush3.bf16.msra.mxu1 %v3771_v57  ;;  %3554 = vmatprep.subr.bf16.mxu0 %v3772_v58 }
 0x157   : > { %3576 = vmatprep.subr.bf16.mxu1 %v3774_v60 }
 0x159   : > { %3555 = vmatpush3.bf16.msra.mxu0 %v3773_v59 }
 0x15a   : > { %3577 = vmatpush3.bf16.msra.mxu1 %v3775_v61  ;;  %3556 = vmatprep.subr.bf16.mxu0 %v3776_v62 }
 0x15b   : > { %3578 = vmatprep.subr.bf16.mxu1 %v3778_v1 }
 0x15d   : > { %3557 = vmatpush3.bf16.msra.mxu0 %v3777_v63 }
 0x15e   : > { %3579 = vmatpush3.bf16.msra.mxu1 %v3780_v2  ;;  %3586 = vmatprep.subr.bf16.mxu0 %v3781_v3 }
 0x160   : > { %3011 = vmatmul.mubr.bf16.vlgmr.msra.gmra.mrb[12].mxu0 %v1815_v0 }
 0x161   : > { %3587 = vmatpush3.bf16.msra.mxu0 %v3782_v4  ;;  %3051 = vmatmul.mubr.bf16.vlgmr.msra.gmra.mrb[12].mxu1 %v1831_v5 }
 0x162   : > { %3588 = vmatprep.subr.bf16.mxu0 %v3783_v6  ;;  %3090 = vmatprep.mubr.bf16.mxu0 %v1855_v17 }
 0x165   : > { %3589 = vmatpush3.bf16.msra.mxu0 %v3784_v7 }
 0x166   : > { %3590 = vmatprep.subr.bf16.mxu0 %v3785_v8 }
 0x169   : > { %3591 = vmatpush3.bf16.msra.mxu0 %v3786_v9 }
 0x16a   : > { %3592 = vmatprep.subr.bf16.mxu0 %v3787_v10 }
 0x16d   : > { %3593 = vmatpush3.bf16.msra.mxu0 %v3788_v11  ;;  %v3405_v11 = vld [vmem:[%s1437_s29] ss:$0 sm:$0xff] }
 0x16e   : > { %3594 = vmatprep.subr.bf16.mxu0 %v3789_v12 }
 0x171   : > { %3595 = vmatpush3.bf16.msra.mxu0 %v3790_v13 }
 0x172   : > { %3596 = vmatprep.subr.bf16.mxu0 %v3791_v15 }
 0x175   : > { %3597 = vmatpush3.bf16.msra.mxu0 %v3792_v18 }
 0x176   : > { %3598 = vmatprep.subr.bf16.mxu0 %v3793_v19 }
 0x179   : > { %3599 = vmatpush3.bf16.msra.mxu0 %v3794_v20 }
 0x17a   : > { %3600 = vmatprep.subr.bf16.mxu0 %v3795_v21 }
 0x17d   : > { %3601 = vmatpush3.bf16.msra.mxu0 %v3796_v22 }
 0x180   : > { %3091 = vmatmul.mubr.bf16.vlgmr.msra.gmra.mrb[16].mxu0 %v1848_v23 }
 0x1d3   : > { %v3426_v24 = vpop.f32.mrb[0].mxu0 }
 0x1d4   : > { %v3448_v25 = vpop.f32.mrb[0].mxu1  ;;  %v3427_v26 = vpop.f32.mrb[1].mxu0 }
 0x1d5   : > { %v3428_v27 = vadd.f32 %v3427_v26, %v3426_v24  ;;  %v3449_v28 = vpop.f32.mrb[1].mxu1  ;;  %v3429_v29 = vpop.f32.mrb[2].mxu0 }
 0x1d6   : > { %v3450_v30 = vadd.f32 %v3449_v28, %v3448_v25  ;;  %v3430_v31 = vpop.f32.mrb[3].mxu0  ;;  %v3451_v32 = vpop.f32.mrb[2].mxu1 }
 0x1d7   : > { %v3452_v33 = vpop.f32.mrb[3].mxu1 }
 0x1d8   : > { %v2813_v34 = vadd.f32 %v3450_v30, %v3428_v27 }
 0x1f3   : > { %v3470_v35 = vpop.f32.mrb[4].mxu0 }
 0x1f4   : > { %v3471_v36 = vpop.f32.mrb[5].mxu0  ;;  %v3492_v39 = vpop.f32.mrb[4].mxu1 }
 0x1f5   : > { %v3472_v37 = vadd.f32 %v3471_v36, %v3470_v35  ;;  %v3473_v38 = vpop.f32.mrb[6].mxu0  ;;  %v3493_v40 = vpop.f32.mrb[5].mxu1 }
 0x1f6   : > { %v3474_v41 = vpop.f32.mrb[7].mxu0  ;;  %v3494_v43 = vadd.f32 %v3493_v40, %v3492_v39  ;;  %v3495_v44 = vpop.f32.mrb[6].mxu1 }
 0x1f7   : > { %v2853_v42 = vadd.f32 %v3472_v37, %v2813_v34  ;;  %v3496_v45 = vpop.f32.mrb[7].mxu1 }
 0x1f9   : > { %v2893_v46 = vadd.f32 %v3494_v43, %v2853_v42 }
 0x213   : > { %v3514_v47 = vpop.f32.mrb[8].mxu0 }
 0x214   : > { %v3515_v48 = vpop.f32.mrb[9].mxu0  ;;  %v3536_v51 = vpop.f32.mrb[8].mxu1 }
 0x215   : > { %v3516_v49 = vadd.f32 %v3515_v48, %v3514_v47  ;;  %v3517_v50 = vpop.f32.mrb[10].mxu0  ;;  %v3537_v53 = vpop.f32.mrb[9].mxu1 }
 0x216   : > { %v3518_v52 = vpop.f32.mrb[11].mxu0  ;;  %v3538_v55 = vadd.f32 %v3537_v53, %v3536_v51  ;;  %v3539_v56 = vpop.f32.mrb[10].mxu1 }
 0x217   : > { %v2933_v54 = vadd.f32 %v3516_v49, %v2893_v46  ;;  %v3540_v57 = vpop.f32.mrb[11].mxu1 }
 0x219   : > { %v2973_v58 = vadd.f32 %v3538_v55, %v2933_v54 }
 0x233   : > { %v3558_v59 = vpop.f32.mrb[12].mxu0 }
 0x234   : > { %v3559_v60 = vpop.f32.mrb[13].mxu0  ;;  %v3580_v63 = vpop.f32.mrb[12].mxu1 }
 0x235   : > { %v3560_v61 = vadd.f32 %v3559_v60, %v3558_v59  ;;  %v3561_v62 = vpop.f32.mrb[14].mxu0  ;;  %v3581_v1 = vpop.f32.mrb[13].mxu1 }
 0x236   : > { %v3562_v0 = vpop.f32.mrb[15].mxu0  ;;  %v3582_v3 = vadd.f32 %v3581_v1, %v3580_v63  ;;  %v3583_v4 = vpop.f32.mrb[14].mxu1 }
 0x237   : > { %v3013_v2 = vadd.f32 %v3560_v61, %v2973_v58  ;;  %v3584_v5 = vpop.f32.mrb[15].mxu1 }
 0x239   : > { %v3053_v6 = vadd.f32 %v3582_v3, %v3013_v2 }
 0x253   : > { %v3602_v7 = vpop.f32.mrb[16].mxu0 }
 0x254   : > { %v3603_v8 = vpop.f32.mrb[17].mxu0 }
 0x255   : > { %v3604_v9 = vadd.f32 %v3603_v8, %v3602_v7  ;;  %v3605_v10 = vpop.f32.mrb[18].mxu0 }
 0x256   : > { %v3606_v12 = vpop.f32.mrb[19].mxu0 }
 0x257   : > { %v3093_v13 = vadd.f32 %v3604_v9, %v3053_v6 }
 0x259   : > { %v3105_v15 = vmul.f32 %v3405_v11, %v3093_v13 }
 0x25b   : > { %v3113_v16 = vadd.f32 %v3406_v14, %v3105_v15  ;;  %3122 = sbr.rel (!%p3903_p6) target bundleno = 618 (0x26a), region = 81 }
 0x25d   : > { %v3114_v17 = vmax.f32 %v3113_v16, 0.0 }
 0x25f   : > { %v3115_v18 = vpack.c.bf16 %v3114_v17, %v3114_v17 }
 0x261   : > { %3116 = vst [vmem:[%s1430_s8] sm:$0x1] %v3115_v18 }
 0x268   : > { %v3141_v19 = vld [vmem:[%s1430_s8] sm:$0x1] }
 0x269   : > { %3407 = vst [vmem:[%s3192_s12 + $0x10] sm:$0x1] %v3141_v19 }
 0x26a PF: > { %s16_s21 = sadd.s32 1, %s3835_s21   ;;  %s4730_s18 = smov %s3823_s19 }
 0x26b   : > { %p13_p12 = scmp.ge.s32.totalorder %s16_s21, 6   ;;  %s4731_s19 = smov %s3908_s27 }
 0x26c   : > { %s4732_s0 = smov %s3831_s20  ;;  %s4733_s20 = smov %s4735_s22 }
 0x26d   :  { %15 = sbr.rel (!%p13_p12) target bundleno = 3 (0x3), region = 156 }

// kernel: resnet_forward.17
= control target key start
LH: loop header
LB: loop body
LE: loop exit
PB: predicated region body
PF: predicated region fallthrough
CT: control target
= control target key end

     0   :  { %s10143_s27 = smov 0   ;;  %s10145_s28 = smov 0   ;;  %s11857_s0 = inlined_call_operand.vmem [shape: bf16[2,4608], index: 0, kind: input, shape index: {}]   ;;  %s11858_s1 = inlined_call_operand.vmem [shape: bf16[4608,512], index: 1, kind: input, shape index: {}]   ;;  %s11859_s2 = inlined_call_operand.vmem [shape: f32[1,512], index: 2, kind: input, shape index: {}]   ;;  %s11860_s3 = inlined_call_operand.vmem [shape: f32[1,512], index: 3, kind: input, shape index: {}]   ;;  %s11861_s4 = inlined_call_operand.vmem [shape: bf16[2,256], index: 4, kind: input, shape index: {}]   ;;  %s11862_s5 = inlined_call_operand.vmem [shape: bf16[256,512], index: 5, kind: input, shape index: {}]   ;;  %s11863_s6 = inlined_call_operand.vmem [shape: f32[1,512], index: 6, kind: input, shape index: {}]   ;;  %s11864_s7 = inlined_call_operand.vmem [shape: f32[1,512], index: 7, kind: input, shape index: {}]   ;;  %s11865_s8 = inlined_call_operand.vmem [shape: bf16[2,512], index: 8, kind: output, shape index: {}]  }
   0x1   :  { %s10147_s29 = smov 0   ;;  %s10149_s30 = smov 0  }
   0x2   :  { %s10151_s9 = smov 0  }
   0x3 LB: > { %s27_s10 = sadd.s32 1, %s10091_s30  ;;  %p70_p1 = scmp.ne.s32.totalorder %s10083_s28, %s10079_s27  ;;  %s10095_s9 = sphi %s10151_s9, %s18_s9   ;;  %s10091_s30 = sphi %s10149_s30, %s11870_s30   ;;  %s10087_s29 = sphi %s10147_s29, %s11869_s29   ;;  %s10083_s28 = sphi %s10145_s28, %s11868_s28   ;;  %s10079_s27 = sphi %s10143_s27, %s11867_s27  }
   0x4   : > { %p28_p0 = scmp.ge.s32.totalorder %s27_s10, 4  ;;  %p71_p2 = scmp.eq.s32.totalorder %s10095_s9, 0 }
   0x5   : > { %s63_s13 = sadd.s32 1, %s10083_s28  ;;  %p8970_p5 = scmp.ge.s32.totalorder %s10095_s9, 4 }
   0x6   : > { %s11872_s10 = smov (%p28_p0, %s27_s10), 0  ;;  %p10174_p3 = por %p71_p2, %p70_p1 }
   0x7   : > { %s60_s12 = ssub.s32 %s10091_s30, %s11872_s10  ;;  %294 = sbr.rel (%p8970_p5) target bundleno = 427 (0x1ab), region = 24 }
   0x8   : > { %p61_p4 = scmp.eq.s32.totalorder %s60_s12, 0 }
   0xa   : > { %s10182_s14 = scalar_select %p61_p4, %s10083_s28, %s63_s13  }
   0xe   : > { %297 = sbr.rel (!%p10174_p3) target bundleno = 402 (0x192), region = 28  ;;  %s299_s15 = sand.u32 (%p10174_p3), 1, %s10083_s28  }
   0xf   : > { %s8971_s16 = sshll.u32 (%p10174_p3), %s10091_s30, 2  ;;  %s9706_s17 = smul.u32 (%p10174_p3), 2304, %s299_s15 }
  0x10   : > { %s10192_s20 = scalar_lea.vmem (%p10174_p3), %s11858_s1, %s8971_s16 }
  0x11   : > { %v319_v0 = vld [vmem:[%s10192_s20] sm:$0xf] (%p10174_p3)  ;;  %v321_v1 = vld [vmem:[%s10192_s20 + $0x10] sm:$0xf] (%p10174_p3)  ;;  %s10199_s21 = scalar_lea.vmem (%p10174_p3), [#allocation2], %s9706_s17 }
  0x12   : > { %v323_v2 = vld [vmem:[%s10192_s20 + $0x20] sm:$0xf] (%p10174_p3)  ;;  %v325_v3 = vld [vmem:[%s10192_s20 + $0x30] sm:$0xf] (%p10174_p3)  ;;  %320 = vst [vmem:[%s10199_s21] sm:$0xf] (%p10174_p3), %v319_v0 }
  0x13   : > { %v327_v4 = vld [vmem:[%s10192_s20 + $0x40] sm:$0xf] (%p10174_p3)  ;;  %322 = vst [vmem:[%s10199_s21 + $0x4] sm:$0xf] (%p10174_p3), %v321_v1  ;;  %324 = vst [vmem:[%s10199_s21 + $0x8] sm:$0xf] (%p10174_p3), %v323_v2 }
  0x14   : > { %326 = vst [vmem:[%s10199_s21 + $0xc] sm:$0xf] (%p10174_p3), %v325_v3  ;;  %328 = vst [vmem:[%s10199_s21 + $0x10] sm:$0xf] (%p10174_p3), %v327_v4  ;;  %v329_v5 = vld [vmem:[%s10192_s20 + $0x50] sm:$0xf] (%p10174_p3) }
  0x15   : > { %v331_v6 = vld [vmem:[%s10192_s20 + $0x60] sm:$0xf]  ;;  %v333_v7 = vld [vmem:[%s10192_s20 + $0x70] sm:$0xf]  ;;  %330 = vst [vmem:[%s10199_s21 + $0x14] sm:$0xf] %v329_v5 }
  0x16   : > { %332 = vst [vmem:[%s10199_s21 + $0x18] sm:$0xf] %v331_v6  ;;  %334 = vst [vmem:[%s10199_s21 + $0x1c] sm:$0xf] %v333_v7  ;;  %v335_v8 = vld [vmem:[%s10192_s20 + $0x80] sm:$0xf] }
  0x17   : > { %v337_v9 = vld [vmem:[%s10192_s20 + $0x90] sm:$0xf]  ;;  %v339_v10 = vld [vmem:[%s10192_s20 + $0xa0] sm:$0xf]  ;;  %336 = vst [vmem:[%s10199_s21 + $0x20] sm:$0xf] %v335_v8 }
  0x18   : > { %338 = vst [vmem:[%s10199_s21 + $0x24] sm:$0xf] %v337_v9  ;;  %340 = vst [vmem:[%s10199_s21 + $0x28] sm:$0xf] %v339_v10  ;;  %v341_v11 = vld [vmem:[%s10192_s20 + $0xb0] sm:$0xf] }
  0x19   : > { %v343_v12 = vld [vmem:[%s10192_s20 + $0xc0] sm:$0xf]  ;;  %v345_v13 = vld [vmem:[%s10192_s20 + $0xd0] sm:$0xf]  ;;  %342 = vst [vmem:[%s10199_s21 + $0x2c] sm:$0xf] %v341_v11 }
  0x1a   : > { %344 = vst [vmem:[%s10199_s21 + $0x30] sm:$0xf] %v343_v12  ;;  %346 = vst [vmem:[%s10199_s21 + $0x34] sm:$0xf] %v345_v13  ;;  %v347_v14 = vld [vmem:[%s10192_s20 + $0xe0] sm:$0xf] }
  0x1b   : > { %v349_v15 = vld [vmem:[%s10192_s20 + $0xf0] sm:$0xf]  ;;  %v351_v16 = vld [vmem:[%s10192_s20 + $0x100] sm:$0xf]  ;;  %348 = vst [vmem:[%s10199_s21 + $0x38] sm:$0xf] %v347_v14 }
  0x1c   : > { %350 = vst [vmem:[%s10199_s21 + $0x3c] sm:$0xf] %v349_v15  ;;  %352 = vst [vmem:[%s10199_s21 + $0x40] sm:$0xf] %v351_v16  ;;  %v353_v17 = vld [vmem:[%s10192_s20 + $0x110] sm:$0xf] }
  0x1d   : > { %v355_v18 = vld [vmem:[%s10192_s20 + $0x120] sm:$0xf]  ;;  %v357_v19 = vld [vmem:[%s10192_s20 + $0x130] sm:$0xf]  ;;  %354 = vst [vmem:[%s10199_s21 + $0x44] sm:$0xf] %v353_v17 }
  0x1e   : > { %356 = vst [vmem:[%s10199_s21 + $0x48] sm:$0xf] %v355_v18  ;;  %358 = vst [vmem:[%s10199_s21 + $0x4c] sm:$0xf] %v357_v19  ;;  %v359_v20 = vld [vmem:[%s10192_s20 + $0x140] sm:$0xf] }
  0x1f   : > { %v361_v21 = vld [vmem:[%s10192_s20 + $0x150] sm:$0xf]  ;;  %v363_v22 = vld [vmem:[%s10192_s20 + $0x160] sm:$0xf]  ;;  %360 = vst [vmem:[%s10199_s21 + $0x50] sm:$0xf] %v359_v20 }
  0x20   : > { %362 = vst [vmem:[%s10199_s21 + $0x54] sm:$0xf] %v361_v21  ;;  %364 = vst [vmem:[%s10199_s21 + $0x58] sm:$0xf] %v363_v22  ;;  %v365_v23 = vld [vmem:[%s10192_s20 + $0x170] sm:$0xf] }
  0x21   : > { %v367_v24 = vld [vmem:[%s10192_s20 + $0x180] sm:$0xf]  ;;  %v369_v25 = vld [vmem:[%s10192_s20 + $0x190] sm:$0xf]  ;;  %366 = vst [vmem:[%s10199_s21 + $0x5c] sm:$0xf] %v365_v23 }
  0x22   : > { %368 = vst [vmem:[%s10199_s21 + $0x60] sm:$0xf] %v367_v24  ;;  %370 = vst [vmem:[%s10199_s21 + $0x64] sm:$0xf] %v369_v25  ;;  %v371_v26 = vld [vmem:[%s10192_s20 + $0x1a0] sm:$0xf] }
  0x23   : > { %v373_v27 = vld [vmem:[%s10192_s20 + $0x1b0] sm:$0xf]  ;;  %v375_v28 = vld [vmem:[%s10192_s20 + $0x1c0] sm:$0xf]  ;;  %372 = vst [vmem:[%s10199_s21 + $0x68] sm:$0xf] %v371_v26 }
  0x24   : > { %374 = vst [vmem:[%s10199_s21 + $0x6c] sm:$0xf] %v373_v27  ;;  %376 = vst [vmem:[%s10199_s21 + $0x70] sm:$0xf] %v375_v28  ;;  %v377_v29 = vld [vmem:[%s10192_s20 + $0x1d0] sm:$0xf] }
  0x25   : > { %v379_v30 = vld [vmem:[%s10192_s20 + $0x1e0] sm:$0xf]  ;;  %v381_v31 = vld [vmem:[%s10192_s20 + $0x1f0] sm:$0xf]  ;;  %378 = vst [vmem:[%s10199_s21 + $0x74] sm:$0xf] %v377_v29 }
  0x26   : > { %380 = vst [vmem:[%s10199_s21 + $0x78] sm:$0xf] %v379_v30  ;;  %382 = vst [vmem:[%s10199_s21 + $0x7c] sm:$0xf] %v381_v31  ;;  %v383_v32 = vld [vmem:[%s10192_s20 + $0x200] sm:$0xf] }
  0x27   : > { %v385_v33 = vld [vmem:[%s10192_s20 + $0x210] sm:$0xf]  ;;  %v387_v34 = vld [vmem:[%s10192_s20 + $0x220] sm:$0xf]  ;;  %384 = vst [vmem:[%s10199_s21 + $0x80] sm:$0xf] %v383_v32 }
  0x28   : > { %386 = vst [vmem:[%s10199_s21 + $0x84] sm:$0xf] %v385_v33  ;;  %388 = vst [vmem:[%s10199_s21 + $0x88] sm:$0xf] %v387_v34  ;;  %v389_v35 = vld [vmem:[%s10192_s20 + $0x230] sm:$0xf] }
  0x29   : > { %v391_v36 = vld [vmem:[%s10192_s20 + $0x240] sm:$0xf]  ;;  %v393_v37 = vld [vmem:[%s10192_s20 + $0x250] sm:$0xf]  ;;  %390 = vst [vmem:[%s10199_s21 + $0x8c] sm:$0xf] %v389_v35 }
  0x2a   : > { %392 = vst [vmem:[%s10199_s21 + $0x90] sm:$0xf] %v391_v36  ;;  %394 = vst [vmem:[%s10199_s21 + $0x94] sm:$0xf] %v393_v37  ;;  %v395_v38 = vld [vmem:[%s10192_s20 + $0x260] sm:$0xf] }
  0x2b   : > { %v397_v39 = vld [vmem:[%s10192_s20 + $0x270] sm:$0xf]  ;;  %v399_v40 = vld [vmem:[%s10192_s20 + $0x280] sm:$0xf]  ;;  %396 = vst [vmem:[%s10199_s21 + $0x98] sm:$0xf] %v395_v38 }
  0x2c   : > { %398 = vst [vmem:[%s10199_s21 + $0x9c] sm:$0xf] %v397_v39  ;;  %400 = vst [vmem:[%s10199_s21 + $0xa0] sm:$0xf] %v399_v40  ;;  %v401_v41 = vld [vmem:[%s10192_s20 + $0x290] sm:$0xf] }
  0x2d   : > { %v403_v42 = vld [vmem:[%s10192_s20 + $0x2a0] sm:$0xf]  ;;  %v405_v43 = vld [vmem:[%s10192_s20 + $0x2b0] sm:$0xf]  ;;  %402 = vst [vmem:[%s10199_s21 + $0xa4] sm:$0xf] %v401_v41 }
  0x2e   : > { %404 = vst [vmem:[%s10199_s21 + $0xa8] sm:$0xf] %v403_v42  ;;  %406 = vst [vmem:[%s10199_s21 + $0xac] sm:$0xf] %v405_v43  ;;  %v407_v44 = vld [vmem:[%s10192_s20 + $0x2c0] sm:$0xf] }
  0x2f   : > { %v409_v45 = vld [vmem:[%s10192_s20 + $0x2d0] sm:$0xf]  ;;  %v411_v46 = vld [vmem:[%s10192_s20 + $0x2e0] sm:$0xf]  ;;  %408 = vst [vmem:[%s10199_s21 + $0xb0] sm:$0xf] %v407_v44 }
  0x30   : > { %410 = vst [vmem:[%s10199_s21 + $0xb4] sm:$0xf] %v409_v45  ;;  %412 = vst [vmem:[%s10199_s21 + $0xb8] sm:$0xf] %v411_v46  ;;  %v413_v47 = vld [vmem:[%s10192_s20 + $0x2f0] sm:$0xf] }
  0x31   : > { %v415_v48 = vld [vmem:[%s10192_s20 + $0x300] sm:$0xf]  ;;  %v417_v49 = vld [vmem:[%s10192_s20 + $0x310] sm:$0xf]  ;;  %414 = vst [vmem:[%s10199_s21 + $0xbc] sm:$0xf] %v413_v47 }
  0x32   : > { %416 = vst [vmem:[%s10199_s21 + $0xc0] sm:$0xf] %v415_v48  ;;  %418 = vst [vmem:[%s10199_s21 + $0xc4] sm:$0xf] %v417_v49  ;;  %v419_v50 = vld [vmem:[%s10192_s20 + $0x320] sm:$0xf] }
  0x33   : > { %v421_v51 = vld [vmem:[%s10192_s20 + $0x330] sm:$0xf]  ;;  %v423_v52 = vld [vmem:[%s10192_s20 + $0x340] sm:$0xf]  ;;  %420 = vst [vmem:[%s10199_s21 + $0xc8] sm:$0xf] %v419_v50 }
  0x34   : > { %422 = vst [vmem:[%s10199_s21 + $0xcc] sm:$0xf] %v421_v51  ;;  %424 = vst [vmem:[%s10199_s21 + $0xd0] sm:$0xf] %v423_v52  ;;  %v425_v53 = vld [vmem:[%s10192_s20 + $0x350] sm:$0xf] }
  0x35   : > { %v427_v54 = vld [vmem:[%s10192_s20 + $0x360] sm:$0xf]  ;;  %v429_v55 = vld [vmem:[%s10192_s20 + $0x370] sm:$0xf]  ;;  %426 = vst [vmem:[%s10199_s21 + $0xd4] sm:$0xf] %v425_v53 }
  0x36   : > { %428 = vst [vmem:[%s10199_s21 + $0xd8] sm:$0xf] %v427_v54  ;;  %430 = vst [vmem:[%s10199_s21 + $0xdc] sm:$0xf] %v429_v55  ;;  %v431_v56 = vld [vmem:[%s10192_s20 + $0x380] sm:$0xf] }
  0x37   : > { %v433_v57 = vld [vmem:[%s10192_s20 + $0x390] sm:$0xf]  ;;  %v435_v58 = vld [vmem:[%s10192_s20 + $0x3a0] sm:$0xf]  ;;  %432 = vst [vmem:[%s10199_s21 + $0xe0] sm:$0xf] %v431_v56 }
  0x38   : > { %434 = vst [vmem:[%s10199_s21 + $0xe4] sm:$0xf] %v433_v57  ;;  %436 = vst [vmem:[%s10199_s21 + $0xe8] sm:$0xf] %v435_v58  ;;  %v437_v59 = vld [vmem:[%s10192_s20 + $0x3b0] sm:$0xf] }
  0x39   : > { %v439_v60 = vld [vmem:[%s10192_s20 + $0x3c0] sm:$0xf]  ;;  %v441_v61 = vld [vmem:[%s10192_s20 + $0x3d0] sm:$0xf]  ;;  %438 = vst [vmem:[%s10199_s21 + $0xec] sm:$0xf] %v437_v59 }
  0x3a   : > { %440 = vst [vmem:[%s10199_s21 + $0xf0] sm:$0xf] %v439_v60  ;;  %442 = vst [vmem:[%s10199_s21 + $0xf4] sm:$0xf] %v441_v61  ;;  %v443_v62 = vld [vmem:[%s10192_s20 + $0x3e0] sm:$0xf] }
  0x3b   : > { %v445_v63 = vld [vmem:[%s10192_s20 + $0x3f0] sm:$0xf]  ;;  %v447_v0 = vld [vmem:[%s10192_s20 + $0x400] sm:$0xf]  ;;  %444 = vst [vmem:[%s10199_s21 + $0xf8] sm:$0xf] %v443_v62 }
  0x3c   : > { %446 = vst [vmem:[%s10199_s21 + $0xfc] sm:$0xf] %v445_v63  ;;  %448 = vst [vmem:[%s10199_s21 + $0x100] sm:$0xf] %v447_v0  ;;  %v449_v1 = vld [vmem:[%s10192_s20 + $0x410] sm:$0xf] }
  0x3d   : > { %v451_v2 = vld [vmem:[%s10192_s20 + $0x420] sm:$0xf]  ;;  %v453_v3 = vld [vmem:[%s10192_s20 + $0x430] sm:$0xf]  ;;  %450 = vst [vmem:[%s10199_s21 + $0x104] sm:$0xf] %v449_v1 }
  0x3e   : > { %452 = vst [vmem:[%s10199_s21 + $0x108] sm:$0xf] %v451_v2  ;;  %454 = vst [vmem:[%s10199_s21 + $0x10c] sm:$0xf] %v453_v3  ;;  %v455_v4 = vld [vmem:[%s10192_s20 + $0x440] sm:$0xf] }
  0x3f   : > { %v457_v5 = vld [vmem:[%s10192_s20 + $0x450] sm:$0xf]  ;;  %v459_v6 = vld [vmem:[%s10192_s20 + $0x460] sm:$0xf]  ;;  %456 = vst [vmem:[%s10199_s21 + $0x110] sm:$0xf] %v455_v4 }
  0x40   : > { %458 = vst [vmem:[%s10199_s21 + $0x114] sm:$0xf] %v457_v5  ;;  %460 = vst [vmem:[%s10199_s21 + $0x118] sm:$0xf] %v459_v6  ;;  %v461_v7 = vld [vmem:[%s10192_s20 + $0x470] sm:$0xf] }
  0x41   : > { %v463_v8 = vld [vmem:[%s10192_s20 + $0x480] sm:$0xf]  ;;  %v465_v9 = vld [vmem:[%s10192_s20 + $0x490] sm:$0xf]  ;;  %462 = vst [vmem:[%s10199_s21 + $0x11c] sm:$0xf] %v461_v7 }
  0x42   : > { %464 = vst [vmem:[%s10199_s21 + $0x120] sm:$0xf] %v463_v8  ;;  %466 = vst [vmem:[%s10199_s21 + $0x124] sm:$0xf] %v465_v9  ;;  %v467_v10 = vld [vmem:[%s10192_s20 + $0x4a0] sm:$0xf] }
  0x43   : > { %v469_v11 = vld [vmem:[%s10192_s20 + $0x4b0] sm:$0xf]  ;;  %v471_v12 = vld [vmem:[%s10192_s20 + $0x4c0] sm:$0xf]  ;;  %468 = vst [vmem:[%s10199_s21 + $0x128] sm:$0xf] %v467_v10 }
  0x44   : > { %470 = vst [vmem:[%s10199_s21 + $0x12c] sm:$0xf] %v469_v11  ;;  %472 = vst [vmem:[%s10199_s21 + $0x130] sm:$0xf] %v471_v12  ;;  %v473_v13 = vld [vmem:[%s10192_s20 + $0x4d0] sm:$0xf] }
  0x45   : > { %v475_v14 = vld [vmem:[%s10192_s20 + $0x4e0] sm:$0xf]  ;;  %v477_v15 = vld [vmem:[%s10192_s20 + $0x4f0] sm:$0xf]  ;;  %474 = vst [vmem:[%s10199_s21 + $0x134] sm:$0xf] %v473_v13 }
  0x46   : > { %476 = vst [vmem:[%s10199_s21 + $0x138] sm:$0xf] %v475_v14  ;;  %478 = vst [vmem:[%s10199_s21 + $0x13c] sm:$0xf] %v477_v15  ;;  %v479_v16 = vld [vmem:[%s10192_s20 + $0x500] sm:$0xf] }
  0x47   : > { %v481_v17 = vld [vmem:[%s10192_s20 + $0x510] sm:$0xf]  ;;  %v483_v18 = vld [vmem:[%s10192_s20 + $0x520] sm:$0xf]  ;;  %480 = vst [vmem:[%s10199_s21 + $0x140] sm:$0xf] %v479_v16 }
  0x48   : > { %482 = vst [vmem:[%s10199_s21 + $0x144] sm:$0xf] %v481_v17  ;;  %484 = vst [vmem:[%s10199_s21 + $0x148] sm:$0xf] %v483_v18  ;;  %v485_v19 = vld [vmem:[%s10192_s20 + $0x530] sm:$0xf] }
  0x49   : > { %v487_v20 = vld [vmem:[%s10192_s20 + $0x540] sm:$0xf]  ;;  %v489_v21 = vld [vmem:[%s10192_s20 + $0x550] sm:$0xf]  ;;  %486 = vst [vmem:[%s10199_s21 + $0x14c] sm:$0xf] %v485_v19 }
  0x4a   : > { %488 = vst [vmem:[%s10199_s21 + $0x150] sm:$0xf] %v487_v20  ;;  %490 = vst [vmem:[%s10199_s21 + $0x154] sm:$0xf] %v489_v21  ;;  %v491_v22 = vld [vmem:[%s10192_s20 + $0x560] sm:$0xf] }
  0x4b   : > { %v493_v23 = vld [vmem:[%s10192_s20 + $0x570] sm:$0xf]  ;;  %v495_v24 = vld [vmem:[%s10192_s20 + $0x580] sm:$0xf]  ;;  %492 = vst [vmem:[%s10199_s21 + $0x158] sm:$0xf] %v491_v22 }
  0x4c   : > { %494 = vst [vmem:[%s10199_s21 + $0x15c] sm:$0xf] %v493_v23  ;;  %496 = vst [vmem:[%s10199_s21 + $0x160] sm:$0xf] %v495_v24  ;;  %v497_v25 = vld [vmem:[%s10192_s20 + $0x590] sm:$0xf] }
  0x4d   : > { %v499_v26 = vld [vmem:[%s10192_s20 + $0x5a0] sm:$0xf]  ;;  %v501_v27 = vld [vmem:[%s10192_s20 + $0x5b0] sm:$0xf]  ;;  %498 = vst [vmem:[%s10199_s21 + $0x164] sm:$0xf] %v497_v25 }
  0x4e   : > { %500 = vst [vmem:[%s10199_s21 + $0x168] sm:$0xf] %v499_v26  ;;  %502 = vst [vmem:[%s10199_s21 + $0x16c] sm:$0xf] %v501_v27  ;;  %v503_v28 = vld [vmem:[%s10192_s20 + $0x5c0] sm:$0xf] }
  0x4f   : > { %v505_v29 = vld [vmem:[%s10192_s20 + $0x5d0] sm:$0xf]  ;;  %v507_v30 = vld [vmem:[%s10192_s20 + $0x5e0] sm:$0xf]  ;;  %504 = vst [vmem:[%s10199_s21 + $0x170] sm:$0xf] %v503_v28 }
  0x50   : > { %506 = vst [vmem:[%s10199_s21 + $0x174] sm:$0xf] %v505_v29  ;;  %508 = vst [vmem:[%s10199_s21 + $0x178] sm:$0xf] %v507_v30  ;;  %v509_v31 = vld [vmem:[%s10192_s20 + $0x5f0] sm:$0xf] }
  0x51   : > { %v511_v32 = vld [vmem:[%s10192_s20 + $0x600] sm:$0xf]  ;;  %v513_v33 = vld [vmem:[%s10192_s20 + $0x610] sm:$0xf]  ;;  %510 = vst [vmem:[%s10199_s21 + $0x17c] sm:$0xf] %v509_v31 }
  0x52   : > { %512 = vst [vmem:[%s10199_s21 + $0x180] sm:$0xf] %v511_v32  ;;  %514 = vst [vmem:[%s10199_s21 + $0x184] sm:$0xf] %v513_v33  ;;  %v515_v34 = vld [vmem:[%s10192_s20 + $0x620] sm:$0xf] }
  0x53   : > { %v517_v35 = vld [vmem:[%s10192_s20 + $0x630] sm:$0xf]  ;;  %v519_v36 = vld [vmem:[%s10192_s20 + $0x640] sm:$0xf]  ;;  %516 = vst [vmem:[%s10199_s21 + $0x188] sm:$0xf] %v515_v34 }
  0x54   : > { %518 = vst [vmem:[%s10199_s21 + $0x18c] sm:$0xf] %v517_v35  ;;  %520 = vst [vmem:[%s10199_s21 + $0x190] sm:$0xf] %v519_v36  ;;  %v521_v37 = vld [vmem:[%s10192_s20 + $0x650] sm:$0xf] }
  0x55   : > { %v523_v38 = vld [vmem:[%s10192_s20 + $0x660] sm:$0xf]  ;;  %v525_v39 = vld [vmem:[%s10192_s20 + $0x670] sm:$0xf]  ;;  %522 = vst [vmem:[%s10199_s21 + $0x194] sm:$0xf] %v521_v37 }
  0x56   : > { %524 = vst [vmem:[%s10199_s21 + $0x198] sm:$0xf] %v523_v38  ;;  %526 = vst [vmem:[%s10199_s21 + $0x19c] sm:$0xf] %v525_v39  ;;  %v527_v40 = vld [vmem:[%s10192_s20 + $0x680] sm:$0xf] }
  0x57   : > { %v529_v41 = vld [vmem:[%s10192_s20 + $0x690] sm:$0xf]  ;;  %v531_v42 = vld [vmem:[%s10192_s20 + $0x6a0] sm:$0xf]  ;;  %528 = vst [vmem:[%s10199_s21 + $0x1a0] sm:$0xf] %v527_v40 }
  0x58   : > { %530 = vst [vmem:[%s10199_s21 + $0x1a4] sm:$0xf] %v529_v41  ;;  %532 = vst [vmem:[%s10199_s21 + $0x1a8] sm:$0xf] %v531_v42  ;;  %v533_v43 = vld [vmem:[%s10192_s20 + $0x6b0] sm:$0xf] }
  0x59   : > { %v535_v44 = vld [vmem:[%s10192_s20 + $0x6c0] sm:$0xf]  ;;  %v537_v45 = vld [vmem:[%s10192_s20 + $0x6d0] sm:$0xf]  ;;  %534 = vst [vmem:[%s10199_s21 + $0x1ac] sm:$0xf] %v533_v43 }
  0x5a   : > { %536 = vst [vmem:[%s10199_s21 + $0x1b0] sm:$0xf] %v535_v44  ;;  %538 = vst [vmem:[%s10199_s21 + $0x1b4] sm:$0xf] %v537_v45  ;;  %v539_v46 = vld [vmem:[%s10192_s20 + $0x6e0] sm:$0xf] }
  0x5b   : > { %v541_v47 = vld [vmem:[%s10192_s20 + $0x6f0] sm:$0xf]  ;;  %v543_v48 = vld [vmem:[%s10192_s20 + $0x700] sm:$0xf]  ;;  %540 = vst [vmem:[%s10199_s21 + $0x1b8] sm:$0xf] %v539_v46 }
  0x5c   : > { %542 = vst [vmem:[%s10199_s21 + $0x1bc] sm:$0xf] %v541_v47  ;;  %544 = vst [vmem:[%s10199_s21 + $0x1c0] sm:$0xf] %v543_v48  ;;  %v545_v49 = vld [vmem:[%s10192_s20 + $0x710] sm:$0xf] }
  0x5d   : > { %v547_v50 = vld [vmem:[%s10192_s20 + $0x720] sm:$0xf]  ;;  %v549_v51 = vld [vmem:[%s10192_s20 + $0x730] sm:$0xf]  ;;  %546 = vst [vmem:[%s10199_s21 + $0x1c4] sm:$0xf] %v545_v49 }
  0x5e   : > { %548 = vst [vmem:[%s10199_s21 + $0x1c8] sm:$0xf] %v547_v50  ;;  %550 = vst [vmem:[%s10199_s21 + $0x1cc] sm:$0xf] %v549_v51  ;;  %v551_v52 = vld [vmem:[%s10192_s20 + $0x740] sm:$0xf] }
  0x5f   : > { %v553_v53 = vld [vmem:[%s10192_s20 + $0x750] sm:$0xf]  ;;  %v555_v54 = vld [vmem:[%s10192_s20 + $0x760] sm:$0xf]  ;;  %552 = vst [vmem:[%s10199_s21 + $0x1d0] sm:$0xf] %v551_v52 }
  0x60   : > { %554 = vst [vmem:[%s10199_s21 + $0x1d4] sm:$0xf] %v553_v53  ;;  %556 = vst [vmem:[%s10199_s21 + $0x1d8] sm:$0xf] %v555_v54  ;;  %v557_v55 = vld [vmem:[%s10192_s20 + $0x770] sm:$0xf] }
  0x61   : > { %v559_v56 = vld [vmem:[%s10192_s20 + $0x780] sm:$0xf]  ;;  %v561_v57 = vld [vmem:[%s10192_s20 + $0x790] sm:$0xf]  ;;  %558 = vst [vmem:[%s10199_s21 + $0x1dc] sm:$0xf] %v557_v55 }
  0x62   : > { %560 = vst [vmem:[%s10199_s21 + $0x1e0] sm:$0xf] %v559_v56  ;;  %562 = vst [vmem:[%s10199_s21 + $0x1e4] sm:$0xf] %v561_v57  ;;  %v563_v58 = vld [vmem:[%s10192_s20 + $0x7a0] sm:$0xf] }
  0x63   : > { %v565_v59 = vld [vmem:[%s10192_s20 + $0x7b0] sm:$0xf]  ;;  %v567_v60 = vld [vmem:[%s10192_s20 + $0x7c0] sm:$0xf]  ;;  %564 = vst [vmem:[%s10199_s21 + $0x1e8] sm:$0xf] %v563_v58 }
  0x64   : > { %566 = vst [vmem:[%s10199_s21 + $0x1ec] sm:$0xf] %v565_v59  ;;  %568 = vst [vmem:[%s10199_s21 + $0x1f0] sm:$0xf] %v567_v60  ;;  %v569_v61 = vld [vmem:[%s10192_s20 + $0x7d0] sm:$0xf] }
  0x65   : > { %v571_v62 = vld [vmem:[%s10192_s20 + $0x7e0] sm:$0xf]  ;;  %v573_v63 = vld [vmem:[%s10192_s20 + $0x7f0] sm:$0xf]  ;;  %570 = vst [vmem:[%s10199_s21 + $0x1f4] sm:$0xf] %v569_v61 }
  0x66   : > { %572 = vst [vmem:[%s10199_s21 + $0x1f8] sm:$0xf] %v571_v62  ;;  %574 = vst [vmem:[%s10199_s21 + $0x1fc] sm:$0xf] %v573_v63  ;;  %v575_v0 = vld [vmem:[%s10192_s20 + $0x800] sm:$0xf] }
  0x67   : > { %v577_v1 = vld [vmem:[%s10192_s20 + $0x810] sm:$0xf]  ;;  %v579_v2 = vld [vmem:[%s10192_s20 + $0x820] sm:$0xf]  ;;  %576 = vst [vmem:[%s10199_s21 + $0x200] sm:$0xf] %v575_v0 }
  0x68   : > { %578 = vst [vmem:[%s10199_s21 + $0x204] sm:$0xf] %v577_v1  ;;  %580 = vst [vmem:[%s10199_s21 + $0x208] sm:$0xf] %v579_v2  ;;  %v581_v3 = vld [vmem:[%s10192_s20 + $0x830] sm:$0xf] }
  0x69   : > { %v583_v4 = vld [vmem:[%s10192_s20 + $0x840] sm:$0xf]  ;;  %v585_v5 = vld [vmem:[%s10192_s20 + $0x850] sm:$0xf]  ;;  %582 = vst [vmem:[%s10199_s21 + $0x20c] sm:$0xf] %v581_v3 }
  0x6a   : > { %584 = vst [vmem:[%s10199_s21 + $0x210] sm:$0xf] %v583_v4  ;;  %586 = vst [vmem:[%s10199_s21 + $0x214] sm:$0xf] %v585_v5  ;;  %v587_v6 = vld [vmem:[%s10192_s20 + $0x860] sm:$0xf] }
  0x6b   : > { %v589_v7 = vld [vmem:[%s10192_s20 + $0x870] sm:$0xf]  ;;  %v591_v8 = vld [vmem:[%s10192_s20 + $0x880] sm:$0xf]  ;;  %588 = vst [vmem:[%s10199_s21 + $0x218] sm:$0xf] %v587_v6 }
  0x6c   : > { %590 = vst [vmem:[%s10199_s21 + $0x21c] sm:$0xf] %v589_v7  ;;  %592 = vst [vmem:[%s10199_s21 + $0x220] sm:$0xf] %v591_v8  ;;  %v593_v9 = vld [vmem:[%s10192_s20 + $0x890] sm:$0xf] }
  0x6d   : > { %v595_v10 = vld [vmem:[%s10192_s20 + $0x8a0] sm:$0xf]  ;;  %v597_v11 = vld [vmem:[%s10192_s20 + $0x8b0] sm:$0xf]  ;;  %594 = vst [vmem:[%s10199_s21 + $0x224] sm:$0xf] %v593_v9 }
  0x6e   : > { %596 = vst [vmem:[%s10199_s21 + $0x228] sm:$0xf] %v595_v10  ;;  %598 = vst [vmem:[%s10199_s21 + $0x22c] sm:$0xf] %v597_v11  ;;  %v599_v12 = vld [vmem:[%s10192_s20 + $0x8c0] sm:$0xf] }
  0x6f   : > { %v601_v13 = vld [vmem:[%s10192_s20 + $0x8d0] sm:$0xf]  ;;  %v603_v14 = vld [vmem:[%s10192_s20 + $0x8e0] sm:$0xf]  ;;  %600 = vst [vmem:[%s10199_s21 + $0x230] sm:$0xf] %v599_v12 }
  0x70   : > { %602 = vst [vmem:[%s10199_s21 + $0x234] sm:$0xf] %v601_v13  ;;  %604 = vst [vmem:[%s10199_s21 + $0x238] sm:$0xf] %v603_v14  ;;  %v605_v15 = vld [vmem:[%s10192_s20 + $0x8f0] sm:$0xf] }
  0x71   : > { %v607_v16 = vld [vmem:[%s10192_s20 + $0x900] sm:$0xf]  ;;  %v609_v17 = vld [vmem:[%s10192_s20 + $0x910] sm:$0xf]  ;;  %606 = vst [vmem:[%s10199_s21 + $0x23c] sm:$0xf] %v605_v15 }
  0x72   : > { %608 = vst [vmem:[%s10199_s21 + $0x240] sm:$0xf] %v607_v16  ;;  %610 = vst [vmem:[%s10199_s21 + $0x244] sm:$0xf] %v609_v17  ;;  %v611_v18 = vld [vmem:[%s10192_s20 + $0x920] sm:$0xf] }
  0x73   : > { %v613_v19 = vld [vmem:[%s10192_s20 + $0x930] sm:$0xf]  ;;  %v615_v20 = vld [vmem:[%s10192_s20 + $0x940] sm:$0xf]  ;;  %612 = vst [vmem:[%s10199_s21 + $0x248] sm:$0xf] %v611_v18 }
  0x74   : > { %614 = vst [vmem:[%s10199_s21 + $0x24c] sm:$0xf] %v613_v19  ;;  %616 = vst [vmem:[%s10199_s21 + $0x250] sm:$0xf] %v615_v20  ;;  %v617_v21 = vld [vmem:[%s10192_s20 + $0x950] sm:$0xf] }
  0x75   : > { %v619_v22 = vld [vmem:[%s10192_s20 + $0x960] sm:$0xf]  ;;  %v621_v23 = vld [vmem:[%s10192_s20 + $0x970] sm:$0xf]  ;;  %618 = vst [vmem:[%s10199_s21 + $0x254] sm:$0xf] %v617_v21 }
  0x76   : > { %620 = vst [vmem:[%s10199_s21 + $0x258] sm:$0xf] %v619_v22  ;;  %622 = vst [vmem:[%s10199_s21 + $0x25c] sm:$0xf] %v621_v23  ;;  %v623_v24 = vld [vmem:[%s10192_s20 + $0x980] sm:$0xf] }
  0x77   : > { %v625_v25 = vld [vmem:[%s10192_s20 + $0x990] sm:$0xf]  ;;  %v627_v26 = vld [vmem:[%s10192_s20 + $0x9a0] sm:$0xf]  ;;  %624 = vst [vmem:[%s10199_s21 + $0x260] sm:$0xf] %v623_v24 }
  0x78   : > { %626 = vst [vmem:[%s10199_s21 + $0x264] sm:$0xf] %v625_v25  ;;  %628 = vst [vmem:[%s10199_s21 + $0x268] sm:$0xf] %v627_v26  ;;  %v629_v27 = vld [vmem:[%s10192_s20 + $0x9b0] sm:$0xf] }
  0x79   : > { %v631_v28 = vld [vmem:[%s10192_s20 + $0x9c0] sm:$0xf]  ;;  %v633_v29 = vld [vmem:[%s10192_s20 + $0x9d0] sm:$0xf]  ;;  %630 = vst [vmem:[%s10199_s21 + $0x26c] sm:$0xf] %v629_v27 }
  0x7a   : > { %632 = vst [vmem:[%s10199_s21 + $0x270] sm:$0xf] %v631_v28  ;;  %634 = vst [vmem:[%s10199_s21 + $0x274] sm:$0xf] %v633_v29  ;;  %v635_v30 = vld [vmem:[%s10192_s20 + $0x9e0] sm:$0xf] }
  0x7b   : > { %v637_v31 = vld [vmem:[%s10192_s20 + $0x9f0] sm:$0xf]  ;;  %v639_v32 = vld [vmem:[%s10192_s20 + $0xa00] sm:$0xf]  ;;  %636 = vst [vmem:[%s10199_s21 + $0x278] sm:$0xf] %v635_v30 }
  0x7c   : > { %638 = vst [vmem:[%s10199_s21 + $0x27c] sm:$0xf] %v637_v31  ;;  %640 = vst [vmem:[%s10199_s21 + $0x280] sm:$0xf] %v639_v32  ;;  %v641_v33 = vld [vmem:[%s10192_s20 + $0xa10] sm:$0xf] }
  0x7d   : > { %v643_v34 = vld [vmem:[%s10192_s20 + $0xa20] sm:$0xf]  ;;  %v645_v35 = vld [vmem:[%s10192_s20 + $0xa30] sm:$0xf]  ;;  %642 = vst [vmem:[%s10199_s21 + $0x284] sm:$0xf] %v641_v33 }
  0x7e   : > { %644 = vst [vmem:[%s10199_s21 + $0x288] sm:$0xf] %v643_v34  ;;  %646 = vst [vmem:[%s10199_s21 + $0x28c] sm:$0xf] %v645_v35  ;;  %v647_v36 = vld [vmem:[%s10192_s20 + $0xa40] sm:$0xf] }
  0x7f   : > { %v649_v37 = vld [vmem:[%s10192_s20 + $0xa50] sm:$0xf]  ;;  %v651_v38 = vld [vmem:[%s10192_s20 + $0xa60] sm:$0xf]  ;;  %648 = vst [vmem:[%s10199_s21 + $0x290] sm:$0xf] %v647_v36 }
  0x80   : > { %650 = vst [vmem:[%s10199_s21 + $0x294] sm:$0xf] %v649_v37  ;;  %652 = vst [vmem:[%s10199_s21 + $0x298] sm:$0xf] %v651_v38  ;;  %v653_v39 = vld [vmem:[%s10192_s20 + $0xa70] sm:$0xf] }
  0x81   : > { %v655_v40 = vld [vmem:[%s10192_s20 + $0xa80] sm:$0xf]  ;;  %v657_v41 = vld [vmem:[%s10192_s20 + $0xa90] sm:$0xf]  ;;  %654 = vst [vmem:[%s10199_s21 + $0x29c] sm:$0xf] %v653_v39 }
  0x82   : > { %656 = vst [vmem:[%s10199_s21 + $0x2a0] sm:$0xf] %v655_v40  ;;  %658 = vst [vmem:[%s10199_s21 + $0x2a4] sm:$0xf] %v657_v41  ;;  %v659_v42 = vld [vmem:[%s10192_s20 + $0xaa0] sm:$0xf] }
  0x83   : > { %v661_v43 = vld [vmem:[%s10192_s20 + $0xab0] sm:$0xf]  ;;  %v663_v44 = vld [vmem:[%s10192_s20 + $0xac0] sm:$0xf]  ;;  %660 = vst [vmem:[%s10199_s21 + $0x2a8] sm:$0xf] %v659_v42 }
  0x84   : > { %662 = vst [vmem:[%s10199_s21 + $0x2ac] sm:$0xf] %v661_v43  ;;  %664 = vst [vmem:[%s10199_s21 + $0x2b0] sm:$0xf] %v663_v44  ;;  %v665_v45 = vld [vmem:[%s10192_s20 + $0xad0] sm:$0xf] }
  0x85   : > { %v667_v46 = vld [vmem:[%s10192_s20 + $0xae0] sm:$0xf]  ;;  %v669_v47 = vld [vmem:[%s10192_s20 + $0xaf0] sm:$0xf]  ;;  %666 = vst [vmem:[%s10199_s21 + $0x2b4] sm:$0xf] %v665_v45 }
  0x86   : > { %668 = vst [vmem:[%s10199_s21 + $0x2b8] sm:$0xf] %v667_v46  ;;  %670 = vst [vmem:[%s10199_s21 + $0x2bc] sm:$0xf] %v669_v47  ;;  %v671_v48 = vld [vmem:[%s10192_s20 + $0xb00] sm:$0xf] }
  0x87   : > { %v673_v49 = vld [vmem:[%s10192_s20 + $0xb10] sm:$0xf]  ;;  %v675_v50 = vld [vmem:[%s10192_s20 + $0xb20] sm:$0xf]  ;;  %672 = vst [vmem:[%s10199_s21 + $0x2c0] sm:$0xf] %v671_v48 }
  0x88   : > { %674 = vst [vmem:[%s10199_s21 + $0x2c4] sm:$0xf] %v673_v49  ;;  %676 = vst [vmem:[%s10199_s21 + $0x2c8] sm:$0xf] %v675_v50  ;;  %v677_v51 = vld [vmem:[%s10192_s20 + $0xb30] sm:$0xf] }
  0x89   : > { %v679_v52 = vld [vmem:[%s10192_s20 + $0xb40] sm:$0xf]  ;;  %v681_v53 = vld [vmem:[%s10192_s20 + $0xb50] sm:$0xf]  ;;  %678 = vst [vmem:[%s10199_s21 + $0x2cc] sm:$0xf] %v677_v51 }
  0x8a   : > { %680 = vst [vmem:[%s10199_s21 + $0x2d0] sm:$0xf] %v679_v52  ;;  %682 = vst [vmem:[%s10199_s21 + $0x2d4] sm:$0xf] %v681_v53  ;;  %v683_v54 = vld [vmem:[%s10192_s20 + $0xb60] sm:$0xf] }
  0x8b   : > { %v685_v55 = vld [vmem:[%s10192_s20 + $0xb70] sm:$0xf]  ;;  %v687_v56 = vld [vmem:[%s10192_s20 + $0xb80] sm:$0xf]  ;;  %684 = vst [vmem:[%s10199_s21 + $0x2d8] sm:$0xf] %v683_v54 }
  0x8c   : > { %686 = vst [vmem:[%s10199_s21 + $0x2dc] sm:$0xf] %v685_v55  ;;  %688 = vst [vmem:[%s10199_s21 + $0x2e0] sm:$0xf] %v687_v56  ;;  %v689_v57 = vld [vmem:[%s10192_s20 + $0xb90] sm:$0xf] }
  0x8d   : > { %v691_v58 = vld [vmem:[%s10192_s20 + $0xba0] sm:$0xf]  ;;  %v693_v59 = vld [vmem:[%s10192_s20 + $0xbb0] sm:$0xf]  ;;  %690 = vst [vmem:[%s10199_s21 + $0x2e4] sm:$0xf] %v689_v57 }
  0x8e   : > { %692 = vst [vmem:[%s10199_s21 + $0x2e8] sm:$0xf] %v691_v58  ;;  %694 = vst [vmem:[%s10199_s21 + $0x2ec] sm:$0xf] %v693_v59  ;;  %v695_v60 = vld [vmem:[%s10192_s20 + $0xbc0] sm:$0xf] }
  0x8f   : > { %v697_v61 = vld [vmem:[%s10192_s20 + $0xbd0] sm:$0xf]  ;;  %v699_v62 = vld [vmem:[%s10192_s20 + $0xbe0] sm:$0xf]  ;;  %696 = vst [vmem:[%s10199_s21 + $0x2f0] sm:$0xf] %v695_v60 }
  0x90   : > { %698 = vst [vmem:[%s10199_s21 + $0x2f4] sm:$0xf] %v697_v61  ;;  %700 = vst [vmem:[%s10199_s21 + $0x2f8] sm:$0xf] %v699_v62  ;;  %v701_v63 = vld [vmem:[%s10192_s20 + $0xbf0] sm:$0xf] }
  0x91   : > { %v703_v0 = vld [vmem:[%s10192_s20 + $0xc00] sm:$0xf]  ;;  %v705_v1 = vld [vmem:[%s10192_s20 + $0xc10] sm:$0xf]  ;;  %702 = vst [vmem:[%s10199_s21 + $0x2fc] sm:$0xf] %v701_v63 }
  0x92   : > { %704 = vst [vmem:[%s10199_s21 + $0x300] sm:$0xf] %v703_v0  ;;  %706 = vst [vmem:[%s10199_s21 + $0x304] sm:$0xf] %v705_v1  ;;  %v707_v2 = vld [vmem:[%s10192_s20 + $0xc20] sm:$0xf] }
  0x93   : > { %v709_v3 = vld [vmem:[%s10192_s20 + $0xc30] sm:$0xf]  ;;  %v711_v4 = vld [vmem:[%s10192_s20 + $0xc40] sm:$0xf]  ;;  %708 = vst [vmem:[%s10199_s21 + $0x308] sm:$0xf] %v707_v2 }
  0x94   : > { %710 = vst [vmem:[%s10199_s21 + $0x30c] sm:$0xf] %v709_v3  ;;  %712 = vst [vmem:[%s10199_s21 + $0x310] sm:$0xf] %v711_v4  ;;  %v713_v5 = vld [vmem:[%s10192_s20 + $0xc50] sm:$0xf] }
  0x95   : > { %v715_v6 = vld [vmem:[%s10192_s20 + $0xc60] sm:$0xf]  ;;  %v717_v7 = vld [vmem:[%s10192_s20 + $0xc70] sm:$0xf]  ;;  %714 = vst [vmem:[%s10199_s21 + $0x314] sm:$0xf] %v713_v5 }
  0x96   : > { %716 = vst [vmem:[%s10199_s21 + $0x318] sm:$0xf] %v715_v6  ;;  %718 = vst [vmem:[%s10199_s21 + $0x31c] sm:$0xf] %v717_v7  ;;  %v719_v8 = vld [vmem:[%s10192_s20 + $0xc80] sm:$0xf] }
  0x97   : > { %v721_v9 = vld [vmem:[%s10192_s20 + $0xc90] sm:$0xf]  ;;  %v723_v10 = vld [vmem:[%s10192_s20 + $0xca0] sm:$0xf]  ;;  %720 = vst [vmem:[%s10199_s21 + $0x320] sm:$0xf] %v719_v8 }
  0x98   : > { %722 = vst [vmem:[%s10199_s21 + $0x324] sm:$0xf] %v721_v9  ;;  %724 = vst [vmem:[%s10199_s21 + $0x328] sm:$0xf] %v723_v10  ;;  %v725_v11 = vld [vmem:[%s10192_s20 + $0xcb0] sm:$0xf] }
  0x99   : > { %v727_v12 = vld [vmem:[%s10192_s20 + $0xcc0] sm:$0xf]  ;;  %v729_v13 = vld [vmem:[%s10192_s20 + $0xcd0] sm:$0xf]  ;;  %726 = vst [vmem:[%s10199_s21 + $0x32c] sm:$0xf] %v725_v11 }
  0x9a   : > { %728 = vst [vmem:[%s10199_s21 + $0x330] sm:$0xf] %v727_v12  ;;  %730 = vst [vmem:[%s10199_s21 + $0x334] sm:$0xf] %v729_v13  ;;  %v731_v14 = vld [vmem:[%s10192_s20 + $0xce0] sm:$0xf] }
  0x9b   : > { %v733_v15 = vld [vmem:[%s10192_s20 + $0xcf0] sm:$0xf]  ;;  %v735_v16 = vld [vmem:[%s10192_s20 + $0xd00] sm:$0xf]  ;;  %732 = vst [vmem:[%s10199_s21 + $0x338] sm:$0xf] %v731_v14 }
  0x9c   : > { %734 = vst [vmem:[%s10199_s21 + $0x33c] sm:$0xf] %v733_v15  ;;  %736 = vst [vmem:[%s10199_s21 + $0x340] sm:$0xf] %v735_v16  ;;  %v737_v17 = vld [vmem:[%s10192_s20 + $0xd10] sm:$0xf] }
  0x9d   : > { %v739_v18 = vld [vmem:[%s10192_s20 + $0xd20] sm:$0xf]  ;;  %v741_v19 = vld [vmem:[%s10192_s20 + $0xd30] sm:$0xf]  ;;  %738 = vst [vmem:[%s10199_s21 + $0x344] sm:$0xf] %v737_v17 }
  0x9e   : > { %740 = vst [vmem:[%s10199_s21 + $0x348] sm:$0xf] %v739_v18  ;;  %742 = vst [vmem:[%s10199_s21 + $0x34c] sm:$0xf] %v741_v19  ;;  %v743_v20 = vld [vmem:[%s10192_s20 + $0xd40] sm:$0xf] }
  0x9f   : > { %v745_v21 = vld [vmem:[%s10192_s20 + $0xd50] sm:$0xf]  ;;  %v747_v22 = vld [vmem:[%s10192_s20 + $0xd60] sm:$0xf]  ;;  %744 = vst [vmem:[%s10199_s21 + $0x350] sm:$0xf] %v743_v20 }
  0xa0   : > { %746 = vst [vmem:[%s10199_s21 + $0x354] sm:$0xf] %v745_v21  ;;  %748 = vst [vmem:[%s10199_s21 + $0x358] sm:$0xf] %v747_v22  ;;  %v749_v23 = vld [vmem:[%s10192_s20 + $0xd70] sm:$0xf] }
  0xa1   : > { %v751_v24 = vld [vmem:[%s10192_s20 + $0xd80] sm:$0xf]  ;;  %v753_v25 = vld [vmem:[%s10192_s20 + $0xd90] sm:$0xf]  ;;  %750 = vst [vmem:[%s10199_s21 + $0x35c] sm:$0xf] %v749_v23 }
  0xa2   : > { %752 = vst [vmem:[%s10199_s21 + $0x360] sm:$0xf] %v751_v24  ;;  %754 = vst [vmem:[%s10199_s21 + $0x364] sm:$0xf] %v753_v25  ;;  %v755_v26 = vld [vmem:[%s10192_s20 + $0xda0] sm:$0xf] }
  0xa3   : > { %v757_v27 = vld [vmem:[%s10192_s20 + $0xdb0] sm:$0xf]  ;;  %v759_v28 = vld [vmem:[%s10192_s20 + $0xdc0] sm:$0xf]  ;;  %756 = vst [vmem:[%s10199_s21 + $0x368] sm:$0xf] %v755_v26 }
  0xa4   : > { %758 = vst [vmem:[%s10199_s21 + $0x36c] sm:$0xf] %v757_v27  ;;  %760 = vst [vmem:[%s10199_s21 + $0x370] sm:$0xf] %v759_v28  ;;  %v761_v29 = vld [vmem:[%s10192_s20 + $0xdd0] sm:$0xf] }
  0xa5   : > { %v763_v30 = vld [vmem:[%s10192_s20 + $0xde0] sm:$0xf]  ;;  %v765_v31 = vld [vmem:[%s10192_s20 + $0xdf0] sm:$0xf]  ;;  %762 = vst [vmem:[%s10199_s21 + $0x374] sm:$0xf] %v761_v29 }
  0xa6   : > { %764 = vst [vmem:[%s10199_s21 + $0x378] sm:$0xf] %v763_v30  ;;  %766 = vst [vmem:[%s10199_s21 + $0x37c] sm:$0xf] %v765_v31  ;;  %v767_v32 = vld [vmem:[%s10192_s20 + $0xe00] sm:$0xf] }
  0xa7   : > { %v769_v33 = vld [vmem:[%s10192_s20 + $0xe10] sm:$0xf]  ;;  %v771_v34 = vld [vmem:[%s10192_s20 + $0xe20] sm:$0xf]  ;;  %768 = vst [vmem:[%s10199_s21 + $0x380] sm:$0xf] %v767_v32 }
  0xa8   : > { %770 = vst [vmem:[%s10199_s21 + $0x384] sm:$0xf] %v769_v33  ;;  %772 = vst [vmem:[%s10199_s21 + $0x388] sm:$0xf] %v771_v34  ;;  %v773_v35 = vld [vmem:[%s10192_s20 + $0xe30] sm:$0xf] }
  0xa9   : > { %v775_v36 = vld [vmem:[%s10192_s20 + $0xe40] sm:$0xf]  ;;  %v777_v37 = vld [vmem:[%s10192_s20 + $0xe50] sm:$0xf]  ;;  %774 = vst [vmem:[%s10199_s21 + $0x38c] sm:$0xf] %v773_v35 }
  0xaa   : > { %776 = vst [vmem:[%s10199_s21 + $0x390] sm:$0xf] %v775_v36  ;;  %778 = vst [vmem:[%s10199_s21 + $0x394] sm:$0xf] %v777_v37  ;;  %v779_v38 = vld [vmem:[%s10192_s20 + $0xe60] sm:$0xf] }
  0xab   : > { %v781_v39 = vld [vmem:[%s10192_s20 + $0xe70] sm:$0xf]  ;;  %v783_v40 = vld [vmem:[%s10192_s20 + $0xe80] sm:$0xf]  ;;  %780 = vst [vmem:[%s10199_s21 + $0x398] sm:$0xf] %v779_v38 }
  0xac   : > { %782 = vst [vmem:[%s10199_s21 + $0x39c] sm:$0xf] %v781_v39  ;;  %784 = vst [vmem:[%s10199_s21 + $0x3a0] sm:$0xf] %v783_v40  ;;  %v785_v41 = vld [vmem:[%s10192_s20 + $0xe90] sm:$0xf] }
  0xad   : > { %v787_v42 = vld [vmem:[%s10192_s20 + $0xea0] sm:$0xf]  ;;  %v789_v43 = vld [vmem:[%s10192_s20 + $0xeb0] sm:$0xf]  ;;  %786 = vst [vmem:[%s10199_s21 + $0x3a4] sm:$0xf] %v785_v41 }
  0xae   : > { %788 = vst [vmem:[%s10199_s21 + $0x3a8] sm:$0xf] %v787_v42  ;;  %790 = vst [vmem:[%s10199_s21 + $0x3ac] sm:$0xf] %v789_v43  ;;  %v791_v44 = vld [vmem:[%s10192_s20 + $0xec0] sm:$0xf] }
  0xaf   : > { %v793_v45 = vld [vmem:[%s10192_s20 + $0xed0] sm:$0xf]  ;;  %v795_v46 = vld [vmem:[%s10192_s20 + $0xee0] sm:$0xf]  ;;  %792 = vst [vmem:[%s10199_s21 + $0x3b0] sm:$0xf] %v791_v44 }
  0xb0   : > { %794 = vst [vmem:[%s10199_s21 + $0x3b4] sm:$0xf] %v793_v45  ;;  %796 = vst [vmem:[%s10199_s21 + $0x3b8] sm:$0xf] %v795_v46  ;;  %v797_v47 = vld [vmem:[%s10192_s20 + $0xef0] sm:$0xf] }
  0xb1   : > { %v799_v48 = vld [vmem:[%s10192_s20 + $0xf00] sm:$0xf]  ;;  %v801_v49 = vld [vmem:[%s10192_s20 + $0xf10] sm:$0xf]  ;;  %798 = vst [vmem:[%s10199_s21 + $0x3bc] sm:$0xf] %v797_v47 }
  0xb2   : > { %800 = vst [vmem:[%s10199_s21 + $0x3c0] sm:$0xf] %v799_v48  ;;  %802 = vst [vmem:[%s10199_s21 + $0x3c4] sm:$0xf] %v801_v49  ;;  %v803_v50 = vld [vmem:[%s10192_s20 + $0xf20] sm:$0xf] }
  0xb3   : > { %v805_v51 = vld [vmem:[%s10192_s20 + $0xf30] sm:$0xf]  ;;  %v807_v52 = vld [vmem:[%s10192_s20 + $0xf40] sm:$0xf]  ;;  %804 = vst [vmem:[%s10199_s21 + $0x3c8] sm:$0xf] %v803_v50 }
  0xb4   : > { %806 = vst [vmem:[%s10199_s21 + $0x3cc] sm:$0xf] %v805_v51  ;;  %808 = vst [vmem:[%s10199_s21 + $0x3d0] sm:$0xf] %v807_v52  ;;  %v809_v53 = vld [vmem:[%s10192_s20 + $0xf50] sm:$0xf] }
  0xb5   : > { %v811_v54 = vld [vmem:[%s10192_s20 + $0xf60] sm:$0xf]  ;;  %v813_v55 = vld [vmem:[%s10192_s20 + $0xf70] sm:$0xf]  ;;  %810 = vst [vmem:[%s10199_s21 + $0x3d4] sm:$0xf] %v809_v53 }
  0xb6   : > { %812 = vst [vmem:[%s10199_s21 + $0x3d8] sm:$0xf] %v811_v54  ;;  %814 = vst [vmem:[%s10199_s21 + $0x3dc] sm:$0xf] %v813_v55  ;;  %v815_v56 = vld [vmem:[%s10192_s20 + $0xf80] sm:$0xf] }
  0xb7   : > { %v817_v57 = vld [vmem:[%s10192_s20 + $0xf90] sm:$0xf]  ;;  %v819_v58 = vld [vmem:[%s10192_s20 + $0xfa0] sm:$0xf]  ;;  %816 = vst [vmem:[%s10199_s21 + $0x3e0] sm:$0xf] %v815_v56 }
  0xb8   : > { %818 = vst [vmem:[%s10199_s21 + $0x3e4] sm:$0xf] %v817_v57  ;;  %820 = vst [vmem:[%s10199_s21 + $0x3e8] sm:$0xf] %v819_v58  ;;  %v821_v59 = vld [vmem:[%s10192_s20 + $0xfb0] sm:$0xf] }
  0xb9   : > { %v823_v60 = vld [vmem:[%s10192_s20 + $0xfc0] sm:$0xf]  ;;  %v825_v61 = vld [vmem:[%s10192_s20 + $0xfd0] sm:$0xf]  ;;  %822 = vst [vmem:[%s10199_s21 + $0x3ec] sm:$0xf] %v821_v59 }
  0xba   : > { %824 = vst [vmem:[%s10199_s21 + $0x3f0] sm:$0xf] %v823_v60  ;;  %826 = vst [vmem:[%s10199_s21 + $0x3f4] sm:$0xf] %v825_v61  ;;  %v827_v62 = vld [vmem:[%s10192_s20 + $0xfe0] sm:$0xf] }
  0xbb   : > { %v829_v63 = vld [vmem:[%s10192_s20 + $0xff0] sm:$0xf]  ;;  %v831_v0 = vld [vmem:[%s10192_s20 + $0x1000] sm:$0xf]  ;;  %828 = vst [vmem:[%s10199_s21 + $0x3f8] sm:$0xf] %v827_v62 }
  0xbc   : > { %830 = vst [vmem:[%s10199_s21 + $0x3fc] sm:$0xf] %v829_v63  ;;  %832 = vst [vmem:[%s10199_s21 + $0x400] sm:$0xf] %v831_v0  ;;  %v833_v1 = vld [vmem:[%s10192_s20 + $0x1010] sm:$0xf] }
  0xbd   : > { %v835_v2 = vld [vmem:[%s10192_s20 + $0x1020] sm:$0xf]  ;;  %v837_v3 = vld [vmem:[%s10192_s20 + $0x1030] sm:$0xf]  ;;  %834 = vst [vmem:[%s10199_s21 + $0x404] sm:$0xf] %v833_v1 }
  0xbe   : > { %836 = vst [vmem:[%s10199_s21 + $0x408] sm:$0xf] %v835_v2  ;;  %838 = vst [vmem:[%s10199_s21 + $0x40c] sm:$0xf] %v837_v3  ;;  %v839_v4 = vld [vmem:[%s10192_s20 + $0x1040] sm:$0xf] }
  0xbf   : > { %v841_v5 = vld [vmem:[%s10192_s20 + $0x1050] sm:$0xf]  ;;  %v843_v6 = vld [vmem:[%s10192_s20 + $0x1060] sm:$0xf]  ;;  %840 = vst [vmem:[%s10199_s21 + $0x410] sm:$0xf] %v839_v4 }
  0xc0   : > { %842 = vst [vmem:[%s10199_s21 + $0x414] sm:$0xf] %v841_v5  ;;  %844 = vst [vmem:[%s10199_s21 + $0x418] sm:$0xf] %v843_v6  ;;  %v845_v7 = vld [vmem:[%s10192_s20 + $0x1070] sm:$0xf] }
  0xc1   : > { %v847_v8 = vld [vmem:[%s10192_s20 + $0x1080] sm:$0xf]  ;;  %v849_v9 = vld [vmem:[%s10192_s20 + $0x1090] sm:$0xf]  ;;  %846 = vst [vmem:[%s10199_s21 + $0x41c] sm:$0xf] %v845_v7 }
  0xc2   : > { %848 = vst [vmem:[%s10199_s21 + $0x420] sm:$0xf] %v847_v8  ;;  %850 = vst [vmem:[%s10199_s21 + $0x424] sm:$0xf] %v849_v9  ;;  %v851_v10 = vld [vmem:[%s10192_s20 + $0x10a0] sm:$0xf] }
  0xc3   : > { %v853_v11 = vld [vmem:[%s10192_s20 + $0x10b0] sm:$0xf]  ;;  %v855_v12 = vld [vmem:[%s10192_s20 + $0x10c0] sm:$0xf]  ;;  %852 = vst [vmem:[%s10199_s21 + $0x428] sm:$0xf] %v851_v10 }
  0xc4   : > { %854 = vst [vmem:[%s10199_s21 + $0x42c] sm:$0xf] %v853_v11  ;;  %856 = vst [vmem:[%s10199_s21 + $0x430] sm:$0xf] %v855_v12  ;;  %v857_v13 = vld [vmem:[%s10192_s20 + $0x10d0] sm:$0xf] }
  0xc5   : > { %v859_v14 = vld [vmem:[%s10192_s20 + $0x10e0] sm:$0xf]  ;;  %v861_v15 = vld [vmem:[%s10192_s20 + $0x10f0] sm:$0xf]  ;;  %858 = vst [vmem:[%s10199_s21 + $0x434] sm:$0xf] %v857_v13 }
  0xc6   : > { %860 = vst [vmem:[%s10199_s21 + $0x438] sm:$0xf] %v859_v14  ;;  %862 = vst [vmem:[%s10199_s21 + $0x43c] sm:$0xf] %v861_v15  ;;  %v863_v16 = vld [vmem:[%s10192_s20 + $0x1100] sm:$0xf] }
  0xc7   : > { %v865_v17 = vld [vmem:[%s10192_s20 + $0x1110] sm:$0xf]  ;;  %v867_v18 = vld [vmem:[%s10192_s20 + $0x1120] sm:$0xf]  ;;  %864 = vst [vmem:[%s10199_s21 + $0x440] sm:$0xf] %v863_v16 }
  0xc8   : > { %866 = vst [vmem:[%s10199_s21 + $0x444] sm:$0xf] %v865_v17  ;;  %868 = vst [vmem:[%s10199_s21 + $0x448] sm:$0xf] %v867_v18  ;;  %v869_v19 = vld [vmem:[%s10192_s20 + $0x1130] sm:$0xf] }
  0xc9   : > { %v871_v20 = vld [vmem:[%s10192_s20 + $0x1140] sm:$0xf]  ;;  %v873_v21 = vld [vmem:[%s10192_s20 + $0x1150] sm:$0xf]  ;;  %870 = vst [vmem:[%s10199_s21 + $0x44c] sm:$0xf] %v869_v19 }
  0xca   : > { %872 = vst [vmem:[%s10199_s21 + $0x450] sm:$0xf] %v871_v20  ;;  %874 = vst [vmem:[%s10199_s21 + $0x454] sm:$0xf] %v873_v21  ;;  %v875_v22 = vld [vmem:[%s10192_s20 + $0x1160] sm:$0xf] }
  0xcb   : > { %v877_v23 = vld [vmem:[%s10192_s20 + $0x1170] sm:$0xf]  ;;  %v879_v24 = vld [vmem:[%s10192_s20 + $0x1180] sm:$0xf]  ;;  %876 = vst [vmem:[%s10199_s21 + $0x458] sm:$0xf] %v875_v22 }
  0xcc   : > { %878 = vst [vmem:[%s10199_s21 + $0x45c] sm:$0xf] %v877_v23  ;;  %880 = vst [vmem:[%s10199_s21 + $0x460] sm:$0xf] %v879_v24  ;;  %v881_v25 = vld [vmem:[%s10192_s20 + $0x1190] sm:$0xf] }
  0xcd   : > { %v883_v26 = vld [vmem:[%s10192_s20 + $0x11a0] sm:$0xf]  ;;  %v885_v27 = vld [vmem:[%s10192_s20 + $0x11b0] sm:$0xf]  ;;  %882 = vst [vmem:[%s10199_s21 + $0x464] sm:$0xf] %v881_v25 }
  0xce   : > { %884 = vst [vmem:[%s10199_s21 + $0x468] sm:$0xf] %v883_v26  ;;  %886 = vst [vmem:[%s10199_s21 + $0x46c] sm:$0xf] %v885_v27  ;;  %v887_v28 = vld [vmem:[%s10192_s20 + $0x11c0] sm:$0xf] }
  0xcf   : > { %v889_v29 = vld [vmem:[%s10192_s20 + $0x11d0] sm:$0xf]  ;;  %v891_v30 = vld [vmem:[%s10192_s20 + $0x11e0] sm:$0xf]  ;;  %888 = vst [vmem:[%s10199_s21 + $0x470] sm:$0xf] %v887_v28 }
  0xd0   : > { %890 = vst [vmem:[%s10199_s21 + $0x474] sm:$0xf] %v889_v29  ;;  %892 = vst [vmem:[%s10199_s21 + $0x478] sm:$0xf] %v891_v30  ;;  %v893_v31 = vld [vmem:[%s10192_s20 + $0x11f0] sm:$0xf] }
  0xd1   : > { %v895_v32 = vld [vmem:[%s10192_s20 + $0x1200] sm:$0xf]  ;;  %v897_v33 = vld [vmem:[%s10192_s20 + $0x1210] sm:$0xf]  ;;  %894 = vst [vmem:[%s10199_s21 + $0x47c] sm:$0xf] %v893_v31 }
  0xd2   : > { %896 = vst [vmem:[%s10199_s21 + $0x480] sm:$0xf] %v895_v32  ;;  %898 = vst [vmem:[%s10199_s21 + $0x484] sm:$0xf] %v897_v33  ;;  %v899_v34 = vld [vmem:[%s10192_s20 + $0x1220] sm:$0xf] }
  0xd3   : > { %v901_v35 = vld [vmem:[%s10192_s20 + $0x1230] sm:$0xf]  ;;  %v903_v36 = vld [vmem:[%s10192_s20 + $0x1240] sm:$0xf]  ;;  %900 = vst [vmem:[%s10199_s21 + $0x488] sm:$0xf] %v899_v34 }
  0xd4   : > { %902 = vst [vmem:[%s10199_s21 + $0x48c] sm:$0xf] %v901_v35  ;;  %904 = vst [vmem:[%s10199_s21 + $0x490] sm:$0xf] %v903_v36  ;;  %v905_v37 = vld [vmem:[%s10192_s20 + $0x1250] sm:$0xf] }
  0xd5   : > { %v907_v38 = vld [vmem:[%s10192_s20 + $0x1260] sm:$0xf]  ;;  %v909_v39 = vld [vmem:[%s10192_s20 + $0x1270] sm:$0xf]  ;;  %906 = vst [vmem:[%s10199_s21 + $0x494] sm:$0xf] %v905_v37 }
  0xd6   : > { %908 = vst [vmem:[%s10199_s21 + $0x498] sm:$0xf] %v907_v38  ;;  %910 = vst [vmem:[%s10199_s21 + $0x49c] sm:$0xf] %v909_v39  ;;  %v911_v40 = vld [vmem:[%s10192_s20 + $0x1280] sm:$0xf] }
  0xd7   : > { %v913_v41 = vld [vmem:[%s10192_s20 + $0x1290] sm:$0xf]  ;;  %v915_v42 = vld [vmem:[%s10192_s20 + $0x12a0] sm:$0xf]  ;;  %912 = vst [vmem:[%s10199_s21 + $0x4a0] sm:$0xf] %v911_v40 }
  0xd8   : > { %914 = vst [vmem:[%s10199_s21 + $0x4a4] sm:$0xf] %v913_v41  ;;  %916 = vst [vmem:[%s10199_s21 + $0x4a8] sm:$0xf] %v915_v42  ;;  %v917_v43 = vld [vmem:[%s10192_s20 + $0x12b0] sm:$0xf] }
  0xd9   : > { %v919_v44 = vld [vmem:[%s10192_s20 + $0x12c0] sm:$0xf]  ;;  %v921_v45 = vld [vmem:[%s10192_s20 + $0x12d0] sm:$0xf]  ;;  %918 = vst [vmem:[%s10199_s21 + $0x4ac] sm:$0xf] %v917_v43 }
  0xda   : > { %920 = vst [vmem:[%s10199_s21 + $0x4b0] sm:$0xf] %v919_v44  ;;  %922 = vst [vmem:[%s10199_s21 + $0x4b4] sm:$0xf] %v921_v45  ;;  %v923_v46 = vld [vmem:[%s10192_s20 + $0x12e0] sm:$0xf] }
  0xdb   : > { %v925_v47 = vld [vmem:[%s10192_s20 + $0x12f0] sm:$0xf]  ;;  %v927_v48 = vld [vmem:[%s10192_s20 + $0x1300] sm:$0xf]  ;;  %924 = vst [vmem:[%s10199_s21 + $0x4b8] sm:$0xf] %v923_v46 }
  0xdc   : > { %926 = vst [vmem:[%s10199_s21 + $0x4bc] sm:$0xf] %v925_v47  ;;  %928 = vst [vmem:[%s10199_s21 + $0x4c0] sm:$0xf] %v927_v48  ;;  %v929_v49 = vld [vmem:[%s10192_s20 + $0x1310] sm:$0xf] }
  0xdd   : > { %v931_v50 = vld [vmem:[%s10192_s20 + $0x1320] sm:$0xf]  ;;  %v933_v51 = vld [vmem:[%s10192_s20 + $0x1330] sm:$0xf]  ;;  %930 = vst [vmem:[%s10199_s21 + $0x4c4] sm:$0xf] %v929_v49 }
  0xde   : > { %932 = vst [vmem:[%s10199_s21 + $0x4c8] sm:$0xf] %v931_v50  ;;  %934 = vst [vmem:[%s10199_s21 + $0x4cc] sm:$0xf] %v933_v51  ;;  %v935_v52 = vld [vmem:[%s10192_s20 + $0x1340] sm:$0xf] }
  0xdf   : > { %v937_v53 = vld [vmem:[%s10192_s20 + $0x1350] sm:$0xf]  ;;  %v939_v54 = vld [vmem:[%s10192_s20 + $0x1360] sm:$0xf]  ;;  %936 = vst [vmem:[%s10199_s21 + $0x4d0] sm:$0xf] %v935_v52 }
  0xe0   : > { %938 = vst [vmem:[%s10199_s21 + $0x4d4] sm:$0xf] %v937_v53  ;;  %940 = vst [vmem:[%s10199_s21 + $0x4d8] sm:$0xf] %v939_v54  ;;  %v941_v55 = vld [vmem:[%s10192_s20 + $0x1370] sm:$0xf] }
  0xe1   : > { %v943_v56 = vld [vmem:[%s10192_s20 + $0x1380] sm:$0xf]  ;;  %v945_v57 = vld [vmem:[%s10192_s20 + $0x1390] sm:$0xf]  ;;  %942 = vst [vmem:[%s10199_s21 + $0x4dc] sm:$0xf] %v941_v55 }
  0xe2   : > { %944 = vst [vmem:[%s10199_s21 + $0x4e0] sm:$0xf] %v943_v56  ;;  %946 = vst [vmem:[%s10199_s21 + $0x4e4] sm:$0xf] %v945_v57  ;;  %v947_v58 = vld [vmem:[%s10192_s20 + $0x13a0] sm:$0xf] }
  0xe3   : > { %v949_v59 = vld [vmem:[%s10192_s20 + $0x13b0] sm:$0xf]  ;;  %v951_v60 = vld [vmem:[%s10192_s20 + $0x13c0] sm:$0xf]  ;;  %948 = vst [vmem:[%s10199_s21 + $0x4e8] sm:$0xf] %v947_v58 }
  0xe4   : > { %950 = vst [vmem:[%s10199_s21 + $0x4ec] sm:$0xf] %v949_v59  ;;  %952 = vst [vmem:[%s10199_s21 + $0x4f0] sm:$0xf] %v951_v60  ;;  %v953_v61 = vld [vmem:[%s10192_s20 + $0x13d0] sm:$0xf] }
  0xe5   : > { %v955_v62 = vld [vmem:[%s10192_s20 + $0x13e0] sm:$0xf]  ;;  %v957_v63 = vld [vmem:[%s10192_s20 + $0x13f0] sm:$0xf]  ;;  %954 = vst [vmem:[%s10199_s21 + $0x4f4] sm:$0xf] %v953_v61 }
  0xe6   : > { %956 = vst [vmem:[%s10199_s21 + $0x4f8] sm:$0xf] %v955_v62  ;;  %958 = vst [vmem:[%s10199_s21 + $0x4fc] sm:$0xf] %v957_v63  ;;  %v959_v0 = vld [vmem:[%s10192_s20 + $0x1400] sm:$0xf] }
  0xe7   : > { %v961_v1 = vld [vmem:[%s10192_s20 + $0x1410] sm:$0xf]  ;;  %v963_v2 = vld [vmem:[%s10192_s20 + $0x1420] sm:$0xf]  ;;  %960 = vst [vmem:[%s10199_s21 + $0x500] sm:$0xf] %v959_v0 }
  0xe8   : > { %962 = vst [vmem:[%s10199_s21 + $0x504] sm:$0xf] %v961_v1  ;;  %964 = vst [vmem:[%s10199_s21 + $0x508] sm:$0xf] %v963_v2  ;;  %v965_v3 = vld [vmem:[%s10192_s20 + $0x1430] sm:$0xf] }
  0xe9   : > { %v967_v4 = vld [vmem:[%s10192_s20 + $0x1440] sm:$0xf]  ;;  %v969_v5 = vld [vmem:[%s10192_s20 + $0x1450] sm:$0xf]  ;;  %966 = vst [vmem:[%s10199_s21 + $0x50c] sm:$0xf] %v965_v3 }
  0xea   : > { %968 = vst [vmem:[%s10199_s21 + $0x510] sm:$0xf] %v967_v4  ;;  %970 = vst [vmem:[%s10199_s21 + $0x514] sm:$0xf] %v969_v5  ;;  %v971_v6 = vld [vmem:[%s10192_s20 + $0x1460] sm:$0xf] }
  0xeb   : > { %v973_v7 = vld [vmem:[%s10192_s20 + $0x1470] sm:$0xf]  ;;  %v975_v8 = vld [vmem:[%s10192_s20 + $0x1480] sm:$0xf]  ;;  %972 = vst [vmem:[%s10199_s21 + $0x518] sm:$0xf] %v971_v6 }
  0xec   : > { %974 = vst [vmem:[%s10199_s21 + $0x51c] sm:$0xf] %v973_v7  ;;  %976 = vst [vmem:[%s10199_s21 + $0x520] sm:$0xf] %v975_v8  ;;  %v977_v9 = vld [vmem:[%s10192_s20 + $0x1490] sm:$0xf] }
  0xed   : > { %v979_v10 = vld [vmem:[%s10192_s20 + $0x14a0] sm:$0xf]  ;;  %v981_v11 = vld [vmem:[%s10192_s20 + $0x14b0] sm:$0xf]  ;;  %978 = vst [vmem:[%s10199_s21 + $0x524] sm:$0xf] %v977_v9 }
  0xee   : > { %980 = vst [vmem:[%s10199_s21 + $0x528] sm:$0xf] %v979_v10  ;;  %982 = vst [vmem:[%s10199_s21 + $0x52c] sm:$0xf] %v981_v11  ;;  %v983_v12 = vld [vmem:[%s10192_s20 + $0x14c0] sm:$0xf] }
  0xef   : > { %v985_v13 = vld [vmem:[%s10192_s20 + $0x14d0] sm:$0xf]  ;;  %v987_v14 = vld [vmem:[%s10192_s20 + $0x14e0] sm:$0xf]  ;;  %984 = vst [vmem:[%s10199_s21 + $0x530] sm:$0xf] %v983_v12 }
  0xf0   : > { %986 = vst [vmem:[%s10199_s21 + $0x534] sm:$0xf] %v985_v13  ;;  %988 = vst [vmem:[%s10199_s21 + $0x538] sm:$0xf] %v987_v14  ;;  %v989_v15 = vld [vmem:[%s10192_s20 + $0x14f0] sm:$0xf] }
  0xf1   : > { %v991_v16 = vld [vmem:[%s10192_s20 + $0x1500] sm:$0xf]  ;;  %v993_v17 = vld [vmem:[%s10192_s20 + $0x1510] sm:$0xf]  ;;  %990 = vst [vmem:[%s10199_s21 + $0x53c] sm:$0xf] %v989_v15 }
  0xf2   : > { %992 = vst [vmem:[%s10199_s21 + $0x540] sm:$0xf] %v991_v16  ;;  %994 = vst [vmem:[%s10199_s21 + $0x544] sm:$0xf] %v993_v17  ;;  %v995_v18 = vld [vmem:[%s10192_s20 + $0x1520] sm:$0xf] }
  0xf3   : > { %v997_v19 = vld [vmem:[%s10192_s20 + $0x1530] sm:$0xf]  ;;  %v999_v20 = vld [vmem:[%s10192_s20 + $0x1540] sm:$0xf]  ;;  %996 = vst [vmem:[%s10199_s21 + $0x548] sm:$0xf] %v995_v18 }
  0xf4   : > { %998 = vst [vmem:[%s10199_s21 + $0x54c] sm:$0xf] %v997_v19  ;;  %1000 = vst [vmem:[%s10199_s21 + $0x550] sm:$0xf] %v999_v20  ;;  %v1001_v21 = vld [vmem:[%s10192_s20 + $0x1550] sm:$0xf] }
  0xf5   : > { %v1003_v22 = vld [vmem:[%s10192_s20 + $0x1560] sm:$0xf]  ;;  %v1005_v23 = vld [vmem:[%s10192_s20 + $0x1570] sm:$0xf]  ;;  %1002 = vst [vmem:[%s10199_s21 + $0x554] sm:$0xf] %v1001_v21 }
  0xf6   : > { %1004 = vst [vmem:[%s10199_s21 + $0x558] sm:$0xf] %v1003_v22  ;;  %1006 = vst [vmem:[%s10199_s21 + $0x55c] sm:$0xf] %v1005_v23  ;;  %v1007_v24 = vld [vmem:[%s10192_s20 + $0x1580] sm:$0xf] }
  0xf7   : > { %v1009_v25 = vld [vmem:[%s10192_s20 + $0x1590] sm:$0xf]  ;;  %v1011_v26 = vld [vmem:[%s10192_s20 + $0x15a0] sm:$0xf]  ;;  %1008 = vst [vmem:[%s10199_s21 + $0x560] sm:$0xf] %v1007_v24 }
  0xf8   : > { %1010 = vst [vmem:[%s10199_s21 + $0x564] sm:$0xf] %v1009_v25  ;;  %1012 = vst [vmem:[%s10199_s21 + $0x568] sm:$0xf] %v1011_v26  ;;  %v1013_v27 = vld [vmem:[%s10192_s20 + $0x15b0] sm:$0xf] }
  0xf9   : > { %v1015_v28 = vld [vmem:[%s10192_s20 + $0x15c0] sm:$0xf]  ;;  %v1017_v29 = vld [vmem:[%s10192_s20 + $0x15d0] sm:$0xf]  ;;  %1014 = vst [vmem:[%s10199_s21 + $0x56c] sm:$0xf] %v1013_v27 }
  0xfa   : > { %1016 = vst [vmem:[%s10199_s21 + $0x570] sm:$0xf] %v1015_v28  ;;  %1018 = vst [vmem:[%s10199_s21 + $0x574] sm:$0xf] %v1017_v29  ;;  %v1019_v30 = vld [vmem:[%s10192_s20 + $0x15e0] sm:$0xf] }
  0xfb   : > { %v1021_v31 = vld [vmem:[%s10192_s20 + $0x15f0] sm:$0xf]  ;;  %v1023_v32 = vld [vmem:[%s10192_s20 + $0x1600] sm:$0xf]  ;;  %1020 = vst [vmem:[%s10199_s21 + $0x578] sm:$0xf] %v1019_v30 }
  0xfc   : > { %1022 = vst [vmem:[%s10199_s21 + $0x57c] sm:$0xf] %v1021_v31  ;;  %1024 = vst [vmem:[%s10199_s21 + $0x580] sm:$0xf] %v1023_v32  ;;  %v1025_v33 = vld [vmem:[%s10192_s20 + $0x1610] sm:$0xf] }
  0xfd   : > { %v1027_v34 = vld [vmem:[%s10192_s20 + $0x1620] sm:$0xf]  ;;  %v1029_v35 = vld [vmem:[%s10192_s20 + $0x1630] sm:$0xf]  ;;  %1026 = vst [vmem:[%s10199_s21 + $0x584] sm:$0xf] %v1025_v33 }
  0xfe   : > { %1028 = vst [vmem:[%s10199_s21 + $0x588] sm:$0xf] %v1027_v34  ;;  %1030 = vst [vmem:[%s10199_s21 + $0x58c] sm:$0xf] %v1029_v35  ;;  %v1031_v36 = vld [vmem:[%s10192_s20 + $0x1640] sm:$0xf] }
  0xff   : > { %v1033_v37 = vld [vmem:[%s10192_s20 + $0x1650] sm:$0xf]  ;;  %v1035_v38 = vld [vmem:[%s10192_s20 + $0x1660] sm:$0xf]  ;;  %1032 = vst [vmem:[%s10199_s21 + $0x590] sm:$0xf] %v1031_v36 }
 0x100   : > { %1034 = vst [vmem:[%s10199_s21 + $0x594] sm:$0xf] %v1033_v37  ;;  %1036 = vst [vmem:[%s10199_s21 + $0x598] sm:$0xf] %v1035_v38  ;;  %v1037_v39 = vld [vmem:[%s10192_s20 + $0x1670] sm:$0xf] }
 0x101   : > { %v1039_v40 = vld [vmem:[%s10192_s20 + $0x1680] sm:$0xf]  ;;  %v1041_v41 = vld [vmem:[%s10192_s20 + $0x1690] sm:$0xf]  ;;  %1038 = vst [vmem:[%s10199_s21 + $0x59c] sm:$0xf] %v1037_v39 }
 0x102   : > { %1040 = vst [vmem:[%s10199_s21 + $0x5a0] sm:$0xf] %v1039_v40  ;;  %1042 = vst [vmem:[%s10199_s21 + $0x5a4] sm:$0xf] %v1041_v41  ;;  %v1043_v42 = vld [vmem:[%s10192_s20 + $0x16a0] sm:$0xf] }
 0x103   : > { %v1045_v43 = vld [vmem:[%s10192_s20 + $0x16b0] sm:$0xf]  ;;  %v1047_v44 = vld [vmem:[%s10192_s20 + $0x16c0] sm:$0xf]  ;;  %1044 = vst [vmem:[%s10199_s21 + $0x5a8] sm:$0xf] %v1043_v42 }
 0x104   : > { %1046 = vst [vmem:[%s10199_s21 + $0x5ac] sm:$0xf] %v1045_v43  ;;  %1048 = vst [vmem:[%s10199_s21 + $0x5b0] sm:$0xf] %v1047_v44  ;;  %v1049_v45 = vld [vmem:[%s10192_s20 + $0x16d0] sm:$0xf] }
 0x105   : > { %v1051_v46 = vld [vmem:[%s10192_s20 + $0x16e0] sm:$0xf]  ;;  %v1053_v47 = vld [vmem:[%s10192_s20 + $0x16f0] sm:$0xf]  ;;  %1050 = vst [vmem:[%s10199_s21 + $0x5b4] sm:$0xf] %v1049_v45 }
 0x106   : > { %1052 = vst [vmem:[%s10199_s21 + $0x5b8] sm:$0xf] %v1051_v46  ;;  %1054 = vst [vmem:[%s10199_s21 + $0x5bc] sm:$0xf] %v1053_v47  ;;  %v1055_v48 = vld [vmem:[%s10192_s20 + $0x1700] sm:$0xf] }
 0x107   : > { %v1057_v49 = vld [vmem:[%s10192_s20 + $0x1710] sm:$0xf]  ;;  %v1059_v50 = vld [vmem:[%s10192_s20 + $0x1720] sm:$0xf]  ;;  %1056 = vst [vmem:[%s10199_s21 + $0x5c0] sm:$0xf] %v1055_v48 }
 0x108   : > { %1058 = vst [vmem:[%s10199_s21 + $0x5c4] sm:$0xf] %v1057_v49  ;;  %1060 = vst [vmem:[%s10199_s21 + $0x5c8] sm:$0xf] %v1059_v50  ;;  %v1061_v51 = vld [vmem:[%s10192_s20 + $0x1730] sm:$0xf] }
 0x109   : > { %v1063_v52 = vld [vmem:[%s10192_s20 + $0x1740] sm:$0xf]  ;;  %v1065_v53 = vld [vmem:[%s10192_s20 + $0x1750] sm:$0xf]  ;;  %1062 = vst [vmem:[%s10199_s21 + $0x5cc] sm:$0xf] %v1061_v51 }
 0x10a   : > { %1064 = vst [vmem:[%s10199_s21 + $0x5d0] sm:$0xf] %v1063_v52  ;;  %1066 = vst [vmem:[%s10199_s21 + $0x5d4] sm:$0xf] %v1065_v53  ;;  %v1067_v54 = vld [vmem:[%s10192_s20 + $0x1760] sm:$0xf] }
 0x10b   : > { %v1069_v55 = vld [vmem:[%s10192_s20 + $0x1770] sm:$0xf]  ;;  %v1071_v56 = vld [vmem:[%s10192_s20 + $0x1780] sm:$0xf]  ;;  %1068 = vst [vmem:[%s10199_s21 + $0x5d8] sm:$0xf] %v1067_v54 }
 0x10c   : > { %1070 = vst [vmem:[%s10199_s21 + $0x5dc] sm:$0xf] %v1069_v55  ;;  %1072 = vst [vmem:[%s10199_s21 + $0x5e0] sm:$0xf] %v1071_v56  ;;  %v1073_v57 = vld [vmem:[%s10192_s20 + $0x1790] sm:$0xf] }
 0x10d   : > { %v1075_v58 = vld [vmem:[%s10192_s20 + $0x17a0] sm:$0xf]  ;;  %v1077_v59 = vld [vmem:[%s10192_s20 + $0x17b0] sm:$0xf]  ;;  %1074 = vst [vmem:[%s10199_s21 + $0x5e4] sm:$0xf] %v1073_v57 }
 0x10e   : > { %1076 = vst [vmem:[%s10199_s21 + $0x5e8] sm:$0xf] %v1075_v58  ;;  %1078 = vst [vmem:[%s10199_s21 + $0x5ec] sm:$0xf] %v1077_v59  ;;  %v1079_v60 = vld [vmem:[%s10192_s20 + $0x17c0] sm:$0xf] }
 0x10f   : > { %v1081_v61 = vld [vmem:[%s10192_s20 + $0x17d0] sm:$0xf]  ;;  %v1083_v62 = vld [vmem:[%s10192_s20 + $0x17e0] sm:$0xf]  ;;  %1080 = vst [vmem:[%s10199_s21 + $0x5f0] sm:$0xf] %v1079_v60 }
 0x110   : > { %1082 = vst [vmem:[%s10199_s21 + $0x5f4] sm:$0xf] %v1081_v61  ;;  %1084 = vst [vmem:[%s10199_s21 + $0x5f8] sm:$0xf] %v1083_v62  ;;  %v1085_v63 = vld [vmem:[%s10192_s20 + $0x17f0] sm:$0xf] }
 0x111   : > { %v1087_v0 = vld [vmem:[%s10192_s20 + $0x1800] sm:$0xf]  ;;  %v1089_v1 = vld [vmem:[%s10192_s20 + $0x1810] sm:$0xf]  ;;  %1086 = vst [vmem:[%s10199_s21 + $0x5fc] sm:$0xf] %v1085_v63 }
 0x112   : > { %1088 = vst [vmem:[%s10199_s21 + $0x600] sm:$0xf] %v1087_v0  ;;  %1090 = vst [vmem:[%s10199_s21 + $0x604] sm:$0xf] %v1089_v1  ;;  %v1091_v2 = vld [vmem:[%s10192_s20 + $0x1820] sm:$0xf] }
 0x113   : > { %v1093_v3 = vld [vmem:[%s10192_s20 + $0x1830] sm:$0xf]  ;;  %v1095_v4 = vld [vmem:[%s10192_s20 + $0x1840] sm:$0xf]  ;;  %1092 = vst [vmem:[%s10199_s21 + $0x608] sm:$0xf] %v1091_v2 }
 0x114   : > { %1094 = vst [vmem:[%s10199_s21 + $0x60c] sm:$0xf] %v1093_v3  ;;  %1096 = vst [vmem:[%s10199_s21 + $0x610] sm:$0xf] %v1095_v4  ;;  %v1097_v5 = vld [vmem:[%s10192_s20 + $0x1850] sm:$0xf] }
 0x115   : > { %v1099_v6 = vld [vmem:[%s10192_s20 + $0x1860] sm:$0xf]  ;;  %v1101_v7 = vld [vmem:[%s10192_s20 + $0x1870] sm:$0xf]  ;;  %1098 = vst [vmem:[%s10199_s21 + $0x614] sm:$0xf] %v1097_v5 }
 0x116   : > { %1100 = vst [vmem:[%s10199_s21 + $0x618] sm:$0xf] %v1099_v6  ;;  %1102 = vst [vmem:[%s10199_s21 + $0x61c] sm:$0xf] %v1101_v7  ;;  %v1103_v8 = vld [vmem:[%s10192_s20 + $0x1880] sm:$0xf] }
 0x117   : > { %v1105_v9 = vld [vmem:[%s10192_s20 + $0x1890] sm:$0xf]  ;;  %v1107_v10 = vld [vmem:[%s10192_s20 + $0x18a0] sm:$0xf]  ;;  %1104 = vst [vmem:[%s10199_s21 + $0x620] sm:$0xf] %v1103_v8 }
 0x118   : > { %1106 = vst [vmem:[%s10199_s21 + $0x624] sm:$0xf] %v1105_v9  ;;  %1108 = vst [vmem:[%s10199_s21 + $0x628] sm:$0xf] %v1107_v10  ;;  %v1109_v11 = vld [vmem:[%s10192_s20 + $0x18b0] sm:$0xf] }
 0x119   : > { %v1111_v12 = vld [vmem:[%s10192_s20 + $0x18c0] sm:$0xf]  ;;  %v1113_v13 = vld [vmem:[%s10192_s20 + $0x18d0] sm:$0xf]  ;;  %1110 = vst [vmem:[%s10199_s21 + $0x62c] sm:$0xf] %v1109_v11 }
 0x11a   : > { %1112 = vst [vmem:[%s10199_s21 + $0x630] sm:$0xf] %v1111_v12  ;;  %1114 = vst [vmem:[%s10199_s21 + $0x634] sm:$0xf] %v1113_v13  ;;  %v1115_v14 = vld [vmem:[%s10192_s20 + $0x18e0] sm:$0xf] }
 0x11b   : > { %v1117_v15 = vld [vmem:[%s10192_s20 + $0x18f0] sm:$0xf]  ;;  %v1119_v16 = vld [vmem:[%s10192_s20 + $0x1900] sm:$0xf]  ;;  %1116 = vst [vmem:[%s10199_s21 + $0x638] sm:$0xf] %v1115_v14 }
 0x11c   : > { %1118 = vst [vmem:[%s10199_s21 + $0x63c] sm:$0xf] %v1117_v15  ;;  %1120 = vst [vmem:[%s10199_s21 + $0x640] sm:$0xf] %v1119_v16  ;;  %v1121_v17 = vld [vmem:[%s10192_s20 + $0x1910] sm:$0xf] }
 0x11d   : > { %v1123_v18 = vld [vmem:[%s10192_s20 + $0x1920] sm:$0xf]  ;;  %v1125_v19 = vld [vmem:[%s10192_s20 + $0x1930] sm:$0xf]  ;;  %1122 = vst [vmem:[%s10199_s21 + $0x644] sm:$0xf] %v1121_v17 }
 0x11e   : > { %1124 = vst [vmem:[%s10199_s21 + $0x648] sm:$0xf] %v1123_v18  ;;  %1126 = vst [vmem:[%s10199_s21 + $0x64c] sm:$0xf] %v1125_v19  ;;  %v1127_v20 = vld [vmem:[%s10192_s20 + $0x1940] sm:$0xf] }
 0x11f   : > { %v1129_v21 = vld [vmem:[%s10192_s20 + $0x1950] sm:$0xf]  ;;  %v1131_v22 = vld [vmem:[%s10192_s20 + $0x1960] sm:$0xf]  ;;  %1128 = vst [vmem:[%s10199_s21 + $0x650] sm:$0xf] %v1127_v20 }
 0x120   : > { %1130 = vst [vmem:[%s10199_s21 + $0x654] sm:$0xf] %v1129_v21  ;;  %1132 = vst [vmem:[%s10199_s21 + $0x658] sm:$0xf] %v1131_v22  ;;  %v1133_v23 = vld [vmem:[%s10192_s20 + $0x1970] sm:$0xf] }
 0x121   : > { %v1135_v24 = vld [vmem:[%s10192_s20 + $0x1980] sm:$0xf]  ;;  %v1137_v25 = vld [vmem:[%s10192_s20 + $0x1990] sm:$0xf]  ;;  %1134 = vst [vmem:[%s10199_s21 + $0x65c] sm:$0xf] %v1133_v23 }
 0x122   : > { %1136 = vst [vmem:[%s10199_s21 + $0x660] sm:$0xf] %v1135_v24  ;;  %1138 = vst [vmem:[%s10199_s21 + $0x664] sm:$0xf] %v1137_v25  ;;  %v1139_v26 = vld [vmem:[%s10192_s20 + $0x19a0] sm:$0xf] }
 0x123   : > { %v1141_v27 = vld [vmem:[%s10192_s20 + $0x19b0] sm:$0xf]  ;;  %v1143_v28 = vld [vmem:[%s10192_s20 + $0x19c0] sm:$0xf]  ;;  %1140 = vst [vmem:[%s10199_s21 + $0x668] sm:$0xf] %v1139_v26 }
 0x124   : > { %1142 = vst [vmem:[%s10199_s21 + $0x66c] sm:$0xf] %v1141_v27  ;;  %1144 = vst [vmem:[%s10199_s21 + $0x670] sm:$0xf] %v1143_v28  ;;  %v1145_v29 = vld [vmem:[%s10192_s20 + $0x19d0] sm:$0xf] }
 0x125   : > { %v1147_v30 = vld [vmem:[%s10192_s20 + $0x19e0] sm:$0xf]  ;;  %v1149_v31 = vld [vmem:[%s10192_s20 + $0x19f0] sm:$0xf]  ;;  %1146 = vst [vmem:[%s10199_s21 + $0x674] sm:$0xf] %v1145_v29 }
 0x126   : > { %1148 = vst [vmem:[%s10199_s21 + $0x678] sm:$0xf] %v1147_v30  ;;  %1150 = vst [vmem:[%s10199_s21 + $0x67c] sm:$0xf] %v1149_v31  ;;  %v1151_v32 = vld [vmem:[%s10192_s20 + $0x1a00] sm:$0xf] }
 0x127   : > { %v1153_v33 = vld [vmem:[%s10192_s20 + $0x1a10] sm:$0xf]  ;;  %v1155_v34 = vld [vmem:[%s10192_s20 + $0x1a20] sm:$0xf]  ;;  %1152 = vst [vmem:[%s10199_s21 + $0x680] sm:$0xf] %v1151_v32 }
 0x128   : > { %1154 = vst [vmem:[%s10199_s21 + $0x684] sm:$0xf] %v1153_v33  ;;  %1156 = vst [vmem:[%s10199_s21 + $0x688] sm:$0xf] %v1155_v34  ;;  %v1157_v35 = vld [vmem:[%s10192_s20 + $0x1a30] sm:$0xf] }
 0x129   : > { %v1159_v36 = vld [vmem:[%s10192_s20 + $0x1a40] sm:$0xf]  ;;  %v1161_v37 = vld [vmem:[%s10192_s20 + $0x1a50] sm:$0xf]  ;;  %1158 = vst [vmem:[%s10199_s21 + $0x68c] sm:$0xf] %v1157_v35 }
 0x12a   : > { %1160 = vst [vmem:[%s10199_s21 + $0x690] sm:$0xf] %v1159_v36  ;;  %1162 = vst [vmem:[%s10199_s21 + $0x694] sm:$0xf] %v1161_v37  ;;  %v1163_v38 = vld [vmem:[%s10192_s20 + $0x1a60] sm:$0xf] }
 0x12b   : > { %v1165_v39 = vld [vmem:[%s10192_s20 + $0x1a70] sm:$0xf]  ;;  %v1167_v40 = vld [vmem:[%s10192_s20 + $0x1a80] sm:$0xf]  ;;  %1164 = vst [vmem:[%s10199_s21 + $0x698] sm:$0xf] %v1163_v38 }
 0x12c   : > { %1166 = vst [vmem:[%s10199_s21 + $0x69c] sm:$0xf] %v1165_v39  ;;  %1168 = vst [vmem:[%s10199_s21 + $0x6a0] sm:$0xf] %v1167_v40  ;;  %v1169_v41 = vld [vmem:[%s10192_s20 + $0x1a90] sm:$0xf] }
 0x12d   : > { %v1171_v42 = vld [vmem:[%s10192_s20 + $0x1aa0] sm:$0xf]  ;;  %v1173_v43 = vld [vmem:[%s10192_s20 + $0x1ab0] sm:$0xf]  ;;  %1170 = vst [vmem:[%s10199_s21 + $0x6a4] sm:$0xf] %v1169_v41 }
 0x12e   : > { %1172 = vst [vmem:[%s10199_s21 + $0x6a8] sm:$0xf] %v1171_v42  ;;  %1174 = vst [vmem:[%s10199_s21 + $0x6ac] sm:$0xf] %v1173_v43  ;;  %v1175_v44 = vld [vmem:[%s10192_s20 + $0x1ac0] sm:$0xf] }
 0x12f   : > { %v1177_v45 = vld [vmem:[%s10192_s20 + $0x1ad0] sm:$0xf]  ;;  %v1179_v46 = vld [vmem:[%s10192_s20 + $0x1ae0] sm:$0xf]  ;;  %1176 = vst [vmem:[%s10199_s21 + $0x6b0] sm:$0xf] %v1175_v44 }
 0x130   : > { %1178 = vst [vmem:[%s10199_s21 + $0x6b4] sm:$0xf] %v1177_v45  ;;  %1180 = vst [vmem:[%s10199_s21 + $0x6b8] sm:$0xf] %v1179_v46  ;;  %v1181_v47 = vld [vmem:[%s10192_s20 + $0x1af0] sm:$0xf] }
 0x131   : > { %v1183_v48 = vld [vmem:[%s10192_s20 + $0x1b00] sm:$0xf]  ;;  %v1185_v49 = vld [vmem:[%s10192_s20 + $0x1b10] sm:$0xf]  ;;  %1182 = vst [vmem:[%s10199_s21 + $0x6bc] sm:$0xf] %v1181_v47 }
 0x132   : > { %1184 = vst [vmem:[%s10199_s21 + $0x6c0] sm:$0xf] %v1183_v48  ;;  %1186 = vst [vmem:[%s10199_s21 + $0x6c4] sm:$0xf] %v1185_v49  ;;  %v1187_v50 = vld [vmem:[%s10192_s20 + $0x1b20] sm:$0xf] }
 0x133   : > { %v1189_v51 = vld [vmem:[%s10192_s20 + $0x1b30] sm:$0xf]  ;;  %v1191_v52 = vld [vmem:[%s10192_s20 + $0x1b40] sm:$0xf]  ;;  %1188 = vst [vmem:[%s10199_s21 + $0x6c8] sm:$0xf] %v1187_v50 }
 0x134   : > { %1190 = vst [vmem:[%s10199_s21 + $0x6cc] sm:$0xf] %v1189_v51  ;;  %1192 = vst [vmem:[%s10199_s21 + $0x6d0] sm:$0xf] %v1191_v52  ;;  %v1193_v53 = vld [vmem:[%s10192_s20 + $0x1b50] sm:$0xf] }
 0x135   : > { %v1195_v54 = vld [vmem:[%s10192_s20 + $0x1b60] sm:$0xf]  ;;  %v1197_v55 = vld [vmem:[%s10192_s20 + $0x1b70] sm:$0xf]  ;;  %1194 = vst [vmem:[%s10199_s21 + $0x6d4] sm:$0xf] %v1193_v53 }
 0x136   : > { %1196 = vst [vmem:[%s10199_s21 + $0x6d8] sm:$0xf] %v1195_v54  ;;  %1198 = vst [vmem:[%s10199_s21 + $0x6dc] sm:$0xf] %v1197_v55  ;;  %v1199_v56 = vld [vmem:[%s10192_s20 + $0x1b80] sm:$0xf] }
 0x137   : > { %v1201_v57 = vld [vmem:[%s10192_s20 + $0x1b90] sm:$0xf]  ;;  %v1203_v58 = vld [vmem:[%s10192_s20 + $0x1ba0] sm:$0xf]  ;;  %1200 = vst [vmem:[%s10199_s21 + $0x6e0] sm:$0xf] %v1199_v56 }
 0x138   : > { %1202 = vst [vmem:[%s10199_s21 + $0x6e4] sm:$0xf] %v1201_v57  ;;  %1204 = vst [vmem:[%s10199_s21 + $0x6e8] sm:$0xf] %v1203_v58  ;;  %v1205_v59 = vld [vmem:[%s10192_s20 + $0x1bb0] sm:$0xf] }
 0x139   : > { %v1207_v60 = vld [vmem:[%s10192_s20 + $0x1bc0] sm:$0xf]  ;;  %v1209_v61 = vld [vmem:[%s10192_s20 + $0x1bd0] sm:$0xf]  ;;  %1206 = vst [vmem:[%s10199_s21 + $0x6ec] sm:$0xf] %v1205_v59 }
 0x13a   : > { %1208 = vst [vmem:[%s10199_s21 + $0x6f0] sm:$0xf] %v1207_v60  ;;  %1210 = vst [vmem:[%s10199_s21 + $0x6f4] sm:$0xf] %v1209_v61  ;;  %v1211_v62 = vld [vmem:[%s10192_s20 + $0x1be0] sm:$0xf] }
 0x13b   : > { %v1213_v63 = vld [vmem:[%s10192_s20 + $0x1bf0] sm:$0xf]  ;;  %v1215_v0 = vld [vmem:[%s10192_s20 + $0x1c00] sm:$0xf]  ;;  %1212 = vst [vmem:[%s10199_s21 + $0x6f8] sm:$0xf] %v1211_v62 }
 0x13c   : > { %1214 = vst [vmem:[%s10199_s21 + $0x6fc] sm:$0xf] %v1213_v63  ;;  %1216 = vst [vmem:[%s10199_s21 + $0x700] sm:$0xf] %v1215_v0  ;;  %v1217_v1 = vld [vmem:[%s10192_s20 + $0x1c10] sm:$0xf] }
 0x13d   : > { %v1219_v2 = vld [vmem:[%s10192_s20 + $0x1c20] sm:$0xf]  ;;  %v1221_v3 = vld [vmem:[%s10192_s20 + $0x1c30] sm:$0xf]  ;;  %1218 = vst [vmem:[%s10199_s21 + $0x704] sm:$0xf] %v1217_v1 }
 0x13e   : > { %1220 = vst [vmem:[%s10199_s21 + $0x708] sm:$0xf] %v1219_v2  ;;  %1222 = vst [vmem:[%s10199_s21 + $0x70c] sm:$0xf] %v1221_v3  ;;  %v1223_v4 = vld [vmem:[%s10192_s20 + $0x1c40] sm:$0xf] }
 0x13f   : > { %v1225_v5 = vld [vmem:[%s10192_s20 + $0x1c50] sm:$0xf]  ;;  %v1227_v6 = vld [vmem:[%s10192_s20 + $0x1c60] sm:$0xf]  ;;  %1224 = vst [vmem:[%s10199_s21 + $0x710] sm:$0xf] %v1223_v4 }
 0x140   : > { %1226 = vst [vmem:[%s10199_s21 + $0x714] sm:$0xf] %v1225_v5  ;;  %1228 = vst [vmem:[%s10199_s21 + $0x718] sm:$0xf] %v1227_v6  ;;  %v1229_v7 = vld [vmem:[%s10192_s20 + $0x1c70] sm:$0xf] }
 0x141   : > { %v1231_v8 = vld [vmem:[%s10192_s20 + $0x1c80] sm:$0xf]  ;;  %v1233_v9 = vld [vmem:[%s10192_s20 + $0x1c90] sm:$0xf]  ;;  %1230 = vst [vmem:[%s10199_s21 + $0x71c] sm:$0xf] %v1229_v7 }
 0x142   : > { %1232 = vst [vmem:[%s10199_s21 + $0x720] sm:$0xf] %v1231_v8  ;;  %1234 = vst [vmem:[%s10199_s21 + $0x724] sm:$0xf] %v1233_v9  ;;  %v1235_v10 = vld [vmem:[%s10192_s20 + $0x1ca0] sm:$0xf] }
 0x143   : > { %v1237_v11 = vld [vmem:[%s10192_s20 + $0x1cb0] sm:$0xf]  ;;  %v1239_v12 = vld [vmem:[%s10192_s20 + $0x1cc0] sm:$0xf]  ;;  %1236 = vst [vmem:[%s10199_s21 + $0x728] sm:$0xf] %v1235_v10 }
 0x144   : > { %1238 = vst [vmem:[%s10199_s21 + $0x72c] sm:$0xf] %v1237_v11  ;;  %1240 = vst [vmem:[%s10199_s21 + $0x730] sm:$0xf] %v1239_v12  ;;  %v1241_v13 = vld [vmem:[%s10192_s20 + $0x1cd0] sm:$0xf] }
 0x145   : > { %v1243_v14 = vld [vmem:[%s10192_s20 + $0x1ce0] sm:$0xf]  ;;  %v1245_v15 = vld [vmem:[%s10192_s20 + $0x1cf0] sm:$0xf]  ;;  %1242 = vst [vmem:[%s10199_s21 + $0x734] sm:$0xf] %v1241_v13 }
 0x146   : > { %1244 = vst [vmem:[%s10199_s21 + $0x738] sm:$0xf] %v1243_v14  ;;  %1246 = vst [vmem:[%s10199_s21 + $0x73c] sm:$0xf] %v1245_v15  ;;  %v1247_v16 = vld [vmem:[%s10192_s20 + $0x1d00] sm:$0xf] }
 0x147   : > { %v1249_v17 = vld [vmem:[%s10192_s20 + $0x1d10] sm:$0xf]  ;;  %v1251_v18 = vld [vmem:[%s10192_s20 + $0x1d20] sm:$0xf]  ;;  %1248 = vst [vmem:[%s10199_s21 + $0x740] sm:$0xf] %v1247_v16 }
 0x148   : > { %1250 = vst [vmem:[%s10199_s21 + $0x744] sm:$0xf] %v1249_v17  ;;  %1252 = vst [vmem:[%s10199_s21 + $0x748] sm:$0xf] %v1251_v18  ;;  %v1253_v19 = vld [vmem:[%s10192_s20 + $0x1d30] sm:$0xf] }
 0x149   : > { %v1255_v20 = vld [vmem:[%s10192_s20 + $0x1d40] sm:$0xf]  ;;  %v1257_v21 = vld [vmem:[%s10192_s20 + $0x1d50] sm:$0xf]  ;;  %1254 = vst [vmem:[%s10199_s21 + $0x74c] sm:$0xf] %v1253_v19 }
 0x14a   : > { %1256 = vst [vmem:[%s10199_s21 + $0x750] sm:$0xf] %v1255_v20  ;;  %1258 = vst [vmem:[%s10199_s21 + $0x754] sm:$0xf] %v1257_v21  ;;  %v1259_v22 = vld [vmem:[%s10192_s20 + $0x1d60] sm:$0xf] }
 0x14b   : > { %v1261_v23 = vld [vmem:[%s10192_s20 + $0x1d70] sm:$0xf]  ;;  %v1263_v24 = vld [vmem:[%s10192_s20 + $0x1d80] sm:$0xf]  ;;  %1260 = vst [vmem:[%s10199_s21 + $0x758] sm:$0xf] %v1259_v22 }
 0x14c   : > { %1262 = vst [vmem:[%s10199_s21 + $0x75c] sm:$0xf] %v1261_v23  ;;  %1264 = vst [vmem:[%s10199_s21 + $0x760] sm:$0xf] %v1263_v24  ;;  %v1265_v25 = vld [vmem:[%s10192_s20 + $0x1d90] sm:$0xf] }
 0x14d   : > { %v1267_v26 = vld [vmem:[%s10192_s20 + $0x1da0] sm:$0xf]  ;;  %v1269_v27 = vld [vmem:[%s10192_s20 + $0x1db0] sm:$0xf]  ;;  %1266 = vst [vmem:[%s10199_s21 + $0x764] sm:$0xf] %v1265_v25 }
 0x14e   : > { %1268 = vst [vmem:[%s10199_s21 + $0x768] sm:$0xf] %v1267_v26  ;;  %1270 = vst [vmem:[%s10199_s21 + $0x76c] sm:$0xf] %v1269_v27  ;;  %v1271_v28 = vld [vmem:[%s10192_s20 + $0x1dc0] sm:$0xf] }
 0x14f   : > { %v1273_v29 = vld [vmem:[%s10192_s20 + $0x1dd0] sm:$0xf]  ;;  %v1275_v30 = vld [vmem:[%s10192_s20 + $0x1de0] sm:$0xf]  ;;  %1272 = vst [vmem:[%s10199_s21 + $0x770] sm:$0xf] %v1271_v28 }
 0x150   : > { %1274 = vst [vmem:[%s10199_s21 + $0x774] sm:$0xf] %v1273_v29  ;;  %1276 = vst [vmem:[%s10199_s21 + $0x778] sm:$0xf] %v1275_v30  ;;  %v1277_v31 = vld [vmem:[%s10192_s20 + $0x1df0] sm:$0xf] }
 0x151   : > { %v1279_v32 = vld [vmem:[%s10192_s20 + $0x1e00] sm:$0xf]  ;;  %v1281_v33 = vld [vmem:[%s10192_s20 + $0x1e10] sm:$0xf]  ;;  %1278 = vst [vmem:[%s10199_s21 + $0x77c] sm:$0xf] %v1277_v31 }
 0x152   : > { %1280 = vst [vmem:[%s10199_s21 + $0x780] sm:$0xf] %v1279_v32  ;;  %1282 = vst [vmem:[%s10199_s21 + $0x784] sm:$0xf] %v1281_v33  ;;  %v1283_v34 = vld [vmem:[%s10192_s20 + $0x1e20] sm:$0xf] }
 0x153   : > { %v1285_v35 = vld [vmem:[%s10192_s20 + $0x1e30] sm:$0xf]  ;;  %v1287_v36 = vld [vmem:[%s10192_s20 + $0x1e40] sm:$0xf]  ;;  %1284 = vst [vmem:[%s10199_s21 + $0x788] sm:$0xf] %v1283_v34 }
 0x154   : > { %1286 = vst [vmem:[%s10199_s21 + $0x78c] sm:$0xf] %v1285_v35  ;;  %1288 = vst [vmem:[%s10199_s21 + $0x790] sm:$0xf] %v1287_v36  ;;  %v1289_v37 = vld [vmem:[%s10192_s20 + $0x1e50] sm:$0xf] }
 0x155   : > { %v1291_v38 = vld [vmem:[%s10192_s20 + $0x1e60] sm:$0xf]  ;;  %v1293_v39 = vld [vmem:[%s10192_s20 + $0x1e70] sm:$0xf]  ;;  %1290 = vst [vmem:[%s10199_s21 + $0x794] sm:$0xf] %v1289_v37 }
 0x156   : > { %1292 = vst [vmem:[%s10199_s21 + $0x798] sm:$0xf] %v1291_v38  ;;  %1294 = vst [vmem:[%s10199_s21 + $0x79c] sm:$0xf] %v1293_v39  ;;  %v1295_v40 = vld [vmem:[%s10192_s20 + $0x1e80] sm:$0xf] }
 0x157   : > { %v1297_v41 = vld [vmem:[%s10192_s20 + $0x1e90] sm:$0xf]  ;;  %v1299_v42 = vld [vmem:[%s10192_s20 + $0x1ea0] sm:$0xf]  ;;  %1296 = vst [vmem:[%s10199_s21 + $0x7a0] sm:$0xf] %v1295_v40 }
 0x158   : > { %1298 = vst [vmem:[%s10199_s21 + $0x7a4] sm:$0xf] %v1297_v41  ;;  %1300 = vst [vmem:[%s10199_s21 + $0x7a8] sm:$0xf] %v1299_v42  ;;  %v1301_v43 = vld [vmem:[%s10192_s20 + $0x1eb0] sm:$0xf] }
 0x159   : > { %v1303_v44 = vld [vmem:[%s10192_s20 + $0x1ec0] sm:$0xf]  ;;  %v1305_v45 = vld [vmem:[%s10192_s20 + $0x1ed0] sm:$0xf]  ;;  %1302 = vst [vmem:[%s10199_s21 + $0x7ac] sm:$0xf] %v1301_v43 }
 0x15a   : > { %1304 = vst [vmem:[%s10199_s21 + $0x7b0] sm:$0xf] %v1303_v44  ;;  %1306 = vst [vmem:[%s10199_s21 + $0x7b4] sm:$0xf] %v1305_v45  ;;  %v1307_v46 = vld [vmem:[%s10192_s20 + $0x1ee0] sm:$0xf] }
 0x15b   : > { %v1309_v47 = vld [vmem:[%s10192_s20 + $0x1ef0] sm:$0xf]  ;;  %v1311_v48 = vld [vmem:[%s10192_s20 + $0x1f00] sm:$0xf]  ;;  %1308 = vst [vmem:[%s10199_s21 + $0x7b8] sm:$0xf] %v1307_v46 }
 0x15c   : > { %1310 = vst [vmem:[%s10199_s21 + $0x7bc] sm:$0xf] %v1309_v47  ;;  %1312 = vst [vmem:[%s10199_s21 + $0x7c0] sm:$0xf] %v1311_v48  ;;  %v1313_v49 = vld [vmem:[%s10192_s20 + $0x1f10] sm:$0xf] }
 0x15d   : > { %v1315_v50 = vld [vmem:[%s10192_s20 + $0x1f20] sm:$0xf]  ;;  %v1317_v51 = vld [vmem:[%s10192_s20 + $0x1f30] sm:$0xf]  ;;  %1314 = vst [vmem:[%s10199_s21 + $0x7c4] sm:$0xf] %v1313_v49 }
 0x15e   : > { %1316 = vst [vmem:[%s10199_s21 + $0x7c8] sm:$0xf] %v1315_v50  ;;  %1318 = vst [vmem:[%s10199_s21 + $0x7cc] sm:$0xf] %v1317_v51  ;;  %v1319_v52 = vld [vmem:[%s10192_s20 + $0x1f40] sm:$0xf] }
 0x15f   : > { %v1321_v53 = vld [vmem:[%s10192_s20 + $0x1f50] sm:$0xf]  ;;  %v1323_v54 = vld [vmem:[%s10192_s20 + $0x1f60] sm:$0xf]  ;;  %1320 = vst [vmem:[%s10199_s21 + $0x7d0] sm:$0xf] %v1319_v52 }
 0x160   : > { %1322 = vst [vmem:[%s10199_s21 + $0x7d4] sm:$0xf] %v1321_v53  ;;  %1324 = vst [vmem:[%s10199_s21 + $0x7d8] sm:$0xf] %v1323_v54  ;;  %v1325_v55 = vld [vmem:[%s10192_s20 + $0x1f70] sm:$0xf] }
 0x161   : > { %v1327_v56 = vld [vmem:[%s10192_s20 + $0x1f80] sm:$0xf]  ;;  %v1329_v57 = vld [vmem:[%s10192_s20 + $0x1f90] sm:$0xf]  ;;  %1326 = vst [vmem:[%s10199_s21 + $0x7dc] sm:$0xf] %v1325_v55 }
 0x162   : > { %1328 = vst [vmem:[%s10199_s21 + $0x7e0] sm:$0xf] %v1327_v56  ;;  %1330 = vst [vmem:[%s10199_s21 + $0x7e4] sm:$0xf] %v1329_v57  ;;  %v1331_v58 = vld [vmem:[%s10192_s20 + $0x1fa0] sm:$0xf] }
 0x163   : > { %v1333_v59 = vld [vmem:[%s10192_s20 + $0x1fb0] sm:$0xf]  ;;  %v1335_v60 = vld [vmem:[%s10192_s20 + $0x1fc0] sm:$0xf]  ;;  %1332 = vst [vmem:[%s10199_s21 + $0x7e8] sm:$0xf] %v1331_v58 }
 0x164   : > { %1334 = vst [vmem:[%s10199_s21 + $0x7ec] sm:$0xf] %v1333_v59  ;;  %1336 = vst [vmem:[%s10199_s21 + $0x7f0] sm:$0xf] %v1335_v60  ;;  %v1337_v61 = vld [vmem:[%s10192_s20 + $0x1fd0] sm:$0xf] }
 0x165   : > { %v1339_v62 = vld [vmem:[%s10192_s20 + $0x1fe0] sm:$0xf]  ;;  %v1341_v63 = vld [vmem:[%s10192_s20 + $0x1ff0] sm:$0xf]  ;;  %1338 = vst [vmem:[%s10199_s21 + $0x7f4] sm:$0xf] %v1337_v61 }
 0x166   : > { %1340 = vst [vmem:[%s10199_s21 + $0x7f8] sm:$0xf] %v1339_v62  ;;  %1342 = vst [vmem:[%s10199_s21 + $0x7fc] sm:$0xf] %v1341_v63  ;;  %v1343_v0 = vld [vmem:[%s10192_s20 + $0x2000] sm:$0xf] }
 0x167   : > { %v1345_v1 = vld [vmem:[%s10192_s20 + $0x2010] sm:$0xf]  ;;  %v1347_v2 = vld [vmem:[%s10192_s20 + $0x2020] sm:$0xf]  ;;  %1344 = vst [vmem:[%s10199_s21 + $0x800] sm:$0xf] %v1343_v0 }
 0x168   : > { %1346 = vst [vmem:[%s10199_s21 + $0x804] sm:$0xf] %v1345_v1  ;;  %1348 = vst [vmem:[%s10199_s21 + $0x808] sm:$0xf] %v1347_v2  ;;  %v1349_v3 = vld [vmem:[%s10192_s20 + $0x2030] sm:$0xf] }
 0x169   : > { %v1351_v4 = vld [vmem:[%s10192_s20 + $0x2040] sm:$0xf]  ;;  %v1353_v5 = vld [vmem:[%s10192_s20 + $0x2050] sm:$0xf]  ;;  %1350 = vst [vmem:[%s10199_s21 + $0x80c] sm:$0xf] %v1349_v3 }
 0x16a   : > { %1352 = vst [vmem:[%s10199_s21 + $0x810] sm:$0xf] %v1351_v4  ;;  %1354 = vst [vmem:[%s10199_s21 + $0x814] sm:$0xf] %v1353_v5  ;;  %v1355_v6 = vld [vmem:[%s10192_s20 + $0x2060] sm:$0xf] }
 0x16b   : > { %v1357_v7 = vld [vmem:[%s10192_s20 + $0x2070] sm:$0xf]  ;;  %v1359_v8 = vld [vmem:[%s10192_s20 + $0x2080] sm:$0xf]  ;;  %1356 = vst [vmem:[%s10199_s21 + $0x818] sm:$0xf] %v1355_v6 }
 0x16c   : > { %1358 = vst [vmem:[%s10199_s21 + $0x81c] sm:$0xf] %v1357_v7  ;;  %1360 = vst [vmem:[%s10199_s21 + $0x820] sm:$0xf] %v1359_v8  ;;  %v1361_v9 = vld [vmem:[%s10192_s20 + $0x2090] sm:$0xf] }
 0x16d   : > { %v1363_v10 = vld [vmem:[%s10192_s20 + $0x20a0] sm:$0xf]  ;;  %v1365_v11 = vld [vmem:[%s10192_s20 + $0x20b0] sm:$0xf]  ;;  %1362 = vst [vmem:[%s10199_s21 + $0x824] sm:$0xf] %v1361_v9 }
 0x16e   : > { %1364 = vst [vmem:[%s10199_s21 + $0x828] sm:$0xf] %v1363_v10  ;;  %1366 = vst [vmem:[%s10199_s21 + $0x82c] sm:$0xf] %v1365_v11  ;;  %v1367_v12 = vld [vmem:[%s10192_s20 + $0x20c0] sm:$0xf] }
 0x16f   : > { %v1369_v13 = vld [vmem:[%s10192_s20 + $0x20d0] sm:$0xf]  ;;  %v1371_v14 = vld [vmem:[%s10192_s20 + $0x20e0] sm:$0xf]  ;;  %1368 = vst [vmem:[%s10199_s21 + $0x830] sm:$0xf] %v1367_v12 }
 0x170   : > { %1370 = vst [vmem:[%s10199_s21 + $0x834] sm:$0xf] %v1369_v13  ;;  %1372 = vst [vmem:[%s10199_s21 + $0x838] sm:$0xf] %v1371_v14  ;;  %v1373_v15 = vld [vmem:[%s10192_s20 + $0x20f0] sm:$0xf] }
 0x171   : > { %v1375_v16 = vld [vmem:[%s10192_s20 + $0x2100] sm:$0xf]  ;;  %v1377_v17 = vld [vmem:[%s10192_s20 + $0x2110] sm:$0xf]  ;;  %1374 = vst [vmem:[%s10199_s21 + $0x83c] sm:$0xf] %v1373_v15 }
 0x172   : > { %1376 = vst [vmem:[%s10199_s21 + $0x840] sm:$0xf] %v1375_v16  ;;  %1378 = vst [vmem:[%s10199_s21 + $0x844] sm:$0xf] %v1377_v17  ;;  %v1379_v18 = vld [vmem:[%s10192_s20 + $0x2120] sm:$0xf] }
 0x173   : > { %v1381_v19 = vld [vmem:[%s10192_s20 + $0x2130] sm:$0xf]  ;;  %v1383_v20 = vld [vmem:[%s10192_s20 + $0x2140] sm:$0xf]  ;;  %1380 = vst [vmem:[%s10199_s21 + $0x848] sm:$0xf] %v1379_v18 }
 0x174   : > { %1382 = vst [vmem:[%s10199_s21 + $0x84c] sm:$0xf] %v1381_v19  ;;  %1384 = vst [vmem:[%s10199_s21 + $0x850] sm:$0xf] %v1383_v20  ;;  %v1385_v21 = vld [vmem:[%s10192_s20 + $0x2150] sm:$0xf] }
 0x175   : > { %v1387_v22 = vld [vmem:[%s10192_s20 + $0x2160] sm:$0xf]  ;;  %v1389_v23 = vld [vmem:[%s10192_s20 + $0x2170] sm:$0xf]  ;;  %1386 = vst [vmem:[%s10199_s21 + $0x854] sm:$0xf] %v1385_v21 }
 0x176   : > { %1388 = vst [vmem:[%s10199_s21 + $0x858] sm:$0xf] %v1387_v22  ;;  %1390 = vst [vmem:[%s10199_s21 + $0x85c] sm:$0xf] %v1389_v23  ;;  %v1391_v24 = vld [vmem:[%s10192_s20 + $0x2180] sm:$0xf] }
 0x177   : > { %v1393_v25 = vld [vmem:[%s10192_s20 + $0x2190] sm:$0xf]  ;;  %v1395_v26 = vld [vmem:[%s10192_s20 + $0x21a0] sm:$0xf]  ;;  %1392 = vst [vmem:[%s10199_s21 + $0x860] sm:$0xf] %v1391_v24 }
 0x178   : > { %1394 = vst [vmem:[%s10199_s21 + $0x864] sm:$0xf] %v1393_v25  ;;  %1396 = vst [vmem:[%s10199_s21 + $0x868] sm:$0xf] %v1395_v26  ;;  %v1397_v27 = vld [vmem:[%s10192_s20 + $0x21b0] sm:$0xf] }
 0x179   : > { %v1399_v28 = vld [vmem:[%s10192_s20 + $0x21c0] sm:$0xf]  ;;  %v1401_v29 = vld [vmem:[%s10192_s20 + $0x21d0] sm:$0xf]  ;;  %1398 = vst [vmem:[%s10199_s21 + $0x86c] sm:$0xf] %v1397_v27 }
 0x17a   : > { %1400 = vst [vmem:[%s10199_s21 + $0x870] sm:$0xf] %v1399_v28  ;;  %1402 = vst [vmem:[%s10199_s21 + $0x874] sm:$0xf] %v1401_v29  ;;  %v1403_v30 = vld [vmem:[%s10192_s20 + $0x21e0] sm:$0xf] }
 0x17b   : > { %v1405_v31 = vld [vmem:[%s10192_s20 + $0x21f0] sm:$0xf]  ;;  %v1407_v32 = vld [vmem:[%s10192_s20 + $0x2200] sm:$0xf]  ;;  %1404 = vst [vmem:[%s10199_s21 + $0x878] sm:$0xf] %v1403_v30 }
 0x17c   : > { %1406 = vst [vmem:[%s10199_s21 + $0x87c] sm:$0xf] %v1405_v31  ;;  %1408 = vst [vmem:[%s10199_s21 + $0x880] sm:$0xf] %v1407_v32  ;;  %v1409_v33 = vld [vmem:[%s10192_s20 + $0x2210] sm:$0xf] }
 0x17d   : > { %v1411_v34 = vld [vmem:[%s10192_s20 + $0x2220] sm:$0xf]  ;;  %v1413_v35 = vld [vmem:[%s10192_s20 + $0x2230] sm:$0xf]  ;;  %1410 = vst [vmem:[%s10199_s21 + $0x884] sm:$0xf] %v1409_v33 }
 0x17e   : > { %1412 = vst [vmem:[%s10199_s21 + $0x888] sm:$0xf] %v1411_v34  ;;  %1414 = vst [vmem:[%s10199_s21 + $0x88c] sm:$0xf] %v1413_v35  ;;  %v1415_v36 = vld [vmem:[%s10192_s20 + $0x2240] sm:$0xf] }
 0x17f   : > { %v1417_v37 = vld [vmem:[%s10192_s20 + $0x2250] sm:$0xf]  ;;  %v1419_v38 = vld [vmem:[%s10192_s20 + $0x2260] sm:$0xf]  ;;  %1416 = vst [vmem:[%s10199_s21 + $0x890] sm:$0xf] %v1415_v36 }
 0x180   : > { %1418 = vst [vmem:[%s10199_s21 + $0x894] sm:$0xf] %v1417_v37  ;;  %1420 = vst [vmem:[%s10199_s21 + $0x898] sm:$0xf] %v1419_v38  ;;  %v1421_v39 = vld [vmem:[%s10192_s20 + $0x2270] sm:$0xf] }
 0x181   : > { %v1423_v40 = vld [vmem:[%s10192_s20 + $0x2280] sm:$0xf]  ;;  %v1425_v41 = vld [vmem:[%s10192_s20 + $0x2290] sm:$0xf]  ;;  %1422 = vst [vmem:[%s10199_s21 + $0x89c] sm:$0xf] %v1421_v39 }
 0x182   : > { %1424 = vst [vmem:[%s10199_s21 + $0x8a0] sm:$0xf] %v1423_v40  ;;  %1426 = vst [vmem:[%s10199_s21 + $0x8a4] sm:$0xf] %v1425_v41  ;;  %v1427_v42 = vld [vmem:[%s10192_s20 + $0x22a0] sm:$0xf] }
 0x183   : > { %v1429_v43 = vld [vmem:[%s10192_s20 + $0x22b0] sm:$0xf]  ;;  %v1431_v44 = vld [vmem:[%s10192_s20 + $0x22c0] sm:$0xf]  ;;  %1428 = vst [vmem:[%s10199_s21 + $0x8a8] sm:$0xf] %v1427_v42 }
 0x184   : > { %1430 = vst [vmem:[%s10199_s21 + $0x8ac] sm:$0xf] %v1429_v43  ;;  %1432 = vst [vmem:[%s10199_s21 + $0x8b0] sm:$0xf] %v1431_v44  ;;  %v1433_v45 = vld [vmem:[%s10192_s20 + $0x22d0] sm:$0xf] }
 0x185   : > { %v1435_v46 = vld [vmem:[%s10192_s20 + $0x22e0] sm:$0xf]  ;;  %v1437_v47 = vld [vmem:[%s10192_s20 + $0x22f0] sm:$0xf]  ;;  %1434 = vst [vmem:[%s10199_s21 + $0x8b4] sm:$0xf] %v1433_v45 }
 0x186   : > { %1436 = vst [vmem:[%s10199_s21 + $0x8b8] sm:$0xf] %v1435_v46  ;;  %1438 = vst [vmem:[%s10199_s21 + $0x8bc] sm:$0xf] %v1437_v47  ;;  %v1439_v48 = vld [vmem:[%s10192_s20 + $0x2300] sm:$0xf] }
 0x187   : > { %v1441_v49 = vld [vmem:[%s10192_s20 + $0x2310] sm:$0xf]  ;;  %v1443_v50 = vld [vmem:[%s10192_s20 + $0x2320] sm:$0xf]  ;;  %1440 = vst [vmem:[%s10199_s21 + $0x8c0] sm:$0xf] %v1439_v48 }
 0x188   : > { %1442 = vst [vmem:[%s10199_s21 + $0x8c4] sm:$0xf] %v1441_v49  ;;  %1444 = vst [vmem:[%s10199_s21 + $0x8c8] sm:$0xf] %v1443_v50  ;;  %v1445_v51 = vld [vmem:[%s10192_s20 + $0x2330] sm:$0xf] }
 0x189   : > { %v1447_v52 = vld [vmem:[%s10192_s20 + $0x2340] sm:$0xf]  ;;  %v1449_v53 = vld [vmem:[%s10192_s20 + $0x2350] sm:$0xf]  ;;  %1446 = vst [vmem:[%s10199_s21 + $0x8cc] sm:$0xf] %v1445_v51 }
 0x18a   : > { %1448 = vst [vmem:[%s10199_s21 + $0x8d0] sm:$0xf] %v1447_v52  ;;  %1450 = vst [vmem:[%s10199_s21 + $0x8d4] sm:$0xf] %v1449_v53  ;;  %v1451_v54 = vld [vmem:[%s10192_s20 + $0x2360] sm:$0xf] }
 0x18b   : > { %v1453_v55 = vld [vmem:[%s10192_s20 + $0x2370] sm:$0xf]  ;;  %v1455_v56 = vld [vmem:[%s10192_s20 + $0x2380] sm:$0xf]  ;;  %1452 = vst [vmem:[%s10199_s21 + $0x8d8] sm:$0xf] %v1451_v54 }
 0x18c   : > { %1454 = vst [vmem:[%s10199_s21 + $0x8dc] sm:$0xf] %v1453_v55  ;;  %1456 = vst [vmem:[%s10199_s21 + $0x8e0] sm:$0xf] %v1455_v56  ;;  %v1457_v57 = vld [vmem:[%s10192_s20 + $0x2390] sm:$0xf] }
 0x18d   : > { %v1459_v58 = vld [vmem:[%s10192_s20 + $0x23a0] sm:$0xf]  ;;  %v1461_v59 = vld [vmem:[%s10192_s20 + $0x23b0] sm:$0xf]  ;;  %1458 = vst [vmem:[%s10199_s21 + $0x8e4] sm:$0xf] %v1457_v57 }
 0x18e   : > { %1460 = vst [vmem:[%s10199_s21 + $0x8e8] sm:$0xf] %v1459_v58  ;;  %1462 = vst [vmem:[%s10199_s21 + $0x8ec] sm:$0xf] %v1461_v59  ;;  %v1463_v60 = vld [vmem:[%s10192_s20 + $0x23c0] sm:$0xf] }
 0x18f   : > { %v1465_v61 = vld [vmem:[%s10192_s20 + $0x23d0] sm:$0xf]  ;;  %v1467_v62 = vld [vmem:[%s10192_s20 + $0x23e0] sm:$0xf]  ;;  %1464 = vst [vmem:[%s10199_s21 + $0x8f0] sm:$0xf] %v1463_v60 }
 0x190   : > { %1466 = vst [vmem:[%s10199_s21 + $0x8f4] sm:$0xf] %v1465_v61  ;;  %1468 = vst [vmem:[%s10199_s21 + $0x8f8] sm:$0xf] %v1467_v62  ;;  %v1469_v63 = vld [vmem:[%s10192_s20 + $0x23f0] sm:$0xf] }
 0x191   : > { %1470 = vst [vmem:[%s10199_s21 + $0x8fc] sm:$0xf] %v1469_v63 }
 0x192 PF: > { %4991 = sbr.rel (!%p10174_p3) target bundleno = 427 (0x1ab), region = 88  ;;  %s4993_s22 = sand.u32 (%p10174_p3), 1, %s10083_s28  }
 0x193   : > { %s8973_s23 = sshll.u32 (%p10174_p3), %s10091_s30, 2  ;;  %s8972_s24 = sshll.u32 (%p10174_p3), %s4993_s22, 7 }
 0x194   : > { %s11355_s12 = scalar_lea.vmem (%p10174_p3), %s11862_s5, %s8973_s23  ;;  %s11359_s11 = scalar_lea.vmem (%p10174_p3), [#allocation3], %s8972_s24 }
 0x195   : > { %v5013_v0 = vld [vmem:[%s11355_s12] sm:$0xf] (%p10174_p3)  ;;  %v5015_v1 = vld [vmem:[%s11355_s12 + $0x10] sm:$0xf] (%p10174_p3) }
 0x196   : > { %5014 = vst [vmem:[%s11359_s11] sm:$0xf] (%p10174_p3), %v5013_v0  ;;  %5016 = vst [vmem:[%s11359_s11 + $0x4] sm:$0xf] (%p10174_p3), %v5015_v1  ;;  %v5017_v2 = vld [vmem:[%s11355_s12 + $0x20] sm:$0xf] (%p10174_p3) }
 0x197   : > { %v5019_v3 = vld [vmem:[%s11355_s12 + $0x30] sm:$0xf] (%p10174_p3)  ;;  %v5021_v4 = vld [vmem:[%s11355_s12 + $0x40] sm:$0xf] (%p10174_p3)  ;;  %5018 = vst [vmem:[%s11359_s11 + $0x8] sm:$0xf] (%p10174_p3), %v5017_v2 }
 0x198   : > { %5020 = vst [vmem:[%s11359_s11 + $0xc] sm:$0xf] (%p10174_p3), %v5019_v3  ;;  %5022 = vst [vmem:[%s11359_s11 + $0x10] sm:$0xf] (%p10174_p3), %v5021_v4  ;;  %v5023_v5 = vld [vmem:[%s11355_s12 + $0x50] sm:$0xf] (%p10174_p3) }
 0x199   : > { %v5025_v6 = vld [vmem:[%s11355_s12 + $0x60] sm:$0xf]  ;;  %v5027_v7 = vld [vmem:[%s11355_s12 + $0x70] sm:$0xf]  ;;  %5024 = vst [vmem:[%s11359_s11 + $0x14] sm:$0xf] %v5023_v5 }
 0x19a   : > { %5026 = vst [vmem:[%s11359_s11 + $0x18] sm:$0xf] %v5025_v6  ;;  %5028 = vst [vmem:[%s11359_s11 + $0x1c] sm:$0xf] %v5027_v7  ;;  %v5029_v8 = vld [vmem:[%s11355_s12 + $0x80] sm:$0xf] }
 0x19b   : > { %v5031_v9 = vld [vmem:[%s11355_s12 + $0x90] sm:$0xf]  ;;  %v5033_v10 = vld [vmem:[%s11355_s12 + $0xa0] sm:$0xf]  ;;  %5030 = vst [vmem:[%s11359_s11 + $0x20] sm:$0xf] %v5029_v8 }
 0x19c   : > { %5032 = vst [vmem:[%s11359_s11 + $0x24] sm:$0xf] %v5031_v9  ;;  %5034 = vst [vmem:[%s11359_s11 + $0x28] sm:$0xf] %v5033_v10  ;;  %v5035_v11 = vld [vmem:[%s11355_s12 + $0xb0] sm:$0xf] }
 0x19d   : > { %v5037_v12 = vld [vmem:[%s11355_s12 + $0xc0] sm:$0xf]  ;;  %v5039_v13 = vld [vmem:[%s11355_s12 + $0xd0] sm:$0xf]  ;;  %5036 = vst [vmem:[%s11359_s11 + $0x2c] sm:$0xf] %v5035_v11 }
 0x19e   : > { %5038 = vst [vmem:[%s11359_s11 + $0x30] sm:$0xf] %v5037_v12  ;;  %5040 = vst [vmem:[%s11359_s11 + $0x34] sm:$0xf] %v5039_v13  ;;  %v5041_v14 = vld [vmem:[%s11355_s12 + $0xe0] sm:$0xf] }
 0x19f   : > { %v5043_v15 = vld [vmem:[%s11355_s12 + $0xf0] sm:$0xf]  ;;  %v5045_v16 = vld [vmem:[%s11355_s12 + $0x100] sm:$0xf]  ;;  %5042 = vst [vmem:[%s11359_s11 + $0x38] sm:$0xf] %v5041_v14 }
 0x1a0   : > { %5044 = vst [vmem:[%s11359_s11 + $0x3c] sm:$0xf] %v5043_v15  ;;  %5046 = vst [vmem:[%s11359_s11 + $0x40] sm:$0xf] %v5045_v16  ;;  %v5047_v17 = vld [vmem:[%s11355_s12 + $0x110] sm:$0xf] }
 0x1a1   : > { %v5049_v18 = vld [vmem:[%s11355_s12 + $0x120] sm:$0xf]  ;;  %v5051_v19 = vld [vmem:[%s11355_s12 + $0x130] sm:$0xf]  ;;  %5048 = vst [vmem:[%s11359_s11 + $0x44] sm:$0xf] %v5047_v17 }
 0x1a2   : > { %5050 = vst [vmem:[%s11359_s11 + $0x48] sm:$0xf] %v5049_v18  ;;  %5052 = vst [vmem:[%s11359_s11 + $0x4c] sm:$0xf] %v5051_v19  ;;  %v5053_v20 = vld [vmem:[%s11355_s12 + $0x140] sm:$0xf] }
 0x1a3   : > { %v5055_v21 = vld [vmem:[%s11355_s12 + $0x150] sm:$0xf]  ;;  %v5057_v22 = vld [vmem:[%s11355_s12 + $0x160] sm:$0xf]  ;;  %5054 = vst [vmem:[%s11359_s11 + $0x50] sm:$0xf] %v5053_v20 }
 0x1a4   : > { %5056 = vst [vmem:[%s11359_s11 + $0x54] sm:$0xf] %v5055_v21  ;;  %5058 = vst [vmem:[%s11359_s11 + $0x58] sm:$0xf] %v5057_v22  ;;  %v5059_v23 = vld [vmem:[%s11355_s12 + $0x170] sm:$0xf] }
 0x1a5   : > { %v5061_v24 = vld [vmem:[%s11355_s12 + $0x180] sm:$0xf]  ;;  %v5063_v25 = vld [vmem:[%s11355_s12 + $0x190] sm:$0xf]  ;;  %5060 = vst [vmem:[%s11359_s11 + $0x5c] sm:$0xf] %v5059_v23 }
 0x1a6   : > { %5062 = vst [vmem:[%s11359_s11 + $0x60] sm:$0xf] %v5061_v24  ;;  %5064 = vst [vmem:[%s11359_s11 + $0x64] sm:$0xf] %v5063_v25  ;;  %v5065_v26 = vld [vmem:[%s11355_s12 + $0x1a0] sm:$0xf] }
 0x1a7   : > { %v5067_v27 = vld [vmem:[%s11355_s12 + $0x1b0] sm:$0xf]  ;;  %v5069_v28 = vld [vmem:[%s11355_s12 + $0x1c0] sm:$0xf]  ;;  %5066 = vst [vmem:[%s11359_s11 + $0x68] sm:$0xf] %v5065_v26 }
 0x1a8   : > { %5068 = vst [vmem:[%s11359_s11 + $0x6c] sm:$0xf] %v5067_v27  ;;  %5070 = vst [vmem:[%s11359_s11 + $0x70] sm:$0xf] %v5069_v28  ;;  %v5071_v29 = vld [vmem:[%s11355_s12 + $0x1d0] sm:$0xf] }
 0x1a9   : > { %v5073_v30 = vld [vmem:[%s11355_s12 + $0x1e0] sm:$0xf]  ;;  %v5075_v31 = vld [vmem:[%s11355_s12 + $0x1f0] sm:$0xf]  ;;  %5072 = vst [vmem:[%s11359_s11 + $0x74] sm:$0xf] %v5071_v29 }
 0x1aa   : > { %5074 = vst [vmem:[%s11359_s11 + $0x78] sm:$0xf] %v5073_v30  ;;  %5076 = vst [vmem:[%s11359_s11 + $0x7c] sm:$0xf] %v5075_v31 }
 0x1ab PF: > { %p8974_p6 = scmp.ge.s32.totalorder %s10095_s9, 1  ;;  %p5174_p7 = scmp.lt.s32.totalorder %s10095_s9, 5 }
 0x1ad   : > { %p5175_p8 = pnand %p8974_p6, %p5174_p7 }
 0x1ae   : > { %s5181_s13 = sand.u32 (!%p5175_p8), 1, %s10079_s27   ;;  %v5865_v32 = vlaneseq (!%p5175_p8)  ;;  %v10097_v33 = vmov (!%p5175_p8), 1966171168   ;;  %v5275_v36 = vld [vmem:[%s11857_s0] sm:$0xff] (!%p5175_p8)  ;;  %p5251_p9 = scmp.lt.s32.totalorder (!%p5175_p8), %s10087_s29, 3 }
 0x1af   : > { %5178 = sbr.rel (%p5175_p8) target bundleno = 983 (0x3d7), region = 137  ;;  %v5863_v34 = vunpack.c.l.s4 (!%p5175_p8), %v10097_v33  ;;  %v5861_v63 = vcombine.high (!%p5175_p8), %v5275_v36, %v5275_v36  ;;  %s11779_s25 = sshll.u32 (!%p5175_p8), %s5181_s13, 7 }
 0x1b0   : > { %s9707_s15 = smul.u32 (!%p5175_p8), 2304, %s5181_s13  ;;  %v5866_v35 = vshrl.u32 (!%p5175_p8), %v5865_v32, 7  ;;  %s11800_s12 = scalar_lea.vmem (!%p5175_p8), [#allocation3], %s11779_s25 }
 0x1b1   : > { %v5864_v37 = vunpack.c.0.s8 (!%p5175_p8), %v5863_v34 }
 0x1b2   : > { %s11431_s18 = scalar_lea.vmem (!%p5175_p8), [#allocation2], %s9707_s15 }
 0x1b3   : > { %v9749_v38 = vld [vmem:[%s11431_s18 + $0x40] sm:$0xff] (!%p5175_p8)   ;;  %v11435_v40 = vsub.s32 (!%p5175_p8), %v5864_v37, %v5866_v35  ;;  %v9753_v44 = vld [vmem:[%s11431_s18 + $0x48] sm:$0xff] (!%p5175_p8)   ;;  %v9757_v50 = vld [vmem:[%s11431_s18 + $0x50] sm:$0xff] (!%p5175_p8)  }
 0x1b4   : > { %v9750_v39 = vld [vmem:[%s11431_s18 + $0xc0] sm:$0xff] (!%p5175_p8)   ;;  %9288 = vmatprep.subr.bf16.mxu0 (!%p5175_p8), %v9749_v38  ;;  %v9754_v45 = vld [vmem:[%s11431_s18 + $0xc8] sm:$0xff] (!%p5175_p8)   ;;  %v9758_v51 = vld [vmem:[%s11431_s18 + $0xd0] sm:$0xff] (!%p5175_p8)  }
 0x1b5   : > { %v9751_v41 = vld [vmem:[%s11431_s18] sm:$0xff] (!%p5175_p8)   ;;  %9310 = vmatprep.subr.bf16.mxu1 (!%p5175_p8), %v9750_v39  ;;  %v5868_v43 = vrot.slane (!%p5175_p8), %v5275_v36, %v11435_v40  ;;  %v9755_v47 = vld [vmem:[%s11431_s18 + $0x8] sm:$0xff] (!%p5175_p8)   ;;  %v9759_v53 = vld [vmem:[%s11431_s18 + $0x10] sm:$0xff] (!%p5175_p8)   ;;  %v11462_v4 = vrot.slane (!%p5175_p8), %v5861_v63, %v11435_v40 }
 0x1b6   : > { %v9752_v42 = vld [vmem:[%s11431_s18 + $0x80] sm:$0xff]   ;;  %9289 = vmatpush3.bf16.msra.mxu0 %v9751_v41  ;;  %v9756_v48 = vld [vmem:[%s11431_s18 + $0x88] sm:$0xff]   ;;  %v9760_v54 = vld [vmem:[%s11431_s18 + $0x90] sm:$0xff]   ;;  %s11874_s29 = smov (!%p5251_p9, %s10087_s29), 3 }
 0x1b7   : > { %9311 = vmatpush3.bf16.msra.mxu1 %v9752_v42  ;;  %v5876_v46 = vcombine.high %v5868_v43, %v5868_v43  ;;  %9290 = vmatprep.subr.bf16.mxu0 %v9753_v44  ;;  %v9761_v55 = vld [vmem:[%s11431_s18 + $0x58] sm:$0xff]   ;;  %v9765_v59 = vld [vmem:[%s11431_s18 + $0x60] sm:$0xff]   ;;  %v9769_v0 = vld [vmem:[%s11431_s18 + $0x68] sm:$0xff]   ;;  %v5877_v9 = vcombine.high %v11462_v4, %v11462_v4  ;;  %v5884_v11 = vrot.slane %v5868_v43, %v11435_v40  ;;  %s5253_s17 = scalar_lea.vmem %s11859_s2, %s11874_s29  ;;  %s5263_s20 = scalar_lea.vmem %s11863_s6, %s11874_s29 }
 0x1b8   : > { %9312 = vmatprep.subr.bf16.mxu1 %v9754_v45  ;;  %v9762_v56 = vld [vmem:[%s11431_s18 + $0xd8] sm:$0xff]   ;;  %v9766_v60 = vld [vmem:[%s11431_s18 + $0xe0] sm:$0xff]   ;;  %v9770_v1 = vld [vmem:[%s11431_s18 + $0xe8] sm:$0xff]   ;;  %s5256_s23 = scalar_lea.vmem %s11860_s3, %s11874_s29  ;;  %s5266_s27 = scalar_lea.vmem %s11864_s7, %s11874_s29 }
 0x1b9   : > { %v5898_v49 = vrot.slane %v5876_v46, %v11435_v40  ;;  %v9763_v57 = vld [vmem:[%s11431_s18 + $0x18] sm:$0xff]   ;;  %v9767_v61 = vld [vmem:[%s11431_s18 + $0x20] sm:$0xff]   ;;  %v9771_v2 = vld [vmem:[%s11431_s18 + $0x28] sm:$0xff]   ;;  %v5905_v15 = vrot.slane %v5877_v9, %v11435_v40  ;;  %v5906_v16 = vcombine.high %v5884_v11, %v5884_v11  ;;  %s5273_s11 = scalar_lea.vmem %s11865_s8, %s11874_s29 }
 0x1ba   : > { %9291 = vmatpush3.bf16.msra.mxu0 %v9755_v47  ;;  %v9764_v58 = vld [vmem:[%s11431_s18 + $0x98] sm:$0xff]   ;;  %v9768_v62 = vld [vmem:[%s11431_s18 + $0xa0] sm:$0xff]   ;;  %v9772_v3 = vld [vmem:[%s11431_s18 + $0xa8] sm:$0xff]  }
 0x1bb   : > { %9313 = vmatpush3.bf16.msra.mxu1 %v9756_v48  ;;  %7877 = vmatprep.mubr.bf16.mxu0 %v5898_v49  ;;  %v5908_v52 = vcombine.high %v5898_v49, %v5898_v49  ;;  %v9773_v5 = vld [vmem:[%s11431_s18 + $0x70] sm:$0xff]   ;;  %v9777_v10 = vld [vmem:[%s11431_s18 + $0x78] sm:$0xff]   ;;  %v9782_v17 = vld [vmem:[%s11431_s18 + $0x140] sm:$0xff]   ;;  %v5909_v21 = vcombine.high %v5905_v15, %v5905_v15 }
 0x1bc   : > { %9292 = vmatprep.subr.bf16.mxu0 %v9757_v50  ;;  %9314 = vmatprep.subr.bf16.mxu1 %v9758_v51  ;;  %v9774_v6 = vld [vmem:[%s11431_s18 + $0xf0] sm:$0xff]   ;;  %v9778_v12 = vld [vmem:[%s11431_s18 + $0xf8] sm:$0xff]   ;;  %v9783_v18 = vld [vmem:[%s11431_s18 + $0x100] sm:$0xff]  }
 0x1bd   : > { %7917 = vmatprep.mubr.bf16.mxu1 %v5908_v52  ;;  %v9775_v7 = vld [vmem:[%s11431_s18 + $0x30] sm:$0xff]   ;;  %v9779_v13 = vld [vmem:[%s11431_s18 + $0x38] sm:$0xff]   ;;  %v9784_v19 = vld [vmem:[%s11431_s18 + $0x1c0] sm:$0xff]   ;;  %v5891_v52 = vrot.slane %v11462_v4, %v11435_v40 }
 0x1be   : > { %9293 = vmatpush3.bf16.msra.mxu0 %v9759_v53  ;;  %v9776_v8 = vld [vmem:[%s11431_s18 + $0xb0] sm:$0xff]   ;;  %v9780_v14 = vld [vmem:[%s11431_s18 + $0xb8] sm:$0xff]   ;;  %v9785_v20 = vld [vmem:[%s11431_s18 + $0x180] sm:$0xff]  }
 0x1bf   : > { %9315 = vmatpush3.bf16.msra.mxu1 %v9760_v54  ;;  %9294 = vmatprep.subr.bf16.mxu0 %v9761_v55  ;;  %v9786_v22 = vld [vmem:[%s11431_s18 + $0x148] sm:$0xff]   ;;  %v9790_v26 = vld [vmem:[%s11431_s18 + $0x150] sm:$0xff]   ;;  %v9794_v30 = vld [vmem:[%s11431_s18 + $0x158] sm:$0xff]  }
 0x1c0   : > { %9316 = vmatprep.subr.bf16.mxu1 %v9762_v56  ;;  %v9787_v23 = vld [vmem:[%s11431_s18 + $0x108] sm:$0xff]   ;;  %v9791_v27 = vld [vmem:[%s11431_s18 + $0x110] sm:$0xff]   ;;  %v9795_v31 = vld [vmem:[%s11431_s18 + $0x118] sm:$0xff]  }
 0x1c1   : > { %v9788_v24 = vld [vmem:[%s11431_s18 + $0x1c8] sm:$0xff]   ;;  %v9792_v28 = vld [vmem:[%s11431_s18 + $0x1d0] sm:$0xff]   ;;  %v9796_v32 = vld [vmem:[%s11431_s18 + $0x1d8] sm:$0xff]  }
 0x1c2   : > { %9295 = vmatpush3.bf16.msra.mxu0 %v9763_v57  ;;  %v9789_v25 = vld [vmem:[%s11431_s18 + $0x188] sm:$0xff]   ;;  %v9793_v29 = vld [vmem:[%s11431_s18 + $0x190] sm:$0xff]   ;;  %v9797_v33 = vld [vmem:[%s11431_s18 + $0x198] sm:$0xff]  }
 0x1c3   : > { %9317 = vmatpush3.bf16.msra.mxu1 %v9764_v58  ;;  %9296 = vmatprep.subr.bf16.mxu0 %v9765_v59  ;;  %v9798_v34 = vld [vmem:[%s11431_s18 + $0x160] sm:$0xff]   ;;  %v11498_v37 = vld [vmem:[%s11857_s0 + $0x8] sm:$0xff]  ;;  %v9806_v45 = vld [vmem:[%s11431_s18 + $0x170] sm:$0xff]   ;;  %v5907_v58 = vcombine.high %v5891_v52, %v5891_v52 }
 0x1c4   : > { %9318 = vmatprep.subr.bf16.mxu1 %v9766_v60  ;;  %v9799_v35 = vld [vmem:[%s11431_s18 + $0x120] sm:$0xff]   ;;  %v9802_v39 = vld [vmem:[%s11431_s18 + $0x168] sm:$0xff]   ;;  %v11507_v44 = vrot.slane %v11498_v37, %v11435_v40  ;;  %v9807_v46 = vld [vmem:[%s11431_s18 + $0x130] sm:$0xff]  }
 0x1c5   : > { %v9800_v36 = vld [vmem:[%s11431_s18 + $0x1e0] sm:$0xff]   ;;  %v9803_v41 = vld [vmem:[%s11431_s18 + $0x128] sm:$0xff]   ;;  %v9808_v47 = vld [vmem:[%s11431_s18 + $0x1f0] sm:$0xff]  }
 0x1c6   : > { %9297 = vmatpush3.bf16.msra.mxu0 %v9767_v61  ;;  %v9801_v38 = vld [vmem:[%s11431_s18 + $0x1a0] sm:$0xff]   ;;  %v9804_v42 = vld [vmem:[%s11431_s18 + $0x1e8] sm:$0xff]   ;;  %v9809_v48 = vld [vmem:[%s11431_s18 + $0x1b0] sm:$0xff]   ;;  %v5925_v49 = vcombine.high %v11507_v44, %v11507_v44 }
 0x1c7   : > { %9319 = vmatpush3.bf16.msra.mxu1 %v9768_v62  ;;  %9298 = vmatprep.subr.bf16.mxu0 %v9769_v0  ;;  %v9805_v43 = vld [vmem:[%s11431_s18 + $0x1a8] sm:$0xff]   ;;  %v9810_v50 = vld [vmem:[%s11431_s18 + $0x178] sm:$0xff]   ;;  %v9814_v56 = vld [vmem:[%s11431_s18 + $0x240] sm:$0xff]  }
 0x1c8   : > { %9320 = vmatprep.subr.bf16.mxu1 %v9770_v1  ;;  %v9811_v51 = vld [vmem:[%s11431_s18 + $0x138] sm:$0xff]   ;;  %v5947_v55 = vrot.slane %v5925_v49, %v11435_v40  ;;  %v9815_v57 = vld [vmem:[%s11431_s18 + $0x200] sm:$0xff]   ;;  %v9818_v62 = vld [vmem:[%s11431_s18 + $0x248] sm:$0xff]  }
 0x1c9   : > { %v9812_v53 = vld [vmem:[%s11431_s18 + $0x1f8] sm:$0xff]   ;;  %v9816_v59 = vld [vmem:[%s11431_s18 + $0x2c0] sm:$0xff]   ;;  %v9819_v63 = vld [vmem:[%s11431_s18 + $0x208] sm:$0xff]  }
 0x1ca   : > { %9299 = vmatpush3.bf16.msra.mxu0 %v9771_v2  ;;  %v9813_v54 = vld [vmem:[%s11431_s18 + $0x1b8] sm:$0xff]   ;;  %v9817_v60 = vld [vmem:[%s11431_s18 + $0x280] sm:$0xff]   ;;  %v5957_v61 = vcombine.high %v5947_v55, %v5947_v55  ;;  %v9820_v0 = vld [vmem:[%s11431_s18 + $0x2c8] sm:$0xff]  }
 0x1cb   : > { %9321 = vmatpush3.bf16.msra.mxu1 %v9772_v3  ;;  %9300 = vmatprep.subr.bf16.mxu0 %v9773_v5  ;;  %v9821_v1 = vld [vmem:[%s11431_s18 + $0x288] sm:$0xff]   ;;  %v9822_v2 = vld [vmem:[%s11431_s18 + $0x250] sm:$0xff]   ;;  %v9829_v9 = vld [vmem:[%s11431_s18 + $0x298] sm:$0xff]  }
 0x1cc   : > { %9322 = vmatprep.subr.bf16.mxu1 %v9774_v6  ;;  %v9823_v3 = vld [vmem:[%s11431_s18 + $0x210] sm:$0xff]   ;;  %v9826_v6 = vld [vmem:[%s11431_s18 + $0x258] sm:$0xff]  }
 0x1cd   : > { %v9824_v4 = vld [vmem:[%s11431_s18 + $0x2d0] sm:$0xff]   ;;  %v9861_v49 = vld [vmem:[%s11431_s18 + $0x398] sm:$0xff]  }
 0x1ce   : > { %9301 = vmatpush3.bf16.msra.mxu0 %v9775_v7  ;;  %v9825_v5 = vld [vmem:[%s11431_s18 + $0x290] sm:$0xff]   ;;  %v9827_v7 = vld [vmem:[%s11431_s18 + $0x218] sm:$0xff]  }
 0x1cf   : > { %9323 = vmatpush3.bf16.msra.mxu1 %v9776_v8  ;;  %9302 = vmatprep.subr.bf16.mxu0 %v9777_v10  ;;  %v9828_v8 = vld [vmem:[%s11431_s18 + $0x2d8] sm:$0xff]   ;;  %v9830_v10 = vld [vmem:[%s11431_s18 + $0x260] sm:$0xff]  }
 0x1d0   : > { %9324 = vmatprep.subr.bf16.mxu1 %v9778_v12  ;;  %v9832_v12 = vld [vmem:[%s11431_s18 + $0x2e0] sm:$0xff]  }
 0x1d2   : > { %9303 = vmatpush3.bf16.msra.mxu0 %v9779_v13  ;;  %v9833_v13 = vld [vmem:[%s11431_s18 + $0x2a0] sm:$0xff]  }
 0x1d3   : > { %9325 = vmatpush3.bf16.msra.mxu1 %v9780_v14  ;;  %9332 = vmatprep.subr.bf16.mxu0 %v9782_v17  ;;  %v5910_v14 = vcombine.high %v11498_v37, %v11498_v37  ;;  %v9836_v17 = vld [vmem:[%s11431_s18 + $0x2e8] sm:$0xff]  }
 0x1d4   : > { %9354 = vmatprep.subr.bf16.mxu1 %v9784_v19  ;;  %v9850_v37 = vld [vmem:[%s11431_s18 + $0x348] sm:$0xff]  }
 0x1d5   : > { %7878 = vmatmul.mubr.bf16.vlgmr.msra.gmra.mrb[0].mxu0 %v5884_v11  ;;  %v9831_v11 = vld [vmem:[%s11431_s18 + $0x220] sm:$0xff]   ;;  %v11549_v19 = vrot.slane %v5910_v14, %v11435_v40  ;;  %v9889_v14 = vld [vmem:[%s11431_s18 + $0x4d0] sm:$0xff]  }
 0x1d6   : > { %7918 = vmatmul.mubr.bf16.vlgmr.msra.gmra.mrb[0].mxu1 %v5906_v16  ;;  %9333 = vmatpush3.bf16.msra.mxu0 %v9783_v18  ;;  %v9835_v16 = vld [vmem:[%s11431_s18 + $0x228] sm:$0xff]  }
 0x1d7   : > { %7957 = vmatprep.mubr.bf16.mxu0 %v5905_v15  ;;  %9355 = vmatpush3.bf16.msra.mxu1 %v9785_v20  ;;  %v9834_v15 = vld [vmem:[%s11431_s18 + $0x268] sm:$0xff]   ;;  %v9838_v20 = vld [vmem:[%s11431_s18 + $0x270] sm:$0xff]  }
 0x1d8   : > { %9334 = vmatprep.subr.bf16.mxu0 %v9786_v22  ;;  %7997 = vmatprep.mubr.bf16.mxu1 %v5909_v21  ;;  %v9837_v18 = vld [vmem:[%s11431_s18 + $0x2a8] sm:$0xff]   ;;  %v9839_v21 = vld [vmem:[%s11431_s18 + $0x230] sm:$0xff]  }
 0x1d9   : > { %9356 = vmatprep.subr.bf16.mxu1 %v9788_v24  ;;  %v9840_v22 = vld [vmem:[%s11431_s18 + $0x2f0] sm:$0xff]   ;;  %v5926_v24 = vcombine.high %v11549_v19, %v11549_v19 }
 0x1da   : > { %9335 = vmatpush3.bf16.msra.mxu0 %v9787_v23  ;;  %v9841_v23 = vld [vmem:[%s11431_s18 + $0x2b0] sm:$0xff]  }
 0x1db   : > { %9357 = vmatpush3.bf16.msra.mxu1 %v9789_v25  ;;  %9336 = vmatprep.subr.bf16.mxu0 %v9790_v26  ;;  %v9842_v25 = vld [vmem:[%s11431_s18 + $0x278] sm:$0xff]  }
 0x1dc   : > { %9358 = vmatprep.subr.bf16.mxu1 %v9792_v28  ;;  %v9843_v26 = vld [vmem:[%s11431_s18 + $0x238] sm:$0xff]  }
 0x1dd   : > { %v9844_v28 = vld [vmem:[%s11431_s18 + $0x2f8] sm:$0xff]  }
 0x1de   : > { %9337 = vmatpush3.bf16.msra.mxu0 %v9791_v27  ;;  %v5933_v27 = vrot.slane %v11507_v44, %v11435_v40  ;;  %v9856_v44 = vld [vmem:[%s11431_s18 + $0x3d0] sm:$0xff]  }
 0x1df   : > { %9359 = vmatpush3.bf16.msra.mxu1 %v9793_v29  ;;  %9338 = vmatprep.subr.bf16.mxu0 %v9794_v30  ;;  %v9845_v29 = vld [vmem:[%s11431_s18 + $0x2b8] sm:$0xff]   ;;  %v5954_v30 = vrot.slane %v5926_v24, %v11435_v40  ;;  %v9899_v24 = vld [vmem:[%s11431_s18 + $0x468] sm:$0xff]  }
 0x1e0   : > { %9360 = vmatprep.subr.bf16.mxu1 %v9796_v32  ;;  %v9847_v32 = vld [vmem:[%s11431_s18 + $0x300] sm:$0xff]  }
 0x1e2   : > { %9339 = vmatpush3.bf16.msra.mxu0 %v9795_v31  ;;  %v9846_v31 = vld [vmem:[%s11431_s18 + $0x340] sm:$0xff]  }
 0x1e3   : > { %9361 = vmatpush3.bf16.msra.mxu1 %v9797_v33  ;;  %9340 = vmatprep.subr.bf16.mxu0 %v9798_v34  ;;  %v5955_v33 = vcombine.high %v5933_v27, %v5933_v27  ;;  %v9848_v34 = vld [vmem:[%s11431_s18 + $0x3c0] sm:$0xff]  }
 0x1e4   : > { %9362 = vmatprep.subr.bf16.mxu1 %v9800_v36  ;;  %v5958_v36 = vcombine.high %v5954_v30, %v5954_v30 }
 0x1e6   : > { %9341 = vmatpush3.bf16.msra.mxu0 %v9799_v35  ;;  %v9849_v35 = vld [vmem:[%s11431_s18 + $0x380] sm:$0xff]  }
 0x1e7   : > { %9363 = vmatpush3.bf16.msra.mxu1 %v9801_v38  ;;  %9342 = vmatprep.subr.bf16.mxu0 %v9802_v39  ;;  %v9851_v38 = vld [vmem:[%s11431_s18 + $0x308] sm:$0xff]  }
 0x1e8   : > { %9364 = vmatprep.subr.bf16.mxu1 %v9804_v42  ;;  %v9852_v39 = vld [vmem:[%s11431_s18 + $0x3c8] sm:$0xff]   ;;  %v9854_v42 = vld [vmem:[%s11431_s18 + $0x350] sm:$0xff]  }
 0x1ea   : > { %9343 = vmatpush3.bf16.msra.mxu0 %v9803_v41  ;;  %v9853_v41 = vld [vmem:[%s11431_s18 + $0x388] sm:$0xff]  }
 0x1eb   : > { %9365 = vmatpush3.bf16.msra.mxu1 %v9805_v43  ;;  %9344 = vmatprep.subr.bf16.mxu0 %v9806_v45  ;;  %v9855_v43 = vld [vmem:[%s11431_s18 + $0x310] sm:$0xff]  }
 0x1ec   : > { %9366 = vmatprep.subr.bf16.mxu1 %v9808_v47  ;;  %v9857_v45 = vld [vmem:[%s11431_s18 + $0x390] sm:$0xff]   ;;  %v9859_v47 = vld [vmem:[%s11431_s18 + $0x318] sm:$0xff]  }
 0x1ee   : > { %9345 = vmatpush3.bf16.msra.mxu0 %v9807_v46  ;;  %v9858_v46 = vld [vmem:[%s11431_s18 + $0x358] sm:$0xff]  }
 0x1ef   : > { %9367 = vmatpush3.bf16.msra.mxu1 %v9809_v48  ;;  %9346 = vmatprep.subr.bf16.mxu0 %v9810_v50  ;;  %v9860_v48 = vld [vmem:[%s11431_s18 + $0x3d8] sm:$0xff]   ;;  %v9862_v50 = vld [vmem:[%s11431_s18 + $0x360] sm:$0xff]  }
 0x1f0   : > { %9368 = vmatprep.subr.bf16.mxu1 %v9812_v53  ;;  %v9865_v53 = vld [vmem:[%s11431_s18 + $0x3a0] sm:$0xff]  }
 0x1f2   : > { %9347 = vmatpush3.bf16.msra.mxu0 %v9811_v51  ;;  %v9863_v51 = vld [vmem:[%s11431_s18 + $0x320] sm:$0xff]  }
 0x1f3   : > { %9369 = vmatpush3.bf16.msra.mxu1 %v9813_v54  ;;  %9376 = vmatprep.subr.bf16.mxu0 %v9814_v56  ;;  %v9866_v54 = vld [vmem:[%s11431_s18 + $0x368] sm:$0xff]  }
 0x1f4   : > { %9398 = vmatprep.subr.bf16.mxu1 %v9816_v59  ;;  %v9868_v56 = vld [vmem:[%s11431_s18 + $0x3e8] sm:$0xff]   ;;  %v9871_v59 = vld [vmem:[%s11431_s18 + $0x330] sm:$0xff]  }
 0x1f5   : > { %7958 = vmatmul.mubr.bf16.vlgmr.msra.gmra.mrb[4].mxu0 %v5891_v52  ;;  %v9864_v52 = vld [vmem:[%s11431_s18 + $0x3e0] sm:$0xff]  }
 0x1f6   : > { %9377 = vmatpush3.bf16.msra.mxu0 %v9815_v57  ;;  %7998 = vmatmul.mubr.bf16.vlgmr.msra.gmra.mrb[4].mxu1 %v5907_v58  ;;  %v9869_v57 = vld [vmem:[%s11431_s18 + $0x3a8] sm:$0xff]   ;;  %v9870_v58 = vld [vmem:[%s11431_s18 + $0x370] sm:$0xff]  }
 0x1f7   : > { %8037 = vmatprep.mubr.bf16.mxu0 %v5947_v55  ;;  %9399 = vmatpush3.bf16.msra.mxu1 %v9817_v60  ;;  %v9867_v55 = vld [vmem:[%s11431_s18 + $0x328] sm:$0xff]   ;;  %v9872_v60 = vld [vmem:[%s11431_s18 + $0x3f0] sm:$0xff]  }
 0x1f8   : > { %9378 = vmatprep.subr.bf16.mxu0 %v9818_v62  ;;  %8077 = vmatprep.mubr.bf16.mxu1 %v5957_v61  ;;  %v9873_v61 = vld [vmem:[%s11431_s18 + $0x3b0] sm:$0xff]   ;;  %v9874_v62 = vld [vmem:[%s11431_s18 + $0x378] sm:$0xff]  }
 0x1f9   : > { %9400 = vmatprep.subr.bf16.mxu1 %v9820_v0  ;;  %v5940_v0 = vrot.slane %v11549_v19, %v11435_v40  ;;  %v9894_v19 = vld [vmem:[%s11431_s18 + $0x498] sm:$0xff]  }
 0x1fa   : > { %9379 = vmatpush3.bf16.msra.mxu0 %v9819_v63  ;;  %v9875_v63 = vld [vmem:[%s11431_s18 + $0x338] sm:$0xff]  }
 0x1fb   : > { %9401 = vmatpush3.bf16.msra.mxu1 %v9821_v1  ;;  %9380 = vmatprep.subr.bf16.mxu0 %v9822_v2  ;;  %v9876_v1 = vld [vmem:[%s11431_s18 + $0x3f8] sm:$0xff]  }
 0x1fc   : > { %9402 = vmatprep.subr.bf16.mxu1 %v9824_v4  ;;  %v9878_v2 = vld [vmem:[%s11431_s18 + $0x3b8] sm:$0xff]   ;;  %v9880_v4 = vld [vmem:[%s11431_s18 + $0x400] sm:$0xff]  }
 0x1fe   : > { %9381 = vmatpush3.bf16.msra.mxu0 %v9823_v3  ;;  %v9879_v3 = vld [vmem:[%s11431_s18 + $0x440] sm:$0xff]  }
 0x1ff   : > { %9403 = vmatpush3.bf16.msra.mxu1 %v9825_v5  ;;  %9382 = vmatprep.subr.bf16.mxu0 %v9826_v6  ;;  %v5956_v5 = vcombine.high %v5940_v0, %v5940_v0  ;;  %v9881_v6 = vld [vmem:[%s11431_s18 + $0x4c0] sm:$0xff]  }
 0x200   : > { %9404 = vmatprep.subr.bf16.mxu1 %v9828_v8  ;;  %v9883_v8 = vld [vmem:[%s11431_s18 + $0x448] sm:$0xff]  }
 0x202   : > { %9383 = vmatpush3.bf16.msra.mxu0 %v9827_v7  ;;  %v9882_v7 = vld [vmem:[%s11431_s18 + $0x480] sm:$0xff]  }
 0x203   : > { %9405 = vmatpush3.bf16.msra.mxu1 %v9829_v9  ;;  %9384 = vmatprep.subr.bf16.mxu0 %v9830_v10  ;;  %v9884_v9 = vld [vmem:[%s11431_s18 + $0x408] sm:$0xff]  }
 0x204   : > { %9406 = vmatprep.subr.bf16.mxu1 %v9832_v12  ;;  %v9885_v10 = vld [vmem:[%s11431_s18 + $0x4c8] sm:$0xff]   ;;  %v9887_v12 = vld [vmem:[%s11431_s18 + $0x450] sm:$0xff]  }
 0x206   : > { %9385 = vmatpush3.bf16.msra.mxu0 %v9831_v11  ;;  %v9886_v11 = vld [vmem:[%s11431_s18 + $0x488] sm:$0xff]  }
 0x207   : > { %9407 = vmatpush3.bf16.msra.mxu1 %v9833_v13  ;;  %9386 = vmatprep.subr.bf16.mxu0 %v9834_v15  ;;  %v9888_v13 = vld [vmem:[%s11431_s18 + $0x410] sm:$0xff]  }
 0x208   : > { %9408 = vmatprep.subr.bf16.mxu1 %v9836_v17  ;;  %v9890_v15 = vld [vmem:[%s11431_s18 + $0x490] sm:$0xff]   ;;  %v9892_v17 = vld [vmem:[%s11431_s18 + $0x418] sm:$0xff]  }
 0x20a   : > { %9387 = vmatpush3.bf16.msra.mxu0 %v9835_v16  ;;  %v9891_v16 = vld [vmem:[%s11431_s18 + $0x458] sm:$0xff]  }
 0x20b   : > { %9409 = vmatpush3.bf16.msra.mxu1 %v9837_v18  ;;  %9388 = vmatprep.subr.bf16.mxu0 %v9838_v20  ;;  %v9893_v18 = vld [vmem:[%s11431_s18 + $0x4d8] sm:$0xff]   ;;  %v9895_v20 = vld [vmem:[%s11431_s18 + $0x460] sm:$0xff]  }
 0x20c   : > { %9410 = vmatprep.subr.bf16.mxu1 %v9840_v22  ;;  %v9897_v22 = vld [vmem:[%s11431_s18 + $0x4e0] sm:$0xff]  }
 0x20e   : > { %9389 = vmatpush3.bf16.msra.mxu0 %v9839_v21  ;;  %v9896_v21 = vld [vmem:[%s11431_s18 + $0x420] sm:$0xff]  }
 0x20f   : > { %9411 = vmatpush3.bf16.msra.mxu1 %v9841_v23  ;;  %9390 = vmatprep.subr.bf16.mxu0 %v9842_v25  ;;  %v9898_v23 = vld [vmem:[%s11431_s18 + $0x4a0] sm:$0xff]   ;;  %v9900_v25 = vld [vmem:[%s11431_s18 + $0x428] sm:$0xff]  }
 0x210   : > { %9412 = vmatprep.subr.bf16.mxu1 %v9844_v28  ;;  %v9903_v28 = vld [vmem:[%s11431_s18 + $0x470] sm:$0xff]  }
 0x212   : > { %9391 = vmatpush3.bf16.msra.mxu0 %v9843_v26  ;;  %v9901_v26 = vld [vmem:[%s11431_s18 + $0x4e8] sm:$0xff]  }
 0x213   : > { %9413 = vmatpush3.bf16.msra.mxu1 %v9845_v29  ;;  %9420 = vmatprep.subr.bf16.mxu0 %v9846_v31  ;;  %v9904_v29 = vld [vmem:[%s11431_s18 + $0x430] sm:$0xff]  }
 0x214   : > { %9442 = vmatprep.subr.bf16.mxu1 %v9848_v34  ;;  %v9906_v31 = vld [vmem:[%s11431_s18 + $0x4b0] sm:$0xff]   ;;  %v9909_v34 = vld [vmem:[%s11431_s18 + $0x4f8] sm:$0xff]  }
 0x215   : > { %8038 = vmatmul.mubr.bf16.vlgmr.msra.gmra.mrb[8].mxu0 %v5933_v27  ;;  %v9902_v27 = vld [vmem:[%s11431_s18 + $0x4a8] sm:$0xff]  }
 0x216   : > { %9421 = vmatpush3.bf16.msra.mxu0 %v9847_v32  ;;  %8078 = vmatmul.mubr.bf16.vlgmr.msra.gmra.mrb[8].mxu1 %v5955_v33  ;;  %v9907_v32 = vld [vmem:[%s11431_s18 + $0x478] sm:$0xff]  }
 0x217   : > { %8117 = vmatprep.mubr.bf16.mxu0 %v5954_v30  ;;  %9443 = vmatpush3.bf16.msra.mxu1 %v9849_v35  ;;  %v9905_v30 = vld [vmem:[%s11431_s18 + $0x4f0] sm:$0xff]   ;;  %v9908_v33 = vld [vmem:[%s11431_s18 + $0x438] sm:$0xff]  }
 0x218   : > { %9422 = vmatprep.subr.bf16.mxu0 %v9850_v37  ;;  %8157 = vmatprep.mubr.bf16.mxu1 %v5958_v36  ;;  %v5277_v35 = vld [vmem:[%s11857_s0 + $0x10] sm:$0xff]  ;;  %v9910_v37 = vld [vmem:[%s11431_s18 + $0x4b8] sm:$0xff]  }
 0x219   : > { %9444 = vmatprep.subr.bf16.mxu1 %v9852_v39  ;;  %v5966_v36 = vrot.slane %v5277_v35, %v11435_v40  ;;  %v9911_v39 = vld [vmem:[%s11431_s18 + $0x540] sm:$0xff]  }
 0x21a   : > { %9423 = vmatpush3.bf16.msra.mxu0 %v9851_v38  ;;  %v5959_v38 = vcombine.high %v5277_v35, %v5277_v35  ;;  %v9959_v35 = vld [vmem:[%s11431_s18 + $0x698] sm:$0xff]  }
 0x21b   : > { %9445 = vmatpush3.bf16.msra.mxu1 %v9853_v41  ;;  %9424 = vmatprep.subr.bf16.mxu0 %v9854_v42  ;;  %v5974_v41 = vcombine.high %v5966_v36, %v5966_v36  ;;  %v5982_v42 = vrot.slane %v5966_v36, %v11435_v40  ;;  %v9962_v36 = vld [vmem:[%s11431_s18 + $0x6e0] sm:$0xff]  }
 0x21c   : > { %9446 = vmatprep.subr.bf16.mxu1 %v9856_v44  ;;  %v9913_v44 = vld [vmem:[%s11431_s18 + $0x5c0] sm:$0xff]  }
 0x21e   : > { %9425 = vmatpush3.bf16.msra.mxu0 %v9855_v43  ;;  %v11637_v43 = vrot.slane %v5959_v38, %v11435_v40  ;;  %v9964_v38 = vld [vmem:[%s11431_s18 + $0x668] sm:$0xff]  }
 0x21f   : > { %9447 = vmatpush3.bf16.msra.mxu1 %v9857_v45  ;;  %9426 = vmatprep.subr.bf16.mxu0 %v9858_v46  ;;  %v5996_v45 = vrot.slane %v5974_v41, %v11435_v40  ;;  %v9912_v46 = vld [vmem:[%s11431_s18 + $0x500] sm:$0xff]   ;;  %v9966_v41 = vld [vmem:[%s11431_s18 + $0x6e8] sm:$0xff]  }
 0x220   : > { %9448 = vmatprep.subr.bf16.mxu1 %v9860_v48  ;;  %v6004_v48 = vcombine.high %v5982_v42, %v5982_v42 }
 0x222   : > { %9427 = vmatpush3.bf16.msra.mxu0 %v9859_v47  ;;  %v5975_v47 = vcombine.high %v11637_v43, %v11637_v43 }
 0x223   : > { %9449 = vmatpush3.bf16.msra.mxu1 %v9861_v49  ;;  %9428 = vmatprep.subr.bf16.mxu0 %v9862_v50  ;;  %v9915_v49 = vld [vmem:[%s11431_s18 + $0x548] sm:$0xff]   ;;  %v6006_v50 = vcombine.high %v5996_v45, %v5996_v45 }
 0x224   : > { %9450 = vmatprep.subr.bf16.mxu1 %v9864_v52  ;;  %v6003_v52 = vrot.slane %v5975_v47, %v11435_v40  ;;  %v9972_v47 = vld [vmem:[%s11431_s18 + $0x678] sm:$0xff]  }
 0x226   : > { %9429 = vmatpush3.bf16.msra.mxu0 %v9863_v51  ;;  %v9914_v51 = vld [vmem:[%s11431_s18 + $0x580] sm:$0xff]  }
 0x227   : > { %9451 = vmatpush3.bf16.msra.mxu1 %v9865_v53  ;;  %9430 = vmatprep.subr.bf16.mxu0 %v9866_v54  ;;  %v9917_v53 = vld [vmem:[%s11431_s18 + $0x5c8] sm:$0xff]  }
 0x228   : > { %9452 = vmatprep.subr.bf16.mxu1 %v9868_v56  ;;  %v9916_v54 = vld [vmem:[%s11431_s18 + $0x508] sm:$0xff]   ;;  %v9919_v56 = vld [vmem:[%s11431_s18 + $0x550] sm:$0xff]  }
 0x22a   : > { %9431 = vmatpush3.bf16.msra.mxu0 %v9867_v55  ;;  %v6007_v55 = vcombine.high %v6003_v52, %v6003_v52 }
 0x22b   : > { %9453 = vmatpush3.bf16.msra.mxu1 %v9869_v57  ;;  %9432 = vmatprep.subr.bf16.mxu0 %v9870_v58  ;;  %v9918_v57 = vld [vmem:[%s11431_s18 + $0x588] sm:$0xff]   ;;  %v9921_v58 = vld [vmem:[%s11431_s18 + $0x5d0] sm:$0xff]  }
 0x22c   : > { %9454 = vmatprep.subr.bf16.mxu1 %v9872_v60  ;;  %v9923_v60 = vld [vmem:[%s11431_s18 + $0x558] sm:$0xff]  }
 0x22e   : > { %9433 = vmatpush3.bf16.msra.mxu0 %v9871_v59  ;;  %v9920_v59 = vld [vmem:[%s11431_s18 + $0x510] sm:$0xff]  }
 0x22f   : > { %9455 = vmatpush3.bf16.msra.mxu1 %v9873_v61  ;;  %9434 = vmatprep.subr.bf16.mxu0 %v9874_v62  ;;  %v9922_v61 = vld [vmem:[%s11431_s18 + $0x590] sm:$0xff]   ;;  %v9925_v62 = vld [vmem:[%s11431_s18 + $0x5d8] sm:$0xff]  }
 0x230   : > { %9456 = vmatprep.subr.bf16.mxu1 %v9876_v1  ;;  %v9926_v1 = vld [vmem:[%s11431_s18 + $0x598] sm:$0xff]  }
 0x232   : > { %9435 = vmatpush3.bf16.msra.mxu0 %v9875_v63  ;;  %v9924_v63 = vld [vmem:[%s11431_s18 + $0x518] sm:$0xff]  }
 0x233   : > { %9457 = vmatpush3.bf16.msra.mxu1 %v9878_v2  ;;  %9464 = vmatprep.subr.bf16.mxu0 %v9879_v3  ;;  %v9929_v2 = vld [vmem:[%s11431_s18 + $0x5e0] sm:$0xff]  }
 0x234   : > { %9486 = vmatprep.subr.bf16.mxu1 %v9881_v6  ;;  %v9928_v3 = vld [vmem:[%s11431_s18 + $0x520] sm:$0xff]   ;;  %v9933_v6 = vld [vmem:[%s11431_s18 + $0x5e8] sm:$0xff]  }
 0x235   : > { %8118 = vmatmul.mubr.bf16.vlgmr.msra.gmra.mrb[12].mxu0 %v5940_v0  ;;  %v9927_v0 = vld [vmem:[%s11431_s18 + $0x560] sm:$0xff]  }
 0x236   : > { %9465 = vmatpush3.bf16.msra.mxu0 %v9880_v4  ;;  %8158 = vmatmul.mubr.bf16.vlgmr.msra.gmra.mrb[12].mxu1 %v5956_v5  ;;  %v9931_v4 = vld [vmem:[%s11431_s18 + $0x568] sm:$0xff]   ;;  %v9930_v5 = vld [vmem:[%s11431_s18 + $0x5a0] sm:$0xff]  }
 0x237   : > { %9487 = vmatpush3.bf16.msra.mxu1 %v9882_v7  ;;  %9466 = vmatprep.subr.bf16.mxu0 %v9883_v8  ;;  %v9932_v7 = vld [vmem:[%s11431_s18 + $0x528] sm:$0xff]   ;;  %v9935_v8 = vld [vmem:[%s11431_s18 + $0x570] sm:$0xff]  }
 0x238   : > { %9488 = vmatprep.subr.bf16.mxu1 %v9885_v10  ;;  %8197 = vmatprep.mubr.bf16.mxu0 %v5996_v45  ;;  %v9937_v10 = vld [vmem:[%s11431_s18 + $0x5f0] sm:$0xff]  }
 0x239   : > { %8237 = vmatprep.mubr.bf16.mxu1 %v6006_v50  ;;  %v9970_v45 = vld [vmem:[%s11431_s18 + $0x6f0] sm:$0xff]   ;;  %v5278_v50 = vld [vmem:[%s11857_s0 + $0x18] sm:$0xff] }
 0x23a   : > { %9467 = vmatpush3.bf16.msra.mxu0 %v9884_v9  ;;  %v9934_v9 = vld [vmem:[%s11431_s18 + $0x5a8] sm:$0xff]  }
 0x23b   : > { %9489 = vmatpush3.bf16.msra.mxu1 %v9886_v11  ;;  %9468 = vmatprep.subr.bf16.mxu0 %v9887_v12  ;;  %v9936_v11 = vld [vmem:[%s11431_s18 + $0x530] sm:$0xff]   ;;  %v9939_v12 = vld [vmem:[%s11431_s18 + $0x578] sm:$0xff]  }
 0x23c   : > { %9490 = vmatprep.subr.bf16.mxu1 %v9889_v14  ;;  %v9941_v14 = vld [vmem:[%s11431_s18 + $0x5f8] sm:$0xff]  }
 0x23e   : > { %9469 = vmatpush3.bf16.msra.mxu0 %v9888_v13  ;;  %v9938_v13 = vld [vmem:[%s11431_s18 + $0x5b0] sm:$0xff]  }
 0x23f   : > { %9491 = vmatpush3.bf16.msra.mxu1 %v9890_v15  ;;  %9470 = vmatprep.subr.bf16.mxu0 %v9891_v16  ;;  %v9940_v15 = vld [vmem:[%s11431_s18 + $0x538] sm:$0xff]   ;;  %v5989_v16 = vrot.slane %v11637_v43, %v11435_v40  ;;  %v9968_v43 = vld [vmem:[%s11431_s18 + $0x670] sm:$0xff]  }
 0x240   : > { %9492 = vmatprep.subr.bf16.mxu1 %v9893_v18  ;;  %v9943_v18 = vld [vmem:[%s11431_s18 + $0x5b8] sm:$0xff]  }
 0x242   : > { %9471 = vmatpush3.bf16.msra.mxu0 %v9892_v17  ;;  %v9944_v17 = vld [vmem:[%s11431_s18 + $0x640] sm:$0xff]  }
 0x243   : > { %9493 = vmatpush3.bf16.msra.mxu1 %v9894_v19  ;;  %9472 = vmatprep.subr.bf16.mxu0 %v9895_v20  ;;  %v9946_v19 = vld [vmem:[%s11431_s18 + $0x6c0] sm:$0xff]  }
 0x244   : > { %9494 = vmatprep.subr.bf16.mxu1 %v9897_v22  ;;  %v9945_v20 = vld [vmem:[%s11431_s18 + $0x600] sm:$0xff]   ;;  %v9948_v22 = vld [vmem:[%s11431_s18 + $0x648] sm:$0xff]  }
 0x246   : > { %9473 = vmatpush3.bf16.msra.mxu0 %v9896_v21  ;;  %v6005_v21 = vcombine.high %v5989_v16, %v5989_v16 }
 0x247   : > { %9495 = vmatpush3.bf16.msra.mxu1 %v9898_v23  ;;  %9474 = vmatprep.subr.bf16.mxu0 %v9899_v24  ;;  %v9947_v23 = vld [vmem:[%s11431_s18 + $0x680] sm:$0xff]   ;;  %v9950_v24 = vld [vmem:[%s11431_s18 + $0x6c8] sm:$0xff]  }
 0x248   : > { %9496 = vmatprep.subr.bf16.mxu1 %v9901_v26  ;;  %v9952_v26 = vld [vmem:[%s11431_s18 + $0x650] sm:$0xff]  }
 0x24a   : > { %9475 = vmatpush3.bf16.msra.mxu0 %v9900_v25  ;;  %v9949_v25 = vld [vmem:[%s11431_s18 + $0x608] sm:$0xff]  }
 0x24b   : > { %9497 = vmatpush3.bf16.msra.mxu1 %v9902_v27  ;;  %9476 = vmatprep.subr.bf16.mxu0 %v9903_v28  ;;  %v9951_v27 = vld [vmem:[%s11431_s18 + $0x688] sm:$0xff]   ;;  %v9954_v28 = vld [vmem:[%s11431_s18 + $0x6d0] sm:$0xff]  }
 0x24c   : > { %9498 = vmatprep.subr.bf16.mxu1 %v9905_v30  ;;  %v9956_v30 = vld [vmem:[%s11431_s18 + $0x658] sm:$0xff]  }
 0x24e   : > { %9477 = vmatpush3.bf16.msra.mxu0 %v9904_v29  ;;  %v9953_v29 = vld [vmem:[%s11431_s18 + $0x610] sm:$0xff]  }
 0x24f   : > { %9499 = vmatpush3.bf16.msra.mxu1 %v9906_v31  ;;  %9478 = vmatprep.subr.bf16.mxu0 %v9907_v32  ;;  %v9955_v31 = vld [vmem:[%s11431_s18 + $0x690] sm:$0xff]   ;;  %v9958_v32 = vld [vmem:[%s11431_s18 + $0x6d8] sm:$0xff]  }
 0x250   : > { %9500 = vmatprep.subr.bf16.mxu1 %v9909_v34  ;;  %v9960_v34 = vld [vmem:[%s11431_s18 + $0x660] sm:$0xff]  }
 0x252   : > { %9479 = vmatpush3.bf16.msra.mxu0 %v9908_v33  ;;  %v9957_v33 = vld [vmem:[%s11431_s18 + $0x618] sm:$0xff]  }
 0x253   : > { %9501 = vmatpush3.bf16.msra.mxu1 %v9910_v37  ;;  %9508 = vmatprep.subr.bf16.mxu0 %v9911_v39  ;;  %v9961_v37 = vld [vmem:[%s11431_s18 + $0x620] sm:$0xff]  }
 0x254   : > { %9530 = vmatprep.subr.bf16.mxu1 %v9913_v44  ;;  %v9963_v39 = vld [vmem:[%s11431_s18 + $0x6a0] sm:$0xff]   ;;  %v9967_v44 = vld [vmem:[%s11431_s18 + $0x6a8] sm:$0xff]  }
 0x255   : > { %8198 = vmatmul.mubr.bf16.vlgmr.msra.gmra.mrb[16].mxu0 %v5982_v42  ;;  %v9965_v42 = vld [vmem:[%s11431_s18 + $0x628] sm:$0xff]  }
 0x256   : > { %9509 = vmatpush3.bf16.msra.mxu0 %v9912_v46  ;;  %8238 = vmatmul.mubr.bf16.vlgmr.msra.gmra.mrb[16].mxu1 %v6004_v48  ;;  %v9969_v46 = vld [vmem:[%s11431_s18 + $0x630] sm:$0xff]  }
 0x257   : > { %9510 = vmatprep.subr.bf16.mxu0 %v9915_v49  ;;  %9531 = vmatpush3.bf16.msra.mxu1 %v9914_v51  ;;  %v9971_v48 = vld [vmem:[%s11431_s18 + $0x6b0] sm:$0xff]   ;;  %v9974_v49 = vld [vmem:[%s11431_s18 + $0x6f8] sm:$0xff]  }
 0x258   : > { %8277 = vmatprep.mubr.bf16.mxu0 %v6003_v52  ;;  %9532 = vmatprep.subr.bf16.mxu1 %v9917_v53  ;;  %v9973_v51 = vld [vmem:[%s11431_s18 + $0x638] sm:$0xff]   ;;  %v6015_v52 = vrot.slane %v5278_v50, %v11435_v40  ;;  %v6008_v53 = vcombine.high %v5278_v50, %v5278_v50  ;;  %v10013_v50 = vld [vmem:[%s11431_s18 + $0x848] sm:$0xff]  }
 0x259   : > { %8317 = vmatprep.mubr.bf16.mxu1 %v6007_v55 }
 0x25a   : > { %9511 = vmatpush3.bf16.msra.mxu0 %v9916_v54  ;;  %v9976_v54 = vld [vmem:[%s11431_s18 + $0x740] sm:$0xff]   ;;  %v6023_v55 = vcombine.high %v6015_v52, %v6015_v52 }
 0x25b   : > { %9512 = vmatprep.subr.bf16.mxu0 %v9919_v56  ;;  %9533 = vmatpush3.bf16.msra.mxu1 %v9918_v57  ;;  %v9975_v56 = vld [vmem:[%s11431_s18 + $0x6b8] sm:$0xff]   ;;  %v6031_v57 = vrot.slane %v6015_v52, %v11435_v40  ;;  %v10015_v52 = vld [vmem:[%s11431_s18 + $0x8c8] sm:$0xff]  }
 0x25c   : > { %9534 = vmatprep.subr.bf16.mxu1 %v9921_v58  ;;  %v11715_v58 = vrot.slane %v6008_v53, %v11435_v40  ;;  %v10016_v53 = vld [vmem:[%s11431_s18 + $0x888] sm:$0xff]  }
 0x25e   : > { %9513 = vmatpush3.bf16.msra.mxu0 %v9920_v59  ;;  %v9978_v59 = vld [vmem:[%s11431_s18 + $0x7c0] sm:$0xff]  }
 0x25f   : > { %9514 = vmatprep.subr.bf16.mxu0 %v9923_v60  ;;  %9535 = vmatpush3.bf16.msra.mxu1 %v9922_v61  ;;  %v6045_v60 = vrot.slane %v6023_v55, %v11435_v40  ;;  %v9977_v61 = vld [vmem:[%s11431_s18 + $0x700] sm:$0xff]   ;;  %v10018_v55 = vld [vmem:[%s11431_s18 + $0x810] sm:$0xff]  }
 0x260   : > { %9536 = vmatprep.subr.bf16.mxu1 %v9925_v62  ;;  %v6024_v62 = vcombine.high %v11715_v58, %v11715_v58 }
 0x262   : > { %9515 = vmatpush3.bf16.msra.mxu0 %v9924_v63  ;;  %v6053_v63 = vcombine.high %v6031_v57, %v6031_v57 }
 0x263   : > { %9516 = vmatprep.subr.bf16.mxu0 %v9927_v0  ;;  %9537 = vmatpush3.bf16.msra.mxu1 %v9926_v1  ;;  %v9980_v0 = vld [vmem:[%s11431_s18 + $0x748] sm:$0xff]   ;;  %v6055_v1 = vcombine.high %v6045_v60, %v6045_v60 }
 0x264   : > { %9538 = vmatprep.subr.bf16.mxu1 %v9929_v2  ;;  %v9979_v2 = vld [vmem:[%s11431_s18 + $0x780] sm:$0xff]  }
 0x266   : > { %9517 = vmatpush3.bf16.msra.mxu0 %v9928_v3  ;;  %v6052_v3 = vrot.slane %v6024_v62, %v11435_v40  ;;  %v10025_v62 = vld [vmem:[%s11431_s18 + $0x860] sm:$0xff]  }
 0x267   : > { %9518 = vmatprep.subr.bf16.mxu0 %v9931_v4  ;;  %9539 = vmatpush3.bf16.msra.mxu1 %v9930_v5  ;;  %v9982_v4 = vld [vmem:[%s11431_s18 + $0x7c8] sm:$0xff]  }
 0x268   : > { %9540 = vmatprep.subr.bf16.mxu1 %v9933_v6  ;;  %v9981_v5 = vld [vmem:[%s11431_s18 + $0x708] sm:$0xff]   ;;  %v6056_v6 = vcombine.high %v6052_v3, %v6052_v3 }
 0x26a   : > { %9519 = vmatpush3.bf16.msra.mxu0 %v9932_v7  ;;  %v9984_v7 = vld [vmem:[%s11431_s18 + $0x750] sm:$0xff]  }
 0x26b   : > { %9520 = vmatprep.subr.bf16.mxu0 %v9935_v8  ;;  %9541 = vmatpush3.bf16.msra.mxu1 %v9934_v9  ;;  %v9983_v8 = vld [vmem:[%s11431_s18 + $0x788] sm:$0xff]   ;;  %v9986_v9 = vld [vmem:[%s11431_s18 + $0x7d0] sm:$0xff]  }
 0x26c   : > { %9542 = vmatprep.subr.bf16.mxu1 %v9937_v10  ;;  %v9985_v10 = vld [vmem:[%s11431_s18 + $0x710] sm:$0xff]  }
 0x26e   : > { %9521 = vmatpush3.bf16.msra.mxu0 %v9936_v11  ;;  %v9988_v11 = vld [vmem:[%s11431_s18 + $0x758] sm:$0xff]  }
 0x26f   : > { %9522 = vmatprep.subr.bf16.mxu0 %v9939_v12  ;;  %9543 = vmatpush3.bf16.msra.mxu1 %v9938_v13  ;;  %v9987_v12 = vld [vmem:[%s11431_s18 + $0x790] sm:$0xff]   ;;  %v9990_v13 = vld [vmem:[%s11431_s18 + $0x7d8] sm:$0xff]  }
 0x270   : > { %9544 = vmatprep.subr.bf16.mxu1 %v9941_v14  ;;  %v9989_v14 = vld [vmem:[%s11431_s18 + $0x718] sm:$0xff]  }
 0x272   : > { %9523 = vmatpush3.bf16.msra.mxu0 %v9940_v15  ;;  %v9992_v15 = vld [vmem:[%s11431_s18 + $0x760] sm:$0xff]  }
 0x273   : > { %9552 = vmatprep.subr.bf16.mxu0 %v9944_v17  ;;  %9545 = vmatpush3.bf16.msra.mxu1 %v9943_v18  ;;  %v9994_v17 = vld [vmem:[%s11431_s18 + $0x7e0] sm:$0xff]  }
 0x274   : > { %9574 = vmatprep.subr.bf16.mxu1 %v9946_v19  ;;  %v9993_v18 = vld [vmem:[%s11431_s18 + $0x720] sm:$0xff]   ;;  %v9996_v19 = vld [vmem:[%s11431_s18 + $0x768] sm:$0xff]  }
 0x275   : > { %8278 = vmatmul.mubr.bf16.vlgmr.msra.gmra.mrb[20].mxu0 %v5989_v16  ;;  %v9991_v16 = vld [vmem:[%s11431_s18 + $0x798] sm:$0xff]  }
 0x276   : > { %9553 = vmatpush3.bf16.msra.mxu0 %v9945_v20  ;;  %8318 = vmatmul.mubr.bf16.vlgmr.msra.gmra.mrb[20].mxu1 %v6005_v21  ;;  %v9995_v21 = vld [vmem:[%s11431_s18 + $0x7a0] sm:$0xff]  }
 0x277   : > { %9554 = vmatprep.subr.bf16.mxu0 %v9948_v22  ;;  %9575 = vmatpush3.bf16.msra.mxu1 %v9947_v23 }
 0x278   : > { %9576 = vmatprep.subr.bf16.mxu1 %v9950_v24  ;;  %8357 = vmatprep.mubr.bf16.mxu0 %v6045_v60  ;;  %v9997_v24 = vld [vmem:[%s11431_s18 + $0x728] sm:$0xff]   ;;  %v10023_v60 = vld [vmem:[%s11431_s18 + $0x8d8] sm:$0xff]  }
 0x279   : > { %8397 = vmatprep.mubr.bf16.mxu1 %v6055_v1  ;;  %v10028_v1 = vld [vmem:[%s11431_s18 + $0x8a0] sm:$0xff]  }
 0x27a   : > { %9555 = vmatpush3.bf16.msra.mxu0 %v9949_v25  ;;  %v9998_v25 = vld [vmem:[%s11431_s18 + $0x7e8] sm:$0xff]  }
 0x27b   : > { %9556 = vmatprep.subr.bf16.mxu0 %v9952_v26  ;;  %9577 = vmatpush3.bf16.msra.mxu1 %v9951_v27 }
 0x27c   : > { %9578 = vmatprep.subr.bf16.mxu1 %v9954_v28 }
 0x27e   : > { %9557 = vmatpush3.bf16.msra.mxu0 %v9953_v29  ;;  %v9999_v29 = vld [vmem:[%s11431_s18 + $0x7a8] sm:$0xff]  }
 0x27f   : > { %9558 = vmatprep.subr.bf16.mxu0 %v9956_v30  ;;  %9579 = vmatpush3.bf16.msra.mxu1 %v9955_v31 }
 0x280   : > { %9580 = vmatprep.subr.bf16.mxu1 %v9958_v32  ;;  %v10000_v32 = vld [vmem:[%s11431_s18 + $0x770] sm:$0xff]  }
 0x282   : > { %9559 = vmatpush3.bf16.msra.mxu0 %v9957_v33  ;;  %v10001_v33 = vld [vmem:[%s11431_s18 + $0x730] sm:$0xff]  }
 0x283   : > { %9560 = vmatprep.subr.bf16.mxu0 %v9960_v34  ;;  %9581 = vmatpush3.bf16.msra.mxu1 %v9959_v35 }
 0x284   : > { %9582 = vmatprep.subr.bf16.mxu1 %v9962_v36  ;;  %v10002_v36 = vld [vmem:[%s11431_s18 + $0x7f0] sm:$0xff]  }
 0x286   : > { %9561 = vmatpush3.bf16.msra.mxu0 %v9961_v37 }
 0x287   : > { %9562 = vmatprep.subr.bf16.mxu0 %v9964_v38  ;;  %9583 = vmatpush3.bf16.msra.mxu1 %v9963_v39  ;;  %v10003_v38 = vld [vmem:[%s11431_s18 + $0x7b0] sm:$0xff]   ;;  %v10004_v39 = vld [vmem:[%s11431_s18 + $0x778] sm:$0xff]  }
 0x288   : > { %9584 = vmatprep.subr.bf16.mxu1 %v9966_v41  ;;  %v10005_v41 = vld [vmem:[%s11431_s18 + $0x738] sm:$0xff]  }
 0x28a   : > { %9563 = vmatpush3.bf16.msra.mxu0 %v9965_v42  ;;  %v10006_v42 = vld [vmem:[%s11431_s18 + $0x7f8] sm:$0xff]  }
 0x28b   : > { %9564 = vmatprep.subr.bf16.mxu0 %v9968_v43  ;;  %9585 = vmatpush3.bf16.msra.mxu1 %v9967_v44  ;;  %v10008_v43 = vld [vmem:[%s11431_s18 + $0x7b8] sm:$0xff]   ;;  %v6038_v44 = vrot.slane %v11715_v58, %v11435_v40 }
 0x28c   : > { %9586 = vmatprep.subr.bf16.mxu1 %v9970_v45  ;;  %v10009_v45 = vld [vmem:[%s11431_s18 + $0x840] sm:$0xff]   ;;  %v10021_v58 = vld [vmem:[%s11431_s18 + $0x858] sm:$0xff]  }
 0x28e   : > { %9565 = vmatpush3.bf16.msra.mxu0 %v9969_v46  ;;  %v10010_v46 = vld [vmem:[%s11431_s18 + $0x800] sm:$0xff]  }
 0x28f   : > { %9566 = vmatprep.subr.bf16.mxu0 %v9972_v47  ;;  %9587 = vmatpush3.bf16.msra.mxu1 %v9971_v48  ;;  %v10011_v47 = vld [vmem:[%s11431_s18 + $0x8c0] sm:$0xff]  }
 0x290   : > { %9588 = vmatprep.subr.bf16.mxu1 %v9974_v49  ;;  %v10012_v48 = vld [vmem:[%s11431_s18 + $0x880] sm:$0xff]   ;;  %v6054_v49 = vcombine.high %v6038_v44, %v6038_v44 }
 0x292   : > { %9567 = vmatpush3.bf16.msra.mxu0 %v9973_v51  ;;  %v10014_v51 = vld [vmem:[%s11431_s18 + $0x808] sm:$0xff]  }
 0x293   : > { %9596 = vmatprep.subr.bf16.mxu0 %v9976_v54  ;;  %9589 = vmatpush3.bf16.msra.mxu1 %v9975_v56  ;;  %v10017_v54 = vld [vmem:[%s11431_s18 + $0x850] sm:$0xff]  }
 0x294   : > { %9618 = vmatprep.subr.bf16.mxu1 %v9978_v59  ;;  %v10019_v56 = vld [vmem:[%s11431_s18 + $0x8d0] sm:$0xff]   ;;  %v10022_v59 = vld [vmem:[%s11431_s18 + $0x818] sm:$0xff]  }
 0x295   : > { %8358 = vmatmul.mubr.bf16.vlgmr.msra.gmra.mrb[24].mxu0 %v6031_v57  ;;  %v10020_v57 = vld [vmem:[%s11431_s18 + $0x890] sm:$0xff]  }
 0x296   : > { %9597 = vmatpush3.bf16.msra.mxu0 %v9977_v61  ;;  %8398 = vmatmul.mubr.bf16.vlgmr.msra.gmra.mrb[24].mxu1 %v6053_v63  ;;  %v10024_v61 = vld [vmem:[%s11431_s18 + $0x898] sm:$0xff]   ;;  %v10026_v63 = vld [vmem:[%s11431_s18 + $0x820] sm:$0xff]  }
 0x297   : > { %9598 = vmatprep.subr.bf16.mxu0 %v9980_v0  ;;  %9619 = vmatpush3.bf16.msra.mxu1 %v9979_v2  ;;  %v10027_v0 = vld [vmem:[%s11431_s18 + $0x8e0] sm:$0xff]   ;;  %v10029_v2 = vld [vmem:[%s11431_s18 + $0x868] sm:$0xff]  }
 0x298   : > { %8437 = vmatprep.mubr.bf16.mxu0 %v6052_v3  ;;  %9620 = vmatprep.subr.bf16.mxu1 %v9982_v4  ;;  %v10030_v4 = vld [vmem:[%s11431_s18 + $0x828] sm:$0xff]  }
 0x299   : > { %8477 = vmatprep.mubr.bf16.mxu1 %v6056_v6  ;;  %v10031_v6 = vld [vmem:[%s11431_s18 + $0x8e8] sm:$0xff]  }
 0x29a   : > { %9599 = vmatpush3.bf16.msra.mxu0 %v9981_v5 }
 0x29b   : > { %9600 = vmatprep.subr.bf16.mxu0 %v9984_v7  ;;  %9621 = vmatpush3.bf16.msra.mxu1 %v9983_v8 }
 0x29c   : > { %9622 = vmatprep.subr.bf16.mxu1 %v9986_v9 }
 0x29e   : > { %9601 = vmatpush3.bf16.msra.mxu0 %v9985_v10 }
 0x29f   : > { %9602 = vmatprep.subr.bf16.mxu0 %v9988_v11  ;;  %9623 = vmatpush3.bf16.msra.mxu1 %v9987_v12  ;;  %v10032_v12 = vld [vmem:[%s11431_s18 + $0x8a8] sm:$0xff]  }
 0x2a0   : > { %9624 = vmatprep.subr.bf16.mxu1 %v9990_v13  ;;  %v10033_v13 = vld [vmem:[%s11431_s18 + $0x870] sm:$0xff]  }
 0x2a2   : > { %9603 = vmatpush3.bf16.msra.mxu0 %v9989_v14 }
 0x2a3   : > { %9604 = vmatprep.subr.bf16.mxu0 %v9992_v15  ;;  %9625 = vmatpush3.bf16.msra.mxu1 %v9991_v16  ;;  %v10034_v16 = vld [vmem:[%s11431_s18 + $0x830] sm:$0xff]  }
 0x2a4   : > { %9626 = vmatprep.subr.bf16.mxu1 %v9994_v17 }
 0x2a6   : > { %9605 = vmatpush3.bf16.msra.mxu0 %v9993_v18 }
 0x2a7   : > { %9606 = vmatprep.subr.bf16.mxu0 %v9996_v19  ;;  %9627 = vmatpush3.bf16.msra.mxu1 %v9995_v21  ;;  %v10035_v19 = vld [vmem:[%s11431_s18 + $0x8f0] sm:$0xff]  }
 0x2a8   : > { %v9304_v20 = vpop.f32.mrb[0].mxu0  ;;  %9628 = vmatprep.subr.bf16.mxu1 %v9998_v25  ;;  %v10036_v21 = vld [vmem:[%s11431_s18 + $0x8b0] sm:$0xff]   ;;  %v8976_v25 = vld.sshfl [vmem:[%s11857_s0 + $0x20] sm:$0x33 pattern:$0x75316420] }
 0x2a9   : > { %v9326_v22 = vpop.f32.mrb[0].mxu1  ;;  %v9305_v23 = vpop.f32.mrb[1].mxu0 }
 0x2aa   : > { %v9306_v26 = vadd.f32 %v9305_v23, %v9304_v20  ;;  %v9327_v27 = vpop.f32.mrb[1].mxu1  ;;  %v9307_v28 = vpop.f32.mrb[2].mxu0  ;;  %9607 = vmatpush3.bf16.msra.mxu0 %v9997_v24  ;;  %v10038_v23 = vld [vmem:[%s11431_s18 + $0x838] sm:$0xff]  }
 0x2ab   : > { %v9328_v30 = vadd.f32 %v9327_v27, %v9326_v22  ;;  %v9308_v31 = vpop.f32.mrb[3].mxu0  ;;  %v9329_v34 = vpop.f32.mrb[2].mxu1  ;;  %9608 = vmatprep.subr.bf16.mxu0 %v10000_v32  ;;  %9629 = vmatpush3.bf16.msra.mxu1 %v9999_v29  ;;  %v10037_v22 = vld [vmem:[%s11431_s18 + $0x878] sm:$0xff]   ;;  %v6064_v27 = vcombine.high %v8976_v25, %v8976_v25  ;;  %v6071_v28 = vrot.slane %v8976_v25, %v11435_v40  ;;  %v10041_v29 = vld [vmem:[%s11800_s12 + $0x40] sm:$0xff]  }
 0x2ac   : > { %v9330_v37 = vpop.f32.mrb[3].mxu1  ;;  %9630 = vmatprep.subr.bf16.mxu1 %v10002_v36  ;;  %v10039_v24 = vld [vmem:[%s11431_s18 + $0x8f8] sm:$0xff]   ;;  %v10042_v31 = vld [vmem:[%s11800_s12] sm:$0xff]   ;;  %v10043_v34 = vld [vmem:[%s11800_s12 + $0x48] sm:$0xff]  }
 0x2ad   : > { %v11746_v35 = vadd.f32 %v9328_v30, %v9306_v26  ;;  %v10040_v26 = vld [vmem:[%s11431_s18 + $0x8b8] sm:$0xff]   ;;  %v6078_v30 = vrot.slane %v6064_v27, %v11435_v40  ;;  %v10045_v36 = vld [vmem:[%s11800_s12 + $0x50] sm:$0xff]  }
 0x2ae   : > { %9609 = vmatpush3.bf16.msra.mxu0 %v10001_v33  ;;  %v6079_v33 = vcombine.high %v6071_v28, %v6071_v28  ;;  %v10046_v37 = vld [vmem:[%s11800_s12 + $0x10] sm:$0xff]  }
 0x2af   : > { %9610 = vmatprep.subr.bf16.mxu0 %v10004_v39  ;;  %9631 = vmatpush3.bf16.msra.mxu1 %v10003_v38  ;;  %v6080_v32 = vcombine.high %v6078_v30, %v6078_v30  ;;  %v10047_v38 = vld [vmem:[%s11800_s12 + $0x58] sm:$0xff]  }
 0x2b0   : > { %9632 = vmatprep.subr.bf16.mxu1 %v10006_v42  ;;  %v10048_v39 = vld [vmem:[%s11800_s12 + $0x18] sm:$0xff]   ;;  %v9267_v42 = vld.sshfl [vmem:[%s11861_s4] sm:$0x11 pattern:$0x75316420] }
 0x2b2   : > { %9611 = vmatpush3.bf16.msra.mxu0 %v10005_v41  ;;  %v10049_v41 = vld [vmem:[%s11800_s12 + $0x60] sm:$0xff]  }
 0x2b3   : > { %9640 = vmatprep.subr.bf16.mxu0 %v10009_v45  ;;  %9633 = vmatpush3.bf16.msra.mxu1 %v10008_v43  ;;  %v8622_v43 = vcombine.high %v9267_v42, %v9267_v42  ;;  %v10051_v45 = vld [vmem:[%s11800_s12 + $0x68] sm:$0xff]  }
 0x2b4   : > { %9662 = vmatprep.subr.bf16.mxu1 %v10011_v47 }
 0x2b5   : > { %8438 = vmatmul.mubr.bf16.vlgmr.msra.gmra.mrb[28].mxu0 %v6038_v44  ;;  %v10050_v44 = vld [vmem:[%s11800_s12 + $0x20] sm:$0xff]  }
 0x2b6   : > { %9641 = vmatpush3.bf16.msra.mxu0 %v10010_v46  ;;  %8478 = vmatmul.mubr.bf16.vlgmr.msra.gmra.mrb[28].mxu1 %v6054_v49  ;;  %v8636_v46 = vrot.slane %v8622_v43, %v11435_v40 }
 0x2b7   : > { %9642 = vmatprep.subr.bf16.mxu0 %v10013_v50  ;;  %9663 = vmatpush3.bf16.msra.mxu1 %v10012_v48 }
 0x2b8   : > { %9664 = vmatprep.subr.bf16.mxu1 %v10015_v52  ;;  %8517 = vmatprep.mubr.bf16.mxu0 %v6078_v30  ;;  %v10052_v52 = vld [vmem:[%s11800_s12 + $0x28] sm:$0xff]  }
 0x2b9   : > { %8557 = vmatprep.mubr.bf16.mxu1 %v6080_v32 }
 0x2ba   : > { %9643 = vmatpush3.bf16.msra.mxu0 %v10014_v51 }
 0x2bb   : > { %9644 = vmatprep.subr.bf16.mxu0 %v10017_v54  ;;  %9665 = vmatpush3.bf16.msra.mxu1 %v10016_v53 }
 0x2bc   : > { %9666 = vmatprep.subr.bf16.mxu1 %v10019_v56 }
 0x2be   : > { %9645 = vmatpush3.bf16.msra.mxu0 %v10018_v55  ;;  %v10053_v55 = vld [vmem:[%s11800_s12 + $0x70] sm:$0xff]  }
 0x2bf   : > { %9646 = vmatprep.subr.bf16.mxu0 %v10021_v58  ;;  %9667 = vmatpush3.bf16.msra.mxu1 %v10020_v57 }
 0x2c0   : > { %9668 = vmatprep.subr.bf16.mxu1 %v10023_v60 }
 0x2c2   : > { %9647 = vmatpush3.bf16.msra.mxu0 %v10022_v59 }
 0x2c3   : > { %9648 = vmatprep.subr.bf16.mxu0 %v10025_v62  ;;  %9669 = vmatpush3.bf16.msra.mxu1 %v10024_v61  ;;  %v10054_v61 = vld [vmem:[%s11800_s12 + $0x30] sm:$0xff]   ;;  %v10055_v62 = vld [vmem:[%s11800_s12 + $0x78] sm:$0xff]  }
 0x2c4   : > { %9670 = vmatprep.subr.bf16.mxu1 %v10027_v0  ;;  %v8629_v0 = vrot.slane %v9267_v42, %v11435_v40 }
 0x2c6   : > { %9649 = vmatpush3.bf16.msra.mxu0 %v10026_v63  ;;  %v10056_v63 = vld [vmem:[%s11800_s12 + $0x38] sm:$0xff]  }
 0x2c7   : > { %9650 = vmatprep.subr.bf16.mxu0 %v10029_v2  ;;  %9671 = vmatpush3.bf16.msra.mxu1 %v10028_v1 }
 0x2c8   : > { %v9348_v3 = vpop.f32.mrb[4].mxu0  ;;  %9672 = vmatprep.subr.bf16.mxu1 %v10031_v6 }
 0x2c9   : > { %v9349_v5 = vpop.f32.mrb[5].mxu0  ;;  %v9370_v9 = vpop.f32.mrb[4].mxu1 }
 0x2ca   : > { %v9350_v7 = vadd.f32 %v9349_v5, %v9348_v3  ;;  %v9351_v8 = vpop.f32.mrb[6].mxu0  ;;  %v9371_v11 = vpop.f32.mrb[5].mxu1  ;;  %9651 = vmatpush3.bf16.msra.mxu0 %v10030_v4 }
 0x2cb   : > { %v9352_v10 = vpop.f32.mrb[7].mxu0  ;;  %v9372_v15 = vadd.f32 %v9371_v11, %v9370_v9  ;;  %v9373_v17 = vpop.f32.mrb[6].mxu1  ;;  %9652 = vmatprep.subr.bf16.mxu0 %v10033_v13  ;;  %9673 = vmatpush3.bf16.msra.mxu1 %v10032_v12 }
 0x2cc   : > { %v7960_v14 = vadd.f32 %v9350_v7, %v11746_v35  ;;  %v9374_v20 = vpop.f32.mrb[7].mxu1  ;;  %9674 = vmatprep.subr.bf16.mxu1 %v10035_v19  ;;  %v10044_v35 = vld [vmem:[%s11800_s12 + $0x8] sm:$0xff]  }
 0x2ce   : > { %v11787_v18 = vadd.f32 %v9372_v15, %v7960_v14  ;;  %9653 = vmatpush3.bf16.msra.mxu0 %v10034_v16 }
 0x2cf   : > { %9654 = vmatprep.subr.bf16.mxu0 %v10037_v22  ;;  %9675 = vmatpush3.bf16.msra.mxu1 %v10036_v21 }
 0x2d0   : > { %9676 = vmatprep.subr.bf16.mxu1 %v10039_v24 }
 0x2d2   : > { %9655 = vmatpush3.bf16.msra.mxu0 %v10038_v23 }
 0x2d3   : > { %9684 = vmatprep.subr.bf16.mxu0 %v10041_v29  ;;  %9677 = vmatpush3.bf16.msra.mxu1 %v10040_v26 }
 0x2d5   : > { %8518 = vmatmul.mubr.bf16.vlgmr.msra.gmra.mrb[32].mxu0 %v6071_v28 }
 0x2d6   : > { %9685 = vmatpush3.bf16.msra.mxu0 %v10042_v31  ;;  %8558 = vmatmul.mubr.bf16.vlgmr.msra.gmra.mrb[32].mxu1 %v6079_v33 }
 0x2d7   : > { %9686 = vmatprep.subr.bf16.mxu0 %v10043_v34  ;;  %8767 = vmatprep.mubr.bf16.mxu0 %v8636_v46 }
 0x2da   : > { %9687 = vmatpush3.bf16.msra.mxu0 %v10044_v35 }
 0x2db   : > { %9688 = vmatprep.subr.bf16.mxu0 %v10045_v36 }
 0x2de   : > { %9689 = vmatpush3.bf16.msra.mxu0 %v10046_v37 }
 0x2df   : > { %9690 = vmatprep.subr.bf16.mxu0 %v10047_v38 }
 0x2e2   : > { %9691 = vmatpush3.bf16.msra.mxu0 %v10048_v39 }
 0x2e3   : > { %9692 = vmatprep.subr.bf16.mxu0 %v10049_v41 }
 0x2e6   : > { %9693 = vmatpush3.bf16.msra.mxu0 %v10050_v44 }
 0x2e7   : > { %9694 = vmatprep.subr.bf16.mxu0 %v10051_v45 }
 0x2e8   : > { %v9392_v47 = vpop.f32.mrb[8].mxu0 }
 0x2e9   : > { %v9393_v48 = vpop.f32.mrb[9].mxu0  ;;  %v9414_v51 = vpop.f32.mrb[8].mxu1 }
 0x2ea   : > { %v9394_v49 = vadd.f32 %v9393_v48, %v9392_v47  ;;  %v9395_v50 = vpop.f32.mrb[10].mxu0  ;;  %v9415_v54 = vpop.f32.mrb[9].mxu1  ;;  %9695 = vmatpush3.bf16.msra.mxu0 %v10052_v52 }
 0x2eb   : > { %v9396_v53 = vpop.f32.mrb[11].mxu0  ;;  %v9416_v57 = vadd.f32 %v9415_v54, %v9414_v51  ;;  %v9417_v58 = vpop.f32.mrb[10].mxu1  ;;  %9696 = vmatprep.subr.bf16.mxu0 %v10053_v55 }
 0x2ec   : > { %v8040_v56 = vadd.f32 %v9394_v49, %v11787_v18  ;;  %v9418_v59 = vpop.f32.mrb[11].mxu1 }
 0x2ee   : > { %v8080_v60 = vadd.f32 %v9416_v57, %v8040_v56  ;;  %9697 = vmatpush3.bf16.msra.mxu0 %v10054_v61 }
 0x2ef   : > { %9698 = vmatprep.subr.bf16.mxu0 %v10055_v62 }
 0x2f2   : > { %9699 = vmatpush3.bf16.msra.mxu0 %v10056_v63 }
 0x2f5   : > { %8768 = vmatmul.mubr.bf16.vlgmr.msra.gmra.mrb[36].mxu0 %v8629_v0 }
 0x308   : > { %v9436_v1 = vpop.f32.mrb[12].mxu0 }
 0x309   : > { %v9437_v2 = vpop.f32.mrb[13].mxu0  ;;  %v9458_v5 = vpop.f32.mrb[12].mxu1 }
 0x30a   : > { %v9438_v3 = vadd.f32 %v9437_v2, %v9436_v1  ;;  %v9439_v4 = vpop.f32.mrb[14].mxu0  ;;  %v9459_v7 = vpop.f32.mrb[13].mxu1 }
 0x30b   : > { %v9440_v6 = vpop.f32.mrb[15].mxu0  ;;  %v9460_v9 = vadd.f32 %v9459_v7, %v9458_v5  ;;  %v9461_v10 = vpop.f32.mrb[14].mxu1 }
 0x30c   : > { %v8120_v8 = vadd.f32 %v9438_v3, %v8080_v60  ;;  %v9462_v11 = vpop.f32.mrb[15].mxu1 }
 0x30e   : > { %v8160_v12 = vadd.f32 %v9460_v9, %v8120_v8  ;;  %v9265_v9 = vld [vmem:[%s5253_s17] ss:$0 sm:$0xff] }
 0x328   : > { %v9480_v13 = vpop.f32.mrb[16].mxu0 }
 0x329   : > { %v9481_v14 = vpop.f32.mrb[17].mxu0  ;;  %v9502_v17 = vpop.f32.mrb[16].mxu1 }
 0x32a   : > { %v9482_v15 = vadd.f32 %v9481_v14, %v9480_v13  ;;  %v9483_v16 = vpop.f32.mrb[18].mxu0  ;;  %v9503_v18 = vpop.f32.mrb[17].mxu1 }
 0x32b   : > { %v9484_v40 = vpop.f32.mrb[19].mxu0  ;;  %v9504_v20 = vadd.f32 %v9503_v18, %v9502_v17  ;;  %v9505_v21 = vpop.f32.mrb[18].mxu1  ;;  %v9266_v16 = vld [vmem:[%s5256_s23] ss:$0 sm:$0xff] }
 0x32c   : > { %v8200_v19 = vadd.f32 %v9482_v15, %v8160_v12  ;;  %v9506_v22 = vpop.f32.mrb[19].mxu1  ;;  %v9284_v12 = vld [vmem:[%s5263_s20] ss:$0 sm:$0xff] }
 0x32d   : > { %v9285_v17 = vld [vmem:[%s5266_s27] ss:$0 sm:$0xff] }
 0x32e   : > { %v8240_v23 = vadd.f32 %v9504_v20, %v8200_v19 }
 0x348   : > { %v9524_v24 = vpop.f32.mrb[20].mxu0 }
 0x349   : > { %v9525_v25 = vpop.f32.mrb[21].mxu0  ;;  %v9546_v28 = vpop.f32.mrb[20].mxu1 }
 0x34a   : > { %v9526_v26 = vadd.f32 %v9525_v25, %v9524_v24  ;;  %v9527_v27 = vpop.f32.mrb[22].mxu0  ;;  %v9547_v30 = vpop.f32.mrb[21].mxu1 }
 0x34b   : > { %v9528_v29 = vpop.f32.mrb[23].mxu0  ;;  %v9548_v32 = vadd.f32 %v9547_v30, %v9546_v28  ;;  %v9549_v33 = vpop.f32.mrb[22].mxu1 }
 0x34c   : > { %v8280_v31 = vadd.f32 %v9526_v26, %v8240_v23  ;;  %v9550_v34 = vpop.f32.mrb[23].mxu1 }
 0x34e   : > { %v8320_v35 = vadd.f32 %v9548_v32, %v8280_v31 }
 0x368   : > { %v9568_v36 = vpop.f32.mrb[24].mxu0 }
 0x369   : > { %v9569_v37 = vpop.f32.mrb[25].mxu0  ;;  %v9590_v41 = vpop.f32.mrb[24].mxu1 }
 0x36a   : > { %v9570_v38 = vadd.f32 %v9569_v37, %v9568_v36  ;;  %v9571_v39 = vpop.f32.mrb[26].mxu0  ;;  %v9591_v43 = vpop.f32.mrb[25].mxu1 }
 0x36b   : > { %v9572_v42 = vpop.f32.mrb[27].mxu0  ;;  %v9592_v45 = vadd.f32 %v9591_v43, %v9590_v41  ;;  %v9593_v46 = vpop.f32.mrb[26].mxu1 }
 0x36c   : > { %v8360_v44 = vadd.f32 %v9570_v38, %v8320_v35  ;;  %v9594_v47 = vpop.f32.mrb[27].mxu1 }
 0x36e   : > { %v8400_v48 = vadd.f32 %v9592_v45, %v8360_v44 }
 0x388   : > { %v9612_v49 = vpop.f32.mrb[28].mxu0 }
 0x389   : > { %v9613_v50 = vpop.f32.mrb[29].mxu0  ;;  %v9634_v53 = vpop.f32.mrb[28].mxu1 }
 0x38a   : > { %v9614_v51 = vadd.f32 %v9613_v50, %v9612_v49  ;;  %v9615_v52 = vpop.f32.mrb[30].mxu0  ;;  %v9635_v55 = vpop.f32.mrb[29].mxu1 }
 0x38b   : > { %v9616_v54 = vpop.f32.mrb[31].mxu0  ;;  %v9636_v57 = vadd.f32 %v9635_v55, %v9634_v53  ;;  %v9637_v58 = vpop.f32.mrb[30].mxu1 }
 0x38c   : > { %v8440_v56 = vadd.f32 %v9614_v51, %v8400_v48  ;;  %v9638_v59 = vpop.f32.mrb[31].mxu1 }
 0x38e   : > { %v8480_v60 = vadd.f32 %v9636_v57, %v8440_v56 }
 0x3a8   : > { %v9656_v61 = vpop.f32.mrb[32].mxu0 }
 0x3a9   : > { %v9657_v62 = vpop.f32.mrb[33].mxu0  ;;  %v9678_v1 = vpop.f32.mrb[32].mxu1 }
 0x3aa   : > { %v9658_v63 = vadd.f32 %v9657_v62, %v9656_v61  ;;  %v9659_v0 = vpop.f32.mrb[34].mxu0  ;;  %v9679_v3 = vpop.f32.mrb[33].mxu1 }
 0x3ab   : > { %v9660_v2 = vpop.f32.mrb[35].mxu0  ;;  %v9680_v5 = vadd.f32 %v9679_v3, %v9678_v1  ;;  %v9681_v6 = vpop.f32.mrb[34].mxu1 }
 0x3ac   : > { %v8520_v4 = vadd.f32 %v9658_v63, %v8480_v60  ;;  %v9682_v7 = vpop.f32.mrb[35].mxu1 }
 0x3ae   : > { %v8560_v8 = vadd.f32 %v9680_v5, %v8520_v4 }
 0x3b0   : > { %v8572_v13 = vmul.f32 %v9265_v9, %v8560_v8 }
 0x3b2   : > { %v8580_v19 = vadd.f32 %v9266_v16, %v8572_v13 }
 0x3c8   : > { %v9700_v10 = vpop.f32.mrb[36].mxu0 }
 0x3c9   : > { %v9701_v11 = vpop.f32.mrb[37].mxu0 }
 0x3ca   : > { %v9702_v14 = vadd.f32 %v9701_v11, %v9700_v10  ;;  %v9703_v15 = vpop.f32.mrb[38].mxu0 }
 0x3cb   : > { %v9704_v40 = vpop.f32.mrb[39].mxu0 }
 0x3cc   : > { %v8782_v18 = vmul.f32 %v9702_v14, %v9284_v12 }
 0x3ce   : > { %v8790_v20 = vadd.f32 %v9285_v17, %v8782_v18 }
 0x3d0   : > { %v8791_v21 = vadd.f32 %v8790_v20, %v8580_v19 }
 0x3d2   : > { %v8792_v22 = vmax.f32 %v8791_v21, 0.0 }
 0x3d4   : > { %v8793_v23 = vpack.c.bf16 %v8792_v22, %v8792_v22 }
 0x3d6   : > { %8794 = vst [vmem:[%s5273_s11] sm:$0x1] %v8793_v23 }
 0x3d7 PF: > { %s18_s9 = sadd.s32 1, %s10095_s9   ;;  %s11867_s27 = smov %s10083_s28 }
 0x3d8   : > { %p15_p10 = scmp.ge.s32.totalorder %s18_s9, 6   ;;  %s11868_s28 = smov %s10182_s14 }
 0x3d9   : > { %s11869_s29 = smov %s10091_s30  ;;  %s11870_s30 = smov %s11872_s10 }
 0x3da   :  { %17 = sbr.rel (!%p15_p10) target bundleno = 3 (0x3), region = 210 }

</bundles_post_ra>
